<compile_context>
chip_gen: v7x
topology: tpu7x:2x2x1
jax: 0.10.0
libtpu: 0.0.40
codegen_flags: <defaults>
</compile_context>

<pallas_src>
import functools

import jax
import jax.numpy as jnp
from jax.experimental import pallas as pl
from jax.experimental.pallas import tpu as pltpu

BN_EPS = 1e-5
LANE = 128
IM2COL_MAX_HW = 64          # layers with H*W <= 64 go through one im2col matmul

# Full PyTorch spec (inconv 64, 7 downs, latent 1024) -- requires 256x256 input.
FULL_ENC_CHANNELS = (64, 128, 256, 512, 1024, 1024, 1024, 1024)


def _default_vmem_limit():
    # Generation-aware: ~96 MiB on v5e/v6e (128 MiB VMEM), ~48 MiB on v7x (64 MiB).
    try:
        cap = pltpu.get_tpu_info().vmem_capacity_bytes
        if not cap:
            cap = 64 * 1024 * 1024
    except Exception:  # pragma: no cover - CPU / interpret fallback
        cap = 64 * 1024 * 1024
    cap = min(cap, 128 * 1024 * 1024)
    return int(cap * 3 // 4)


VMEM_LIMIT = _default_vmem_limit()


def _round_up(x, m):
    return (x + m - 1) // m * m


def _pad_lanes(x, target):
    pad = target - x.shape[-1]
    if pad == 0:
        return x
    cfg = [(0, 0)] * (x.ndim - 1) + [(0, pad)]
    return jnp.pad(x, cfg)


def _pick_div_tile(dim, cap=512):
    """Largest multiple of 128 that divides `dim` and is <= cap."""
    best = LANE
    t = LANE
    while t <= min(dim, cap):
        if dim % t == 0:
            best = t
        t += LANE
    return best


# --------------------------------------------------------------------------
# Fused matmul + bias (+ReLU) kernel: ConvT / 1x1 conv / im2col convs / heads
# --------------------------------------------------------------------------

def _matmul_kernel(a_ref, b_ref, bias_ref, o_ref, acc_ref, *, relu):
    @pl.when(pl.program_id(2) == 0)
    def _():
        acc_ref[...] = jnp.zeros_like(acc_ref)

    acc_ref[...] += jnp.dot(a_ref[...], b_ref[...],
                            preferred_element_type=jnp.float32)

    @pl.when(pl.program_id(2) == pl.num_programs(2) - 1)
    def _():
        out = acc_ref[...] + bias_ref[...]
        if relu:
            out = jnp.maximum(out, 0.0)
        o_ref[...] = out.astype(o_ref.dtype)


def dense_padded(x, w, b, *, relu, out_dtype=jnp.bfloat16):
    """out = [relu](x @ w + b), bf16 operands, f32 accumulation.

    x: (M, Kp), w: (Kp, Np) bf16, b: (1, Np) f32, Kp/Np multiples of 128.
    """
    M, Kp = x.shape
    Kp2, Np = w.shape
    assert Kp == Kp2 and Kp % LANE == 0 and Np % LANE == 0

    if M <= 512:
        tm = _round_up(M, 8)
        Mp = tm
    else:
        tm = 512
        Mp = _round_up(M, tm)
    tn = _pick_div_tile(Np, 512)
    tk = _pick_div_tile(Kp, 512)

    xp = x.astype(jnp.bfloat16)
    if Mp != M:
        xp = jnp.pad(xp, ((0, Mp - M), (0, 0)))

    out = pl.pallas_call(
        functools.partial(_matmul_kernel, relu=relu),
        out_shape=jax.ShapeDtypeStruct((Mp, Np), out_dtype),
        grid=(Mp // tm, Np // tn, Kp // tk),
        in_specs=[pl.BlockSpec((tm, tk), lambda i, j, k: (i, k)),
                  pl.BlockSpec((tk, tn), lambda i, j, k: (k, j)),
                  pl.BlockSpec((1, tn), lambda i, j, k: (0, j))],
        out_specs=pl.BlockSpec((tm, tn), lambda i, j, k: (i, j)),
        scratch_shapes=[pltpu.VMEM((tm, tn), jnp.float32)],
        compiler_params=pltpu.CompilerParams(
            dimension_semantics=("parallel", "parallel", "arbitrary"),
            vmem_limit_bytes=VMEM_LIMIT),
    )(xp, w.astype(jnp.bfloat16), b.astype(jnp.float32))
    return out[:M]


# --------------------------------------------------------------------------
# 3x3 conv (pad=1, stride=1), NHWC, lane-padded channels.
#   Large spatial: Pallas kernel, row-tiled output, whole-image input slab.
#   Small spatial / stem: im2col + dense_padded.
# --------------------------------------------------------------------------

def _conv3x3_kernel(x_ref, w_ref, b_ref, o_ref, *, TH, W, relu):
    # x_ref: (H+2, W+2, Cip) whole padded image (full padded Ci)
    # w_ref: (9, Cip, tco); b_ref: (1, tco); o_ref: (TH, W, tco)
    Cip = x_ref.shape[-1]
    Cop = o_ref.shape[-1]
    r0 = pl.multiple_of(pl.program_id(2) * TH, TH)

    acc = jnp.zeros((TH * W, Cop), jnp.float32)
    for di in range(3):
        rows = x_ref[pl.ds(r0 + di, TH)]                    # (TH, W+2, Cip)
        for dj in range(3):
            lhs = rows[:, dj:dj + W, :].reshape(TH * W, Cip)
            acc = acc + jnp.dot(lhs, w_ref[di * 3 + dj],
                                preferred_element_type=jnp.float32)

    out = acc.reshape(TH, W, Cop) + b_ref[...]
    if relu:
        out = jnp.maximum(out, 0.0)
    o_ref[...] = out.astype(o_ref.dtype)


def conv3x3_rows(x, p, *, relu=True):
    """Row-tiled Pallas conv3x3.  x: (N,H,W,Cip) bf16 with Cip % 128 == 0."""
    N, H, W, Cip = x.shape
    w9, b = p["w9"], p["b"]
    Cop = w9.shape[-1]
    tco = _pick_div_tile(Cop, 512)

    th = min(H, max(1, 2048 // W))          # aim for MXU M = TH*W ~ 2048
    while H % th:
        th -= 1

    xp = jnp.pad(x, ((0, 0), (1, 1), (1, 1), (0, 0)))
    return pl.pallas_call(
        functools.partial(_conv3x3_kernel, TH=th, W=W, relu=relu),
        out_shape=jax.ShapeDtypeStruct((N, H, W, Cop), jnp.bfloat16),
        grid=(N, Cop // tco, H // th),      # x slab fetched once per image
        in_specs=[
            pl.BlockSpec((None, H + 2, W + 2, Cip),
                         lambda n, co, h: (n, 0, 0, 0)),
            pl.BlockSpec((9, Cip, tco), lambda n, co, h: (0, 0, co)),
            pl.BlockSpec((1, tco), lambda n, co, h: (0, co)),
        ],
        out_specs=pl.BlockSpec((None, th, W, tco),
                               lambda n, co, h: (n, h, 0, co)),
        compiler_params=pltpu.CompilerParams(
            dimension_semantics=("parallel", "parallel", "parallel"),
            vmem_limit_bytes=VMEM_LIMIT),
    )(xp, w9, b)


def conv3x3_im2col(x, p, *, relu=True):
    """Small-spatial conv3x3 as one im2col matmul (M=N*H*W, K=9*Cip)."""
    N, H, W, Cip = x.shape
    w9, b = p["w9"], p["b"]
    Cop = w9.shape[-1]
    xp = jnp.pad(x, ((0, 0), (1, 1), (1, 1), (0, 0)))
    taps = [xp[:, di:di + H, dj:dj + W, :]
            for di in range(3) for dj in range(3)]
    patches = jnp.concatenate(taps, axis=-1).reshape(N * H * W, 9 * Cip)
    y = dense_padded(patches, w9.reshape(9 * Cip, Cop), b, relu=relu)
    return y.reshape(N, H, W, Cop)


def conv3x3_stem(x, p, *, relu=True):
    """Stem conv over TRUE channels (no 128-lane input padding): K = 9*Ci -> 128."""
    N, H, W, C = x.shape
    Kp = p["w"].shape[0]
    xp = jnp.pad(x, ((0, 0), (1, 1), (1, 1), (0, 0)))
    taps = [xp[:, di:di + H, dj:dj + W, :]
            for di in range(3) for dj in range(3)]
    patches = jnp.concatenate(taps, axis=-1).astype(jnp.bfloat16)  # (N,H,W,9C)
    patches = _pad_lanes(patches, Kp).reshape(N * H * W, Kp)
    y = dense_padded(patches, p["w"], p["b"], relu=relu)
    return y.reshape(N, H, W, -1)


def conv3x3_any(x, p, *, relu=True):
    N, H, W, _ = x.shape
    if H * W <= IM2COL_MAX_HW:
        return conv3x3_im2col(x, p, relu=relu)
    return conv3x3_rows(x, p, relu=relu)


# --------------------------------------------------------------------------
# 2x2/stride-2 max pool (R output rows per grid step, feature map read once)
# --------------------------------------------------------------------------

def _maxpool2x2_kernel(x_ref, o_ref):
    # x_ref: (R, 2, W/2, 2*C) -- row pairs; lanes hold [pixel(2w) | pixel(2w+1)]
    C = o_ref.shape[-1]
    r = jnp.maximum(x_ref[:, 0], x_ref[:, 1])            # (R, W/2, 2C)
    o_ref[...] = jnp.maximum(r[..., :C], r[..., C:])


def maxpool2x2(x):
    N, H, W, C = x.shape
    H2, W2 = H // 2, W // 2
    R = min(H2, 8)
    while H2 % R:
        R -= 1
    xr = x.reshape(N, H2, 2, W2, 2 * C)                  # free lane/row pairing
    return pl.pallas_call(
        _maxpool2x2_kernel,
        out_shape=jax.ShapeDtypeStruct((N, H2, W2, C), x.dtype),
        grid=(N, H2 // R),
        in_specs=[pl.BlockSpec((None, R, 2, W2, 2 * C),
                               lambda n, i: (n, i, 0, 0, 0))],
        out_specs=pl.BlockSpec((None, R, W2, C),
                               lambda n, i: (n, i, 0, 0)),
        compiler_params=pltpu.CompilerParams(
            dimension_semantics=("parallel", "parallel"),
            vmem_limit_bytes=VMEM_LIMIT),
    )(xr)


# --------------------------------------------------------------------------
# Layer wrappers (glue = cheap reshapes; compute = Pallas kernels above)
# --------------------------------------------------------------------------

def conv_transpose2x2(x, w, b):
    """ConvTranspose2d(Ci, Ci_or_Co, 2, stride=2).  w: (Cip, 4*Cop) bf16 with
    columns ordered (kh, kw, co); b: (1, 4*Cop) bias tiled over taps."""
    N, H, W, Ci = x.shape
    Co = w.shape[1] // 4
    y = dense_padded(x.reshape(N * H * W, Ci), w, b, relu=False)
    y = y.reshape(N, H, W, 2, 2, Co).transpose(0, 1, 3, 2, 4, 5)
    return y.reshape(N, 2 * H, 2 * W, Co)


def conv1x1(x, w, b):
    N, H, W, Ci = x.shape
    Co = w.shape[1]
    y = dense_padded(x.reshape(N * H * W, Ci), w, b, relu=False)
    return y.reshape(N, H, W, Co)


# --------------------------------------------------------------------------
# Deterministic parameter construction (true shapes) + device preparation
# --------------------------------------------------------------------------

class ParamGen:
    def __init__(self, seed=0):
        self._key = jax.random.PRNGKey(seed)

    def normal(self, shape, scale):
        self._key, sub = jax.random.split(self._key)
        return jax.random.normal(sub, shape, dtype=jnp.float32) * scale


def init_params(n_channels=3, n_classes=8,
                enc_channels=FULL_ENC_CHANNELS, seed=0):
    """Random parameters in true shapes.  Conv weights are HWIO (kh,kw,ci,co);
    ConvTranspose weights are (ci,kh,kw,co); linear weights are (din,dout)."""
    pg = ParamGen(seed)
    latent = enc_channels[-1]

    def conv(ci, co):
        return {"w": pg.normal((3, 3, ci, co), 0.5 * (2.0 / (ci * 9)) ** 0.5),
                "b": pg.normal((co,), 0.01)}

    def dconv(ci, co):
        return {"c1": conv(ci, co), "c2": conv(co, co)}

    def linear(din, dout):
        return {"w": pg.normal((din, dout), (1.0 / din) ** 0.5),
                "b": pg.normal((dout,), 0.01)}

    encoder, prev = [], n_channels
    for co in enc_channels:
        encoder.append(dconv(prev, co))
        prev = co

    dec_outs = list(reversed(enc_channels[:-1])) + [n_channels]
    decoder, prev = [], latent
    for co in dec_outs:
        decoder.append({
            "up_w": pg.normal((prev, 2, 2, prev), (1.0 / (prev * 4)) ** 0.5),
            "up_b": pg.normal((prev,), 0.01),
            "conv": dconv(prev, co)})
        prev = co

    outconv = {"w": pg.normal((n_channels, n_channels),
                              (1.0 / n_channels) ** 0.5),
               "b": pg.normal((n_channels,), 0.01)}

    return {"encoder": encoder, "decoder": decoder, "outconv": outconv,
            "mu": linear(latent, latent), "sigma": linear(latent, latent),
            "valence": linear(latent, 1), "classifier": linear(latent, n_classes)}


def _bn_fold(w, b):
    s = 1.0 / (1.0 + BN_EPS) ** 0.5        # eval-mode BN with default stats
    return w * s, b * s


def _prep_conv_taps(p):
    w, b = _bn_fold(p["w"], p["b"])
    ci, co = w.shape[2], w.shape[3]
    cip, cop = _round_up(ci, LANE), _round_up(co, LANE)
    w = jnp.pad(w, ((0, 0), (0, 0), (0, cip - ci), (0, cop - co)))
    return {"w9": w.reshape(9, cip, cop).astype(jnp.bfloat16),
            "b": jnp.pad(b, (0, cop - co)).reshape(1, cop).astype(jnp.float32)}


def _prep_conv_stem(p):
    w, b = _bn_fold(p["w"], p["b"])
    ci, co = w.shape[2], w.shape[3]
    kp, cop = _round_up(9 * ci, LANE), _round_up(co, LANE)
    w = w.reshape(9 * ci, co)
    w = jnp.pad(w, ((0, kp - 9 * ci), (0, cop - co)))
    return {"w": w.astype(jnp.bfloat16),
            "b": jnp.pad(b, (0, cop - co)).reshape(1, cop).astype(jnp.float32)}


def _prep_convT(w, b):
    ci, _, _, co = w.shape
    cip, cop = _round_up(ci, LANE), _round_up(co, LANE)
    w = jnp.pad(w, ((0, cip - ci), (0, 0), (0, 0), (0, cop - co)))
    w = w.reshape(cip, 4 * cop).astype(jnp.bfloat16)       # columns (kh,kw,co)
    b = jnp.tile(jnp.pad(b, (0, cop - co)), 4).reshape(1, 4 * cop)
    return w, b.astype(jnp.float32)


def _prep_linear_cat(plist):
    """Concatenate several Linear heads sharing an input into one matmul."""
    w = jnp.concatenate([p["w"] for p in plist], axis=1)
    b = jnp.concatenate([p["b"] for p in plist], axis=0)
    din, dout = w.shape
    dinp, doutp = _round_up(din, LANE), _round_up(dout, LANE)
    return {"w": jnp.pad(w, ((0, dinp - din), (0, doutp - dout))
                         ).astype(jnp.bfloat16),
            "b": jnp.pad(b, (0, doutp - dout)).reshape(1, doutp
                                                       ).astype(jnp.float32)}


def prepare_params(params):
    """Fold BN, zero-pad channel dims to 128 lanes, cast weights to bf16."""
    enc = []
    for i, p in enumerate(params["encoder"]):
        c1 = _prep_conv_stem(p["c1"]) if i == 0 else _prep_conv_taps(p["c1"])
        enc.append({"c1": c1, "c2": _prep_conv_taps(p["c2"])})

    dec = []
    for p in params["decoder"]:
        up_w, up_b = _prep_convT(p["up_w"], p["up_b"])
        dec.append({"up_w": up_w, "up_b": up_b,
                    "conv": {"c1": _prep_conv_taps(p["conv"]["c1"]),
                             "c2": _prep_conv_taps(p["conv"]["c2"])}})

    ocw, ocb = params["outconv"]["w"], params["outconv"]["b"]
    ci, co = ocw.shape
    cip, cop = _round_up(ci, LANE), _round_up(co, LANE)
    outconv = {"w": jnp.pad(ocw, ((0, cip - ci), (0, cop - co))
                            ).astype(jnp.bfloat16),
               "b": jnp.pad(ocb, (0, cop - co)).reshape(1, cop
                                                        ).astype(jnp.float32)}

    return {"encoder": enc, "decoder": dec, "outconv": outconv,
            "heads_ms": _prep_linear_cat([params["mu"], params["sigma"]]),
            "heads_vc": _prep_linear_cat([params["valence"],
                                          params["classifier"]])}


# --------------------------------------------------------------------------
# Full forward pass
# --------------------------------------------------------------------------

@functools.partial(jax.jit, static_argnames=("n_channels", "n_classes", "latent"))
def vae_forward(params, x, eps, *, n_channels, n_classes, latent):
    """x: (B, n_channels, H, W) NCHW f32; eps: (B, latent) standard normal."""
    B = x.shape[0]
    h_raw = x.transpose(0, 2, 3, 1)                         # NHWC, true channels

    # ---- encoder: inconv (stem im2col + conv), downs (pool + double_conv) ----
    h = conv3x3_stem(h_raw, params["encoder"][0]["c1"])     # Ci=3 special case
    h = conv3x3_any(h, params["encoder"][0]["c2"])
    for p in params["encoder"][1:]:
        h = maxpool2x2(h)
        h = conv3x3_any(h, p["c1"])
        h = conv3x3_any(h, p["c2"])
    # final MaxPool2d(kernel=2, stride=1) on the 2x2 bottleneck -> 1x1 (tiny -> jnp)
    fe = jnp.max(h, axis=(1, 2)).astype(jnp.float32)        # (B, Cp), pad lanes 0

    # ---- latent heads (Dropout = identity in eval); mu|sigma fused ----
    ms = dense_padded(fe, params["heads_ms"]["w"], params["heads_ms"]["b"],
                      relu=True, out_dtype=jnp.float32)
    mu = ms[:, :latent]
    s = ms[:, latent:2 * latent]
    z = mu + jnp.exp(s) * eps                               # reparameterize

    # ---- valence / classification heads: ReLU -> Dropout(id) -> Linear ----
    zr = _pad_lanes(jnp.maximum(z, 0.0), params["heads_vc"]["w"].shape[0])
    vc = dense_padded(zr, params["heads_vc"]["w"], params["heads_vc"]["b"],
                      relu=False, out_dtype=jnp.float32)
    valence = vc[:, :1]
    logits = vc[:, 1:1 + n_classes]
    m = jnp.max(logits, axis=-1, keepdims=True)
    sh = logits - m
    classification = sh - jnp.log(jnp.sum(jnp.exp(sh), axis=-1, keepdims=True))

    # ---- decoder: upVAE blocks (ConvT 2x2 s2 + double_conv), then outconv ----
    d = _pad_lanes(z, params["decoder"][0]["up_w"].shape[0])
    d = d.reshape(B, 1, 1, -1).astype(jnp.bfloat16)
    for p in params["decoder"]:
        d = conv_transpose2x2(d, p["up_w"], p["up_b"])
        d = conv3x3_any(d, p["conv"]["c1"])
        d = conv3x3_any(d, p["conv"]["c2"])
    d = conv1x1(d, params["outconv"]["w"], params["outconv"]["b"])
    decoded = d[..., :n_channels].astype(jnp.float32).transpose(0, 3, 1, 2)

    return valence, classification, decoded, z


# --------------------------------------------------------------------------

if __name__ == "__main__":
    # Scaled smoke-test config (same structure as the PyTorch spec).  The full
    # spec is enc_channels=FULL_ENC_CHANNELS with 256x256 inputs.
    n_channels, n_classes, batch = 3, 8, 2
    enc_channels = (8, 16, 32, 32)              # inconv + 3 downs -> 16x16 input
    latent = enc_channels[-1]                   # 32
    spatial = 2 ** len(enc_channels)            # 16 -> bottleneck 2x2

    key = jax.random.PRNGKey(0)
    k_in, k_noise = jax.random.split(key)
    x = jax.random.normal(k_in, (batch, n_channels, spatial, spatial),
                          dtype=jnp.float32)
    eps = jax.random.normal(k_noise, (batch, latent), dtype=jnp.float32)

    params = prepare_params(
        init_params(n_channels, n_classes, enc_channels, seed=0))

    valence, classification, decoded, z = vae_forward(
        params, x, eps, n_channels=n_channels, n_classes=n_classes,
        latent=latent)
    jax.block_until_ready((valence, classification, decoded, z))

    assert valence.shape == (batch, 1)
    assert classification.shape == (batch, n_classes)
    assert decoded.shape == (batch, n_channels, spatial, spatial)
    assert z.shape == (batch, latent)
    assert bool(jnp.all(jnp.isfinite(valence)))
    assert bool(jnp.all(jnp.isfinite(classification)))
    assert bool(jnp.all(jnp.isfinite(decoded)))
    print("KERNEL_OK")
</pallas_src>

<mosaic_0001>
module attributes {stable_mosaic.version = 11 : i64} {
  func.func @_matmul_kernel(%arg0: i32, %arg1: i32, %arg2: i32, %arg3: memref<512x128xbf16, #tpu.memory_space<vmem>>, %arg4: memref<128x128xbf16, #tpu.memory_space<vmem>>, %arg5: memref<1x128xf32, #tpu.memory_space<vmem>>, %arg6: memref<512x128xbf16, #tpu.memory_space<vmem>>, %arg7: memref<512x128xf32, #tpu.memory_space<vmem>>) attributes {dimension_semantics = [#tpu.dimension_semantics<parallel>, #tpu.dimension_semantics<parallel>, #tpu.dimension_semantics<arbitrary>], iteration_bounds = array<i64: 1, 1, 1>, scalar_prefetch = 0 : i64, scratch_operands = 1 : i64, tpu.core_type = #tpu.core_type<tc>, window_params = [{transform_indices = @transform_0, window_bounds = array<i64: 512, 128>}, {transform_indices = @transform_1, window_bounds = array<i64: 128, 128>}, {transform_indices = @transform_2, window_bounds = array<i64: 1, 128>}, {transform_indices = @transform_3, window_bounds = array<i64: 512, 128>}]} {
    %c0_i32 = arith.constant 0 : i32
    %0 = arith.cmpi eq, %arg2, %c0_i32 : i32
    %1 = arith.extui %0 : i1 to i32
    %c0_i32_0 = arith.constant 0 : i32
    %2 = arith.cmpi ne, %1, %c0_i32_0 : i32
    scf.if %2 {
      %cst_10 = arith.constant 0.000000e+00 : f32
      %12 = vector.broadcast %cst_10 : f32 to vector<512x128xf32>
      %c0_11 = arith.constant 0 : index
      %c0_12 = arith.constant 0 : index
      %13 = vector.load %arg7[%c0_11, %c0_12] : memref<512x128xf32, #tpu.memory_space<vmem>>, vector<512x128xf32>
      tpu.vector_store %arg7[%c0_11, %c0_12], %12 {strides = array<i32>} : memref<512x128xf32, #tpu.memory_space<vmem>>, vector<512x128xf32>,
    } else {
    }
    %c0 = arith.constant 0 : index
    %c0_1 = arith.constant 0 : index
    %3 = vector.load %arg7[%c0, %c0_1] : memref<512x128xf32, #tpu.memory_space<vmem>>, vector<512x128xf32>
    %c0_2 = arith.constant 0 : index
    %c0_3 = arith.constant 0 : index
    %4 = vector.load %arg3[%c0_2, %c0_3] : memref<512x128xbf16, #tpu.memory_space<vmem>>, vector<512x128xbf16>
    %c0_4 = arith.constant 0 : index
    %c0_5 = arith.constant 0 : index
    %5 = vector.load %arg4[%c0_4, %c0_5] : memref<128x128xbf16, #tpu.memory_space<vmem>>, vector<128x128xbf16>
    %cst = arith.constant dense<0.000000e+00> : vector<512x128xf32>
    %6 = tpu.matmul %4, %5, %cst {dimension_numbers = #tpu.dot_dimension_numbers<[1], [0], [0], [1], [0, 0, 1, 1], [], []>} : vector<512x128xbf16>, vector<128x128xbf16>, vector<512x128xf32> -> vector<512x128xf32>
    %7 = arith.addf %3, %6 : vector<512x128xf32>
    %c0_6 = arith.constant 0 : index
    %c0_7 = arith.constant 0 : index
    %8 = vector.load %arg7[%c0_6, %c0_7] : memref<512x128xf32, #tpu.memory_space<vmem>>, vector<512x128xf32>
    tpu.vector_store %arg7[%c0_6, %c0_7], %7 {strides = array<i32>} : memref<512x128xf32, #tpu.memory_space<vmem>>, vector<512x128xf32>,
    %c0_i32_8 = arith.constant 0 : i32
    %9 = arith.cmpi eq, %arg2, %c0_i32_8 : i32
    %10 = arith.extui %9 : i1 to i32
    %c0_i32_9 = arith.constant 0 : i32
    %11 = arith.cmpi ne, %10, %c0_i32_9 : i32
    scf.if %11 {
      %c0_10 = arith.constant 0 : index
      %c0_11 = arith.constant 0 : index
      %12 = vector.load %arg7[%c0_10, %c0_11] : memref<512x128xf32, #tpu.memory_space<vmem>>, vector<512x128xf32>
      %c0_12 = arith.constant 0 : index
      %c0_13 = arith.constant 0 : index
      %13 = vector.load %arg5[%c0_12, %c0_13] : memref<1x128xf32, #tpu.memory_space<vmem>>, vector<1x128xf32>
      %14 = vector.broadcast %13 : vector<1x128xf32> to vector<512x128xf32>
      %15 = arith.addf %12, %14 : vector<512x128xf32>
      %cst_14 = arith.constant 0.000000e+00 : f32
      %16 = vector.broadcast %cst_14 : f32 to vector<512x128xf32>
      %17 = arith.maximumf %15, %16 : vector<512x128xf32>
      %18 = arith.truncf %17 : vector<512x128xf32> to vector<512x128xbf16>
      %c0_15 = arith.constant 0 : index
      %c0_16 = arith.constant 0 : index
      %19 = vector.load %arg6[%c0_15, %c0_16] : memref<512x128xbf16, #tpu.memory_space<vmem>>, vector<512x128xbf16>
      tpu.vector_store %arg6[%c0_15, %c0_16], %18 {strides = array<i32>} : memref<512x128xbf16, #tpu.memory_space<vmem>>, vector<512x128xbf16>,
    } else {
    }
    return
  }
  func.func @transform_0(%arg0: i32, %arg1: i32, %arg2: i32) -> (i32, i32) {
    %c0_i32 = arith.constant 0 : i32
    return %arg0, %arg2 : i32, i32
  }
  func.func @transform_1(%arg0: i32, %arg1: i32, %arg2: i32) -> (i32, i32) {
    %c0_i32 = arith.constant 0 : i32
    return %arg2, %arg1 : i32, i32
  }
  func.func @transform_2(%arg0: i32, %arg1: i32, %arg2: i32) -> (i32, i32) {
    %c0_i32 = arith.constant 0 : i32
    %c0_i32_0 = arith.constant 0 : i32
    return %c0_i32, %arg1 : i32, i32
  }
  func.func @transform_3(%arg0: i32, %arg1: i32, %arg2: i32) -> (i32, i32) {
    %c0_i32 = arith.constant 0 : i32
    return %arg0, %arg1 : i32, i32
  }
}

module attributes {stable_mosaic.version = 11 : i64} {
  func.func @_conv3x3_kernel(%arg0: i32, %arg1: i32, %arg2: i32, %arg3: memref<1x18x18x128xbf16, #tpu.memory_space<vmem>>, %arg4: memref<9x128x128xbf16, #tpu.memory_space<vmem>>, %arg5: memref<1x128xf32, #tpu.memory_space<vmem>>, %arg6: memref<1x16x16x128xbf16, #tpu.memory_space<vmem>>) attributes {dimension_semantics = [#tpu.dimension_semantics<parallel>, #tpu.dimension_semantics<parallel>, #tpu.dimension_semantics<parallel>], iteration_bounds = array<i64: 2, 1, 1>, scalar_prefetch = 0 : i64, scratch_operands = 0 : i64, tpu.core_type = #tpu.core_type<tc>, window_params = [{transform_indices = @transform_0, window_bounds = array<i64: 1, 18, 18, 128>}, {transform_indices = @transform_1, window_bounds = array<i64: 9, 128, 128>}, {transform_indices = @transform_2, window_bounds = array<i64: 1, 128>}, {transform_indices = @transform_3, window_bounds = array<i64: 1, 16, 16, 128>}]} {
    %c16_i32 = arith.constant 16 : i32
    %0 = arith.muli %arg2, %c16_i32 : i32
    %1 = tpu.assume_multiple %0, 16 : i32
    %cst = arith.constant 0.000000e+00 : f32
    %2 = vector.broadcast %cst : f32 to vector<256x128xf32>
    %c0_i32 = arith.constant 0 : i32
    %3 = arith.addi %1, %c0_i32 : i32
    %c0 = arith.constant 0 : index
    %4 = arith.index_cast %3 : i32 to index
    %c0_0 = arith.constant 0 : index
    %c0_1 = arith.constant 0 : index
    %5 = vector.load %arg3[%c0, %4, %c0_0, %c0_1] : memref<1x18x18x128xbf16, #tpu.memory_space<vmem>>, vector<1x16x18x128xbf16>
    %6 = vector.shape_cast %5 : vector<1x16x18x128xbf16> to vector<16x18x128xbf16>
    %7 = vector.extract_strided_slice %6 {offsets = [0, 0, 0], sizes = [16, 16, 128], strides = [1, 1, 1]} : vector<16x18x128xbf16> to vector<16x16x128xbf16>
    %8 = vector.shape_cast %7 : vector<16x16x128xbf16> to vector<256x128xbf16>
    %c0_2 = arith.constant 0 : index
    %c0_3 = arith.constant 0 : index
    %c0_4 = arith.constant 0 : index
    %9 = vector.load %arg4[%c0_2, %c0_3, %c0_4] : memref<9x128x128xbf16, #tpu.memory_space<vmem>>, vector<1x128x128xbf16>
    %10 = vector.shape_cast %9 : vector<1x128x128xbf16> to vector<128x128xbf16>
    %cst_5 = arith.constant dense<0.000000e+00> : vector<256x128xf32>
    %11 = tpu.matmul %8, %10, %cst_5 {dimension_numbers = #tpu.dot_dimension_numbers<[1], [0], [0], [1], [0, 0, 1, 1], [], []>} : vector<256x128xbf16>, vector<128x128xbf16>, vector<256x128xf32> -> vector<256x128xf32>
    %12 = arith.addf %2, %11 : vector<256x128xf32>
    %13 = vector.extract_strided_slice %6 {offsets = [0, 1, 0], sizes = [16, 16, 128], strides = [1, 1, 1]} : vector<16x18x128xbf16> to vector<16x16x128xbf16>
    %14 = vector.shape_cast %13 : vector<16x16x128xbf16> to vector<256x128xbf16>
    %c1 = arith.constant 1 : index
    %c0_6 = arith.constant 0 : index
    %c0_7 = arith.constant 0 : index
    %15 = vector.load %arg4[%c1, %c0_6, %c0_7] : memref<9x128x128xbf16, #tpu.memory_space<vmem>>, vector<1x128x128xbf16>
    %16 = vector.shape_cast %15 : vector<1x128x128xbf16> to vector<128x128xbf16>
    %cst_8 = arith.constant dense<0.000000e+00> : vector<256x128xf32>
    %17 = tpu.matmul %14, %16, %cst_8 {dimension_numbers = #tpu.dot_dimension_numbers<[1], [0], [0], [1], [0, 0, 1, 1], [], []>} : vector<256x128xbf16>, vector<128x128xbf16>, vector<256x128xf32> -> vector<256x128xf32>
    %18 = arith.addf %12, %17 : vector<256x128xf32>
    %19 = vector.extract_strided_slice %6 {offsets = [0, 2, 0], sizes = [16, 16, 128], strides = [1, 1, 1]} : vector<16x18x128xbf16> to vector<16x16x128xbf16>
    %20 = vector.shape_cast %19 : vector<16x16x128xbf16> to vector<256x128xbf16>
    %c2 = arith.constant 2 : index
    %c0_9 = arith.constant 0 : index
    %c0_10 = arith.constant 0 : index
    %21 = vector.load %arg4[%c2, %c0_9, %c0_10] : memref<9x128x128xbf16, #tpu.memory_space<vmem>>, vector<1x128x128xbf16>
    %22 = vector.shape_cast %21 : vector<1x128x128xbf16> to vector<128x128xbf16>
    %cst_11 = arith.constant dense<0.000000e+00> : vector<256x128xf32>
    %23 = tpu.matmul %20, %22, %cst_11 {dimension_numbers = #tpu.dot_dimension_numbers<[1], [0], [0], [1], [0, 0, 1, 1], [], []>} : vector<256x128xbf16>, vector<128x128xbf16>, vector<256x128xf32> -> vector<256x128xf32>
    %24 = arith.addf %18, %23 : vector<256x128xf32>
    %c1_i32 = arith.constant 1 : i32
    %25 = arith.addi %1, %c1_i32 : i32
    %c0_12 = arith.constant 0 : index
    %26 = arith.index_cast %25 : i32 to index
    %c0_13 = arith.constant 0 : index
    %c0_14 = arith.constant 0 : index
    %27 = vector.load %arg3[%c0_12, %26, %c0_13, %c0_14] : memref<1x18x18x128xbf16, #tpu.memory_space<vmem>>, vector<1x16x18x128xbf16>
    %28 = vector.shape_cast %27 : vector<1x16x18x128xbf16> to vector<16x18x128xbf16>
    %29 = vector.extract_strided_slice %28 {offsets = [0, 0, 0], sizes = [16, 16, 128], strides = [1, 1, 1]} : vector<16x18x128xbf16> to vector<16x16x128xbf16>
    %30 = vector.shape_cast %29 : vector<16x16x128xbf16> to vector<256x128xbf16>
    %c3 = arith.constant 3 : index
    %c0_15 = arith.constant 0 : index
    %c0_16 = arith.constant 0 : index
    %31 = vector.load %arg4[%c3, %c0_15, %c0_16] : memref<9x128x128xbf16, #tpu.memory_space<vmem>>, vector<1x128x128xbf16>
    %32 = vector.shape_cast %31 : vector<1x128x128xbf16> to vector<128x128xbf16>
    %cst_17 = arith.constant dense<0.000000e+00> : vector<256x128xf32>
    %33 = tpu.matmul %30, %32, %cst_17 {dimension_numbers = #tpu.dot_dimension_numbers<[1], [0], [0], [1], [0, 0, 1, 1], [], []>} : vector<256x128xbf16>, vector<128x128xbf16>, vector<256x128xf32> -> vector<256x128xf32>
    %34 = arith.addf %24, %33 : vector<256x128xf32>
    %35 = vector.extract_strided_slice %28 {offsets = [0, 1, 0], sizes = [16, 16, 128], strides = [1, 1, 1]} : vector<16x18x128xbf16> to vector<16x16x128xbf16>
    %36 = vector.shape_cast %35 : vector<16x16x128xbf16> to vector<256x128xbf16>
    %c4 = arith.constant 4 : index
    %c0_18 = arith.constant 0 : index
    %c0_19 = arith.constant 0 : index
    %37 = vector.load %arg4[%c4, %c0_18, %c0_19] : memref<9x128x128xbf16, #tpu.memory_space<vmem>>, vector<1x128x128xbf16>
    %38 = vector.shape_cast %37 : vector<1x128x128xbf16> to vector<128x128xbf16>
    %cst_20 = arith.constant dense<0.000000e+00> : vector<256x128xf32>
    %39 = tpu.matmul %36, %38, %cst_20 {dimension_numbers = #tpu.dot_dimension_numbers<[1], [0], [0], [1], [0, 0, 1, 1], [], []>} : vector<256x128xbf16>, vector<128x128xbf16>, vector<256x128xf32> -> vector<256x128xf32>
    %40 = arith.addf %34, %39 : vector<256x128xf32>
    %41 = vector.extract_strided_slice %28 {offsets = [0, 2, 0], sizes = [16, 16, 128], strides = [1, 1, 1]} : vector<16x18x128xbf16> to vector<16x16x128xbf16>
    %42 = vector.shape_cast %41 : vector<16x16x128xbf16> to vector<256x128xbf16>
    %c5 = arith.constant 5 : index
    %c0_21 = arith.constant 0 : index
    %c0_22 = arith.constant 0 : index
    %43 = vector.load %arg4[%c5, %c0_21, %c0_22] : memref<9x128x128xbf16, #tpu.memory_space<vmem>>, vector<1x128x128xbf16>
    %44 = vector.shape_cast %43 : vector<1x128x128xbf16> to vector<128x128xbf16>
    %cst_23 = arith.constant dense<0.000000e+00> : vector<256x128xf32>
    %45 = tpu.matmul %42, %44, %cst_23 {dimension_numbers = #tpu.dot_dimension_numbers<[1], [0], [0], [1], [0, 0, 1, 1], [], []>} : vector<256x128xbf16>, vector<128x128xbf16>, vector<256x128xf32> -> vector<256x128xf32>
    %46 = arith.addf %40, %45 : vector<256x128xf32>
    %c2_i32 = arith.constant 2 : i32
    %47 = arith.addi %1, %c2_i32 : i32
    %c0_24 = arith.constant 0 : index
    %48 = arith.index_cast %47 : i32 to index
    %c0_25 = arith.constant 0 : index
    %c0_26 = arith.constant 0 : index
    %49 = vector.load %arg3[%c0_24, %48, %c0_25, %c0_26] : memref<1x18x18x128xbf16, #tpu.memory_space<vmem>>, vector<1x16x18x128xbf16>
    %50 = vector.shape_cast %49 : vector<1x16x18x128xbf16> to vector<16x18x128xbf16>
    %51 = vector.extract_strided_slice %50 {offsets = [0, 0, 0], sizes = [16, 16, 128], strides = [1, 1, 1]} : vector<16x18x128xbf16> to vector<16x16x128xbf16>
    %52 = vector.shape_cast %51 : vector<16x16x128xbf16> to vector<256x128xbf16>
    %c6 = arith.constant 6 : index
    %c0_27 = arith.constant 0 : index
    %c0_28 = arith.constant 0 : index
    %53 = vector.load %arg4[%c6, %c0_27, %c0_28] : memref<9x128x128xbf16, #tpu.memory_space<vmem>>, vector<1x128x128xbf16>
    %54 = vector.shape_cast %53 : vector<1x128x128xbf16> to vector<128x128xbf16>
    %cst_29 = arith.constant dense<0.000000e+00> : vector<256x128xf32>
    %55 = tpu.matmul %52, %54, %cst_29 {dimension_numbers = #tpu.dot_dimension_numbers<[1], [0], [0], [1], [0, 0, 1, 1], [], []>} : vector<256x128xbf16>, vector<128x128xbf16>, vector<256x128xf32> -> vector<256x128xf32>
    %56 = arith.addf %46, %55 : vector<256x128xf32>
    %57 = vector.extract_strided_slice %50 {offsets = [0, 1, 0], sizes = [16, 16, 128], strides = [1, 1, 1]} : vector<16x18x128xbf16> to vector<16x16x128xbf16>
    %58 = vector.shape_cast %57 : vector<16x16x128xbf16> to vector<256x128xbf16>
    %c7 = arith.constant 7 : index
    %c0_30 = arith.constant 0 : index
    %c0_31 = arith.constant 0 : index
    %59 = vector.load %arg4[%c7, %c0_30, %c0_31] : memref<9x128x128xbf16, #tpu.memory_space<vmem>>, vector<1x128x128xbf16>
    %60 = vector.shape_cast %59 : vector<1x128x128xbf16> to vector<128x128xbf16>
    %cst_32 = arith.constant dense<0.000000e+00> : vector<256x128xf32>
    %61 = tpu.matmul %58, %60, %cst_32 {dimension_numbers = #tpu.dot_dimension_numbers<[1], [0], [0], [1], [0, 0, 1, 1], [], []>} : vector<256x128xbf16>, vector<128x128xbf16>, vector<256x128xf32> -> vector<256x128xf32>
    %62 = arith.addf %56, %61 : vector<256x128xf32>
    %63 = vector.extract_strided_slice %50 {offsets = [0, 2, 0], sizes = [16, 16, 128], strides = [1, 1, 1]} : vector<16x18x128xbf16> to vector<16x16x128xbf16>
    %64 = vector.shape_cast %63 : vector<16x16x128xbf16> to vector<256x128xbf16>
    %c8 = arith.constant 8 : index
    %c0_33 = arith.constant 0 : index
    %c0_34 = arith.constant 0 : index
    %65 = vector.load %arg4[%c8, %c0_33, %c0_34] : memref<9x128x128xbf16, #tpu.memory_space<vmem>>, vector<1x128x128xbf16>
    %66 = vector.shape_cast %65 : vector<1x128x128xbf16> to vector<128x128xbf16>
    %cst_35 = arith.constant dense<0.000000e+00> : vector<256x128xf32>
    %67 = tpu.matmul %64, %66, %cst_35 {dimension_numbers = #tpu.dot_dimension_numbers<[1], [0], [0], [1], [0, 0, 1, 1], [], []>} : vector<256x128xbf16>, vector<128x128xbf16>, vector<256x128xf32> -> vector<256x128xf32>
    %68 = arith.addf %62, %67 : vector<256x128xf32>
    %69 = vector.shape_cast %68 : vector<256x128xf32> to vector<16x16x128xf32>
    %c0_36 = arith.constant 0 : index
    %c0_37 = arith.constant 0 : index
    %70 = vector.load %arg5[%c0_36, %c0_37] : memref<1x128xf32, #tpu.memory_space<vmem>>, vector<1x128xf32>
    %71 = vector.shape_cast %70 : vector<1x128xf32> to vector<1x1x128xf32>
    %72 = vector.broadcast %71 : vector<1x1x128xf32> to vector<16x16x128xf32>
    %73 = arith.addf %69, %72 : vector<16x16x128xf32>
    %cst_38 = arith.constant 0.000000e+00 : f32
    %74 = vector.broadcast %cst_38 : f32 to vector<16x16x128xf32>
    %75 = arith.maximumf %73, %74 : vector<16x16x128xf32>
    %76 = arith.truncf %75 : vector<16x16x128xf32> to vector<16x16x128xbf16>
    %c0_39 = arith.constant 0 : index
    %c0_40 = arith.constant 0 : index
    %c0_41 = arith.constant 0 : index
    %c0_42 = arith.constant 0 : index
    %77 = vector.load %arg6[%c0_39, %c0_40, %c0_41, %c0_42] : memref<1x16x16x128xbf16, #tpu.memory_space<vmem>>, vector<1x16x16x128xbf16>
    %78 = vector.shape_cast %77 : vector<1x16x16x128xbf16> to vector<16x16x128xbf16>
    %79 = vector.shape_cast %76 : vector<16x16x128xbf16> to vector<1x16x16x128xbf16>
    tpu.vector_store %arg6[%c0_39, %c0_40, %c0_41, %c0_42], %79 {strides = array<i32>} : memref<1x16x16x128xbf16, #tpu.memory_space<vmem>>, vector<1x16x16x128xbf16>,
    return
  }
  func.func @transform_0(%arg0: i32, %arg1: i32, %arg2: i32) -> (i32, i32, i32, i32) {
    %c0_i32 = arith.constant 0 : i32
    %c0_i32_0 = arith.constant 0 : i32
    %c0_i32_1 = arith.constant 0 : i32
    %c0_i32_2 = arith.constant 0 : i32
    return %arg0, %c0_i32, %c0_i32_0, %c0_i32_1 : i32, i32, i32, i32
  }
  func.func @transform_1(%arg0: i32, %arg1: i32, %arg2: i32) -> (i32, i32, i32) {
    %c0_i32 = arith.constant 0 : i32
    %c0_i32_0 = arith.constant 0 : i32
    %c0_i32_1 = arith.constant 0 : i32
    return %c0_i32, %c0_i32_0, %arg1 : i32, i32, i32
  }
  func.func @transform_2(%arg0: i32, %arg1: i32, %arg2: i32) -> (i32, i32) {
    %c0_i32 = arith.constant 0 : i32
    %c0_i32_0 = arith.constant 0 : i32
    return %c0_i32, %arg1 : i32, i32
  }
  func.func @transform_3(%arg0: i32, %arg1: i32, %arg2: i32) -> (i32, i32, i32, i32) {
    %c0_i32 = arith.constant 0 : i32
    %c0_i32_0 = arith.constant 0 : i32
    return %arg0, %arg2, %c0_i32, %arg1 : i32, i32, i32, i32
  }
}

module attributes {stable_mosaic.version = 11 : i64} {
  func.func @_maxpool2x2_kernel(%arg0: i32, %arg1: i32, %arg2: memref<1x8x2x8x256xbf16, #tpu.memory_space<vmem>>, %arg3: memref<1x8x8x128xbf16, #tpu.memory_space<vmem>>) attributes {dimension_semantics = [#tpu.dimension_semantics<parallel>, #tpu.dimension_semantics<parallel>], iteration_bounds = array<i64: 2, 1>, scalar_prefetch = 0 : i64, scratch_operands = 0 : i64, tpu.core_type = #tpu.core_type<tc>, window_params = [{transform_indices = @transform_0, window_bounds = array<i64: 1, 8, 2, 8, 256>}, {transform_indices = @transform_1, window_bounds = array<i64: 1, 8, 8, 128>}]} {
    %c0 = arith.constant 0 : index
    %c0_0 = arith.constant 0 : index
    %c0_1 = arith.constant 0 : index
    %c0_2 = arith.constant 0 : index
    %c0_3 = arith.constant 0 : index
    %0 = vector.load %arg2[%c0, %c0_0, %c0_1, %c0_2, %c0_3] : memref<1x8x2x8x256xbf16, #tpu.memory_space<vmem>>, vector<1x8x1x8x256xbf16>
    %1 = vector.shape_cast %0 : vector<1x8x1x8x256xbf16> to vector<8x8x256xbf16>
    %c0_4 = arith.constant 0 : index
    %c0_5 = arith.constant 0 : index
    %c1 = arith.constant 1 : index
    %c0_6 = arith.constant 0 : index
    %c0_7 = arith.constant 0 : index
    %2 = vector.load %arg2[%c0_4, %c0_5, %c1, %c0_6, %c0_7] : memref<1x8x2x8x256xbf16, #tpu.memory_space<vmem>>, vector<1x8x1x8x256xbf16>
    %3 = vector.shape_cast %2 : vector<1x8x1x8x256xbf16> to vector<8x8x256xbf16>
    %4 = arith.maximumf %1, %3 : vector<8x8x256xbf16>
    %5 = vector.extract_strided_slice %4 {offsets = [0, 0, 0], sizes = [8, 8, 128], strides = [1, 1, 1]} : vector<8x8x256xbf16> to vector<8x8x128xbf16>
    %6 = vector.extract_strided_slice %4 {offsets = [0, 0, 128], sizes = [8, 8, 128], strides = [1, 1, 1]} : vector<8x8x256xbf16> to vector<8x8x128xbf16>
    %7 = arith.maximumf %5, %6 : vector<8x8x128xbf16>
    %c0_8 = arith.constant 0 : index
    %c0_9 = arith.constant 0 : index
    %c0_10 = arith.constant 0 : index
    %c0_11 = arith.constant 0 : index
    %8 = vector.load %arg3[%c0_8, %c0_9, %c0_10, %c0_11] : memref<1x8x8x128xbf16, #tpu.memory_space<vmem>>, vector<1x8x8x128xbf16>
    %9 = vector.shape_cast %8 : vector<1x8x8x128xbf16> to vector<8x8x128xbf16>
    %10 = vector.shape_cast %7 : vector<8x8x128xbf16> to vector<1x8x8x128xbf16>
    tpu.vector_store %arg3[%c0_8, %c0_9, %c0_10, %c0_11], %10 {strides = array<i32>} : memref<1x8x8x128xbf16, #tpu.memory_space<vmem>>, vector<1x8x8x128xbf16>,
    return
  }
  func.func @transform_0(%arg0: i32, %arg1: i32) -> (i32, i32, i32, i32, i32) {
    %c0_i32 = arith.constant 0 : i32
    %c0_i32_0 = arith.constant 0 : i32
    %c0_i32_1 = arith.constant 0 : i32
    %c0_i32_2 = arith.constant 0 : i32
    return %arg0, %arg1, %c0_i32, %c0_i32_0, %c0_i32_1 : i32, i32, i32, i32, i32
  }
  func.func @transform_1(%arg0: i32, %arg1: i32) -> (i32, i32, i32, i32) {
    %c0_i32 = arith.constant 0 : i32
    %c0_i32_0 = arith.constant 0 : i32
    %c0_i32_1 = arith.constant 0 : i32
    return %arg0, %arg1, %c0_i32, %c0_i32_0 : i32, i32, i32, i32
  }
}

module attributes {stable_mosaic.version = 11 : i64} {
  func.func @_matmul_kernel(%arg0: i32, %arg1: i32, %arg2: i32, %arg3: memref<128x384xbf16, #tpu.memory_space<vmem>>, %arg4: memref<384x128xbf16, #tpu.memory_space<vmem>>, %arg5: memref<1x128xf32, #tpu.memory_space<vmem>>, %arg6: memref<128x128xbf16, #tpu.memory_space<vmem>>, %arg7: memref<128x128xf32, #tpu.memory_space<vmem>>) attributes {dimension_semantics = [#tpu.dimension_semantics<parallel>, #tpu.dimension_semantics<parallel>, #tpu.dimension_semantics<arbitrary>], iteration_bounds = array<i64: 1, 1, 3>, scalar_prefetch = 0 : i64, scratch_operands = 1 : i64, tpu.core_type = #tpu.core_type<tc>, window_params = [{transform_indices = @transform_0, window_bounds = array<i64: 128, 384>}, {transform_indices = @transform_1, window_bounds = array<i64: 384, 128>}, {transform_indices = @transform_2, window_bounds = array<i64: 1, 128>}, {transform_indices = @transform_3, window_bounds = array<i64: 128, 128>}]} {
    %c0_i32 = arith.constant 0 : i32
    %0 = arith.cmpi eq, %arg2, %c0_i32 : i32
    %1 = arith.extui %0 : i1 to i32
    %c0_i32_0 = arith.constant 0 : i32
    %2 = arith.cmpi ne, %1, %c0_i32_0 : i32
    scf.if %2 {
      %cst_9 = arith.constant 0.000000e+00 : f32
      %12 = vector.broadcast %cst_9 : f32 to vector<128x128xf32>
      %c0_10 = arith.constant 0 : index
      %c0_11 = arith.constant 0 : index
      %13 = vector.load %arg7[%c0_10, %c0_11] : memref<128x128xf32, #tpu.memory_space<vmem>>, vector<128x128xf32>
      tpu.vector_store %arg7[%c0_10, %c0_11], %12 {strides = array<i32>} : memref<128x128xf32, #tpu.memory_space<vmem>>, vector<128x128xf32>,
    } else {
    }
    %c0 = arith.constant 0 : index
    %c0_1 = arith.constant 0 : index
    %3 = vector.load %arg7[%c0, %c0_1] : memref<128x128xf32, #tpu.memory_space<vmem>>, vector<128x128xf32>
    %c0_2 = arith.constant 0 : index
    %c0_3 = arith.constant 0 : index
    %4 = vector.load %arg3[%c0_2, %c0_3] : memref<128x384xbf16, #tpu.memory_space<vmem>>, vector<128x384xbf16>
    %c0_4 = arith.constant 0 : index
    %c0_5 = arith.constant 0 : index
    %5 = vector.load %arg4[%c0_4, %c0_5] : memref<384x128xbf16, #tpu.memory_space<vmem>>, vector<384x128xbf16>
    %cst = arith.constant dense<0.000000e+00> : vector<128x128xf32>
    %6 = tpu.matmul %4, %5, %cst {dimension_numbers = #tpu.dot_dimension_numbers<[1], [0], [0], [1], [0, 0, 1, 1], [], []>} : vector<128x384xbf16>, vector<384x128xbf16>, vector<128x128xf32> -> vector<128x128xf32>
    %7 = arith.addf %3, %6 : vector<128x128xf32>
    %c0_6 = arith.constant 0 : index
    %c0_7 = arith.constant 0 : index
    %8 = vector.load %arg7[%c0_6, %c0_7] : memref<128x128xf32, #tpu.memory_space<vmem>>, vector<128x128xf32>
    tpu.vector_store %arg7[%c0_6, %c0_7], %7 {strides = array<i32>} : memref<128x128xf32, #tpu.memory_space<vmem>>, vector<128x128xf32>,
    %c2_i32 = arith.constant 2 : i32
    %9 = arith.cmpi eq, %arg2, %c2_i32 : i32
    %10 = arith.extui %9 : i1 to i32
    %c0_i32_8 = arith.constant 0 : i32
    %11 = arith.cmpi ne, %10, %c0_i32_8 : i32
    scf.if %11 {
      %c0_9 = arith.constant 0 : index
      %c0_10 = arith.constant 0 : index
      %12 = vector.load %arg7[%c0_9, %c0_10] : memref<128x128xf32, #tpu.memory_space<vmem>>, vector<128x128xf32>
      %c0_11 = arith.constant 0 : index
      %c0_12 = arith.constant 0 : index
      %13 = vector.load %arg5[%c0_11, %c0_12] : memref<1x128xf32, #tpu.memory_space<vmem>>, vector<1x128xf32>
      %14 = vector.broadcast %13 : vector<1x128xf32> to vector<128x128xf32>
      %15 = arith.addf %12, %14 : vector<128x128xf32>
      %cst_13 = arith.constant 0.000000e+00 : f32
      %16 = vector.broadcast %cst_13 : f32 to vector<128x128xf32>
      %17 = arith.maximumf %15, %16 : vector<128x128xf32>
      %18 = arith.truncf %17 : vector<128x128xf32> to vector<128x128xbf16>
      %c0_14 = arith.constant 0 : index
      %c0_15 = arith.constant 0 : index
      %19 = vector.load %arg6[%c0_14, %c0_15] : memref<128x128xbf16, #tpu.memory_space<vmem>>, vector<128x128xbf16>
      tpu.vector_store %arg6[%c0_14, %c0_15], %18 {strides = array<i32>} : memref<128x128xbf16, #tpu.memory_space<vmem>>, vector<128x128xbf16>,
    } else {
    }
    return
  }
  func.func @transform_0(%arg0: i32, %arg1: i32, %arg2: i32) -> (i32, i32) {
    %c0_i32 = arith.constant 0 : i32
    return %arg0, %arg2 : i32, i32
  }
  func.func @transform_1(%arg0: i32, %arg1: i32, %arg2: i32) -> (i32, i32) {
    %c0_i32 = arith.constant 0 : i32
    return %arg2, %arg1 : i32, i32
  }
  func.func @transform_2(%arg0: i32, %arg1: i32, %arg2: i32) -> (i32, i32) {
    %c0_i32 = arith.constant 0 : i32
    %c0_i32_0 = arith.constant 0 : i32
    return %c0_i32, %arg1 : i32, i32
  }
  func.func @transform_3(%arg0: i32, %arg1: i32, %arg2: i32) -> (i32, i32) {
    %c0_i32 = arith.constant 0 : i32
    return %arg0, %arg1 : i32, i32
  }
}

module attributes {stable_mosaic.version = 11 : i64} {
  func.func @_maxpool2x2_kernel(%arg0: i32, %arg1: i32, %arg2: memref<1x4x2x4x256xbf16, #tpu.memory_space<vmem>>, %arg3: memref<1x4x4x128xbf16, #tpu.memory_space<vmem>>) attributes {dimension_semantics = [#tpu.dimension_semantics<parallel>, #tpu.dimension_semantics<parallel>], iteration_bounds = array<i64: 2, 1>, scalar_prefetch = 0 : i64, scratch_operands = 0 : i64, tpu.core_type = #tpu.core_type<tc>, window_params = [{transform_indices = @transform_0, window_bounds = array<i64: 1, 4, 2, 4, 256>}, {transform_indices = @transform_1, window_bounds = array<i64: 1, 4, 4, 128>}]} {
    %c0 = arith.constant 0 : index
    %c0_0 = arith.constant 0 : index
    %c0_1 = arith.constant 0 : index
    %c0_2 = arith.constant 0 : index
    %c0_3 = arith.constant 0 : index
    %0 = vector.load %arg2[%c0, %c0_0, %c0_1, %c0_2, %c0_3] : memref<1x4x2x4x256xbf16, #tpu.memory_space<vmem>>, vector<1x4x1x4x256xbf16>
    %1 = vector.shape_cast %0 : vector<1x4x1x4x256xbf16> to vector<4x4x256xbf16>
    %c0_4 = arith.constant 0 : index
    %c0_5 = arith.constant 0 : index
    %c1 = arith.constant 1 : index
    %c0_6 = arith.constant 0 : index
    %c0_7 = arith.constant 0 : index
    %2 = vector.load %arg2[%c0_4, %c0_5, %c1, %c0_6, %c0_7] : memref<1x4x2x4x256xbf16, #tpu.memory_space<vmem>>, vector<1x4x1x4x256xbf16>
    %3 = vector.shape_cast %2 : vector<1x4x1x4x256xbf16> to vector<4x4x256xbf16>
    %4 = arith.maximumf %1, %3 : vector<4x4x256xbf16>
    %5 = vector.extract_strided_slice %4 {offsets = [0, 0, 0], sizes = [4, 4, 128], strides = [1, 1, 1]} : vector<4x4x256xbf16> to vector<4x4x128xbf16>
    %6 = vector.extract_strided_slice %4 {offsets = [0, 0, 128], sizes = [4, 4, 128], strides = [1, 1, 1]} : vector<4x4x256xbf16> to vector<4x4x128xbf16>
    %7 = arith.maximumf %5, %6 : vector<4x4x128xbf16>
    %c0_8 = arith.constant 0 : index
    %c0_9 = arith.constant 0 : index
    %c0_10 = arith.constant 0 : index
    %c0_11 = arith.constant 0 : index
    %8 = vector.load %arg3[%c0_8, %c0_9, %c0_10, %c0_11] : memref<1x4x4x128xbf16, #tpu.memory_space<vmem>>, vector<1x4x4x128xbf16>
    %9 = vector.shape_cast %8 : vector<1x4x4x128xbf16> to vector<4x4x128xbf16>
    %10 = vector.shape_cast %7 : vector<4x4x128xbf16> to vector<1x4x4x128xbf16>
    tpu.vector_store %arg3[%c0_8, %c0_9, %c0_10, %c0_11], %10 {strides = array<i32>} : memref<1x4x4x128xbf16, #tpu.memory_space<vmem>>, vector<1x4x4x128xbf16>,
    return
  }
  func.func @transform_0(%arg0: i32, %arg1: i32) -> (i32, i32, i32, i32, i32) {
    %c0_i32 = arith.constant 0 : i32
    %c0_i32_0 = arith.constant 0 : i32
    %c0_i32_1 = arith.constant 0 : i32
    %c0_i32_2 = arith.constant 0 : i32
    return %arg0, %arg1, %c0_i32, %c0_i32_0, %c0_i32_1 : i32, i32, i32, i32, i32
  }
  func.func @transform_1(%arg0: i32, %arg1: i32) -> (i32, i32, i32, i32) {
    %c0_i32 = arith.constant 0 : i32
    %c0_i32_0 = arith.constant 0 : i32
    %c0_i32_1 = arith.constant 0 : i32
    return %arg0, %arg1, %c0_i32, %c0_i32_0 : i32, i32, i32, i32
  }
}

module attributes {stable_mosaic.version = 11 : i64} {
  func.func @_matmul_kernel(%arg0: i32, %arg1: i32, %arg2: i32, %arg3: memref<32x384xbf16, #tpu.memory_space<vmem>>, %arg4: memref<384x128xbf16, #tpu.memory_space<vmem>>, %arg5: memref<1x128xf32, #tpu.memory_space<vmem>>, %arg6: memref<32x128xbf16, #tpu.memory_space<vmem>>, %arg7: memref<32x128xf32, #tpu.memory_space<vmem>>) attributes {dimension_semantics = [#tpu.dimension_semantics<parallel>, #tpu.dimension_semantics<parallel>, #tpu.dimension_semantics<arbitrary>], iteration_bounds = array<i64: 1, 1, 3>, scalar_prefetch = 0 : i64, scratch_operands = 1 : i64, tpu.core_type = #tpu.core_type<tc>, window_params = [{transform_indices = @transform_0, window_bounds = array<i64: 32, 384>}, {transform_indices = @transform_1, window_bounds = array<i64: 384, 128>}, {transform_indices = @transform_2, window_bounds = array<i64: 1, 128>}, {transform_indices = @transform_3, window_bounds = array<i64: 32, 128>}]} {
    %c0_i32 = arith.constant 0 : i32
    %0 = arith.cmpi eq, %arg2, %c0_i32 : i32
    %1 = arith.extui %0 : i1 to i32
    %c0_i32_0 = arith.constant 0 : i32
    %2 = arith.cmpi ne, %1, %c0_i32_0 : i32
    scf.if %2 {
      %cst_9 = arith.constant 0.000000e+00 : f32
      %12 = vector.broadcast %cst_9 : f32 to vector<32x128xf32>
      %c0_10 = arith.constant 0 : index
      %c0_11 = arith.constant 0 : index
      %13 = vector.load %arg7[%c0_10, %c0_11] : memref<32x128xf32, #tpu.memory_space<vmem>>, vector<32x128xf32>
      tpu.vector_store %arg7[%c0_10, %c0_11], %12 {strides = array<i32>} : memref<32x128xf32, #tpu.memory_space<vmem>>, vector<32x128xf32>,
    } else {
    }
    %c0 = arith.constant 0 : index
    %c0_1 = arith.constant 0 : index
    %3 = vector.load %arg7[%c0, %c0_1] : memref<32x128xf32, #tpu.memory_space<vmem>>, vector<32x128xf32>
    %c0_2 = arith.constant 0 : index
    %c0_3 = arith.constant 0 : index
    %4 = vector.load %arg3[%c0_2, %c0_3] : memref<32x384xbf16, #tpu.memory_space<vmem>>, vector<32x384xbf16>
    %c0_4 = arith.constant 0 : index
    %c0_5 = arith.constant 0 : index
    %5 = vector.load %arg4[%c0_4, %c0_5] : memref<384x128xbf16, #tpu.memory_space<vmem>>, vector<384x128xbf16>
    %cst = arith.constant dense<0.000000e+00> : vector<32x128xf32>
    %6 = tpu.matmul %4, %5, %cst {dimension_numbers = #tpu.dot_dimension_numbers<[1], [0], [0], [1], [0, 0, 1, 1], [], []>} : vector<32x384xbf16>, vector<384x128xbf16>, vector<32x128xf32> -> vector<32x128xf32>
    %7 = arith.addf %3, %6 : vector<32x128xf32>
    %c0_6 = arith.constant 0 : index
    %c0_7 = arith.constant 0 : index
    %8 = vector.load %arg7[%c0_6, %c0_7] : memref<32x128xf32, #tpu.memory_space<vmem>>, vector<32x128xf32>
    tpu.vector_store %arg7[%c0_6, %c0_7], %7 {strides = array<i32>} : memref<32x128xf32, #tpu.memory_space<vmem>>, vector<32x128xf32>,
    %c2_i32 = arith.constant 2 : i32
    %9 = arith.cmpi eq, %arg2, %c2_i32 : i32
    %10 = arith.extui %9 : i1 to i32
    %c0_i32_8 = arith.constant 0 : i32
    %11 = arith.cmpi ne, %10, %c0_i32_8 : i32
    scf.if %11 {
      %c0_9 = arith.constant 0 : index
      %c0_10 = arith.constant 0 : index
      %12 = vector.load %arg7[%c0_9, %c0_10] : memref<32x128xf32, #tpu.memory_space<vmem>>, vector<32x128xf32>
      %c0_11 = arith.constant 0 : index
      %c0_12 = arith.constant 0 : index
      %13 = vector.load %arg5[%c0_11, %c0_12] : memref<1x128xf32, #tpu.memory_space<vmem>>, vector<1x128xf32>
      %14 = vector.broadcast %13 : vector<1x128xf32> to vector<32x128xf32>
      %15 = arith.addf %12, %14 : vector<32x128xf32>
      %cst_13 = arith.constant 0.000000e+00 : f32
      %16 = vector.broadcast %cst_13 : f32 to vector<32x128xf32>
      %17 = arith.maximumf %15, %16 : vector<32x128xf32>
      %18 = arith.truncf %17 : vector<32x128xf32> to vector<32x128xbf16>
      %c0_14 = arith.constant 0 : index
      %c0_15 = arith.constant 0 : index
      %19 = vector.load %arg6[%c0_14, %c0_15] : memref<32x128xbf16, #tpu.memory_space<vmem>>, vector<32x128xbf16>
      tpu.vector_store %arg6[%c0_14, %c0_15], %18 {strides = array<i32>} : memref<32x128xbf16, #tpu.memory_space<vmem>>, vector<32x128xbf16>,
    } else {
    }
    return
  }
  func.func @transform_0(%arg0: i32, %arg1: i32, %arg2: i32) -> (i32, i32) {
    %c0_i32 = arith.constant 0 : i32
    return %arg0, %arg2 : i32, i32
  }
  func.func @transform_1(%arg0: i32, %arg1: i32, %arg2: i32) -> (i32, i32) {
    %c0_i32 = arith.constant 0 : i32
    return %arg2, %arg1 : i32, i32
  }
  func.func @transform_2(%arg0: i32, %arg1: i32, %arg2: i32) -> (i32, i32) {
    %c0_i32 = arith.constant 0 : i32
    %c0_i32_0 = arith.constant 0 : i32
    return %c0_i32, %arg1 : i32, i32
  }
  func.func @transform_3(%arg0: i32, %arg1: i32, %arg2: i32) -> (i32, i32) {
    %c0_i32 = arith.constant 0 : i32
    return %arg0, %arg1 : i32, i32
  }
}

module attributes {stable_mosaic.version = 11 : i64} {
  func.func @_maxpool2x2_kernel(%arg0: i32, %arg1: i32, %arg2: memref<1x2x2x2x256xbf16, #tpu.memory_space<vmem>>, %arg3: memref<1x2x2x128xbf16, #tpu.memory_space<vmem>>) attributes {dimension_semantics = [#tpu.dimension_semantics<parallel>, #tpu.dimension_semantics<parallel>], iteration_bounds = array<i64: 2, 1>, scalar_prefetch = 0 : i64, scratch_operands = 0 : i64, tpu.core_type = #tpu.core_type<tc>, window_params = [{transform_indices = @transform_0, window_bounds = array<i64: 1, 2, 2, 2, 256>}, {transform_indices = @transform_1, window_bounds = array<i64: 1, 2, 2, 128>}]} {
    %c0 = arith.constant 0 : index
    %c0_0 = arith.constant 0 : index
    %c0_1 = arith.constant 0 : index
    %c0_2 = arith.constant 0 : index
    %c0_3 = arith.constant 0 : index
    %0 = vector.load %arg2[%c0, %c0_0, %c0_1, %c0_2, %c0_3] : memref<1x2x2x2x256xbf16, #tpu.memory_space<vmem>>, vector<1x2x1x2x256xbf16>
    %1 = vector.shape_cast %0 : vector<1x2x1x2x256xbf16> to vector<2x2x256xbf16>
    %c0_4 = arith.constant 0 : index
    %c0_5 = arith.constant 0 : index
    %c1 = arith.constant 1 : index
    %c0_6 = arith.constant 0 : index
    %c0_7 = arith.constant 0 : index
    %2 = vector.load %arg2[%c0_4, %c0_5, %c1, %c0_6, %c0_7] : memref<1x2x2x2x256xbf16, #tpu.memory_space<vmem>>, vector<1x2x1x2x256xbf16>
    %3 = vector.shape_cast %2 : vector<1x2x1x2x256xbf16> to vector<2x2x256xbf16>
    %4 = arith.maximumf %1, %3 : vector<2x2x256xbf16>
    %5 = vector.extract_strided_slice %4 {offsets = [0, 0, 0], sizes = [2, 2, 128], strides = [1, 1, 1]} : vector<2x2x256xbf16> to vector<2x2x128xbf16>
    %6 = vector.extract_strided_slice %4 {offsets = [0, 0, 128], sizes = [2, 2, 128], strides = [1, 1, 1]} : vector<2x2x256xbf16> to vector<2x2x128xbf16>
    %7 = arith.maximumf %5, %6 : vector<2x2x128xbf16>
    %c0_8 = arith.constant 0 : index
    %c0_9 = arith.constant 0 : index
    %c0_10 = arith.constant 0 : index
    %c0_11 = arith.constant 0 : index
    %8 = vector.load %arg3[%c0_8, %c0_9, %c0_10, %c0_11] : memref<1x2x2x128xbf16, #tpu.memory_space<vmem>>, vector<1x2x2x128xbf16>
    %9 = vector.shape_cast %8 : vector<1x2x2x128xbf16> to vector<2x2x128xbf16>
    %10 = vector.shape_cast %7 : vector<2x2x128xbf16> to vector<1x2x2x128xbf16>
    tpu.vector_store %arg3[%c0_8, %c0_9, %c0_10, %c0_11], %10 {strides = array<i32>} : memref<1x2x2x128xbf16, #tpu.memory_space<vmem>>, vector<1x2x2x128xbf16>,
    return
  }
  func.func @transform_0(%arg0: i32, %arg1: i32) -> (i32, i32, i32, i32, i32) {
    %c0_i32 = arith.constant 0 : i32
    %c0_i32_0 = arith.constant 0 : i32
    %c0_i32_1 = arith.constant 0 : i32
    %c0_i32_2 = arith.constant 0 : i32
    return %arg0, %arg1, %c0_i32, %c0_i32_0, %c0_i32_1 : i32, i32, i32, i32, i32
  }
  func.func @transform_1(%arg0: i32, %arg1: i32) -> (i32, i32, i32, i32) {
    %c0_i32 = arith.constant 0 : i32
    %c0_i32_0 = arith.constant 0 : i32
    %c0_i32_1 = arith.constant 0 : i32
    return %arg0, %arg1, %c0_i32, %c0_i32_0 : i32, i32, i32, i32
  }
}

module attributes {stable_mosaic.version = 11 : i64} {
  func.func @_matmul_kernel(%arg0: i32, %arg1: i32, %arg2: i32, %arg3: memref<8x384xbf16, #tpu.memory_space<vmem>>, %arg4: memref<384x128xbf16, #tpu.memory_space<vmem>>, %arg5: memref<1x128xf32, #tpu.memory_space<vmem>>, %arg6: memref<8x128xbf16, #tpu.memory_space<vmem>>, %arg7: memref<8x128xf32, #tpu.memory_space<vmem>>) attributes {dimension_semantics = [#tpu.dimension_semantics<parallel>, #tpu.dimension_semantics<parallel>, #tpu.dimension_semantics<arbitrary>], iteration_bounds = array<i64: 1, 1, 3>, scalar_prefetch = 0 : i64, scratch_operands = 1 : i64, tpu.core_type = #tpu.core_type<tc>, window_params = [{transform_indices = @transform_0, window_bounds = array<i64: 8, 384>}, {transform_indices = @transform_1, window_bounds = array<i64: 384, 128>}, {transform_indices = @transform_2, window_bounds = array<i64: 1, 128>}, {transform_indices = @transform_3, window_bounds = array<i64: 8, 128>}]} {
    %c0_i32 = arith.constant 0 : i32
    %0 = arith.cmpi eq, %arg2, %c0_i32 : i32
    %1 = arith.extui %0 : i1 to i32
    %c0_i32_0 = arith.constant 0 : i32
    %2 = arith.cmpi ne, %1, %c0_i32_0 : i32
    scf.if %2 {
      %cst_9 = arith.constant 0.000000e+00 : f32
      %12 = vector.broadcast %cst_9 : f32 to vector<8x128xf32>
      %c0_10 = arith.constant 0 : index
      %c0_11 = arith.constant 0 : index
      %13 = vector.load %arg7[%c0_10, %c0_11] : memref<8x128xf32, #tpu.memory_space<vmem>>, vector<8x128xf32>
      tpu.vector_store %arg7[%c0_10, %c0_11], %12 {strides = array<i32>} : memref<8x128xf32, #tpu.memory_space<vmem>>, vector<8x128xf32>,
    } else {
    }
    %c0 = arith.constant 0 : index
    %c0_1 = arith.constant 0 : index
    %3 = vector.load %arg7[%c0, %c0_1] : memref<8x128xf32, #tpu.memory_space<vmem>>, vector<8x128xf32>
    %c0_2 = arith.constant 0 : index
    %c0_3 = arith.constant 0 : index
    %4 = vector.load %arg3[%c0_2, %c0_3] : memref<8x384xbf16, #tpu.memory_space<vmem>>, vector<8x384xbf16>
    %c0_4 = arith.constant 0 : index
    %c0_5 = arith.constant 0 : index
    %5 = vector.load %arg4[%c0_4, %c0_5] : memref<384x128xbf16, #tpu.memory_space<vmem>>, vector<384x128xbf16>
    %cst = arith.constant dense<0.000000e+00> : vector<8x128xf32>
    %6 = tpu.matmul %4, %5, %cst {dimension_numbers = #tpu.dot_dimension_numbers<[1], [0], [0], [1], [0, 0, 1, 1], [], []>} : vector<8x384xbf16>, vector<384x128xbf16>, vector<8x128xf32> -> vector<8x128xf32>
    %7 = arith.addf %3, %6 : vector<8x128xf32>
    %c0_6 = arith.constant 0 : index
    %c0_7 = arith.constant 0 : index
    %8 = vector.load %arg7[%c0_6, %c0_7] : memref<8x128xf32, #tpu.memory_space<vmem>>, vector<8x128xf32>
    tpu.vector_store %arg7[%c0_6, %c0_7], %7 {strides = array<i32>} : memref<8x128xf32, #tpu.memory_space<vmem>>, vector<8x128xf32>,
    %c2_i32 = arith.constant 2 : i32
    %9 = arith.cmpi eq, %arg2, %c2_i32 : i32
    %10 = arith.extui %9 : i1 to i32
    %c0_i32_8 = arith.constant 0 : i32
    %11 = arith.cmpi ne, %10, %c0_i32_8 : i32
    scf.if %11 {
      %c0_9 = arith.constant 0 : index
      %c0_10 = arith.constant 0 : index
      %12 = vector.load %arg7[%c0_9, %c0_10] : memref<8x128xf32, #tpu.memory_space<vmem>>, vector<8x128xf32>
      %c0_11 = arith.constant 0 : index
      %c0_12 = arith.constant 0 : index
      %13 = vector.load %arg5[%c0_11, %c0_12] : memref<1x128xf32, #tpu.memory_space<vmem>>, vector<1x128xf32>
      %14 = vector.broadcast %13 : vector<1x128xf32> to vector<8x128xf32>
      %15 = arith.addf %12, %14 : vector<8x128xf32>
      %cst_13 = arith.constant 0.000000e+00 : f32
      %16 = vector.broadcast %cst_13 : f32 to vector<8x128xf32>
      %17 = arith.maximumf %15, %16 : vector<8x128xf32>
      %18 = arith.truncf %17 : vector<8x128xf32> to vector<8x128xbf16>
      %c0_14 = arith.constant 0 : index
      %c0_15 = arith.constant 0 : index
      %19 = vector.load %arg6[%c0_14, %c0_15] : memref<8x128xbf16, #tpu.memory_space<vmem>>, vector<8x128xbf16>
      tpu.vector_store %arg6[%c0_14, %c0_15], %18 {strides = array<i32>} : memref<8x128xbf16, #tpu.memory_space<vmem>>, vector<8x128xbf16>,
    } else {
    }
    return
  }
  func.func @transform_0(%arg0: i32, %arg1: i32, %arg2: i32) -> (i32, i32) {
    %c0_i32 = arith.constant 0 : i32
    return %arg0, %arg2 : i32, i32
  }
  func.func @transform_1(%arg0: i32, %arg1: i32, %arg2: i32) -> (i32, i32) {
    %c0_i32 = arith.constant 0 : i32
    return %arg2, %arg1 : i32, i32
  }
  func.func @transform_2(%arg0: i32, %arg1: i32, %arg2: i32) -> (i32, i32) {
    %c0_i32 = arith.constant 0 : i32
    %c0_i32_0 = arith.constant 0 : i32
    return %c0_i32, %arg1 : i32, i32
  }
  func.func @transform_3(%arg0: i32, %arg1: i32, %arg2: i32) -> (i32, i32) {
    %c0_i32 = arith.constant 0 : i32
    return %arg0, %arg1 : i32, i32
  }
}

module attributes {stable_mosaic.version = 11 : i64} {
  func.func @_matmul_kernel(%arg0: i32, %arg1: i32, %arg2: i32, %arg3: memref<8x128xbf16, #tpu.memory_space<vmem>>, %arg4: memref<128x512xbf16, #tpu.memory_space<vmem>>, %arg5: memref<1x512xf32, #tpu.memory_space<vmem>>, %arg6: memref<8x512xbf16, #tpu.memory_space<vmem>>, %arg7: memref<8x512xf32, #tpu.memory_space<vmem>>) attributes {dimension_semantics = [#tpu.dimension_semantics<parallel>, #tpu.dimension_semantics<parallel>, #tpu.dimension_semantics<arbitrary>], iteration_bounds = array<i64: 1, 1, 1>, scalar_prefetch = 0 : i64, scratch_operands = 1 : i64, tpu.core_type = #tpu.core_type<tc>, window_params = [{transform_indices = @transform_0, window_bounds = array<i64: 8, 128>}, {transform_indices = @transform_1, window_bounds = array<i64: 128, 512>}, {transform_indices = @transform_2, window_bounds = array<i64: 1, 512>}, {transform_indices = @transform_3, window_bounds = array<i64: 8, 512>}]} {
    %c0_i32 = arith.constant 0 : i32
    %0 = arith.cmpi eq, %arg2, %c0_i32 : i32
    %1 = arith.extui %0 : i1 to i32
    %c0_i32_0 = arith.constant 0 : i32
    %2 = arith.cmpi ne, %1, %c0_i32_0 : i32
    scf.if %2 {
      %cst_10 = arith.constant 0.000000e+00 : f32
      %12 = vector.broadcast %cst_10 : f32 to vector<8x512xf32>
      %c0_11 = arith.constant 0 : index
      %c0_12 = arith.constant 0 : index
      %13 = vector.load %arg7[%c0_11, %c0_12] : memref<8x512xf32, #tpu.memory_space<vmem>>, vector<8x512xf32>
      tpu.vector_store %arg7[%c0_11, %c0_12], %12 {strides = array<i32>} : memref<8x512xf32, #tpu.memory_space<vmem>>, vector<8x512xf32>,
    } else {
    }
    %c0 = arith.constant 0 : index
    %c0_1 = arith.constant 0 : index
    %3 = vector.load %arg7[%c0, %c0_1] : memref<8x512xf32, #tpu.memory_space<vmem>>, vector<8x512xf32>
    %c0_2 = arith.constant 0 : index
    %c0_3 = arith.constant 0 : index
    %4 = vector.load %arg3[%c0_2, %c0_3] : memref<8x128xbf16, #tpu.memory_space<vmem>>, vector<8x128xbf16>
    %c0_4 = arith.constant 0 : index
    %c0_5 = arith.constant 0 : index
    %5 = vector.load %arg4[%c0_4, %c0_5] : memref<128x512xbf16, #tpu.memory_space<vmem>>, vector<128x512xbf16>
    %cst = arith.constant dense<0.000000e+00> : vector<8x512xf32>
    %6 = tpu.matmul %4, %5, %cst {dimension_numbers = #tpu.dot_dimension_numbers<[1], [0], [0], [1], [0, 0, 1, 1], [], []>} : vector<8x128xbf16>, vector<128x512xbf16>, vector<8x512xf32> -> vector<8x512xf32>
    %7 = arith.addf %3, %6 : vector<8x512xf32>
    %c0_6 = arith.constant 0 : index
    %c0_7 = arith.constant 0 : index
    %8 = vector.load %arg7[%c0_6, %c0_7] : memref<8x512xf32, #tpu.memory_space<vmem>>, vector<8x512xf32>
    tpu.vector_store %arg7[%c0_6, %c0_7], %7 {strides = array<i32>} : memref<8x512xf32, #tpu.memory_space<vmem>>, vector<8x512xf32>,
    %c0_i32_8 = arith.constant 0 : i32
    %9 = arith.cmpi eq, %arg2, %c0_i32_8 : i32
    %10 = arith.extui %9 : i1 to i32
    %c0_i32_9 = arith.constant 0 : i32
    %11 = arith.cmpi ne, %10, %c0_i32_9 : i32
    scf.if %11 {
      %c0_10 = arith.constant 0 : index
      %c0_11 = arith.constant 0 : index
      %12 = vector.load %arg7[%c0_10, %c0_11] : memref<8x512xf32, #tpu.memory_space<vmem>>, vector<8x512xf32>
      %c0_12 = arith.constant 0 : index
      %c0_13 = arith.constant 0 : index
      %13 = vector.load %arg5[%c0_12, %c0_13] : memref<1x512xf32, #tpu.memory_space<vmem>>, vector<1x512xf32>
      %14 = vector.broadcast %13 : vector<1x512xf32> to vector<8x512xf32>
      %15 = arith.addf %12, %14 : vector<8x512xf32>
      %16 = arith.truncf %15 : vector<8x512xf32> to vector<8x512xbf16>
      %c0_14 = arith.constant 0 : index
      %c0_15 = arith.constant 0 : index
      %17 = vector.load %arg6[%c0_14, %c0_15] : memref<8x512xbf16, #tpu.memory_space<vmem>>, vector<8x512xbf16>
      tpu.vector_store %arg6[%c0_14, %c0_15], %16 {strides = array<i32>} : memref<8x512xbf16, #tpu.memory_space<vmem>>, vector<8x512xbf16>,
    } else {
    }
    return
  }
  func.func @transform_0(%arg0: i32, %arg1: i32, %arg2: i32) -> (i32, i32) {
    %c0_i32 = arith.constant 0 : i32
    return %arg0, %arg2 : i32, i32
  }
  func.func @transform_1(%arg0: i32, %arg1: i32, %arg2: i32) -> (i32, i32) {
    %c0_i32 = arith.constant 0 : i32
    return %arg2, %arg1 : i32, i32
  }
  func.func @transform_2(%arg0: i32, %arg1: i32, %arg2: i32) -> (i32, i32) {
    %c0_i32 = arith.constant 0 : i32
    %c0_i32_0 = arith.constant 0 : i32
    return %c0_i32, %arg1 : i32, i32
  }
  func.func @transform_3(%arg0: i32, %arg1: i32, %arg2: i32) -> (i32, i32) {
    %c0_i32 = arith.constant 0 : i32
    return %arg0, %arg1 : i32, i32
  }
}

module attributes {stable_mosaic.version = 11 : i64} {
  func.func @_matmul_kernel(%arg0: i32, %arg1: i32, %arg2: i32, %arg3: memref<8x128xbf16, #tpu.memory_space<vmem>>, %arg4: memref<128x128xbf16, #tpu.memory_space<vmem>>, %arg5: memref<1x128xf32, #tpu.memory_space<vmem>>, %arg6: memref<8x128xf32, #tpu.memory_space<vmem>>, %arg7: memref<8x128xf32, #tpu.memory_space<vmem>>) attributes {dimension_semantics = [#tpu.dimension_semantics<parallel>, #tpu.dimension_semantics<parallel>, #tpu.dimension_semantics<arbitrary>], iteration_bounds = array<i64: 1, 1, 1>, scalar_prefetch = 0 : i64, scratch_operands = 1 : i64, tpu.core_type = #tpu.core_type<tc>, window_params = [{transform_indices = @transform_0, window_bounds = array<i64: 8, 128>}, {transform_indices = @transform_1, window_bounds = array<i64: 128, 128>}, {transform_indices = @transform_2, window_bounds = array<i64: 1, 128>}, {transform_indices = @transform_3, window_bounds = array<i64: 8, 128>}]} {
    %c0_i32 = arith.constant 0 : i32
    %0 = arith.cmpi eq, %arg2, %c0_i32 : i32
    %1 = arith.extui %0 : i1 to i32
    %c0_i32_0 = arith.constant 0 : i32
    %2 = arith.cmpi ne, %1, %c0_i32_0 : i32
    scf.if %2 {
      %cst_10 = arith.constant 0.000000e+00 : f32
      %12 = vector.broadcast %cst_10 : f32 to vector<8x128xf32>
      %c0_11 = arith.constant 0 : index
      %c0_12 = arith.constant 0 : index
      %13 = vector.load %arg7[%c0_11, %c0_12] : memref<8x128xf32, #tpu.memory_space<vmem>>, vector<8x128xf32>
      tpu.vector_store %arg7[%c0_11, %c0_12], %12 {strides = array<i32>} : memref<8x128xf32, #tpu.memory_space<vmem>>, vector<8x128xf32>,
    } else {
    }
    %c0 = arith.constant 0 : index
    %c0_1 = arith.constant 0 : index
    %3 = vector.load %arg7[%c0, %c0_1] : memref<8x128xf32, #tpu.memory_space<vmem>>, vector<8x128xf32>
    %c0_2 = arith.constant 0 : index
    %c0_3 = arith.constant 0 : index
    %4 = vector.load %arg3[%c0_2, %c0_3] : memref<8x128xbf16, #tpu.memory_space<vmem>>, vector<8x128xbf16>
    %c0_4 = arith.constant 0 : index
    %c0_5 = arith.constant 0 : index
    %5 = vector.load %arg4[%c0_4, %c0_5] : memref<128x128xbf16, #tpu.memory_space<vmem>>, vector<128x128xbf16>
    %cst = arith.constant dense<0.000000e+00> : vector<8x128xf32>
    %6 = tpu.matmul %4, %5, %cst {dimension_numbers = #tpu.dot_dimension_numbers<[1], [0], [0], [1], [0, 0, 1, 1], [], []>} : vector<8x128xbf16>, vector<128x128xbf16>, vector<8x128xf32> -> vector<8x128xf32>
    %7 = arith.addf %3, %6 : vector<8x128xf32>
    %c0_6 = arith.constant 0 : index
    %c0_7 = arith.constant 0 : index
    %8 = vector.load %arg7[%c0_6, %c0_7] : memref<8x128xf32, #tpu.memory_space<vmem>>, vector<8x128xf32>
    tpu.vector_store %arg7[%c0_6, %c0_7], %7 {strides = array<i32>} : memref<8x128xf32, #tpu.memory_space<vmem>>, vector<8x128xf32>,
    %c0_i32_8 = arith.constant 0 : i32
    %9 = arith.cmpi eq, %arg2, %c0_i32_8 : i32
    %10 = arith.extui %9 : i1 to i32
    %c0_i32_9 = arith.constant 0 : i32
    %11 = arith.cmpi ne, %10, %c0_i32_9 : i32
    scf.if %11 {
      %c0_10 = arith.constant 0 : index
      %c0_11 = arith.constant 0 : index
      %12 = vector.load %arg7[%c0_10, %c0_11] : memref<8x128xf32, #tpu.memory_space<vmem>>, vector<8x128xf32>
      %c0_12 = arith.constant 0 : index
      %c0_13 = arith.constant 0 : index
      %13 = vector.load %arg5[%c0_12, %c0_13] : memref<1x128xf32, #tpu.memory_space<vmem>>, vector<1x128xf32>
      %14 = vector.broadcast %13 : vector<1x128xf32> to vector<8x128xf32>
      %15 = arith.addf %12, %14 : vector<8x128xf32>
      %cst_14 = arith.constant 0.000000e+00 : f32
      %16 = vector.broadcast %cst_14 : f32 to vector<8x128xf32>
      %17 = arith.maximumf %15, %16 : vector<8x128xf32>
      %c0_15 = arith.constant 0 : index
      %c0_16 = arith.constant 0 : index
      %18 = vector.load %arg6[%c0_15, %c0_16] : memref<8x128xf32, #tpu.memory_space<vmem>>, vector<8x128xf32>
      tpu.vector_store %arg6[%c0_15, %c0_16], %17 {strides = array<i32>} : memref<8x128xf32, #tpu.memory_space<vmem>>, vector<8x128xf32>,
    } else {
    }
    return
  }
  func.func @transform_0(%arg0: i32, %arg1: i32, %arg2: i32) -> (i32, i32) {
    %c0_i32 = arith.constant 0 : i32
    return %arg0, %arg2 : i32, i32
  }
  func.func @transform_1(%arg0: i32, %arg1: i32, %arg2: i32) -> (i32, i32) {
    %c0_i32 = arith.constant 0 : i32
    return %arg2, %arg1 : i32, i32
  }
  func.func @transform_2(%arg0: i32, %arg1: i32, %arg2: i32) -> (i32, i32) {
    %c0_i32 = arith.constant 0 : i32
    %c0_i32_0 = arith.constant 0 : i32
    return %c0_i32, %arg1 : i32, i32
  }
  func.func @transform_3(%arg0: i32, %arg1: i32, %arg2: i32) -> (i32, i32) {
    %c0_i32 = arith.constant 0 : i32
    return %arg0, %arg1 : i32, i32
  }
}

module attributes {stable_mosaic.version = 11 : i64} {
  func.func @_matmul_kernel(%arg0: i32, %arg1: i32, %arg2: i32, %arg3: memref<32x128xbf16, #tpu.memory_space<vmem>>, %arg4: memref<128x512xbf16, #tpu.memory_space<vmem>>, %arg5: memref<1x512xf32, #tpu.memory_space<vmem>>, %arg6: memref<32x512xbf16, #tpu.memory_space<vmem>>, %arg7: memref<32x512xf32, #tpu.memory_space<vmem>>) attributes {dimension_semantics = [#tpu.dimension_semantics<parallel>, #tpu.dimension_semantics<parallel>, #tpu.dimension_semantics<arbitrary>], iteration_bounds = array<i64: 1, 1, 1>, scalar_prefetch = 0 : i64, scratch_operands = 1 : i64, tpu.core_type = #tpu.core_type<tc>, window_params = [{transform_indices = @transform_0, window_bounds = array<i64: 32, 128>}, {transform_indices = @transform_1, window_bounds = array<i64: 128, 512>}, {transform_indices = @transform_2, window_bounds = array<i64: 1, 512>}, {transform_indices = @transform_3, window_bounds = array<i64: 32, 512>}]} {
    %c0_i32 = arith.constant 0 : i32
    %0 = arith.cmpi eq, %arg2, %c0_i32 : i32
    %1 = arith.extui %0 : i1 to i32
    %c0_i32_0 = arith.constant 0 : i32
    %2 = arith.cmpi ne, %1, %c0_i32_0 : i32
    scf.if %2 {
      %cst_10 = arith.constant 0.000000e+00 : f32
      %12 = vector.broadcast %cst_10 : f32 to vector<32x512xf32>
      %c0_11 = arith.constant 0 : index
      %c0_12 = arith.constant 0 : index
      %13 = vector.load %arg7[%c0_11, %c0_12] : memref<32x512xf32, #tpu.memory_space<vmem>>, vector<32x512xf32>
      tpu.vector_store %arg7[%c0_11, %c0_12], %12 {strides = array<i32>} : memref<32x512xf32, #tpu.memory_space<vmem>>, vector<32x512xf32>,
    } else {
    }
    %c0 = arith.constant 0 : index
    %c0_1 = arith.constant 0 : index
    %3 = vector.load %arg7[%c0, %c0_1] : memref<32x512xf32, #tpu.memory_space<vmem>>, vector<32x512xf32>
    %c0_2 = arith.constant 0 : index
    %c0_3 = arith.constant 0 : index
    %4 = vector.load %arg3[%c0_2, %c0_3] : memref<32x128xbf16, #tpu.memory_space<vmem>>, vector<32x128xbf16>
    %c0_4 = arith.constant 0 : index
    %c0_5 = arith.constant 0 : index
    %5 = vector.load %arg4[%c0_4, %c0_5] : memref<128x512xbf16, #tpu.memory_space<vmem>>, vector<128x512xbf16>
    %cst = arith.constant dense<0.000000e+00> : vector<32x512xf32>
    %6 = tpu.matmul %4, %5, %cst {dimension_numbers = #tpu.dot_dimension_numbers<[1], [0], [0], [1], [0, 0, 1, 1], [], []>} : vector<32x128xbf16>, vector<128x512xbf16>, vector<32x512xf32> -> vector<32x512xf32>
    %7 = arith.addf %3, %6 : vector<32x512xf32>
    %c0_6 = arith.constant 0 : index
    %c0_7 = arith.constant 0 : index
    %8 = vector.load %arg7[%c0_6, %c0_7] : memref<32x512xf32, #tpu.memory_space<vmem>>, vector<32x512xf32>
    tpu.vector_store %arg7[%c0_6, %c0_7], %7 {strides = array<i32>} : memref<32x512xf32, #tpu.memory_space<vmem>>, vector<32x512xf32>,
    %c0_i32_8 = arith.constant 0 : i32
    %9 = arith.cmpi eq, %arg2, %c0_i32_8 : i32
    %10 = arith.extui %9 : i1 to i32
    %c0_i32_9 = arith.constant 0 : i32
    %11 = arith.cmpi ne, %10, %c0_i32_9 : i32
    scf.if %11 {
      %c0_10 = arith.constant 0 : index
      %c0_11 = arith.constant 0 : index
      %12 = vector.load %arg7[%c0_10, %c0_11] : memref<32x512xf32, #tpu.memory_space<vmem>>, vector<32x512xf32>
      %c0_12 = arith.constant 0 : index
      %c0_13 = arith.constant 0 : index
      %13 = vector.load %arg5[%c0_12, %c0_13] : memref<1x512xf32, #tpu.memory_space<vmem>>, vector<1x512xf32>
      %14 = vector.broadcast %13 : vector<1x512xf32> to vector<32x512xf32>
      %15 = arith.addf %12, %14 : vector<32x512xf32>
      %16 = arith.truncf %15 : vector<32x512xf32> to vector<32x512xbf16>
      %c0_14 = arith.constant 0 : index
      %c0_15 = arith.constant 0 : index
      %17 = vector.load %arg6[%c0_14, %c0_15] : memref<32x512xbf16, #tpu.memory_space<vmem>>, vector<32x512xbf16>
      tpu.vector_store %arg6[%c0_14, %c0_15], %16 {strides = array<i32>} : memref<32x512xbf16, #tpu.memory_space<vmem>>, vector<32x512xbf16>,
    } else {
    }
    return
  }
  func.func @transform_0(%arg0: i32, %arg1: i32, %arg2: i32) -> (i32, i32) {
    %c0_i32 = arith.constant 0 : i32
    return %arg0, %arg2 : i32, i32
  }
  func.func @transform_1(%arg0: i32, %arg1: i32, %arg2: i32) -> (i32, i32) {
    %c0_i32 = arith.constant 0 : i32
    return %arg2, %arg1 : i32, i32
  }
  func.func @transform_2(%arg0: i32, %arg1: i32, %arg2: i32) -> (i32, i32) {
    %c0_i32 = arith.constant 0 : i32
    %c0_i32_0 = arith.constant 0 : i32
    return %c0_i32, %arg1 : i32, i32
  }
  func.func @transform_3(%arg0: i32, %arg1: i32, %arg2: i32) -> (i32, i32) {
    %c0_i32 = arith.constant 0 : i32
    return %arg0, %arg1 : i32, i32
  }
}

module attributes {stable_mosaic.version = 11 : i64} {
  func.func @_matmul_kernel(%arg0: i32, %arg1: i32, %arg2: i32, %arg3: memref<128x128xbf16, #tpu.memory_space<vmem>>, %arg4: memref<128x512xbf16, #tpu.memory_space<vmem>>, %arg5: memref<1x512xf32, #tpu.memory_space<vmem>>, %arg6: memref<128x512xbf16, #tpu.memory_space<vmem>>, %arg7: memref<128x512xf32, #tpu.memory_space<vmem>>) attributes {dimension_semantics = [#tpu.dimension_semantics<parallel>, #tpu.dimension_semantics<parallel>, #tpu.dimension_semantics<arbitrary>], iteration_bounds = array<i64: 1, 1, 1>, scalar_prefetch = 0 : i64, scratch_operands = 1 : i64, tpu.core_type = #tpu.core_type<tc>, window_params = [{transform_indices = @transform_0, window_bounds = array<i64: 128, 128>}, {transform_indices = @transform_1, window_bounds = array<i64: 128, 512>}, {transform_indices = @transform_2, window_bounds = array<i64: 1, 512>}, {transform_indices = @transform_3, window_bounds = array<i64: 128, 512>}]} {
    %c0_i32 = arith.constant 0 : i32
    %0 = arith.cmpi eq, %arg2, %c0_i32 : i32
    %1 = arith.extui %0 : i1 to i32
    %c0_i32_0 = arith.constant 0 : i32
    %2 = arith.cmpi ne, %1, %c0_i32_0 : i32
    scf.if %2 {
      %cst_10 = arith.constant 0.000000e+00 : f32
      %12 = vector.broadcast %cst_10 : f32 to vector<128x512xf32>
      %c0_11 = arith.constant 0 : index
      %c0_12 = arith.constant 0 : index
      %13 = vector.load %arg7[%c0_11, %c0_12] : memref<128x512xf32, #tpu.memory_space<vmem>>, vector<128x512xf32>
      tpu.vector_store %arg7[%c0_11, %c0_12], %12 {strides = array<i32>} : memref<128x512xf32, #tpu.memory_space<vmem>>, vector<128x512xf32>,
    } else {
    }
    %c0 = arith.constant 0 : index
    %c0_1 = arith.constant 0 : index
    %3 = vector.load %arg7[%c0, %c0_1] : memref<128x512xf32, #tpu.memory_space<vmem>>, vector<128x512xf32>
    %c0_2 = arith.constant 0 : index
    %c0_3 = arith.constant 0 : index
    %4 = vector.load %arg3[%c0_2, %c0_3] : memref<128x128xbf16, #tpu.memory_space<vmem>>, vector<128x128xbf16>
    %c0_4 = arith.constant 0 : index
    %c0_5 = arith.constant 0 : index
    %5 = vector.load %arg4[%c0_4, %c0_5] : memref<128x512xbf16, #tpu.memory_space<vmem>>, vector<128x512xbf16>
    %cst = arith.constant dense<0.000000e+00> : vector<128x512xf32>
    %6 = tpu.matmul %4, %5, %cst {dimension_numbers = #tpu.dot_dimension_numbers<[1], [0], [0], [1], [0, 0, 1, 1], [], []>} : vector<128x128xbf16>, vector<128x512xbf16>, vector<128x512xf32> -> vector<128x512xf32>
    %7 = arith.addf %3, %6 : vector<128x512xf32>
    %c0_6 = arith.constant 0 : index
    %c0_7 = arith.constant 0 : index
    %8 = vector.load %arg7[%c0_6, %c0_7] : memref<128x512xf32, #tpu.memory_space<vmem>>, vector<128x512xf32>
    tpu.vector_store %arg7[%c0_6, %c0_7], %7 {strides = array<i32>} : memref<128x512xf32, #tpu.memory_space<vmem>>, vector<128x512xf32>,
    %c0_i32_8 = arith.constant 0 : i32
    %9 = arith.cmpi eq, %arg2, %c0_i32_8 : i32
    %10 = arith.extui %9 : i1 to i32
    %c0_i32_9 = arith.constant 0 : i32
    %11 = arith.cmpi ne, %10, %c0_i32_9 : i32
    scf.if %11 {
      %c0_10 = arith.constant 0 : index
      %c0_11 = arith.constant 0 : index
      %12 = vector.load %arg7[%c0_10, %c0_11] : memref<128x512xf32, #tpu.memory_space<vmem>>, vector<128x512xf32>
      %c0_12 = arith.constant 0 : index
      %c0_13 = arith.constant 0 : index
      %13 = vector.load %arg5[%c0_12, %c0_13] : memref<1x512xf32, #tpu.memory_space<vmem>>, vector<1x512xf32>
      %14 = vector.broadcast %13 : vector<1x512xf32> to vector<128x512xf32>
      %15 = arith.addf %12, %14 : vector<128x512xf32>
      %16 = arith.truncf %15 : vector<128x512xf32> to vector<128x512xbf16>
      %c0_14 = arith.constant 0 : index
      %c0_15 = arith.constant 0 : index
      %17 = vector.load %arg6[%c0_14, %c0_15] : memref<128x512xbf16, #tpu.memory_space<vmem>>, vector<128x512xbf16>
      tpu.vector_store %arg6[%c0_14, %c0_15], %16 {strides = array<i32>} : memref<128x512xbf16, #tpu.memory_space<vmem>>, vector<128x512xbf16>,
    } else {
    }
    return
  }
  func.func @transform_0(%arg0: i32, %arg1: i32, %arg2: i32) -> (i32, i32) {
    %c0_i32 = arith.constant 0 : i32
    return %arg0, %arg2 : i32, i32
  }
  func.func @transform_1(%arg0: i32, %arg1: i32, %arg2: i32) -> (i32, i32) {
    %c0_i32 = arith.constant 0 : i32
    return %arg2, %arg1 : i32, i32
  }
  func.func @transform_2(%arg0: i32, %arg1: i32, %arg2: i32) -> (i32, i32) {
    %c0_i32 = arith.constant 0 : i32
    %c0_i32_0 = arith.constant 0 : i32
    return %c0_i32, %arg1 : i32, i32
  }
  func.func @transform_3(%arg0: i32, %arg1: i32, %arg2: i32) -> (i32, i32) {
    %c0_i32 = arith.constant 0 : i32
    return %arg0, %arg1 : i32, i32
  }
}

module attributes {stable_mosaic.version = 11 : i64} {
  func.func @_matmul_kernel(%arg0: i32, %arg1: i32, %arg2: i32, %arg3: memref<512x128xbf16, #tpu.memory_space<vmem>>, %arg4: memref<128x128xbf16, #tpu.memory_space<vmem>>, %arg5: memref<1x128xf32, #tpu.memory_space<vmem>>, %arg6: memref<512x128xbf16, #tpu.memory_space<vmem>>, %arg7: memref<512x128xf32, #tpu.memory_space<vmem>>) attributes {dimension_semantics = [#tpu.dimension_semantics<parallel>, #tpu.dimension_semantics<parallel>, #tpu.dimension_semantics<arbitrary>], iteration_bounds = array<i64: 1, 1, 1>, scalar_prefetch = 0 : i64, scratch_operands = 1 : i64, tpu.core_type = #tpu.core_type<tc>, window_params = [{transform_indices = @transform_0, window_bounds = array<i64: 512, 128>}, {transform_indices = @transform_1, window_bounds = array<i64: 128, 128>}, {transform_indices = @transform_2, window_bounds = array<i64: 1, 128>}, {transform_indices = @transform_3, window_bounds = array<i64: 512, 128>}]} {
    %c0_i32 = arith.constant 0 : i32
    %0 = arith.cmpi eq, %arg2, %c0_i32 : i32
    %1 = arith.extui %0 : i1 to i32
    %c0_i32_0 = arith.constant 0 : i32
    %2 = arith.cmpi ne, %1, %c0_i32_0 : i32
    scf.if %2 {
      %cst_10 = arith.constant 0.000000e+00 : f32
      %12 = vector.broadcast %cst_10 : f32 to vector<512x128xf32>
      %c0_11 = arith.constant 0 : index
      %c0_12 = arith.constant 0 : index
      %13 = vector.load %arg7[%c0_11, %c0_12] : memref<512x128xf32, #tpu.memory_space<vmem>>, vector<512x128xf32>
      tpu.vector_store %arg7[%c0_11, %c0_12], %12 {strides = array<i32>} : memref<512x128xf32, #tpu.memory_space<vmem>>, vector<512x128xf32>,
    } else {
    }
    %c0 = arith.constant 0 : index
    %c0_1 = arith.constant 0 : index
    %3 = vector.load %arg7[%c0, %c0_1] : memref<512x128xf32, #tpu.memory_space<vmem>>, vector<512x128xf32>
    %c0_2 = arith.constant 0 : index
    %c0_3 = arith.constant 0 : index
    %4 = vector.load %arg3[%c0_2, %c0_3] : memref<512x128xbf16, #tpu.memory_space<vmem>>, vector<512x128xbf16>
    %c0_4 = arith.constant 0 : index
    %c0_5 = arith.constant 0 : index
    %5 = vector.load %arg4[%c0_4, %c0_5] : memref<128x128xbf16, #tpu.memory_space<vmem>>, vector<128x128xbf16>
    %cst = arith.constant dense<0.000000e+00> : vector<512x128xf32>
    %6 = tpu.matmul %4, %5, %cst {dimension_numbers = #tpu.dot_dimension_numbers<[1], [0], [0], [1], [0, 0, 1, 1], [], []>} : vector<512x128xbf16>, vector<128x128xbf16>, vector<512x128xf32> -> vector<512x128xf32>
    %7 = arith.addf %3, %6 : vector<512x128xf32>
    %c0_6 = arith.constant 0 : index
    %c0_7 = arith.constant 0 : index
    %8 = vector.load %arg7[%c0_6, %c0_7] : memref<512x128xf32, #tpu.memory_space<vmem>>, vector<512x128xf32>
    tpu.vector_store %arg7[%c0_6, %c0_7], %7 {strides = array<i32>} : memref<512x128xf32, #tpu.memory_space<vmem>>, vector<512x128xf32>,
    %c0_i32_8 = arith.constant 0 : i32
    %9 = arith.cmpi eq, %arg2, %c0_i32_8 : i32
    %10 = arith.extui %9 : i1 to i32
    %c0_i32_9 = arith.constant 0 : i32
    %11 = arith.cmpi ne, %10, %c0_i32_9 : i32
    scf.if %11 {
      %c0_10 = arith.constant 0 : index
      %c0_11 = arith.constant 0 : index
      %12 = vector.load %arg7[%c0_10, %c0_11] : memref<512x128xf32, #tpu.memory_space<vmem>>, vector<512x128xf32>
      %c0_12 = arith.constant 0 : index
      %c0_13 = arith.constant 0 : index
      %13 = vector.load %arg5[%c0_12, %c0_13] : memref<1x128xf32, #tpu.memory_space<vmem>>, vector<1x128xf32>
      %14 = vector.broadcast %13 : vector<1x128xf32> to vector<512x128xf32>
      %15 = arith.addf %12, %14 : vector<512x128xf32>
      %16 = arith.truncf %15 : vector<512x128xf32> to vector<512x128xbf16>
      %c0_14 = arith.constant 0 : index
      %c0_15 = arith.constant 0 : index
      %17 = vector.load %arg6[%c0_14, %c0_15] : memref<512x128xbf16, #tpu.memory_space<vmem>>, vector<512x128xbf16>
      tpu.vector_store %arg6[%c0_14, %c0_15], %16 {strides = array<i32>} : memref<512x128xbf16, #tpu.memory_space<vmem>>, vector<512x128xbf16>,
    } else {
    }
    return
  }
  func.func @transform_0(%arg0: i32, %arg1: i32, %arg2: i32) -> (i32, i32) {
    %c0_i32 = arith.constant 0 : i32
    return %arg0, %arg2 : i32, i32
  }
  func.func @transform_1(%arg0: i32, %arg1: i32, %arg2: i32) -> (i32, i32) {
    %c0_i32 = arith.constant 0 : i32
    return %arg2, %arg1 : i32, i32
  }
  func.func @transform_2(%arg0: i32, %arg1: i32, %arg2: i32) -> (i32, i32) {
    %c0_i32 = arith.constant 0 : i32
    %c0_i32_0 = arith.constant 0 : i32
    return %c0_i32, %arg1 : i32, i32
  }
  func.func @transform_3(%arg0: i32, %arg1: i32, %arg2: i32) -> (i32, i32) {
    %c0_i32 = arith.constant 0 : i32
    return %arg0, %arg1 : i32, i32
  }
}

module attributes {stable_mosaic.version = 11 : i64} {
  func.func @_matmul_kernel(%arg0: i32, %arg1: i32, %arg2: i32, %arg3: memref<8x128xbf16, #tpu.memory_space<vmem>>, %arg4: memref<128x128xbf16, #tpu.memory_space<vmem>>, %arg5: memref<1x128xf32, #tpu.memory_space<vmem>>, %arg6: memref<8x128xf32, #tpu.memory_space<vmem>>, %arg7: memref<8x128xf32, #tpu.memory_space<vmem>>) attributes {dimension_semantics = [#tpu.dimension_semantics<parallel>, #tpu.dimension_semantics<parallel>, #tpu.dimension_semantics<arbitrary>], iteration_bounds = array<i64: 1, 1, 1>, scalar_prefetch = 0 : i64, scratch_operands = 1 : i64, tpu.core_type = #tpu.core_type<tc>, window_params = [{transform_indices = @transform_0, window_bounds = array<i64: 8, 128>}, {transform_indices = @transform_1, window_bounds = array<i64: 128, 128>}, {transform_indices = @transform_2, window_bounds = array<i64: 1, 128>}, {transform_indices = @transform_3, window_bounds = array<i64: 8, 128>}]} {
    %c0_i32 = arith.constant 0 : i32
    %0 = arith.cmpi eq, %arg2, %c0_i32 : i32
    %1 = arith.extui %0 : i1 to i32
    %c0_i32_0 = arith.constant 0 : i32
    %2 = arith.cmpi ne, %1, %c0_i32_0 : i32
    scf.if %2 {
      %cst_10 = arith.constant 0.000000e+00 : f32
      %12 = vector.broadcast %cst_10 : f32 to vector<8x128xf32>
      %c0_11 = arith.constant 0 : index
      %c0_12 = arith.constant 0 : index
      %13 = vector.load %arg7[%c0_11, %c0_12] : memref<8x128xf32, #tpu.memory_space<vmem>>, vector<8x128xf32>
      tpu.vector_store %arg7[%c0_11, %c0_12], %12 {strides = array<i32>} : memref<8x128xf32, #tpu.memory_space<vmem>>, vector<8x128xf32>,
    } else {
    }
    %c0 = arith.constant 0 : index
    %c0_1 = arith.constant 0 : index
    %3 = vector.load %arg7[%c0, %c0_1] : memref<8x128xf32, #tpu.memory_space<vmem>>, vector<8x128xf32>
    %c0_2 = arith.constant 0 : index
    %c0_3 = arith.constant 0 : index
    %4 = vector.load %arg3[%c0_2, %c0_3] : memref<8x128xbf16, #tpu.memory_space<vmem>>, vector<8x128xbf16>
    %c0_4 = arith.constant 0 : index
    %c0_5 = arith.constant 0 : index
    %5 = vector.load %arg4[%c0_4, %c0_5] : memref<128x128xbf16, #tpu.memory_space<vmem>>, vector<128x128xbf16>
    %cst = arith.constant dense<0.000000e+00> : vector<8x128xf32>
    %6 = tpu.matmul %4, %5, %cst {dimension_numbers = #tpu.dot_dimension_numbers<[1], [0], [0], [1], [0, 0, 1, 1], [], []>} : vector<8x128xbf16>, vector<128x128xbf16>, vector<8x128xf32> -> vector<8x128xf32>
    %7 = arith.addf %3, %6 : vector<8x128xf32>
    %c0_6 = arith.constant 0 : index
    %c0_7 = arith.constant 0 : index
    %8 = vector.load %arg7[%c0_6, %c0_7] : memref<8x128xf32, #tpu.memory_space<vmem>>, vector<8x128xf32>
    tpu.vector_store %arg7[%c0_6, %c0_7], %7 {strides = array<i32>} : memref<8x128xf32, #tpu.memory_space<vmem>>, vector<8x128xf32>,
    %c0_i32_8 = arith.constant 0 : i32
    %9 = arith.cmpi eq, %arg2, %c0_i32_8 : i32
    %10 = arith.extui %9 : i1 to i32
    %c0_i32_9 = arith.constant 0 : i32
    %11 = arith.cmpi ne, %10, %c0_i32_9 : i32
    scf.if %11 {
      %c0_10 = arith.constant 0 : index
      %c0_11 = arith.constant 0 : index
      %12 = vector.load %arg7[%c0_10, %c0_11] : memref<8x128xf32, #tpu.memory_space<vmem>>, vector<8x128xf32>
      %c0_12 = arith.constant 0 : index
      %c0_13 = arith.constant 0 : index
      %13 = vector.load %arg5[%c0_12, %c0_13] : memref<1x128xf32, #tpu.memory_space<vmem>>, vector<1x128xf32>
      %14 = vector.broadcast %13 : vector<1x128xf32> to vector<8x128xf32>
      %15 = arith.addf %12, %14 : vector<8x128xf32>
      %c0_14 = arith.constant 0 : index
      %c0_15 = arith.constant 0 : index
      %16 = vector.load %arg6[%c0_14, %c0_15] : memref<8x128xf32, #tpu.memory_space<vmem>>, vector<8x128xf32>
      tpu.vector_store %arg6[%c0_14, %c0_15], %15 {strides = array<i32>} : memref<8x128xf32, #tpu.memory_space<vmem>>, vector<8x128xf32>,
    } else {
    }
    return
  }
  func.func @transform_0(%arg0: i32, %arg1: i32, %arg2: i32) -> (i32, i32) {
    %c0_i32 = arith.constant 0 : i32
    return %arg0, %arg2 : i32, i32
  }
  func.func @transform_1(%arg0: i32, %arg1: i32, %arg2: i32) -> (i32, i32) {
    %c0_i32 = arith.constant 0 : i32
    return %arg2, %arg1 : i32, i32
  }
  func.func @transform_2(%arg0: i32, %arg1: i32, %arg2: i32) -> (i32, i32) {
    %c0_i32 = arith.constant 0 : i32
    %c0_i32_0 = arith.constant 0 : i32
    return %c0_i32, %arg1 : i32, i32
  }
  func.func @transform_3(%arg0: i32, %arg1: i32, %arg2: i32) -> (i32, i32) {
    %c0_i32 = arith.constant 0 : i32
    return %arg0, %arg1 : i32, i32
  }
}

</mosaic_0001>

<bundles_post_ra>
// kernel: vae_forward.26
= control target key start
LH: loop header
LB: loop body
LE: loop exit
PB: predicated region body
PF: predicated region fallthrough
CT: control target
= control target key end

     0   :  { %s2251_s1 = inlined_call_operand.vmem [shape: bf16[128,128], index: 1, kind: input, shape index: {}]   ;;  %s2252_s0 = inlined_call_operand.vmem [shape: bf16[512,128], index: 0, kind: input, shape index: {}]   ;;  %s2253_s2 = inlined_call_operand.vmem [shape: f32[1,128], index: 2, kind: input, shape index: {}]   ;;  %s2254_s3 = inlined_call_operand.vmem [shape: bf16[512,128], index: 3, kind: output, shape index: {}]  }
   0x1   :  { %v1906_v0 = vld [vmem:[%s2251_s1] sm:$0xff]   ;;  %v1907_v1 = vld [vmem:[%s2251_s1 + $0x8] sm:$0xff]   ;;  %v1908_v2 = vld [vmem:[%s2251_s1 + $0x10] sm:$0xff]  }
   0x2   :  { %1810 = vmatprep.subr.bf16.mxu0 %v1906_v0  ;;  %1890 = vmatprep.subr.bf16.mxu1 %v1906_v0  ;;  %v1909_v3 = vld [vmem:[%s2251_s1 + $0x18] sm:$0xff]   ;;  %v1914_v4 = vld [vmem:[%s2252_s0] sm:$0xff]   ;;  %v1911_v7 = vld [vmem:[%s2251_s1 + $0x28] sm:$0xff]  }
   0x3   :  { %1811 = vmatpush3.bf16.msra.mxu0 %v1906_v0  ;;  %1898 = vmatpush3.bf16.msra.mxu1 %v1906_v0  ;;  %v1915_v5 = vld [vmem:[%s2252_s0 + $0x80] sm:$0xff]   ;;  %v1912_v8 = vld [vmem:[%s2251_s1 + $0x30] sm:$0xff]   ;;  %v1913_v9 = vld [vmem:[%s2251_s1 + $0x38] sm:$0xff]  }
   0x4   :  { %1812 = vmatprep.subr.bf16.mxu0 %v1907_v1  ;;  %1891 = vmatprep.subr.bf16.mxu1 %v1907_v1  ;;  %v1910_v6 = vld [vmem:[%s2251_s1 + $0x20] sm:$0xff]   ;;  %v1916_v10 = vld [vmem:[%s2252_s0 + $0x8] sm:$0xff]   ;;  %v1918_v12 = vld [vmem:[%s2252_s0 + $0x10] sm:$0xff]  }
   0x5   :  { %1826 = vmatprep.mubr.bf16.mxu0 %v1914_v4  ;;  %1858 = vmatprep.mubr.bf16.mxu1 %v1915_v5  ;;  %v1917_v11 = vld [vmem:[%s2252_s0 + $0x88] sm:$0xff]   ;;  %v1919_v13 = vld [vmem:[%s2252_s0 + $0x90] sm:$0xff]   ;;  %v1920_v14 = vld [vmem:[%s2252_s0 + $0x18] sm:$0xff]  }
   0x6   :  { %v1921_v15 = vld [vmem:[%s2252_s0 + $0x98] sm:$0xff]   ;;  %v1922_v16 = vld [vmem:[%s2252_s0 + $0x20] sm:$0xff]   ;;  %v1924_v18 = vld [vmem:[%s2252_s0 + $0x28] sm:$0xff]  }
   0x7   :  { %1813 = vmatpush3.bf16.msra.mxu0 %v1907_v1  ;;  %1899 = vmatpush3.bf16.msra.mxu1 %v1907_v1  ;;  %v1923_v17 = vld [vmem:[%s2252_s0 + $0xa0] sm:$0xff]   ;;  %v1925_v19 = vld [vmem:[%s2252_s0 + $0xa8] sm:$0xff]   ;;  %v1926_v20 = vld [vmem:[%s2252_s0 + $0x30] sm:$0xff]  }
   0x8   :  { %1814 = vmatprep.subr.bf16.mxu0 %v1908_v2  ;;  %1892 = vmatprep.subr.bf16.mxu1 %v1908_v2  ;;  %v1927_v21 = vld [vmem:[%s2252_s0 + $0xb0] sm:$0xff]   ;;  %v1928_v22 = vld [vmem:[%s2252_s0 + $0x38] sm:$0xff]   ;;  %v1930_v24 = vld [vmem:[%s2252_s0 + $0x40] sm:$0xff]  }
   0x9   :  { %v1929_v23 = vld [vmem:[%s2252_s0 + $0xb8] sm:$0xff]   ;;  %v1931_v25 = vld [vmem:[%s2252_s0 + $0xc0] sm:$0xff]   ;;  %v1932_v26 = vld [vmem:[%s2252_s0 + $0x48] sm:$0xff]  }
   0xa   :  { %v1933_v27 = vld [vmem:[%s2252_s0 + $0xc8] sm:$0xff]   ;;  %v1934_v28 = vld [vmem:[%s2252_s0 + $0x50] sm:$0xff]   ;;  %v1936_v30 = vld [vmem:[%s2252_s0 + $0x58] sm:$0xff]  }
   0xb   :  { %1815 = vmatpush3.bf16.msra.mxu0 %v1908_v2  ;;  %1900 = vmatpush3.bf16.msra.mxu1 %v1908_v2  ;;  %v1935_v29 = vld [vmem:[%s2252_s0 + $0xd0] sm:$0xff]   ;;  %v1937_v31 = vld [vmem:[%s2252_s0 + $0xd8] sm:$0xff]   ;;  %v1938_v32 = vld [vmem:[%s2252_s0 + $0x60] sm:$0xff]  }
   0xc   :  { %1816 = vmatprep.subr.bf16.mxu0 %v1909_v3  ;;  %1893 = vmatprep.subr.bf16.mxu1 %v1909_v3  ;;  %v1939_v33 = vld [vmem:[%s2252_s0 + $0xe0] sm:$0xff]   ;;  %v1940_v34 = vld [vmem:[%s2252_s0 + $0x68] sm:$0xff]   ;;  %v1942_v36 = vld [vmem:[%s2252_s0 + $0x70] sm:$0xff]  }
   0xd   :  { %v1941_v35 = vld [vmem:[%s2252_s0 + $0xe8] sm:$0xff]   ;;  %v1943_v37 = vld [vmem:[%s2252_s0 + $0xf0] sm:$0xff]   ;;  %v1944_v38 = vld [vmem:[%s2252_s0 + $0x78] sm:$0xff]  }
   0xe   :  { %v1945_v39 = vld [vmem:[%s2252_s0 + $0xf8] sm:$0xff]   ;;  %v2089_v40 = vld [vmem:[%s2253_s2] ss:$0 sm:$0xff] }
   0xf   :  { %1817 = vmatpush3.bf16.msra.mxu0 %v1909_v3  ;;  %1901 = vmatpush3.bf16.msra.mxu1 %v1909_v3 }
  0x10   :  { %1818 = vmatprep.subr.bf16.mxu0 %v1910_v6  ;;  %1894 = vmatprep.subr.bf16.mxu1 %v1910_v6 }
  0x13   :  { %1819 = vmatpush3.bf16.msra.mxu0 %v1910_v6  ;;  %1902 = vmatpush3.bf16.msra.mxu1 %v1910_v6 }
  0x14   :  { %1820 = vmatprep.subr.bf16.mxu0 %v1911_v7  ;;  %1895 = vmatprep.subr.bf16.mxu1 %v1911_v7 }
  0x17   :  { %1821 = vmatpush3.bf16.msra.mxu0 %v1911_v7  ;;  %1903 = vmatpush3.bf16.msra.mxu1 %v1911_v7 }
  0x18   :  { %1822 = vmatprep.subr.bf16.mxu0 %v1912_v8  ;;  %1896 = vmatprep.subr.bf16.mxu1 %v1912_v8 }
  0x1b   :  { %1823 = vmatpush3.bf16.msra.mxu0 %v1912_v8  ;;  %1904 = vmatpush3.bf16.msra.mxu1 %v1912_v8 }
  0x1c   :  { %1824 = vmatprep.subr.bf16.mxu0 %v1913_v9  ;;  %1897 = vmatprep.subr.bf16.mxu1 %v1913_v9 }
  0x1f   :  { %1825 = vmatpush3.bf16.msra.mxu0 %v1913_v9  ;;  %1905 = vmatpush3.bf16.msra.mxu1 %v1913_v9 }
  0x22   :  { %1827 = vmatmul.mubr.bf16.vlgmr.msra.gmra.mrb[0].mxu0 %v1916_v10  ;;  %1859 = vmatmul.mubr.bf16.vlgmr.msra.gmra.mrb[0].mxu1 %v1917_v11 }
  0x23   :  { %1830 = vmatprep.mubr.bf16.mxu0 %v1918_v12  ;;  %1862 = vmatprep.mubr.bf16.mxu1 %v1919_v13 }
  0x2a   :  { %1831 = vmatmul.mubr.bf16.gmra.mrb[4].mxu0 %v1920_v14  ;;  %1863 = vmatmul.mubr.bf16.gmra.mrb[4].mxu1 %v1921_v15 }
  0x2b   :  { %1834 = vmatprep.mubr.bf16.mxu0 %v1922_v16  ;;  %1866 = vmatprep.mubr.bf16.mxu1 %v1923_v17 }
  0x32   :  { %1835 = vmatmul.mubr.bf16.gmra.mrb[8].mxu0 %v1924_v18  ;;  %1867 = vmatmul.mubr.bf16.gmra.mrb[8].mxu1 %v1925_v19 }
  0x33   :  { %1838 = vmatprep.mubr.bf16.mxu0 %v1926_v20  ;;  %1870 = vmatprep.mubr.bf16.mxu1 %v1927_v21 }
  0x3a   :  { %1839 = vmatmul.mubr.bf16.gmra.mrb[12].mxu0 %v1928_v22  ;;  %1871 = vmatmul.mubr.bf16.gmra.mrb[12].mxu1 %v1929_v23 }
  0x3b   :  { %1842 = vmatprep.mubr.bf16.mxu0 %v1930_v24  ;;  %1874 = vmatprep.mubr.bf16.mxu1 %v1931_v25 }
  0x42   :  { %1843 = vmatmul.mubr.bf16.gmra.mrb[16].mxu0 %v1932_v26  ;;  %1875 = vmatmul.mubr.bf16.gmra.mrb[16].mxu1 %v1933_v27 }
  0x43   :  { %1846 = vmatprep.mubr.bf16.mxu0 %v1934_v28  ;;  %1878 = vmatprep.mubr.bf16.mxu1 %v1935_v29 }
  0x4a   :  { %1847 = vmatmul.mubr.bf16.gmra.mrb[20].mxu0 %v1936_v30  ;;  %1879 = vmatmul.mubr.bf16.gmra.mrb[20].mxu1 %v1937_v31 }
  0x4b   :  { %1850 = vmatprep.mubr.bf16.mxu0 %v1938_v32  ;;  %1882 = vmatprep.mubr.bf16.mxu1 %v1939_v33 }
  0x52   :  { %1851 = vmatmul.mubr.bf16.gmra.mrb[24].mxu0 %v1940_v34  ;;  %1883 = vmatmul.mubr.bf16.gmra.mrb[24].mxu1 %v1941_v35 }
  0x53   :  { %1854 = vmatprep.mubr.bf16.mxu0 %v1942_v36  ;;  %1886 = vmatprep.mubr.bf16.mxu1 %v1943_v37 }
  0x5a   :  { %1855 = vmatmul.mubr.bf16.gmra.mrb[28].mxu0 %v1944_v38  ;;  %1887 = vmatmul.mubr.bf16.gmra.mrb[28].mxu1 %v1945_v39 }
  0xf5   :  { %v1828_v41 = vpop.f32.mrb[0].mxu0  ;;  %v1860_v42 = vpop.f32.mrb[0].mxu1 }
  0xf6   :  { %v960_v43 = vadd.f32 %v1828_v41, %v2089_v40  ;;  %v992_v44 = vadd.f32 %v1860_v42, %v2089_v40  ;;  %v501_v45 = vpop.f32.mrb[1].mxu0  ;;  %v629_v46 = vpop.f32.mrb[1].mxu1 }
  0xf7   :  { %v958_v47 = vadd.f32 %v2089_v40, %v501_v45  ;;  %v990_v48 = vadd.f32 %v2089_v40, %v629_v46  ;;  %v1829_v49 = vpop.f32.mrb[2].mxu0  ;;  %v1861_v50 = vpop.f32.mrb[2].mxu1 }
  0xf8   :  { %v961_v51 = vadd.f32 %v1829_v49, %v2089_v40  ;;  %v993_v52 = vadd.f32 %v1861_v50, %v2089_v40  ;;  %v504_v53 = vpop.f32.mrb[3].mxu0  ;;  %v632_v54 = vpop.f32.mrb[3].mxu1  ;;  %v1024_v57 = vmax.f32 %v960_v43, 0.0  ;;  %v1056_v58 = vmax.f32 %v992_v44, 0.0 }
  0xf9   :  { %v959_v55 = vadd.f32 %v2089_v40, %v504_v53  ;;  %v991_v56 = vadd.f32 %v2089_v40, %v632_v54  ;;  %v1022_v61 = vmax.f32 %v958_v47, 0.0  ;;  %v1054_v62 = vmax.f32 %v990_v48, 0.0 }
  0xfa   :  { %v1025_v59 = vmax.f32 %v961_v51, 0.0  ;;  %v1057_v60 = vmax.f32 %v993_v52, 0.0 }
  0xfb   :  { %v1023_v63 = vmax.f32 %v959_v55, 0.0  ;;  %v1055_v0 = vmax.f32 %v991_v56, 0.0 }
  0xfc   :  { %v1587_v1 = vpack.c.bf16 %v1025_v59, %v1024_v57  ;;  %v1667_v2 = vpack.c.bf16 %v1057_v60, %v1056_v58 }
  0xfd   :  { %v1582_v3 = vpack.c.bf16 %v1023_v63, %v1022_v61  ;;  %v1662_v4 = vpack.c.bf16 %v1055_v0, %v1054_v62  ;;  %v1832_v5 = vpop.f32.mrb[4].mxu0  ;;  %v1864_v6 = vpop.f32.mrb[4].mxu1 }
  0xfe   :  { %1739 = vst [vmem:[%s2254_s3 + $0x8] sm:$0xff] %v1587_v1   ;;  %1755 = vst [vmem:[%s2254_s3 + $0x88] sm:$0xff] %v1667_v2   ;;  %v964_v7 = vadd.f32 %v1832_v5, %v2089_v40  ;;  %v996_v8 = vadd.f32 %v1864_v6, %v2089_v40  ;;  %v517_v9 = vpop.f32.mrb[5].mxu0  ;;  %v645_v10 = vpop.f32.mrb[5].mxu1 }
  0xff   :  { %1583 = vst [vmem:[%s2254_s3] sm:$0xff] %v1582_v3   ;;  %1754 = vst [vmem:[%s2254_s3 + $0x80] sm:$0xff] %v1662_v4   ;;  %v962_v11 = vadd.f32 %v2089_v40, %v517_v9  ;;  %v994_v12 = vadd.f32 %v2089_v40, %v645_v10  ;;  %v1833_v13 = vpop.f32.mrb[6].mxu0  ;;  %v1865_v14 = vpop.f32.mrb[6].mxu1 }
 0x100   :  { %v965_v15 = vadd.f32 %v1833_v13, %v2089_v40  ;;  %v997_v16 = vadd.f32 %v1865_v14, %v2089_v40  ;;  %v520_v17 = vpop.f32.mrb[7].mxu0  ;;  %v648_v18 = vpop.f32.mrb[7].mxu1  ;;  %v1028_v21 = vmax.f32 %v964_v7, 0.0  ;;  %v1060_v22 = vmax.f32 %v996_v8, 0.0 }
 0x101   :  { %v963_v19 = vadd.f32 %v2089_v40, %v520_v17  ;;  %v995_v20 = vadd.f32 %v2089_v40, %v648_v18  ;;  %v1026_v25 = vmax.f32 %v962_v11, 0.0  ;;  %v1058_v26 = vmax.f32 %v994_v12, 0.0 }
 0x102   :  { %v1029_v23 = vmax.f32 %v965_v15, 0.0  ;;  %v1061_v24 = vmax.f32 %v997_v16, 0.0 }
 0x103   :  { %v1027_v27 = vmax.f32 %v963_v19, 0.0  ;;  %v1059_v28 = vmax.f32 %v995_v20, 0.0 }
 0x104   :  { %v1597_v29 = vpack.c.bf16 %v1029_v23, %v1028_v21  ;;  %v1677_v30 = vpack.c.bf16 %v1061_v24, %v1060_v22 }
 0x105   :  { %v1592_v31 = vpack.c.bf16 %v1027_v27, %v1026_v25  ;;  %v1672_v32 = vpack.c.bf16 %v1059_v28, %v1058_v26  ;;  %v1836_v33 = vpop.f32.mrb[8].mxu0  ;;  %v1868_v34 = vpop.f32.mrb[8].mxu1 }
 0x106   :  { %1741 = vst [vmem:[%s2254_s3 + $0x18] sm:$0xff] %v1597_v29   ;;  %1757 = vst [vmem:[%s2254_s3 + $0x98] sm:$0xff] %v1677_v30   ;;  %v968_v35 = vadd.f32 %v1836_v33, %v2089_v40  ;;  %v1000_v36 = vadd.f32 %v1868_v34, %v2089_v40  ;;  %v533_v37 = vpop.f32.mrb[9].mxu0  ;;  %v661_v38 = vpop.f32.mrb[9].mxu1 }
 0x107   :  { %1740 = vst [vmem:[%s2254_s3 + $0x10] sm:$0xff] %v1592_v31   ;;  %1756 = vst [vmem:[%s2254_s3 + $0x90] sm:$0xff] %v1672_v32   ;;  %v966_v39 = vadd.f32 %v2089_v40, %v533_v37  ;;  %v998_v41 = vadd.f32 %v2089_v40, %v661_v38  ;;  %v1837_v42 = vpop.f32.mrb[10].mxu0  ;;  %v1869_v43 = vpop.f32.mrb[10].mxu1 }
 0x108   :  { %v969_v44 = vadd.f32 %v1837_v42, %v2089_v40  ;;  %v1001_v45 = vadd.f32 %v1869_v43, %v2089_v40  ;;  %v536_v46 = vpop.f32.mrb[11].mxu0  ;;  %v664_v47 = vpop.f32.mrb[11].mxu1  ;;  %v1032_v50 = vmax.f32 %v968_v35, 0.0  ;;  %v1064_v51 = vmax.f32 %v1000_v36, 0.0 }
 0x109   :  { %v967_v48 = vadd.f32 %v2089_v40, %v536_v46  ;;  %v999_v49 = vadd.f32 %v2089_v40, %v664_v47  ;;  %v1030_v54 = vmax.f32 %v966_v39, 0.0  ;;  %v1062_v55 = vmax.f32 %v998_v41, 0.0 }
 0x10a   :  { %v1033_v52 = vmax.f32 %v969_v44, 0.0  ;;  %v1065_v53 = vmax.f32 %v1001_v45, 0.0 }
 0x10b   :  { %v1031_v56 = vmax.f32 %v967_v48, 0.0  ;;  %v1063_v57 = vmax.f32 %v999_v49, 0.0 }
 0x10c   :  { %v1607_v58 = vpack.c.bf16 %v1033_v52, %v1032_v50  ;;  %v1687_v59 = vpack.c.bf16 %v1065_v53, %v1064_v51 }
 0x10d   :  { %v1602_v60 = vpack.c.bf16 %v1031_v56, %v1030_v54  ;;  %v1682_v61 = vpack.c.bf16 %v1063_v57, %v1062_v55  ;;  %v1840_v62 = vpop.f32.mrb[12].mxu0  ;;  %v1872_v63 = vpop.f32.mrb[12].mxu1 }
 0x10e   :  { %1743 = vst [vmem:[%s2254_s3 + $0x28] sm:$0xff] %v1607_v58   ;;  %1759 = vst [vmem:[%s2254_s3 + $0xa8] sm:$0xff] %v1687_v59   ;;  %v972_v0 = vadd.f32 %v1840_v62, %v2089_v40  ;;  %v1004_v1 = vadd.f32 %v1872_v63, %v2089_v40  ;;  %v549_v2 = vpop.f32.mrb[13].mxu0  ;;  %v677_v3 = vpop.f32.mrb[13].mxu1 }
 0x10f   :  { %1742 = vst [vmem:[%s2254_s3 + $0x20] sm:$0xff] %v1602_v60   ;;  %1758 = vst [vmem:[%s2254_s3 + $0xa0] sm:$0xff] %v1682_v61   ;;  %v970_v4 = vadd.f32 %v2089_v40, %v549_v2  ;;  %v1002_v5 = vadd.f32 %v2089_v40, %v677_v3  ;;  %v1841_v6 = vpop.f32.mrb[14].mxu0  ;;  %v1873_v7 = vpop.f32.mrb[14].mxu1 }
 0x110   :  { %v973_v8 = vadd.f32 %v1841_v6, %v2089_v40  ;;  %v1005_v9 = vadd.f32 %v1873_v7, %v2089_v40  ;;  %v552_v10 = vpop.f32.mrb[15].mxu0  ;;  %v680_v11 = vpop.f32.mrb[15].mxu1  ;;  %v1036_v14 = vmax.f32 %v972_v0, 0.0  ;;  %v1068_v15 = vmax.f32 %v1004_v1, 0.0 }
 0x111   :  { %v971_v12 = vadd.f32 %v2089_v40, %v552_v10  ;;  %v1003_v13 = vadd.f32 %v2089_v40, %v680_v11  ;;  %v1034_v18 = vmax.f32 %v970_v4, 0.0  ;;  %v1066_v19 = vmax.f32 %v1002_v5, 0.0 }
 0x112   :  { %v1037_v16 = vmax.f32 %v973_v8, 0.0  ;;  %v1069_v17 = vmax.f32 %v1005_v9, 0.0 }
 0x113   :  { %v1035_v20 = vmax.f32 %v971_v12, 0.0  ;;  %v1067_v21 = vmax.f32 %v1003_v13, 0.0 }
 0x114   :  { %v1617_v22 = vpack.c.bf16 %v1037_v16, %v1036_v14  ;;  %v1697_v23 = vpack.c.bf16 %v1069_v17, %v1068_v15 }
 0x115   :  { %v1612_v24 = vpack.c.bf16 %v1035_v20, %v1034_v18  ;;  %v1692_v25 = vpack.c.bf16 %v1067_v21, %v1066_v19  ;;  %v1844_v26 = vpop.f32.mrb[16].mxu0  ;;  %v1876_v27 = vpop.f32.mrb[16].mxu1 }
 0x116   :  { %1745 = vst [vmem:[%s2254_s3 + $0x38] sm:$0xff] %v1617_v22   ;;  %1761 = vst [vmem:[%s2254_s3 + $0xb8] sm:$0xff] %v1697_v23   ;;  %v976_v28 = vadd.f32 %v1844_v26, %v2089_v40  ;;  %v1008_v29 = vadd.f32 %v1876_v27, %v2089_v40  ;;  %v565_v30 = vpop.f32.mrb[17].mxu0  ;;  %v693_v31 = vpop.f32.mrb[17].mxu1 }
 0x117   :  { %1744 = vst [vmem:[%s2254_s3 + $0x30] sm:$0xff] %v1612_v24   ;;  %1760 = vst [vmem:[%s2254_s3 + $0xb0] sm:$0xff] %v1692_v25   ;;  %v974_v32 = vadd.f32 %v2089_v40, %v565_v30  ;;  %v1006_v33 = vadd.f32 %v2089_v40, %v693_v31  ;;  %v1845_v34 = vpop.f32.mrb[18].mxu0  ;;  %v1877_v35 = vpop.f32.mrb[18].mxu1 }
 0x118   :  { %v977_v36 = vadd.f32 %v1845_v34, %v2089_v40  ;;  %v1009_v37 = vadd.f32 %v1877_v35, %v2089_v40  ;;  %v568_v38 = vpop.f32.mrb[19].mxu0  ;;  %v696_v39 = vpop.f32.mrb[19].mxu1  ;;  %v1040_v43 = vmax.f32 %v976_v28, 0.0  ;;  %v1072_v44 = vmax.f32 %v1008_v29, 0.0 }
 0x119   :  { %v975_v41 = vadd.f32 %v2089_v40, %v568_v38  ;;  %v1007_v42 = vadd.f32 %v2089_v40, %v696_v39  ;;  %v1038_v47 = vmax.f32 %v974_v32, 0.0  ;;  %v1070_v48 = vmax.f32 %v1006_v33, 0.0 }
 0x11a   :  { %v1041_v45 = vmax.f32 %v977_v36, 0.0  ;;  %v1073_v46 = vmax.f32 %v1009_v37, 0.0 }
 0x11b   :  { %v1039_v49 = vmax.f32 %v975_v41, 0.0  ;;  %v1071_v50 = vmax.f32 %v1007_v42, 0.0 }
 0x11c   :  { %v1627_v51 = vpack.c.bf16 %v1041_v45, %v1040_v43  ;;  %v1707_v52 = vpack.c.bf16 %v1073_v46, %v1072_v44 }
 0x11d   :  { %v1622_v53 = vpack.c.bf16 %v1039_v49, %v1038_v47  ;;  %v1702_v54 = vpack.c.bf16 %v1071_v50, %v1070_v48  ;;  %v1848_v55 = vpop.f32.mrb[20].mxu0  ;;  %v1880_v56 = vpop.f32.mrb[20].mxu1 }
 0x11e   :  { %1747 = vst [vmem:[%s2254_s3 + $0x48] sm:$0xff] %v1627_v51   ;;  %1763 = vst [vmem:[%s2254_s3 + $0xc8] sm:$0xff] %v1707_v52   ;;  %v980_v57 = vadd.f32 %v1848_v55, %v2089_v40  ;;  %v1012_v58 = vadd.f32 %v1880_v56, %v2089_v40  ;;  %v581_v59 = vpop.f32.mrb[21].mxu0  ;;  %v709_v60 = vpop.f32.mrb[21].mxu1 }
 0x11f   :  { %1746 = vst [vmem:[%s2254_s3 + $0x40] sm:$0xff] %v1622_v53   ;;  %1762 = vst [vmem:[%s2254_s3 + $0xc0] sm:$0xff] %v1702_v54   ;;  %v978_v61 = vadd.f32 %v2089_v40, %v581_v59  ;;  %v1010_v62 = vadd.f32 %v2089_v40, %v709_v60  ;;  %v1849_v63 = vpop.f32.mrb[22].mxu0  ;;  %v1881_v0 = vpop.f32.mrb[22].mxu1 }
 0x120   :  { %v981_v1 = vadd.f32 %v1849_v63, %v2089_v40  ;;  %v1013_v2 = vadd.f32 %v1881_v0, %v2089_v40  ;;  %v584_v3 = vpop.f32.mrb[23].mxu0  ;;  %v712_v4 = vpop.f32.mrb[23].mxu1  ;;  %v1044_v7 = vmax.f32 %v980_v57, 0.0  ;;  %v1076_v8 = vmax.f32 %v1012_v58, 0.0 }
 0x121   :  { %v979_v5 = vadd.f32 %v2089_v40, %v584_v3  ;;  %v1011_v6 = vadd.f32 %v2089_v40, %v712_v4  ;;  %v1042_v11 = vmax.f32 %v978_v61, 0.0  ;;  %v1074_v12 = vmax.f32 %v1010_v62, 0.0 }
 0x122   :  { %v1045_v9 = vmax.f32 %v981_v1, 0.0  ;;  %v1077_v10 = vmax.f32 %v1013_v2, 0.0 }
 0x123   :  { %v1043_v13 = vmax.f32 %v979_v5, 0.0  ;;  %v1075_v14 = vmax.f32 %v1011_v6, 0.0 }
 0x124   :  { %v1637_v15 = vpack.c.bf16 %v1045_v9, %v1044_v7  ;;  %v1717_v16 = vpack.c.bf16 %v1077_v10, %v1076_v8 }
 0x125   :  { %v1632_v17 = vpack.c.bf16 %v1043_v13, %v1042_v11  ;;  %v1712_v18 = vpack.c.bf16 %v1075_v14, %v1074_v12  ;;  %v1852_v19 = vpop.f32.mrb[24].mxu0  ;;  %v1884_v20 = vpop.f32.mrb[24].mxu1 }
 0x126   :  { %1749 = vst [vmem:[%s2254_s3 + $0x58] sm:$0xff] %v1637_v15   ;;  %1765 = vst [vmem:[%s2254_s3 + $0xd8] sm:$0xff] %v1717_v16   ;;  %v984_v21 = vadd.f32 %v1852_v19, %v2089_v40  ;;  %v1016_v22 = vadd.f32 %v1884_v20, %v2089_v40  ;;  %v597_v23 = vpop.f32.mrb[25].mxu0  ;;  %v725_v24 = vpop.f32.mrb[25].mxu1 }
 0x127   :  { %1748 = vst [vmem:[%s2254_s3 + $0x50] sm:$0xff] %v1632_v17   ;;  %1764 = vst [vmem:[%s2254_s3 + $0xd0] sm:$0xff] %v1712_v18   ;;  %v982_v25 = vadd.f32 %v2089_v40, %v597_v23  ;;  %v1014_v26 = vadd.f32 %v2089_v40, %v725_v24  ;;  %v1853_v27 = vpop.f32.mrb[26].mxu0  ;;  %v1885_v28 = vpop.f32.mrb[26].mxu1 }
 0x128   :  { %v985_v29 = vadd.f32 %v1853_v27, %v2089_v40  ;;  %v1017_v30 = vadd.f32 %v1885_v28, %v2089_v40  ;;  %v600_v31 = vpop.f32.mrb[27].mxu0  ;;  %v728_v32 = vpop.f32.mrb[27].mxu1  ;;  %v1048_v35 = vmax.f32 %v984_v21, 0.0  ;;  %v1080_v36 = vmax.f32 %v1016_v22, 0.0 }
 0x129   :  { %v983_v33 = vadd.f32 %v2089_v40, %v600_v31  ;;  %v1015_v34 = vadd.f32 %v2089_v40, %v728_v32  ;;  %v1046_v39 = vmax.f32 %v982_v25, 0.0  ;;  %v1078_v41 = vmax.f32 %v1014_v26, 0.0 }
 0x12a   :  { %v1049_v37 = vmax.f32 %v985_v29, 0.0  ;;  %v1081_v38 = vmax.f32 %v1017_v30, 0.0 }
 0x12b   :  { %v1047_v42 = vmax.f32 %v983_v33, 0.0  ;;  %v1079_v43 = vmax.f32 %v1015_v34, 0.0 }
 0x12c   :  { %v1647_v44 = vpack.c.bf16 %v1049_v37, %v1048_v35  ;;  %v1727_v45 = vpack.c.bf16 %v1081_v38, %v1080_v36 }
 0x12d   :  { %v1642_v46 = vpack.c.bf16 %v1047_v42, %v1046_v39  ;;  %v1722_v47 = vpack.c.bf16 %v1079_v43, %v1078_v41  ;;  %v1856_v48 = vpop.f32.mrb[28].mxu0  ;;  %v1888_v49 = vpop.f32.mrb[28].mxu1 }
 0x12e   :  { %1751 = vst [vmem:[%s2254_s3 + $0x68] sm:$0xff] %v1647_v44   ;;  %1767 = vst [vmem:[%s2254_s3 + $0xe8] sm:$0xff] %v1727_v45   ;;  %v988_v50 = vadd.f32 %v1856_v48, %v2089_v40  ;;  %v1020_v51 = vadd.f32 %v1888_v49, %v2089_v40  ;;  %v613_v52 = vpop.f32.mrb[29].mxu0  ;;  %v741_v53 = vpop.f32.mrb[29].mxu1 }
 0x12f   :  { %1750 = vst [vmem:[%s2254_s3 + $0x60] sm:$0xff] %v1642_v46   ;;  %1766 = vst [vmem:[%s2254_s3 + $0xe0] sm:$0xff] %v1722_v47   ;;  %v986_v54 = vadd.f32 %v2089_v40, %v613_v52  ;;  %v1018_v55 = vadd.f32 %v2089_v40, %v741_v53  ;;  %v1857_v56 = vpop.f32.mrb[30].mxu0  ;;  %v1889_v57 = vpop.f32.mrb[30].mxu1 }
 0x130   :  { %v989_v58 = vadd.f32 %v1857_v56, %v2089_v40  ;;  %v1021_v59 = vadd.f32 %v1889_v57, %v2089_v40  ;;  %v616_v60 = vpop.f32.mrb[31].mxu0  ;;  %v744_v61 = vpop.f32.mrb[31].mxu1  ;;  %v1052_v0 = vmax.f32 %v988_v50, 0.0  ;;  %v1084_v1 = vmax.f32 %v1020_v51, 0.0 }
 0x131   :  { %v987_v62 = vadd.f32 %v2089_v40, %v616_v60  ;;  %v1019_v63 = vadd.f32 %v2089_v40, %v744_v61  ;;  %v1050_v4 = vmax.f32 %v986_v54, 0.0  ;;  %v1082_v5 = vmax.f32 %v1018_v55, 0.0 }
 0x132   :  { %v1053_v2 = vmax.f32 %v989_v58, 0.0  ;;  %v1085_v3 = vmax.f32 %v1021_v59, 0.0 }
 0x133   :  { %v1051_v6 = vmax.f32 %v987_v62, 0.0  ;;  %v1083_v7 = vmax.f32 %v1019_v63, 0.0 }
 0x134   :  { %v1657_v8 = vpack.c.bf16 %v1053_v2, %v1052_v0  ;;  %v1737_v9 = vpack.c.bf16 %v1085_v3, %v1084_v1 }
 0x135   :  { %v1652_v10 = vpack.c.bf16 %v1051_v6, %v1050_v4  ;;  %v1732_v11 = vpack.c.bf16 %v1083_v7, %v1082_v5 }
 0x136   :  { %1753 = vst [vmem:[%s2254_s3 + $0x78] sm:$0xff] %v1657_v8   ;;  %1769 = vst [vmem:[%s2254_s3 + $0xf8] sm:$0xff] %v1737_v9  }
 0x137   :  { %1752 = vst [vmem:[%s2254_s3 + $0x70] sm:$0xff] %v1652_v10   ;;  %1768 = vst [vmem:[%s2254_s3 + $0xf0] sm:$0xff] %v1732_v11  }

// kernel: vae_forward.28
= control target key start
LH: loop header
LB: loop body
LE: loop exit
PB: predicated region body
PF: predicated region fallthrough
CT: control target
= control target key end

     0   :  { %s420_s6 = smov 0   ;;  %s422_s7 = smov 0   ;;  %s457_s0 = inlined_call_operand.vmem [shape: bf16[2,8,2,8,256], index: 0, kind: input, shape index: {}]   ;;  %s458_s1 = inlined_call_operand.vmem [shape: bf16[2,8,8,128], index: 1, kind: output, shape index: {}]  }
   0x1   :  { %s424_s8 = smov 0  }
   0x2 LB: > { %s23_s9 = sadd.s32 1, %s404_s7  ;;  %p318_p0 = scmp.ge.s32.totalorder %s408_s8, 1  ;;  %s408_s8 = sphi %s424_s8, %s11_s8   ;;  %s404_s7 = sphi %s422_s7, %s460_s7   ;;  %s400_s6 = sphi %s420_s6, %s459_s6  }
   0x3   : > { %p25_p1 = scmp.ge.s32.totalorder %s23_s9, 2  ;;  %p109_p2 = scmp.lt.s32.totalorder %s408_s8, 3 }
   0x5   : > { %s462_s9 = smov (%p25_p1, %s23_s9), 0  ;;  %p110_p3 = pnand %p318_p0, %p109_p2 }
   0x6   : > { %p139_p4 = scmp.lt.s32.totalorder (!%p110_p3), %s400_s6, 1 }
   0x7   : > { %113 = sbr.rel (%p110_p3) target bundleno = 32 (0x20), region = 24 }
   0xe   : > { %s464_s6 = smov (!%p139_p4, %s400_s6), 1 }
   0xf   : > { %s333_s10 = sshll.u32 %s464_s6, 7  ;;  %s334_s14 = sshll.u32 %s464_s6, 5 }
  0x10   : > { %s147_s13 = scalar_lea.vmem %s457_s0, %s333_s10  ;;  %s157_s17 = scalar_lea.vmem %s458_s1, %s334_s14 }
  0x11   : > { %v159_v0 = vld [vmem:[%s147_s13] sm:$0xff]  ;;  %v160_v1 = vld [vmem:[%s147_s13 + $0x10] sm:$0xff]  ;;  %v323_v2 = vld [vmem:[%s147_s13 + $0x8] sm:$0xff] }
  0x12   : > { %v324_v3 = vld [vmem:[%s147_s13 + $0x18] sm:$0xff]  ;;  %v176_v4 = vmax.bf16 %v323_v2, %v159_v0  ;;  %v161_v5 = vld [vmem:[%s147_s13 + $0x20] sm:$0xff]  ;;  %v162_v6 = vld [vmem:[%s147_s13 + $0x30] sm:$0xff] }
  0x13   : > { %v177_v7 = vmax.bf16 %v324_v3, %v160_v1  ;;  %v325_v8 = vld [vmem:[%s147_s13 + $0x28] sm:$0xff]  ;;  %v326_v9 = vld [vmem:[%s147_s13 + $0x38] sm:$0xff]  ;;  %v163_v10 = vld [vmem:[%s147_s13 + $0x40] sm:$0xff] }
  0x14   : > { %v192_v11 = vrot.slane %v176_v4, 4  ;;  %v178_v12 = vmax.bf16 %v325_v8, %v161_v5  ;;  %v179_v13 = vmax.bf16 %v326_v9, %v162_v6  ;;  %v164_v14 = vld [vmem:[%s147_s13 + $0x50] sm:$0xff]  ;;  %v327_v15 = vld [vmem:[%s147_s13 + $0x48] sm:$0xff]  ;;  %v328_v16 = vld [vmem:[%s147_s13 + $0x58] sm:$0xff] }
  0x15   : > { %v193_v17 = vrot.slane %v177_v7, 4  ;;  %v180_v18 = vmax.bf16 %v327_v15, %v163_v10  ;;  %v181_v19 = vmax.bf16 %v328_v16, %v164_v14  ;;  %v165_v20 = vld [vmem:[%s147_s13 + $0x60] sm:$0xff]  ;;  %v166_v21 = vld [vmem:[%s147_s13 + $0x70] sm:$0xff]  ;;  %v329_v22 = vld [vmem:[%s147_s13 + $0x68] sm:$0xff] }
  0x16   : > { %v208_v23 = vmax.bf16 %v192_v11, %v176_v4  ;;  %v194_v24 = vrot.slane %v178_v12, 4  ;;  %v195_v25 = vrot.slane %v179_v13, 4  ;;  %v330_v26 = vld [vmem:[%s147_s13 + $0x78] sm:$0xff]  ;;  %v182_v27 = vmax.bf16 %v329_v22, %v165_v20 }
  0x17   : > { %v209_v28 = vmax.bf16 %v193_v17, %v177_v7  ;;  %v196_v29 = vrot.slane %v180_v18, 4  ;;  %v197_v30 = vrot.slane %v181_v19, 4  ;;  %v183_v31 = vmax.bf16 %v330_v26, %v166_v21 }
  0x18   : > { %v210_v32 = vmax.bf16 %v194_v24, %v178_v12  ;;  %v211_v33 = vmax.bf16 %v195_v25, %v179_v13  ;;  %v198_v34 = vrot.slane %v182_v27, 4 }
  0x19   : > { %v355_v35 = vcombine.low %v208_v23, %v209_v28  ;;  %v212_v36 = vmax.bf16 %v196_v29, %v180_v18  ;;  %v213_v37 = vmax.bf16 %v197_v30, %v181_v19  ;;  %v199_v38 = vrot.slane %v183_v31, 4 }
  0x1a   : > { %v356_v39 = vcombine.low %v210_v32, %v211_v33  ;;  %v214_v40 = vmax.bf16 %v198_v34, %v182_v27 }
  0x1b   : > { %339 = vst [vmem:[%s157_s17] sm:$0xff] %v355_v35   ;;  %v358_v41 = vcombine.low %v212_v36, %v213_v37  ;;  %v215_v42 = vmax.bf16 %v199_v38, %v183_v31 }
  0x1c   : > { %357 = vst [vmem:[%s157_s17 + $0x8] sm:$0xff] %v356_v39  }
  0x1d   : > { %359 = vst [vmem:[%s157_s17 + $0x10] sm:$0xff] %v358_v41   ;;  %v360_v43 = vcombine.low %v214_v40, %v215_v42 }
  0x1f   : > { %361 = vst [vmem:[%s157_s17 + $0x18] sm:$0xff] %v360_v43  }
  0x20 PF: > { %s11_s8 = sadd.s32 1, %s408_s8   ;;  %s459_s6 = smov %s404_s7 }
  0x21   : > { %p8_p5 = scmp.ge.s32.totalorder %s11_s8, 4   ;;  %s460_s7 = smov %s462_s9 }
  0x23   :  { %10 = sbr.rel (!%p8_p5) target bundleno = 2 (0x2), region = 55 }

// kernel: vae_forward.29
= control target key start
LH: loop header
LB: loop body
LE: loop exit
PB: predicated region body
PF: predicated region fallthrough
CT: control target
= control target key end

     0   :  { %s1659_s12 = smov 0   ;;  %s1661_s13 = smov 0   ;;  %s1873_s0 = inlined_call_operand.vmem [shape: bf16[128,1152], index: 0, kind: input, shape index: {}]   ;;  %s1874_s1 = inlined_call_operand.vmem [shape: bf16[1152,128], index: 1, kind: input, shape index: {}]   ;;  %s1875_s2 = inlined_call_operand.vmem [shape: f32[1,128], index: 2, kind: input, shape index: {}]   ;;  %s1876_s3 = inlined_call_operand.vmem [shape: bf16[128,128], index: 3, kind: output, shape index: {}]  }
   0x1   :  { %s1663_s14 = smov 0   ;;  %s1665_s15 = smov 0  }
   0x2   :  { %s1667_s16 = smov 0  }
   0x3 LB: > { %s25_s17 = sadd.s32 1, %s1632_s15  ;;  %p48_p1 = scmp.ne.s32.totalorder %s1624_s13, %s1620_s12  ;;  %s1636_s16 = sphi %s1667_s16, %s13_s16   ;;  %s1632_s15 = sphi %s1665_s15, %s1880_s15   ;;  %s1628_s14 = sphi %s1663_s14, %s1879_s14   ;;  %s1624_s13 = sphi %s1661_s13, %s1878_s13   ;;  %s1620_s12 = sphi %s1659_s12, %s1877_s12  }
   0x4   : > { %p26_p0 = scmp.ge.s32.totalorder %s25_s17, 3  ;;  %p49_p2 = scmp.eq.s32.totalorder %s1636_s16, 0 }
   0x5   : > { %s41_s19 = sadd.s32 1, %s1624_s13  ;;  %p1216_p5 = scmp.ge.s32.totalorder %s1636_s16, 3 }
   0x6   : > { %s1882_s17 = smov (%p26_p0, %s25_s17), 0  ;;  %p50_p3 = por %p49_p2, %p48_p1 }
   0x7   : > { %s37_s18 = ssub.s32 %s1632_s15, %s1882_s17  ;;  %162 = sbr.rel (%p1216_p5) target bundleno = 37 (0x25), region = 20 }
   0x8   : > { %p39_p4 = scmp.eq.s32.totalorder %s37_s18, 0 }
   0xa   : > { %s1694_s20 = scalar_select %p39_p4, %s1624_s13, %s41_s19  }
   0xe   : > { %165 = sbr.rel (!%p50_p3) target bundleno = 37 (0x25), region = 24  ;;  %s167_s21 = sand.u32 (%p50_p3), 1, %s1624_s13  }
   0xf   : > { %s1323_s22 = smul.u32 (%p50_p3), 12, %s1632_s15 }
  0x10   : > { %s1499_s23 = smul.u32 (%p50_p3), 192, %s167_s21 }
  0x11   : > { %s1702_s26 = scalar_lea.vmem (%p50_p3), %s1873_s0, %s1323_s22 }
  0x12   : > { %v190_v0 = vld [vmem:[%s1702_s26] sm:$0xff] (%p50_p3)  ;;  %v194_v2 = vld [vmem:[%s1702_s26 + $0x48] sm:$0xff] (%p50_p3)  ;;  %s1707_s27 = scalar_lea.vmem (%p50_p3), [#allocation3], %s1499_s23  ;;  %v198_v4 = vld [vmem:[%s1702_s26 + $0x90] sm:$0xff] (%p50_p3) }
  0x13   : > { %v192_v1 = vld [vmem:[%s1702_s26 + $0x24] sm:$0xff] (%p50_p3)  ;;  %191 = vst [vmem:[%s1707_s27] sm:$0xff] (%p50_p3), %v190_v0  ;;  %195 = vst [vmem:[%s1707_s27 + $0x18] sm:$0xff] (%p50_p3), %v194_v2  ;;  %v196_v3 = vld [vmem:[%s1702_s26 + $0x6c] sm:$0xff] (%p50_p3) }
  0x14   : > { %193 = vst [vmem:[%s1707_s27 + $0xc] sm:$0xff] (%p50_p3), %v192_v1  ;;  %v200_v5 = vld [vmem:[%s1702_s26 + $0xb4] sm:$0xff] (%p50_p3)  ;;  %197 = vst [vmem:[%s1707_s27 + $0x24] sm:$0xff] (%p50_p3), %v196_v3  ;;  %v204_v7 = vld [vmem:[%s1702_s26 + $0xfc] sm:$0xff] (%p50_p3) }
  0x15   : > { %199 = vst [vmem:[%s1707_s27 + $0x30] sm:$0xff] %v198_v4  ;;  %201 = vst [vmem:[%s1707_s27 + $0x3c] sm:$0xff] %v200_v5  ;;  %v202_v6 = vld [vmem:[%s1702_s26 + $0xd8] sm:$0xff]  ;;  %v206_v8 = vld [vmem:[%s1702_s26 + $0x120] sm:$0xff] }
  0x16   : > { %203 = vst [vmem:[%s1707_s27 + $0x48] sm:$0xff] %v202_v6  ;;  %205 = vst [vmem:[%s1707_s27 + $0x54] sm:$0xff] %v204_v7  ;;  %v208_v9 = vld [vmem:[%s1702_s26 + $0x144] sm:$0xff]  ;;  %v212_v11 = vld [vmem:[%s1702_s26 + $0x18c] sm:$0xff] }
  0x17   : > { %207 = vst [vmem:[%s1707_s27 + $0x60] sm:$0xff] %v206_v8  ;;  %v210_v10 = vld [vmem:[%s1702_s26 + $0x168] sm:$0xff]  ;;  %209 = vst [vmem:[%s1707_s27 + $0x6c] sm:$0xff] %v208_v9  ;;  %v214_v12 = vld [vmem:[%s1702_s26 + $0x1b0] sm:$0xff] }
  0x18   : > { %211 = vst [vmem:[%s1707_s27 + $0x78] sm:$0xff] %v210_v10  ;;  %213 = vst [vmem:[%s1707_s27 + $0x84] sm:$0xff] %v212_v11  ;;  %v216_v13 = vld [vmem:[%s1702_s26 + $0x1d4] sm:$0xff]  ;;  %v220_v15 = vld [vmem:[%s1702_s26 + $0x21c] sm:$0xff] }
  0x19   : > { %v218_v14 = vld [vmem:[%s1702_s26 + $0x1f8] sm:$0xff]  ;;  %215 = vst [vmem:[%s1707_s27 + $0x90] sm:$0xff] %v214_v12  ;;  %217 = vst [vmem:[%s1707_s27 + $0x9c] sm:$0xff] %v216_v13  ;;  %v1218_v16 = vld [vmem:[%s1702_s26 + $0x8] sm:$0xf] }
  0x1a   : > { %219 = vst [vmem:[%s1707_s27 + $0xa8] sm:$0xff] %v218_v14  ;;  %v1220_v17 = vld [vmem:[%s1702_s26 + $0x2c] sm:$0xf]  ;;  %221 = vst [vmem:[%s1707_s27 + $0xb4] sm:$0xff] %v220_v15  ;;  %v1222_v18 = vld [vmem:[%s1702_s26 + $0x50] sm:$0xf] }
  0x1b   : > { %1219 = vst [vmem:[%s1707_s27 + $0x8] sm:$0xf] %v1218_v16  ;;  %1221 = vst [vmem:[%s1707_s27 + $0x14] sm:$0xf] %v1220_v17  ;;  %v1224_v19 = vld [vmem:[%s1702_s26 + $0x74] sm:$0xf] }
  0x1c   : > { %v1226_v20 = vld [vmem:[%s1702_s26 + $0x98] sm:$0xf]  ;;  %1223 = vst [vmem:[%s1707_s27 + $0x20] sm:$0xf] %v1222_v18  ;;  %1225 = vst [vmem:[%s1707_s27 + $0x2c] sm:$0xf] %v1224_v19 }
  0x1d   : > { %1227 = vst [vmem:[%s1707_s27 + $0x38] sm:$0xf] %v1226_v20  ;;  %v1228_v21 = vld [vmem:[%s1702_s26 + $0xbc] sm:$0xf]  ;;  %v1230_v22 = vld [vmem:[%s1702_s26 + $0xe0] sm:$0xf] }
  0x1e   : > { %v1232_v23 = vld [vmem:[%s1702_s26 + $0x104] sm:$0xf]  ;;  %1229 = vst [vmem:[%s1707_s27 + $0x44] sm:$0xf] %v1228_v21  ;;  %1231 = vst [vmem:[%s1707_s27 + $0x50] sm:$0xf] %v1230_v22 }
  0x1f   : > { %1233 = vst [vmem:[%s1707_s27 + $0x5c] sm:$0xf] %v1232_v23  ;;  %v1234_v24 = vld [vmem:[%s1702_s26 + $0x128] sm:$0xf]  ;;  %v1236_v25 = vld [vmem:[%s1702_s26 + $0x14c] sm:$0xf] }
  0x20   : > { %v1238_v26 = vld [vmem:[%s1702_s26 + $0x170] sm:$0xf]  ;;  %1235 = vst [vmem:[%s1707_s27 + $0x68] sm:$0xf] %v1234_v24  ;;  %1237 = vst [vmem:[%s1707_s27 + $0x74] sm:$0xf] %v1236_v25 }
  0x21   : > { %1239 = vst [vmem:[%s1707_s27 + $0x80] sm:$0xf] %v1238_v26  ;;  %v1240_v27 = vld [vmem:[%s1702_s26 + $0x194] sm:$0xf]  ;;  %v1242_v28 = vld [vmem:[%s1702_s26 + $0x1b8] sm:$0xf] }
  0x22   : > { %v1244_v29 = vld [vmem:[%s1702_s26 + $0x1dc] sm:$0xf]  ;;  %1241 = vst [vmem:[%s1707_s27 + $0x8c] sm:$0xf] %v1240_v27  ;;  %1243 = vst [vmem:[%s1707_s27 + $0x98] sm:$0xf] %v1242_v28 }
  0x23   : > { %1245 = vst [vmem:[%s1707_s27 + $0xa4] sm:$0xf] %v1244_v29  ;;  %v1246_v30 = vld [vmem:[%s1702_s26 + $0x200] sm:$0xf]  ;;  %v1248_v31 = vld [vmem:[%s1702_s26 + $0x224] sm:$0xf] }
  0x24   : > { %1247 = vst [vmem:[%s1707_s27 + $0xb0] sm:$0xf] %v1246_v30  ;;  %1249 = vst [vmem:[%s1707_s27 + $0xbc] sm:$0xf] %v1248_v31 }
  0x25 PF: > { %p1250_p6 = scmp.ge.s32.totalorder %s1636_s16, 1  ;;  %p277_p7 = scmp.lt.s32.totalorder %s1636_s16, 4 }
  0x27   : > { %p278_p8 = pnand %p1250_p6, %p277_p7 }
  0x28   : > { %s284_s28 = sand.u32 (!%p278_p8), 1, %s1620_s12   ;;  %s323_s29 = smul.u32 (!%p278_p8), 48, %s1628_s14 }
  0x29   : > { %281 = sbr.rel (%p278_p8) target bundleno = 383 (0x17f), region = 54  ;;  %p1252_p10 = scmp.ne.s32.totalorder (!%p278_p8), %s1628_s14, 0 }
  0x2a   : > { %s1500_s30 = smul.u32 (!%p278_p8), 192, %s284_s28  ;;  %p324_p9 = scmp.lt.s32.totalorder (!%p278_p8), %s323_s29, 143 }
  0x2c   : > { %s1779_s8 = scalar_lea.vmem (!%p278_p8), [#allocation3], %s1500_s30 }
  0x30   : > { %s1884_s29 = smov (!%p324_p9, %s323_s29), 143  ;;  %348 = sbr.rel (%p1252_p10) target bundleno = 58 (0x3a), region = 62 }
  0x31   : > { %s1251_s4 = sshll.u32 %s1884_s29, 2  ;;  %v1638_v32 = vmov (!%p1252_p10), 0.0  }
  0x32   : > { %s1777_s7 = scalar_lea.vmem %s1874_s1, %s1251_s4  ;;  %349 = vst [vmem:[#allocation2] sm:$0xff] (!%p1252_p10), %v1638_v32  ;;  %350 = vst [vmem:[#allocation2 + $0x8] sm:$0xff] (!%p1252_p10), %v1638_v32 }
  0x33   : > { %351 = vst [vmem:[#allocation2 + $0x10] sm:$0xff] (!%p1252_p10), %v1638_v32  ;;  %352 = vst [vmem:[#allocation2 + $0x18] sm:$0xff] (!%p1252_p10), %v1638_v32 }
  0x34   : > { %353 = vst [vmem:[#allocation2 + $0x20] sm:$0xff] (!%p1252_p10), %v1638_v32  ;;  %354 = vst [vmem:[#allocation2 + $0x28] sm:$0xff] (!%p1252_p10), %v1638_v32 }
  0x35   : > { %355 = vst [vmem:[#allocation2 + $0x30] sm:$0xff] (!%p1252_p10), %v1638_v32  ;;  %356 = vst [vmem:[#allocation2 + $0x38] sm:$0xff] (!%p1252_p10), %v1638_v32 }
  0x36   : > { %357 = vst [vmem:[#allocation2 + $0x40] sm:$0xff] (!%p1252_p10), %v1638_v32  ;;  %358 = vst [vmem:[#allocation2 + $0x48] sm:$0xff] (!%p1252_p10), %v1638_v32 }
  0x37   : > { %359 = vst [vmem:[#allocation2 + $0x50] sm:$0xff] %v1638_v32  ;;  %360 = vst [vmem:[#allocation2 + $0x58] sm:$0xff] %v1638_v32 }
  0x38   : > { %361 = vst [vmem:[#allocation2 + $0x60] sm:$0xff] %v1638_v32  ;;  %362 = vst [vmem:[#allocation2 + $0x68] sm:$0xff] %v1638_v32 }
  0x39   : > { %363 = vst [vmem:[#allocation2 + $0x70] sm:$0xff] %v1638_v32  ;;  %364 = vst [vmem:[#allocation2 + $0x78] sm:$0xff] %v1638_v32 }
  0x3a PF: > { %v1542_v33 = vld [vmem:[%s1777_s7 + $0x40] sm:$0xff]   ;;  %v1545_v36 = vld [vmem:[%s1777_s7 + $0x48] sm:$0xff]   ;;  %v1548_v39 = vld [vmem:[%s1777_s7 + $0x50] sm:$0xff]   ;;  %p1301_p11 = scmp.ne.s32.totalorder %s1628_s14, 2 }
  0x3b   : > { %v1543_v34 = vld [vmem:[%s1777_s7] sm:$0xff]   ;;  %1387 = vmatprep.subr.bf16.mxu0 %v1542_v33  ;;  %v1546_v37 = vld [vmem:[%s1777_s7 + $0x8] sm:$0xff]   ;;  %v1549_v40 = vld [vmem:[%s1777_s7 + $0x10] sm:$0xff]  }
  0x3c   : > { %v1544_v35 = vld [vmem:[%s1777_s7 + $0x80] sm:$0xff]   ;;  %1388 = vmatpush3.bf16.msra.mxu0 %v1543_v34  ;;  %v1547_v38 = vld [vmem:[%s1777_s7 + $0x88] sm:$0xff]   ;;  %v1550_v41 = vld [vmem:[%s1777_s7 + $0x90] sm:$0xff]  }
  0x3d   : > { %1467 = vmatprep.subr.bf16.mxu1 %v1544_v35  ;;  %1389 = vmatprep.subr.bf16.mxu0 %v1545_v36  ;;  %v1551_v42 = vld [vmem:[%s1777_s7 + $0x58] sm:$0xff]   ;;  %v1554_v45 = vld [vmem:[%s1777_s7 + $0x60] sm:$0xff]   ;;  %v1557_v48 = vld [vmem:[%s1777_s7 + $0x68] sm:$0xff]  }
  0x3e   : > { %1468 = vmatpush3.bf16.msra.mxu1 %v1544_v35  ;;  %v1552_v43 = vld [vmem:[%s1777_s7 + $0x18] sm:$0xff]   ;;  %v1556_v46 = vld [vmem:[%s1777_s7 + $0xa0] sm:$0xff]   ;;  %v1559_v49 = vld [vmem:[%s1777_s7 + $0xa8] sm:$0xff]  }
  0x3f   : > { %1469 = vmatprep.subr.bf16.mxu1 %v1547_v38  ;;  %v1553_v44 = vld [vmem:[%s1777_s7 + $0x98] sm:$0xff]   ;;  %v1555_v47 = vld [vmem:[%s1777_s7 + $0x20] sm:$0xff]   ;;  %v1558_v50 = vld [vmem:[%s1777_s7 + $0x28] sm:$0xff]  }
  0x40   : > { %1390 = vmatpush3.bf16.msra.mxu0 %v1546_v37  ;;  %v1560_v51 = vld [vmem:[%s1777_s7 + $0x70] sm:$0xff]   ;;  %v1563_v54 = vld [vmem:[%s1777_s7 + $0x78] sm:$0xff]   ;;  %v1566_v59 = vld [vmem:[%s1779_s8] ss:$12 sps:$4 sm:$0xff]  }
  0x41   : > { %1391 = vmatprep.subr.bf16.mxu0 %v1548_v39  ;;  %v1561_v52 = vld [vmem:[%s1777_s7 + $0x30] sm:$0xff]   ;;  %v1565_v55 = vld [vmem:[%s1777_s7 + $0xb8] sm:$0xff]   ;;  %v1570_v61 = vld [vmem:[%s1779_s8 + $0x20] ss:$12 sps:$4 sm:$0xff]  }
  0x42   : > { %1470 = vmatpush3.bf16.msra.mxu1 %v1547_v38  ;;  %v1562_v53 = vld [vmem:[%s1777_s7 + $0xb0] sm:$0xff]   ;;  %v1564_v58 = vld [vmem:[%s1777_s7 + $0x38] sm:$0xff]   ;;  %v1586_v5 = vld [vmem:[%s1779_s8 + $0x80] ss:$12 sps:$4 sm:$0xff]  }
  0x43   : > { %1471 = vmatprep.subr.bf16.mxu1 %v1550_v41  ;;  %v1568_v56 = vld [vmem:[%s1779_s8 + $0x4] ss:$12 sps:$4 sm:$0xff]   ;;  %v1569_v57 = vld [vmem:[%s1779_s8 + $0x8] ss:$12 sps:$4 sm:$0xff]   ;;  %v1579_v4 = vld [vmem:[%s1779_s8 + $0x4c] ss:$12 sps:$4 sm:$0xff]  }
  0x44   : > { %1392 = vmatpush3.bf16.msra.mxu0 %v1549_v40  ;;  %765 = vmatprep.mubr.bf16.mxu0 %v1568_v56  ;;  %v1571_v60 = vld [vmem:[%s1779_s8 + $0x1c] ss:$12 sps:$4 sm:$0xff]   ;;  %v1577_v62 = vld [vmem:[%s1779_s8 + $0x38] ss:$12 sps:$4 sm:$0xff]   ;;  %v1574_v0 = vld [vmem:[%s1779_s8 + $0x34] ss:$12 sps:$4 sm:$0xff]  }
  0x45   : > { %1393 = vmatprep.subr.bf16.mxu0 %v1551_v42  ;;  %1483 = vmatprep.mubr.bf16.mxu1 %v1569_v57  ;;  %v1573_v63 = vld [vmem:[%s1779_s8 + $0x18] ss:$12 sps:$4 sm:$0xff]   ;;  %v1578_v1 = vld [vmem:[%s1779_s8 + $0x50] ss:$12 sps:$4 sm:$0xff]   ;;  %v1585_v2 = vld [vmem:[%s1779_s8 + $0x68] ss:$12 sps:$4 sm:$0xff]  }
  0x46   : > { %1472 = vmatpush3.bf16.msra.mxu1 %v1550_v41  ;;  %v1576_v3 = vld [vmem:[%s1779_s8 + $0x30] ss:$12 sps:$4 sm:$0xff]   ;;  %v1593_v6 = vld [vmem:[%s1779_s8 + $0x98] ss:$12 sps:$4 sm:$0xff]   ;;  %v1581_v7 = vld [vmem:[%s1779_s8 + $0x48] ss:$12 sps:$4 sm:$0xff]  }
  0x47   : > { %1473 = vmatprep.subr.bf16.mxu1 %v1553_v44  ;;  %v1582_v8 = vld [vmem:[%s1779_s8 + $0x64] ss:$12 sps:$4 sm:$0xff]   ;;  %v1584_v10 = vld [vmem:[%s1779_s8 + $0x60] ss:$12 sps:$4 sm:$0xff]   ;;  %v1587_v11 = vld [vmem:[%s1779_s8 + $0x7c] ss:$12 sps:$4 sm:$0xff]  }
  0x48   : > { %1394 = vmatpush3.bf16.msra.mxu0 %v1552_v43  ;;  %v1594_v9 = vld [vmem:[%s1779_s8 + $0xb0] ss:$12 sps:$4 sm:$0xff]   ;;  %v1589_v12 = vld [vmem:[%s1779_s8 + $0x78] ss:$12 sps:$4 sm:$0xff]   ;;  %v1590_v13 = vld [vmem:[%s1779_s8 + $0x94] ss:$12 sps:$4 sm:$0xff]  }
  0x49   : > { %1395 = vmatprep.subr.bf16.mxu0 %v1554_v45  ;;  %v1592_v14 = vld [vmem:[%s1779_s8 + $0x90] ss:$12 sps:$4 sm:$0xff]   ;;  %v1595_v15 = vld [vmem:[%s1779_s8 + $0xac] ss:$12 sps:$4 sm:$0xff]   ;;  %v1597_v16 = vld [vmem:[%s1779_s8 + $0xa8] ss:$12 sps:$4 sm:$0xff]  }
  0x4a   : > { %1474 = vmatpush3.bf16.msra.mxu1 %v1553_v44  ;;  %v365_v23 = vld [vmem:[#allocation2] sm:$0xff]  ;;  %v366_v28 = vld [vmem:[#allocation2 + $0x8] sm:$0xff]  ;;  %v367_v38 = vld [vmem:[#allocation2 + $0x10] sm:$0xff] }
  0x4b   : > { %1475 = vmatprep.subr.bf16.mxu1 %v1556_v46  ;;  %v368_v44 = vld [vmem:[#allocation2 + $0x18] sm:$0xff] }
  0x4c   : > { %1396 = vmatpush3.bf16.msra.mxu0 %v1555_v47 }
  0x4d   : > { %1397 = vmatprep.subr.bf16.mxu0 %v1557_v48 }
  0x4e   : > { %1476 = vmatpush3.bf16.msra.mxu1 %v1556_v46 }
  0x4f   : > { %1477 = vmatprep.subr.bf16.mxu1 %v1559_v49 }
  0x50   : > { %1398 = vmatpush3.bf16.msra.mxu0 %v1558_v50 }
  0x51   : > { %1399 = vmatprep.subr.bf16.mxu0 %v1560_v51 }
  0x52   : > { %1478 = vmatpush3.bf16.msra.mxu1 %v1559_v49 }
  0x53   : > { %1479 = vmatprep.subr.bf16.mxu1 %v1562_v53 }
  0x54   : > { %1400 = vmatpush3.bf16.msra.mxu0 %v1561_v52 }
  0x55   : > { %1401 = vmatprep.subr.bf16.mxu0 %v1563_v54 }
  0x56   : > { %1480 = vmatpush3.bf16.msra.mxu1 %v1562_v53 }
  0x57   : > { %1481 = vmatprep.subr.bf16.mxu1 %v1565_v55 }
  0x58   : > { %1402 = vmatpush3.bf16.msra.mxu0 %v1564_v58 }
  0x5a   : > { %1482 = vmatpush3.bf16.msra.mxu1 %v1565_v55  ;;  %v369_v55 = vld [vmem:[#allocation2 + $0x20] sm:$0xff] }
  0x5b   : > { %766 = vmatmul.mubr.bf16.vlgmr.msra.gmra.mrb[0].mxu0 %v1566_v59 }
  0x5c   : > { %773 = vmatprep.mubr.bf16.mxu0 %v1571_v60  ;;  %v370_v60 = vld [vmem:[#allocation2 + $0x28] sm:$0xff] }
  0x5d   : > { %1484 = vmatmul.mubr.bf16.vlgmr.msra.gmra.mrb[0].mxu1 %v1570_v61 }
  0x5e   : > { %1487 = vmatprep.mubr.bf16.mxu1 %v1577_v62 }
  0x63   : > { %774 = vmatmul.mubr.bf16.gmra.mrb[4].mxu0 %v1573_v63 }
  0x64   : > { %781 = vmatprep.mubr.bf16.mxu0 %v1574_v0 }
  0x65   : > { %1488 = vmatmul.mubr.bf16.gmra.mrb[4].mxu1 %v1578_v1 }
  0x66   : > { %1491 = vmatprep.mubr.bf16.mxu1 %v1585_v2 }
  0x6b   : > { %782 = vmatmul.mubr.bf16.gmra.mrb[8].mxu0 %v1576_v3 }
  0x6c   : > { %789 = vmatprep.mubr.bf16.mxu0 %v1579_v4 }
  0x6d   : > { %1492 = vmatmul.mubr.bf16.gmra.mrb[8].mxu1 %v1586_v5 }
  0x6e   : > { %1495 = vmatprep.mubr.bf16.mxu1 %v1593_v6  ;;  %v371_v6 = vld [vmem:[#allocation2 + $0x30] sm:$0xff] }
  0x73   : > { %790 = vmatmul.mubr.bf16.gmra.mrb[12].mxu0 %v1581_v7 }
  0x74   : > { %797 = vmatprep.mubr.bf16.mxu0 %v1582_v8 }
  0x75   : > { %1496 = vmatmul.mubr.bf16.gmra.mrb[12].mxu1 %v1594_v9 }
  0x7b   : > { %798 = vmatmul.mubr.bf16.gmra.mrb[16].mxu0 %v1584_v10 }
  0x7c   : > { %805 = vmatprep.mubr.bf16.mxu0 %v1587_v11 }
  0x83   : > { %806 = vmatmul.mubr.bf16.gmra.mrb[20].mxu0 %v1589_v12  ;;  %v372_v12 = vld [vmem:[#allocation2 + $0x38] sm:$0xff] }
  0x84   : > { %813 = vmatprep.mubr.bf16.mxu0 %v1590_v13 }
  0x8b   : > { %814 = vmatmul.mubr.bf16.gmra.mrb[24].mxu0 %v1592_v14 }
  0x8c   : > { %821 = vmatprep.mubr.bf16.mxu0 %v1595_v15 }
  0x93   : > { %822 = vmatmul.mubr.bf16.gmra.mrb[28].mxu0 %v1597_v16 }
 0x12e   : > { %v1403_v17 = vpop.f32.mrb[0].mxu0 }
 0x12f   : > { %v1404_v18 = vpop.f32.mrb[1].mxu0 }
 0x130   : > { %v1405_v19 = vadd.f32 %v1404_v18, %v1403_v17  ;;  %v1406_v20 = vpop.f32.mrb[2].mxu0  ;;  %v1485_v21 = vpop.f32.mrb[0].mxu1 }
 0x131   : > { %v1407_v22 = vpop.f32.mrb[3].mxu0  ;;  %v864_v24 = vpop.f32.mrb[1].mxu1 }
 0x132   : > { %v1408_v25 = vadd.f32 %v1407_v22, %v1406_v20  ;;  %v865_v26 = vadd.f32 %v1405_v19, %v864_v24  ;;  %v1486_v27 = vpop.f32.mrb[2].mxu1  ;;  %v373_v22 = vld [vmem:[#allocation2 + $0x40] sm:$0xff] }
 0x133   : > { %v867_v29 = vpop.f32.mrb[3].mxu1 }
 0x134   : > { %v927_v30 = vadd.f32 %v865_v26, %v365_v23  ;;  %v868_v31 = vadd.f32 %v1408_v25, %v867_v29  ;;  %v374_v25 = vld [vmem:[#allocation2 + $0x48] sm:$0xff] }
 0x136   : > { %943 = vst [vmem:[#allocation2] sm:$0xff] %v927_v30  ;;  %v928_v32 = vadd.f32 %v868_v31, %v366_v28  ;;  %v1409_v33 = vpop.f32.mrb[4].mxu0 }
 0x137   : > { %v1410_v34 = vpop.f32.mrb[5].mxu0 }
 0x138   : > { %944 = vst [vmem:[#allocation2 + $0x8] sm:$0xff] %v928_v32  ;;  %v1411_v35 = vadd.f32 %v1410_v34, %v1409_v33  ;;  %v1412_v36 = vpop.f32.mrb[6].mxu0  ;;  %v1489_v37 = vpop.f32.mrb[4].mxu1  ;;  %v375_v33 = vld [vmem:[#allocation2 + $0x50] sm:$0xff] }
 0x139   : > { %v1413_v39 = vpop.f32.mrb[7].mxu0  ;;  %v880_v40 = vpop.f32.mrb[5].mxu1 }
 0x13a   : > { %v873_v41 = vadd.f32 %v1485_v21, %v1411_v35  ;;  %v1414_v42 = vadd.f32 %v1413_v39, %v1412_v36  ;;  %v1490_v43 = vpop.f32.mrb[6].mxu1 }
 0x13b   : > { %v883_v45 = vpop.f32.mrb[7].mxu1 }
 0x13c   : > { %v929_v46 = vadd.f32 %v873_v41, %v367_v38  ;;  %v876_v47 = vadd.f32 %v1486_v27, %v1414_v42 }
 0x13e   : > { %945 = vst [vmem:[#allocation2 + $0x10] sm:$0xff] %v929_v46  ;;  %v930_v48 = vadd.f32 %v876_v47, %v368_v44  ;;  %v1415_v49 = vpop.f32.mrb[8].mxu0  ;;  %v377_v46 = vld [vmem:[#allocation2 + $0x60] sm:$0xff] }
 0x13f   : > { %v1416_v50 = vpop.f32.mrb[9].mxu0 }
 0x140   : > { %946 = vst [vmem:[#allocation2 + $0x18] sm:$0xff] %v930_v48  ;;  %v1417_v51 = vadd.f32 %v1416_v50, %v1415_v49  ;;  %v1418_v52 = vpop.f32.mrb[10].mxu0  ;;  %v1493_v53 = vpop.f32.mrb[8].mxu1  ;;  %v378_v49 = vld [vmem:[#allocation2 + $0x68] sm:$0xff] }
 0x141   : > { %v1419_v54 = vpop.f32.mrb[11].mxu0  ;;  %v896_v56 = vpop.f32.mrb[9].mxu1 }
 0x142   : > { %v1420_v57 = vadd.f32 %v1419_v54, %v1418_v52  ;;  %v881_v58 = vadd.f32 %v1417_v51, %v880_v40  ;;  %v1494_v59 = vpop.f32.mrb[10].mxu1 }
 0x143   : > { %v899_v61 = vpop.f32.mrb[11].mxu1 }
 0x144   : > { %v931_v62 = vadd.f32 %v881_v58, %v369_v55  ;;  %v884_v63 = vadd.f32 %v1420_v57, %v883_v45  ;;  %v379_v57 = vld [vmem:[#allocation2 + $0x70] sm:$0xff] }
 0x146   : > { %947 = vst [vmem:[#allocation2 + $0x20] sm:$0xff] %v931_v62  ;;  %v932_v0 = vadd.f32 %v884_v63, %v370_v60  ;;  %v1421_v1 = vpop.f32.mrb[12].mxu0 }
 0x147   : > { %v1422_v2 = vpop.f32.mrb[13].mxu0 }
 0x148   : > { %948 = vst [vmem:[#allocation2 + $0x28] sm:$0xff] %v932_v0  ;;  %v1423_v3 = vadd.f32 %v1422_v2, %v1421_v1  ;;  %v1424_v4 = vpop.f32.mrb[14].mxu0  ;;  %v1497_v5 = vpop.f32.mrb[12].mxu1  ;;  %v963_v1 = vld [vmem:[#allocation2] sm:$0xff] (!%p1301_p11)  ;;  %v964_v2 = vld [vmem:[#allocation2 + $0x8] sm:$0xff] (!%p1301_p11) }
 0x149   : > { %v1425_v7 = vpop.f32.mrb[15].mxu0  ;;  %v912_v8 = vpop.f32.mrb[13].mxu1 }
 0x14a   : > { %v889_v9 = vadd.f32 %v1489_v37, %v1423_v3  ;;  %v1426_v10 = vadd.f32 %v1425_v7, %v1424_v4  ;;  %v1498_v11 = vpop.f32.mrb[14].mxu1  ;;  %v376_v37 = vld [vmem:[#allocation2 + $0x58] sm:$0xff]  ;;  %v1302_v3 = vld [vmem:[%s1875_s2] ss:$0 sm:$0xff] (!%p1301_p11)  ;;  %v965_v7 = vld [vmem:[#allocation2 + $0x10] sm:$0xff] (!%p1301_p11) }
 0x14b   : > { %v915_v13 = vpop.f32.mrb[15].mxu1  ;;  %v986_v4 = vadd.f32 (!%p1301_p11), %v1302_v3, %v963_v1 }
 0x14c   : > { %v933_v14 = vadd.f32 %v889_v9, %v371_v6  ;;  %v892_v15 = vadd.f32 %v1490_v43, %v1426_v10  ;;  %v987_v6 = vadd.f32 (!%p1301_p11), %v1302_v3, %v964_v2  ;;  %v988_v9 = vadd.f32 (!%p1301_p11), %v1302_v3, %v965_v7 }
 0x14e   : > { %949 = vst [vmem:[#allocation2 + $0x30] sm:$0xff] %v933_v14  ;;  %v934_v16 = vadd.f32 %v892_v15, %v372_v12  ;;  %v1427_v17 = vpop.f32.mrb[16].mxu0  ;;  %v1002_v15 = vmax.f32 (!%p1301_p11), %v986_v4, 0.0 }
 0x14f   : > { %v1428_v18 = vpop.f32.mrb[17].mxu0 }
 0x150   : > { %950 = vst [vmem:[#allocation2 + $0x38] sm:$0xff] %v934_v16  ;;  %v1429_v19 = vadd.f32 %v1428_v18, %v1427_v17  ;;  %v1430_v20 = vpop.f32.mrb[18].mxu0  ;;  %v1003_v16 = vmax.f32 (!%p1301_p11), %v987_v6, 0.0 }
 0x151   : > { %v1431_v21 = vpop.f32.mrb[19].mxu0 }
 0x152   : > { %v1432_v23 = vadd.f32 %v1431_v21, %v1430_v20  ;;  %v897_v24 = vadd.f32 %v1429_v19, %v896_v56 }
 0x154   : > { %v935_v26 = vadd.f32 %v897_v24, %v373_v22  ;;  %v900_v27 = vadd.f32 %v1432_v23, %v899_v61  ;;  %v380_v61 = vld [vmem:[#allocation2 + $0x78] sm:$0xff]  ;;  %v1004_v22 = vmax.f32 (!%p1301_p11), %v988_v9, 0.0 }
 0x156   : > { %951 = vst [vmem:[#allocation2 + $0x40] sm:$0xff] %v935_v26  ;;  %v936_v28 = vadd.f32 %v900_v27, %v374_v25  ;;  %v1433_v29 = vpop.f32.mrb[20].mxu0 }
 0x157   : > { %v1434_v30 = vpop.f32.mrb[21].mxu0  ;;  %v970_v14 = vld [vmem:[#allocation2 + $0x38] sm:$0xff] (!%p1301_p11) }
 0x158   : > { %952 = vst [vmem:[#allocation2 + $0x48] sm:$0xff] %v936_v28  ;;  %v1435_v31 = vadd.f32 %v1434_v30, %v1433_v29  ;;  %v1436_v32 = vpop.f32.mrb[22].mxu0  ;;  %v993_v25 = vadd.f32 (!%p1301_p11), %v1302_v3, %v970_v14  ;;  %v1343_v28 = vpack.c.bf16 (!%p1301_p11), %v1003_v16, %v1002_v15 }
 0x159   : > { %v1437_v34 = vpop.f32.mrb[23].mxu0 }
 0x15a   : > { %v905_v35 = vadd.f32 %v1493_v53, %v1435_v31  ;;  %v1438_v36 = vadd.f32 %v1437_v34, %v1436_v32  ;;  %v1009_v34 = vmax.f32 (!%p1301_p11), %v993_v25, 0.0  ;;  %1344 = vst [vmem:[%s1876_s3] sm:$0xff] (!%p1301_p11), %v1343_v28  }
 0x15c   : > { %v937_v38 = vadd.f32 %v905_v35, %v375_v33  ;;  %v908_v39 = vadd.f32 %v1494_v59, %v1438_v36 }
 0x15d   : > { %v971_v19 = vld [vmem:[#allocation2 + $0x40] sm:$0xff] (!%p1301_p11) }
 0x15e   : > { %953 = vst [vmem:[#allocation2 + $0x50] sm:$0xff] %v937_v38  ;;  %v938_v40 = vadd.f32 %v908_v39, %v376_v37  ;;  %v1439_v41 = vpop.f32.mrb[24].mxu0  ;;  %v994_v31 = vadd.f32 (!%p1301_p11), %v1302_v3, %v971_v19 }
 0x15f   : > { %v1440_v42 = vpop.f32.mrb[25].mxu0  ;;  %v972_v20 = vld [vmem:[#allocation2 + $0x48] sm:$0xff] (!%p1301_p11) }
 0x160   : > { %954 = vst [vmem:[#allocation2 + $0x58] sm:$0xff] %v938_v40  ;;  %v1441_v43 = vadd.f32 %v1440_v42, %v1439_v41  ;;  %v1442_v44 = vpop.f32.mrb[26].mxu0  ;;  %v995_v35 = vadd.f32 (!%p1301_p11), %v1302_v3, %v972_v20  ;;  %v1010_v40 = vmax.f32 (!%p1301_p11), %v994_v31, 0.0 }
 0x161   : > { %v1443_v45 = vpop.f32.mrb[27].mxu0 }
 0x162   : > { %v1444_v47 = vadd.f32 %v1443_v45, %v1442_v44  ;;  %v913_v48 = vadd.f32 %v1441_v43, %v912_v8  ;;  %v967_v8 = vld [vmem:[#allocation2 + $0x20] sm:$0xff] (!%p1301_p11)  ;;  %v1011_v44 = vmax.f32 (!%p1301_p11), %v995_v35, 0.0 }
 0x163   : > { %v990_v12 = vadd.f32 (!%p1301_p11), %v1302_v3, %v967_v8 }
 0x164   : > { %v939_v50 = vadd.f32 %v913_v48, %v377_v46  ;;  %v916_v51 = vadd.f32 %v1444_v47, %v915_v13  ;;  %v969_v13 = vld [vmem:[#allocation2 + $0x30] sm:$0xff] (!%p1301_p11) }
 0x165   : > { %v992_v18 = vadd.f32 (!%p1301_p11), %v1302_v3, %v969_v13  ;;  %v973_v21 = vld [vmem:[#allocation2 + $0x50] sm:$0xff] (!%p1301_p11)  ;;  %v1006_v24 = vmax.f32 (!%p1301_p11), %v990_v12, 0.0 }
 0x166   : > { %955 = vst [vmem:[#allocation2 + $0x60] sm:$0xff] %v939_v50  ;;  %v940_v52 = vadd.f32 %v916_v51, %v378_v49  ;;  %v1445_v53 = vpop.f32.mrb[28].mxu0  ;;  %v996_v36 = vadd.f32 (!%p1301_p11), %v1302_v3, %v973_v21  ;;  %v1363_v51 = vpack.c.bf16 (!%p1301_p11), %v1011_v44, %v1010_v40 }
 0x167   : > { %v1446_v54 = vpop.f32.mrb[29].mxu0  ;;  %v974_v26 = vld [vmem:[#allocation2 + $0x58] sm:$0xff] (!%p1301_p11)  ;;  %v1008_v30 = vmax.f32 (!%p1301_p11), %v992_v18, 0.0 }
 0x168   : > { %956 = vst [vmem:[#allocation2 + $0x68] sm:$0xff] %v940_v52  ;;  %v1447_v55 = vadd.f32 %v1446_v54, %v1445_v53  ;;  %v1448_v56 = vpop.f32.mrb[30].mxu0  ;;  %v997_v41 = vadd.f32 (!%p1301_p11), %v1302_v3, %v974_v26  ;;  %v1012_v45 = vmax.f32 (!%p1301_p11), %v996_v36, 0.0  ;;  %1383 = vst [vmem:[%s1876_s3 + $0x20] sm:$0xff] (!%p1301_p11), %v1363_v51  }
 0x169   : > { %v1449_v58 = vpop.f32.mrb[31].mxu0  ;;  %v1358_v43 = vpack.c.bf16 (!%p1301_p11), %v1009_v34, %v1008_v30 }
 0x16a   : > { %v921_v59 = vadd.f32 %v1497_v5, %v1447_v55  ;;  %v1450_v60 = vadd.f32 %v1449_v58, %v1448_v56  ;;  %962 = sbr.rel (%p1301_p11) target bundleno = 383 (0x17f), region = 66  ;;  %v966_v5 = vld [vmem:[#allocation2 + $0x18] sm:$0xff] (!%p1301_p11)  ;;  %v1013_v47 = vmax.f32 (!%p1301_p11), %v997_v41, 0.0 }
 0x16b   : > { %v989_v10 = vadd.f32 (!%p1301_p11), %v1302_v3, %v966_v5  ;;  %1382 = vst [vmem:[%s1876_s3 + $0x18] sm:$0xff] (!%p1301_p11), %v1358_v43  }
 0x16c   : > { %v941_v62 = vadd.f32 %v921_v59, %v379_v57  ;;  %v924_v63 = vadd.f32 %v1498_v11, %v1450_v60  ;;  %v968_v11 = vld [vmem:[#allocation2 + $0x28] sm:$0xff] (!%p1301_p11)  ;;  %v1368_v53 = vpack.c.bf16 (!%p1301_p11), %v1013_v47, %v1012_v45 }
 0x16d   : > { %v991_v17 = vadd.f32 (!%p1301_p11), %v1302_v3, %v968_v11  ;;  %v1005_v23 = vmax.f32 (!%p1301_p11), %v989_v10, 0.0  ;;  %v975_v27 = vld [vmem:[#allocation2 + $0x60] sm:$0xff] (!%p1301_p11) }
 0x16e   : > { %957 = vst [vmem:[#allocation2 + $0x70] sm:$0xff] %v941_v62  ;;  %v942_v0 = vadd.f32 %v924_v63, %v380_v61  ;;  %v998_v42 = vadd.f32 (!%p1301_p11), %v1302_v3, %v975_v27  ;;  %1384 = vst [vmem:[%s1876_s3 + $0x28] sm:$0xff] (!%p1301_p11), %v1368_v53  }
 0x16f   : > { %v1007_v29 = vmax.f32 (!%p1301_p11), %v991_v17, 0.0  ;;  %v976_v32 = vld [vmem:[#allocation2 + $0x68] sm:$0xff] (!%p1301_p11)  ;;  %v1348_v33 = vpack.c.bf16 (!%p1301_p11), %v1005_v23, %v1004_v22 }
 0x170   : > { %958 = vst [vmem:[#allocation2 + $0x78] sm:$0xff] %v942_v0  ;;  %v999_v46 = vadd.f32 (!%p1301_p11), %v1302_v3, %v976_v32  ;;  %v1014_v48 = vmax.f32 (!%p1301_p11), %v998_v42, 0.0 }
 0x171   : > { %v1353_v39 = vpack.c.bf16 %v1007_v29, %v1006_v24  ;;  %1380 = vst [vmem:[%s1876_s3 + $0x8] sm:$0xff] %v1348_v33  }
 0x172   : > { %v1015_v52 = vmax.f32 %v999_v46, 0.0 }
 0x173   : > { %1381 = vst [vmem:[%s1876_s3 + $0x10] sm:$0xff] %v1353_v39  }
 0x174   : > { %v1373_v56 = vpack.c.bf16 %v1015_v52, %v1014_v48 }
 0x175   : > { %v977_v37 = vld [vmem:[#allocation2 + $0x70] sm:$0xff] }
 0x176   : > { %v1000_v49 = vadd.f32 %v1302_v3, %v977_v37  ;;  %1385 = vst [vmem:[%s1876_s3 + $0x30] sm:$0xff] %v1373_v56  }
 0x177   : > { %v978_v38 = vld [vmem:[#allocation2 + $0x78] sm:$0xff] }
 0x178   : > { %v1001_v50 = vadd.f32 %v1302_v3, %v978_v38  ;;  %v1016_v54 = vmax.f32 %v1000_v49, 0.0 }
 0x17a   : > { %v1017_v55 = vmax.f32 %v1001_v50, 0.0 }
 0x17c   : > { %v1378_v57 = vpack.c.bf16 %v1017_v55, %v1016_v54 }
 0x17e   : > { %1386 = vst [vmem:[%s1876_s3 + $0x38] sm:$0xff] %v1378_v57  }
 0x17f PF: > { %s13_s16 = sadd.s32 1, %s1636_s16   ;;  %s1877_s12 = smov %s1624_s13 }
 0x180   : > { %p10_p12 = scmp.ge.s32.totalorder %s13_s16, 5   ;;  %s1878_s13 = smov %s1694_s20 }
 0x181   : > { %s1879_s14 = smov %s1632_s15  ;;  %s1880_s15 = smov %s1882_s17 }
 0x182   :  { %12 = sbr.rel (!%p10_p12) target bundleno = 3 (0x3), region = 113 }

// kernel: vae_forward.27
= control target key start
LH: loop header
LB: loop body
LE: loop exit
PB: predicated region body
PF: predicated region fallthrough
CT: control target
= control target key end

     0   :  { %s7136_s12 = smov 0   ;;  %s7138_s13 = smov 0   ;;  %s9191_s0 = inlined_call_operand.vmem [shape: bf16[2,18,18,128], index: 0, kind: input, shape index: {}]   ;;  %s9192_s1 = inlined_call_operand.vmem [shape: bf16[9,128,128], index: 1, kind: input, shape index: {}]   ;;  %s9193_s2 = inlined_call_operand.vmem [shape: f32[1,128], index: 2, kind: input, shape index: {}]   ;;  %s9194_s3 = inlined_call_operand.vmem [shape: bf16[2,16,16,128], index: 3, kind: output, shape index: {}]  }
   0x1   :  { %s7140_s14 = smov 0  }
   0x2 LB: > { %s32_s15 = sadd.s32 1, %s7110_s13  ;;  %p5244_p0 = scmp.ge.s32.totalorder %s7114_s14, 1  ;;  %s7114_s14 = sphi %s7140_s14, %s13_s14   ;;  %s7110_s13 = sphi %s7138_s13, %s9280_s13   ;;  %s7106_s12 = sphi %s7136_s12, %s9279_s12  }
   0x3   : > { %p34_p1 = scmp.ge.s32.totalorder %s32_s15, 2  ;;  %p177_p2 = scmp.lt.s32.totalorder %s7114_s14, 3 }
   0x5   : > { %s9282_s15 = smov (%p34_p1, %s32_s15), 0  ;;  %p178_p3 = pnand %p5244_p0, %p177_p2 }
   0x7   : > { %181 = sbr.rel (%p178_p3) target bundleno = 593 (0x251), region = 32 }
   0xe   : > { %v6844_v0 = vld [vmem:[%s9192_s1 + $0x40] sm:$0xff]   ;;  %p216_p4 = scmp.lt.s32.totalorder %s7106_s12, 1  ;;  %v6846_v2 = vld [vmem:[%s9192_s1 + $0x48] sm:$0xff]   ;;  %v6848_v4 = vld [vmem:[%s9192_s1 + $0x50] sm:$0xff]   ;;  %vm311_vm0 = vsmask.f32 3328 }
   0xf   : > { %v6845_v1 = vld [vmem:[%s9192_s1 + $0x100] sm:$0xff]   ;;  %6115 = vmatprep.subr.bf16.mxu1 %v6844_v0  ;;  %v6847_v3 = vld [vmem:[%s9192_s1 + $0x108] sm:$0xff]   ;;  %v6849_v5 = vld [vmem:[%s9192_s1 + $0x110] sm:$0xff]   ;;  %vm312_vm1 = vsmask.f32 7440  ;;  %vm1309_vm3 = vcmask 1042432  }
  0x10   : > { %6307 = vmatprep.subr.bf16.mxu0 %v6845_v1  ;;  %6116 = vmatpush3.bf16.msra.mxu1 %v6844_v0  ;;  %s9284_s12 = smov (!%p216_p4, %s7106_s12), 1  ;;  %v6850_v6 = vld [vmem:[%s9192_s1 + $0x58] sm:$0xff]   ;;  %v6852_v8 = vld [vmem:[%s9192_s1 + $0x60] sm:$0xff]   ;;  %v6854_v10 = vld [vmem:[%s9192_s1 + $0x68] sm:$0xff]   ;;  %vm1310_vm4 = vcmask 1046532  }
  0x11   : > { %6308 = vmatpush3.bf16.msra.mxu0 %v6845_v1  ;;  %6117 = vmatprep.subr.bf16.mxu1 %v6846_v2  ;;  %v6851_v7 = vld [vmem:[%s9192_s1 + $0x118] sm:$0xff]   ;;  %s6819_s5 = smul.u32 216, %s9284_s12  ;;  %v6853_v9 = vld [vmem:[%s9192_s1 + $0x120] sm:$0xff]   ;;  %v6855_v11 = vld [vmem:[%s9192_s1 + $0x128] sm:$0xff]   ;;  %s5771_s26 = sshll.u32 %s9284_s12, 7 }
  0x12   : > { %6309 = vmatprep.subr.bf16.mxu0 %v6847_v3  ;;  %v6856_v25 = vld [vmem:[%s9192_s1 + $0x70] sm:$0xff]   ;;  %v6858_v36 = vld [vmem:[%s9192_s1 + $0x78] sm:$0xff]   ;;  %vm7226_vm2 = vmor %vm311_vm0, %vm312_vm1  ;;  %s9132_s29 = scalar_lea.vmem %s9194_s3, %s5771_s26 }
  0x13   : > { %s7190_s16 = scalar_lea.vmem %s9191_s0, %s6819_s5  ;;  %v6857_v30 = vld [vmem:[%s9192_s1 + $0x130] sm:$0xff]   ;;  %v6859_v51 = vld [vmem:[%s9192_s1 + $0x138] sm:$0xff]   ;;  %vm7502_vm5 = vmor %vm1309_vm3, %vm1310_vm4 }
  0x14   : > { %6118 = vmatpush3.bf16.msra.mxu1 %v6846_v2  ;;  %v247_v12 = vld [vmem:[%s7190_s16] sm:$0xf]  ;;  %v248_v13 = vld [vmem:[%s7190_s16 + $0x4] sm:$0xf]  ;;  %v249_v14 = vld [vmem:[%s7190_s16 + $0x8] sm:$0x1] }
  0x15   : > { %6310 = vmatpush3.bf16.msra.mxu0 %v6847_v3  ;;  %6119 = vmatprep.subr.bf16.mxu1 %v6848_v4  ;;  %v315_v15 = vshrl.u32 %v247_v12, 16  ;;  %v318_v16 = vshll.u32 %v247_v12, 16  ;;  %v324_v17 = vshll.u32 %v248_v13, 16  ;;  %v328_v18 = vshrl.u32 %v248_v13, 16  ;;  %v7202_v20 = vld [vmem:[%s7190_s16 + $0xc] sm:$0xf] }
  0x16   : > { %6311 = vmatprep.subr.bf16.mxu0 %v6849_v5  ;;  %v334_v19 = vshll.u32 %v249_v14, 16  ;;  %v7205_v23 = vld [vmem:[%s7190_s16 + $0x10] sm:$0xf]  ;;  %v7208_v24 = vld [vmem:[%s7190_s16 + $0x14] sm:$0x1]  ;;  %v2153_v29 = vshrl.u32 %v7202_v20, 16 }
  0x17   : > { %v317_v21 = vrot.slane %v315_v15, 4  ;;  %v320_v22 = vrot.slane %v318_v16, 5  ;;  %v326_v26 = vrot.slane %v324_v17, 5  ;;  %v330_v27 = vrot.slane %v328_v18, 4  ;;  %v250_v35 = vld [vmem:[%s7190_s16 + $0xc] sm:$0xf] }
  0x18   : > { %6120 = vmatpush3.bf16.msra.mxu1 %v6848_v4  ;;  %v336_v28 = vrot.slane %v334_v19, 5  ;;  %v2156_v32 = vshll.u32 %v7202_v20, 16  ;;  %v2162_v33 = vshll.u32 %v7205_v23, 16  ;;  %v2166_v34 = vshrl.u32 %v7205_v23, 16  ;;  %v251_v42 = vld [vmem:[%s7190_s16 + $0x10] sm:$0xf] }
  0x19   : > { %6312 = vmatpush3.bf16.msra.mxu0 %v6849_v5  ;;  %6121 = vmatprep.subr.bf16.mxu1 %v6850_v6  ;;  %v321_v31 = vor.u32 %v320_v22, %v317_v21  ;;  %v331_v38 = vor.u32 %v330_v27, %v326_v26  ;;  %v2155_v39 = vrot.slane %v2153_v29, 4  ;;  %v2172_v40 = vshll.u32 %v7208_v24, 16  ;;  %v252_v55 = vld [vmem:[%s7190_s16 + $0x14] sm:$0x1]  ;;  %v7240_v57 = vld [vmem:[%s7190_s16 + $0x18] sm:$0xf] }
  0x1a   : > { %6313 = vmatprep.subr.bf16.mxu0 %v6851_v7  ;;  %v2879_v41 = vrot.slane %v7208_v24, 5  ;;  %v2158_v44 = vrot.slane %v2156_v32, 5  ;;  %v2164_v45 = vrot.slane %v2162_v33, 5  ;;  %v2168_v46 = vrot.slane %v2166_v34, 4  ;;  %v7245_v62 = vld [vmem:[%s7190_s16 + $0x1c] sm:$0xf] }
  0x1b   : > { %v322_v43 = vrot.slane %v321_v31, 4  ;;  %v332_v47 = vrot.slane %v331_v38, 4  ;;  %v2174_v48 = vrot.slane %v2172_v40, 5  ;;  %v339_v49 = vshrl.u32 %v250_v35, 16  ;;  %v6860_v3 = vld [vmem:[%s9192_s1] sm:$0xff]  }
  0x1c   : > { %6122 = vmatpush3.bf16.msra.mxu1 %v6850_v6  ;;  %v342_v50 = vshll.u32 %v250_v35, 16  ;;  %v2159_v53 = vor.u32 %v2158_v44, %v2155_v39  ;;  %v2169_v54 = vor.u32 %v2168_v46, %v2164_v45  ;;  %v348_v56 = vshll.u32 %v251_v42, 16  ;;  %v7253_v4 = vld [vmem:[%s9192_s1 + $0x140] sm:$0xff]   ;;  %v253_v17 = vld [vmem:[%s7190_s16 + $0x18] sm:$0xf] }
  0x1d   : > { %6314 = vmatpush3.bf16.msra.mxu0 %v6851_v7  ;;  %6123 = vmatprep.subr.bf16.mxu1 %v6852_v8  ;;  %v327_v52 = vsel %vm7226_vm2, %v322_v43, %v326_v26  ;;  %v337_v58 = vsel %vm7226_vm2, %v332_v47, %v336_v28  ;;  %v341_v59 = vrot.slane %v339_v49, 4  ;;  %v352_v61 = vshrl.u32 %v251_v42, 16  ;;  %v255_v33 = vld [vmem:[%s7190_s16 + $0x20] sm:$0x1]  ;;  %v7277_v40 = vld [vmem:[%s7190_s16 + $0x24] sm:$0xf] }
  0x1e   : > { %6315 = vmatprep.subr.bf16.mxu0 %v6853_v9  ;;  %v344_v60 = vrot.slane %v342_v50, 5  ;;  %v5264_v63 = vcombine.low %v327_v52, %v337_v58  ;;  %v2160_v0 = vrot.slane %v2159_v53, 4  ;;  %v2170_v1 = vrot.slane %v2169_v54, 4  ;;  %v7280_v46 = vld [vmem:[%s7190_s16 + $0x28] sm:$0xf] }
  0x1f   : > { %v350_v2 = vrot.slane %v348_v56, 5  ;;  %v354_v6 = vrot.slane %v352_v61, 4  ;;  %v358_v7 = vshll.u32 %v252_v55, 16  ;;  %v2180_v12 = vshll.u32 %v7240_v57, 16  ;;  %v6863_v47 = vld [vmem:[%s9192_s1 + $0x8] sm:$0xff]  }
  0x20   : > { %6124 = vmatpush3.bf16.msra.mxu1 %v6852_v8  ;;  %v345_v5 = vor.u32 %v344_v60, %v341_v59  ;;  %v7256_v8 = vld [vmem:[%s7190_s16 + $0x20] sm:$0x1]  ;;  %6131 = vmatprep.mubr.bf16.mxu1 %v5264_v63  ;;  %v2186_v21 = vshll.u32 %v7245_v62, 16  ;;  %v2190_v22 = vshrl.u32 %v7245_v62, 16  ;;  %v363_v34 = vshrl.u32 %v253_v17, 16 }
  0x21   : > { %6316 = vmatpush3.bf16.msra.mxu0 %v6853_v9  ;;  %6125 = vmatprep.subr.bf16.mxu1 %v6854_v10  ;;  %v2165_v9 = vsel %vm7226_vm2, %v2160_v0, %v2164_v45  ;;  %v355_v15 = vor.u32 %v354_v6, %v350_v2  ;;  %v360_v16 = vrot.slane %v358_v7, 5  ;;  %v2182_v19 = vrot.slane %v2180_v12, 5  ;;  %v7286_v52 = vld [vmem:[%s7190_s16 + $0x2c] sm:$0x1]  ;;  %v256_v53 = vld [vmem:[%s7190_s16 + $0x24] sm:$0xf] }
  0x22   : > { %6317 = vmatprep.subr.bf16.mxu0 %v6855_v11  ;;  %v346_v14 = vrot.slane %v345_v5, 4  ;;  %v2196_v28 = vshll.u32 %v7256_v8, 16  ;;  %v2886_v29 = vrot.slane %v7256_v8, 5  ;;  %v2188_v31 = vrot.slane %v2186_v21, 5  ;;  %v257_v6 = vld [vmem:[%s7190_s16 + $0x28] sm:$0xf] }
  0x23   : > { %v356_v27 = vrot.slane %v355_v15, 4  ;;  %v2192_v32 = vrot.slane %v2190_v22, 4  ;;  %v366_v38 = vshll.u32 %v253_v17, 16  ;;  %v365_v45 = vrot.slane %v363_v34, 4 }
  0x24   : > { %6126 = vmatpush3.bf16.msra.mxu1 %v6854_v10  ;;  %v2175_v10 = vsel %vm7226_vm2, %v2170_v1, %v2174_v48  ;;  %v351_v26 = vsel %vm7226_vm2, %v346_v14, %v350_v2  ;;  %v2201_v56 = vshrl.u32 %v7277_v40, 16  ;;  %v2204_v58 = vshll.u32 %v7277_v40, 16 }
  0x25   : > { %6318 = vmatpush3.bf16.msra.mxu0 %v6855_v11  ;;  %6127 = vmatprep.subr.bf16.mxu1 %v6856_v25  ;;  %v2177_v11 = vshrl.u32 %v7240_v57, 16  ;;  %v5472_v13 = vcombine.low %v2165_v9, %v2175_v10  ;;  %v361_v35 = vsel %vm7226_vm2, %v356_v27, %v360_v16  ;;  %v2193_v44 = vor.u32 %v2192_v32, %v2188_v31  ;;  %v6862_v9 = vld [vmem:[%s9192_s1 + $0x148] sm:$0xff]   ;;  %v6864_v32 = vld [vmem:[%s9192_s1 + $0x150] sm:$0xff]  }
  0x26   : > { %6319 = vmatprep.subr.bf16.mxu0 %v6857_v30  ;;  %v5265_v42 = vcombine.low %v351_v26, %v361_v35  ;;  %v368_v48 = vrot.slane %v366_v38, 5  ;;  %v2210_v63 = vshll.u32 %v7280_v46, 16  ;;  %v2203_v1 = vrot.slane %v2201_v56, 4  ;;  %v7312_v26 = vld [vmem:[%s7190_s16 + $0x34] sm:$0xf]  ;;  %v6872_v56 = vld [vmem:[%s9192_s1 + $0x20] sm:$0xff]  }
  0x27   : > { %v2179_v18 = vrot.slane %v2177_v11, 4  ;;  %6323 = vmatprep.mubr.bf16.mxu0 %v5472_v13  ;;  %v2194_v55 = vrot.slane %v2193_v44, 4  ;;  %v2206_v2 = vrot.slane %v2204_v58, 5  ;;  %v2214_v5 = vshrl.u32 %v7280_v46, 16  ;;  %v258_v13 = vld [vmem:[%s7190_s16 + $0x2c] sm:$0x1] }
  0x28   : > { %6128 = vmatpush3.bf16.msra.mxu1 %v6856_v25  ;;  %v254_v25 = vld [vmem:[%s7190_s16 + $0x1c] sm:$0xf]  ;;  %v369_v59 = vor.u32 %v368_v48, %v365_v45  ;;  %v2212_v12 = vrot.slane %v2210_v63, 5  ;;  %v2220_v16 = vshll.u32 %v7286_v52, 16  ;;  %v387_v17 = vshrl.u32 %v256_v53, 16 }
  0x29   : > { %6320 = vmatpush3.bf16.msra.mxu0 %v6857_v30  ;;  %6129 = vmatprep.subr.bf16.mxu1 %v6858_v36  ;;  %v2183_v30 = vor.u32 %v2182_v19, %v2179_v18  ;;  %v372_v39 = vshll.u32 %v254_v25, 16  ;;  %v376_v50 = vshrl.u32 %v254_v25, 16  ;;  %v2207_v14 = vor.u32 %v2206_v2, %v2203_v1  ;;  %v7307_v18 = vld [vmem:[%s7190_s16 + $0x30] sm:$0xf]  ;;  %v6865_v63 = vld [vmem:[%s9192_s1 + $0x158] sm:$0xff]  }
  0x2a   : > { %6321 = vmatprep.subr.bf16.mxu0 %v6859_v51  ;;  %v370_v10 = vrot.slane %v369_v59, 4  ;;  %v2216_v15 = vrot.slane %v2214_v5, 4  ;;  %v390_v22 = vshll.u32 %v256_v53, 16  ;;  %v396_v25 = vshll.u32 %v257_v6, 16 }
  0x2b   : > { %v2184_v43 = vrot.slane %v2183_v30, 4  ;;  %v374_v49 = vrot.slane %v372_v39, 5  ;;  %v378_v60 = vrot.slane %v376_v50, 4  ;;  %v2208_v27 = vrot.slane %v2207_v14, 4 }
  0x2c   : > { %6130 = vmatpush3.bf16.msra.mxu1 %v6858_v36  ;;  %v2198_v36 = vrot.slane %v2196_v28, 5  ;;  %v2217_v28 = vor.u32 %v2216_v15, %v2212_v12  ;;  %v2222_v30 = vrot.slane %v2220_v16, 5  ;;  %v392_v34 = vrot.slane %v390_v22, 5 }
  0x2d   : > { %6322 = vmatpush3.bf16.msra.mxu0 %v6859_v51  ;;  %6163 = vmatprep.subr.bf16.mxu1 %v6860_v3  ;;  %v382_v51 = vshll.u32 %v255_v33, 16  ;;  %v2189_v54 = vsel %vm7226_vm2, %v2184_v43, %v2188_v31  ;;  %v379_v11 = vor.u32 %v378_v60, %v374_v49  ;;  %v375_v19 = vsel %vm7226_vm2, %v370_v10, %v374_v49 }
  0x2e   : > { %6355 = vmatprep.subr.bf16.mxu0 %v7253_v4  ;;  %v2199_v0 = vsel %vm7226_vm2, %v2194_v55, %v2198_v36  ;;  %v389_v31 = vrot.slane %v387_v17, 4  ;;  %v398_v35 = vrot.slane %v396_v25, 5  ;;  %v400_v36 = vshrl.u32 %v257_v6, 16  ;;  %v259_v55 = vld [vmem:[%s7190_s16 + $0x30] sm:$0xf] }
  0x2f   : > { %6132 = vmatmul.mubr.bf16.vlgmr.msra.gmra.mrb[0].mxu1 %v5265_v42  ;;  %v384_v61 = vrot.slane %v382_v51, 5  ;;  %v5473_v7 = vcombine.low %v2189_v54, %v2199_v0  ;;  %v380_v21 = vrot.slane %v379_v11, 4  ;;  %v2213_v39 = vsel %vm7226_vm2, %v2208_v27, %v2212_v12  ;;  %v260_v0 = vld [vmem:[%s7190_s16 + $0x34] sm:$0xf]  ;;  %v7347_v12 = vld [vmem:[%s7190_s16 + $0x3c] sm:$0xf] }
  0x30   : > { %6164 = vmatpush3.bf16.msra.mxu1 %v6860_v3  ;;  %v6866_v3 = vld [vmem:[%s9192_s1 + $0x10] sm:$0xff]   ;;  %v2218_v42 = vrot.slane %v2217_v28, 4  ;;  %v406_v43 = vshll.u32 %v258_v13, 16  ;;  %v393_v44 = vor.u32 %v392_v34, %v389_v31  ;;  %v402_v45 = vrot.slane %v400_v36, 4  ;;  %v6867_v13 = vld [vmem:[%s9192_s1 + $0x160] sm:$0xff]   ;;  %v6874_v28 = vld [vmem:[%s9192_s1 + $0x28] sm:$0xff]  }
  0x31   : > { %6165 = vmatprep.subr.bf16.mxu1 %v6863_v47  ;;  %6324 = vmatmul.mubr.bf16.vlgmr.msra.gmra.mrb[0].mxu0 %v5473_v7  ;;  %v385_v33 = vsel %vm7226_vm2, %v380_v21, %v384_v61  ;;  %v2225_v48 = vshrl.u32 %v7307_v18, 16  ;;  %v2228_v49 = vshll.u32 %v7307_v18, 16  ;;  %v2234_v53 = vshll.u32 %v7312_v26, 16  ;;  %v7361_v34 = vld [vmem:[%s7190_s16 + $0x44] sm:$0x1] }
  0x32   : > { %6356 = vmatpush3.bf16.msra.mxu0 %v7253_v4  ;;  %v6869_v4 = vld [vmem:[%s9192_s1 + $0x18] sm:$0xff]   ;;  %v5266_v38 = vcombine.low %v375_v19, %v385_v33  ;;  %v2223_v50 = vsel %vm7226_vm2, %v2218_v42, %v2222_v30  ;;  %v408_v51 = vrot.slane %v406_v43, 5  ;;  %v2238_v54 = vshrl.u32 %v7312_v26, 16  ;;  %v7353_v19 = vld [vmem:[%s7190_s16 + $0x40] sm:$0xf]  ;;  %v6868_v42 = vld [vmem:[%s9192_s1 + $0x168] sm:$0xff]  }
  0x33   : > { %6357 = vmatprep.subr.bf16.mxu0 %v6862_v9  ;;  %v5474_v58 = vcombine.low %v2213_v39, %v2223_v50  ;;  %v394_v59 = vrot.slane %v393_v44, 4  ;;  %v403_v60 = vor.u32 %v402_v45, %v398_v35  ;;  %v2227_v61 = vrot.slane %v2225_v48, 4  ;;  %v262_v39 = vld [vmem:[%s7190_s16 + $0x3c] sm:$0xf]  ;;  %v6876_v43 = vld [vmem:[%s9192_s1 + $0x30] sm:$0xff]  }
  0x34   : > { %6166 = vmatpush3.bf16.msra.mxu1 %v6863_v47  ;;  %v7326_v47 = vld [vmem:[%s7190_s16 + $0x38] sm:$0x1]  ;;  %6135 = vmatprep.mubr.bf16.mxu1 %v5266_v38  ;;  %v2230_v1 = vrot.slane %v2228_v49, 5  ;;  %v2236_v2 = vrot.slane %v2234_v53, 5  ;;  %v2240_v5 = vrot.slane %v2238_v54, 4  ;;  %v411_v10 = vshrl.u32 %v259_v55, 16 }
  0x35   : > { %6167 = vmatprep.subr.bf16.mxu1 %v6866_v3  ;;  %v2244_v6 = vshll.u32 %v7326_v47, 16  ;;  %6327 = vmatprep.mubr.bf16.mxu0 %v5474_v58  ;;  %v399_v7 = vsel %vm7226_vm2, %v394_v59, %v398_v35  ;;  %v414_v11 = vshll.u32 %v259_v55, 16  ;;  %v420_v17 = vshll.u32 %v260_v0, 16  ;;  %v263_v50 = vld [vmem:[%s7190_s16 + $0x40] sm:$0xf] }
  0x36   : > { %6358 = vmatpush3.bf16.msra.mxu0 %v6862_v9  ;;  %v404_v9 = vrot.slane %v403_v60, 4  ;;  %v2231_v14 = vor.u32 %v2230_v1, %v2227_v61  ;;  %v2241_v15 = vor.u32 %v2240_v5, %v2236_v2  ;;  %v413_v22 = vrot.slane %v411_v10, 4  ;;  %v264_v1 = vld [vmem:[%s7190_s16 + $0x44] sm:$0x1] }
  0x37   : > { %6359 = vmatprep.subr.bf16.mxu0 %v6864_v32  ;;  %v2246_v16 = vrot.slane %v2244_v6, 5  ;;  %v416_v25 = vrot.slane %v414_v11, 5  ;;  %v424_v27 = vshrl.u32 %v260_v0, 16  ;;  %v2249_v38 = vshrl.u32 %v7347_v12, 16 }
  0x38   : > { %6168 = vmatpush3.bf16.msra.mxu1 %v6866_v3  ;;  %v261_v3 = vld [vmem:[%s7190_s16 + $0x38] sm:$0x1]  ;;  %v409_v21 = vsel %vm7226_vm2, %v404_v9, %v408_v51  ;;  %v2232_v31 = vrot.slane %v2231_v14, 4  ;;  %v2242_v33 = vrot.slane %v2241_v15, 4  ;;  %v2252_v48 = vshll.u32 %v7347_v12, 16 }
  0x39   : > { %6169 = vmatprep.subr.bf16.mxu1 %v6869_v4  ;;  %v5267_v30 = vcombine.low %v399_v7, %v409_v21  ;;  %v417_v35 = vor.u32 %v416_v25, %v413_v22  ;;  %v426_v36 = vrot.slane %v424_v27, 4  ;;  %v2258_v49 = vshll.u32 %v7353_v19, 16  ;;  %v7384_v9 = vld [vmem:[%s7190_s16 + $0x48] sm:$0xf]  ;;  %v7395_v27 = vld [vmem:[%s7190_s16 + $0x4c] sm:$0xf] }
  0x3a   : > { %6360 = vmatpush3.bf16.msra.mxu0 %v6864_v32  ;;  %v422_v32 = vrot.slane %v420_v17, 5  ;;  %v2237_v44 = vsel %vm7226_vm2, %v2232_v31, %v2236_v2  ;;  %v2247_v45 = vsel %vm7226_vm2, %v2242_v33, %v2246_v16  ;;  %v2254_v58 = vrot.slane %v2252_v48, 5  ;;  %v6870_v16 = vld [vmem:[%s9192_s1 + $0x170] sm:$0xff]   ;;  %v6878_v17 = vld [vmem:[%s9192_s1 + $0x38] sm:$0xff]  }
  0x3b   : > { %6361 = vmatprep.subr.bf16.mxu0 %v6865_v63  ;;  %6136 = vmatmul.mubr.bf16.gmra.mrb[4].mxu1 %v5267_v30  ;;  %v5475_v51 = vcombine.low %v2237_v44, %v2247_v45  ;;  %v418_v53 = vrot.slane %v417_v35, 4  ;;  %v2260_v59 = vrot.slane %v2258_v49, 5  ;;  %v2262_v60 = vshrl.u32 %v7353_v19, 16  ;;  %v265_v44 = vld [vmem:[%s7190_s16 + $0x48] sm:$0xf] }
  0x3c   : > { %6170 = vmatpush3.bf16.msra.mxu1 %v6869_v4  ;;  %v430_v4 = vshll.u32 %v261_v3, 16  ;;  %v427_v54 = vor.u32 %v426_v36, %v422_v32  ;;  %v2268_v0 = vshll.u32 %v7361_v34, 16  ;;  %v435_v2 = vshrl.u32 %v262_v39, 16 }
  0x3d   : > { %6171 = vmatprep.subr.bf16.mxu1 %v6872_v56  ;;  %6328 = vmatmul.mubr.bf16.gmra.mrb[4].mxu0 %v5475_v51  ;;  %v423_v61 = vsel %vm7226_vm2, %v418_v53, %v422_v32  ;;  %v2264_v6 = vrot.slane %v2262_v60, 4  ;;  %v438_v3 = vshll.u32 %v262_v39, 16  ;;  %v444_v7 = vshll.u32 %v263_v50, 16  ;;  %v7401_v32 = vld [vmem:[%s9192_s1 + $0x80] sm:$0xff]   ;;  %v6871_v51 = vld [vmem:[%s9192_s1 + $0x178] sm:$0xff]  }
  0x3e   : > { %6362 = vmatpush3.bf16.msra.mxu0 %v6865_v63  ;;  %v432_v55 = vrot.slane %v430_v4, 5  ;;  %v428_v63 = vrot.slane %v427_v54, 4  ;;  %v2270_v11 = vrot.slane %v2268_v0, 5  ;;  %v437_v14 = vrot.slane %v435_v2, 4 }
  0x3f   : > { %6363 = vmatprep.subr.bf16.mxu0 %v6867_v13  ;;  %v448_v15 = vshrl.u32 %v263_v50, 16  ;;  %v440_v25 = vrot.slane %v438_v3, 5  ;;  %v454_v31 = vshll.u32 %v264_v1, 16  ;;  %v2273_v33 = vshrl.u32 %v7384_v9, 16  ;;  %v266_v50 = vld [vmem:[%s7190_s16 + $0x4c] sm:$0xf] }
  0x40   : > { %6172 = vmatpush3.bf16.msra.mxu1 %v6872_v56  ;;  %v2251_v56 = vrot.slane %v2249_v38, 4  ;;  %v433_v10 = vsel %vm7226_vm2, %v428_v63, %v432_v55  ;;  %v7406_v38 = vld [vmem:[%s7190_s16 + $0x50] sm:$0x1]  ;;  %v2276_v39 = vshll.u32 %v7384_v9, 16  ;;  %v2282_v49 = vshll.u32 %v7395_v27, 16 }
  0x41   : > { %6173 = vmatprep.subr.bf16.mxu1 %v6874_v28  ;;  %v5268_v21 = vcombine.low %v423_v61, %v433_v10  ;;  %v450_v30 = vrot.slane %v448_v15, 4  ;;  %v441_v4 = vor.u32 %v440_v25, %v437_v14  ;;  %v456_v48 = vrot.slane %v454_v31, 5  ;;  %v267_v1 = vld [vmem:[%s7190_s16 + $0x50] sm:$0x1]  ;;  %v7434_v14 = vld [vmem:[%s9192_s1 + $0x180] sm:$0xff]  }
  0x42   : > { %v2255_v5 = vor.u32 %v2254_v58, %v2251_v56  ;;  %6364 = vmatpush3.bf16.msra.mxu0 %v6867_v13  ;;  %v2265_v13 = vor.u32 %v2264_v6, %v2260_v59  ;;  %v2286_v55 = vshrl.u32 %v7395_v27, 16  ;;  %v2292_v60 = vshll.u32 %v7406_v38, 16 }
  0x43   : > { %6365 = vmatprep.subr.bf16.mxu0 %v6868_v42  ;;  %6139 = vmatprep.mubr.bf16.mxu1 %v5268_v21  ;;  %v442_v54 = vrot.slane %v441_v4, 4  ;;  %v459_v2 = vshrl.u32 %v265_v44, 16  ;;  %v468_v10 = vshll.u32 %v266_v50, 16  ;;  %v472_v25 = vshrl.u32 %v266_v50, 16 }
  0x44   : > { %6174 = vmatpush3.bf16.msra.mxu1 %v6874_v28  ;;  %v2256_v22 = vrot.slane %v2255_v5, 4  ;;  %v446_v28 = vrot.slane %v444_v7, 5  ;;  %v2266_v36 = vrot.slane %v2265_v13, 4  ;;  %v2288_v0 = vrot.slane %v2286_v55, 4  ;;  %v7423_v5 = vld [vmem:[%s7190_s16 + $0x54] sm:$0xf] }
  0x45   : > { %6175 = vmatprep.subr.bf16.mxu1 %v6876_v43  ;;  %v2294_v3 = vrot.slane %v2292_v60, 5  ;;  %v462_v7 = vshll.u32 %v265_v44, 16  ;;  %v461_v21 = vrot.slane %v459_v2, 4  ;;  %v470_v13 = vrot.slane %v468_v10, 5 }
  0x46   : > { %v2261_v35 = vsel %vm7226_vm2, %v2256_v22, %v2260_v59  ;;  %6366 = vmatpush3.bf16.msra.mxu0 %v6868_v42  ;;  %v451_v45 = vor.u32 %v450_v30, %v446_v28  ;;  %v2271_v53 = vsel %vm7226_vm2, %v2266_v36, %v2270_v11  ;;  %v2278_v42 = vrot.slane %v2276_v39, 5  ;;  %v7429_v11 = vld [vmem:[%s7190_s16 + $0x58] sm:$0xf]  ;;  %v7437_v30 = vld [vmem:[%s7190_s16 + $0x5c] sm:$0x1] }
  0x47   : > { %6367 = vmatprep.subr.bf16.mxu0 %v6870_v16  ;;  %v5476_v56 = vcombine.low %v2261_v35, %v2271_v53  ;;  %v2284_v59 = vrot.slane %v2282_v49, 5  ;;  %v447_v61 = vsel %vm7226_vm2, %v442_v54, %v446_v28  ;;  %v464_v22 = vrot.slane %v462_v7, 5  ;;  %v7452_v54 = vld [vmem:[%s7190_s16 + $0x58] sm:$0xf]  ;;  %v7465_v7 = vld [vmem:[%s7190_s16 + $0x64] sm:$0xf] }
  0x48   : > { %6176 = vmatpush3.bf16.msra.mxu1 %v6876_v43  ;;  %v2275_v43 = vrot.slane %v2273_v33, 4  ;;  %v452_v58 = vrot.slane %v451_v45, 4  ;;  %v478_v28 = vshll.u32 %v267_v1, 16  ;;  %v2297_v35 = vshrl.u32 %v7423_v5, 16 }
  0x49   : > { %6177 = vmatprep.subr.bf16.mxu1 %v6878_v17  ;;  %6331 = vmatprep.mubr.bf16.mxu0 %v5476_v56  ;;  %v2300_v36 = vshll.u32 %v7423_v5, 16  ;;  %v465_v4 = vor.u32 %v464_v22, %v461_v21  ;;  %v474_v39 = vrot.slane %v472_v25, 4  ;;  %v2306_v45 = vshll.u32 %v7429_v11, 16 }
  0x4a   : > { %v2279_v63 = vor.u32 %v2278_v42, %v2275_v43  ;;  %6368 = vmatpush3.bf16.msra.mxu0 %v6870_v16  ;;  %v457_v6 = vsel %vm7226_vm2, %v452_v58, %v456_v48  ;;  %v480_v44 = vrot.slane %v478_v28, 5  ;;  %v7445_v48 = vld [vmem:[%s7190_s16 + $0x54] sm:$0xf]  ;;  %v2299_v49 = vrot.slane %v2297_v35, 4  ;;  %v270_v58 = vld [vmem:[%s7190_s16 + $0x5c] sm:$0x1] }
  0x4b   : > { %6369 = vmatprep.subr.bf16.mxu0 %v6871_v51  ;;  %v5269_v15 = vcombine.low %v447_v61, %v457_v6  ;;  %v2302_v50 = vrot.slane %v2300_v36, 5  ;;  %v2310_v53 = vshrl.u32 %v7429_v11, 16  ;;  %v466_v42 = vrot.slane %v465_v4, 4 }
  0x4c   : > { %6178 = vmatpush3.bf16.msra.mxu1 %v6878_v17  ;;  %v2280_v16 = vrot.slane %v2279_v63, 4  ;;  %v2289_v17 = vor.u32 %v2288_v0, %v2284_v59  ;;  %v475_v55 = vor.u32 %v474_v39, %v470_v13  ;;  %v2308_v56 = vrot.slane %v2306_v45, 5  ;;  %v7458_v0 = vld [vmem:[%s7190_s16 + $0x60] sm:$0xf]  ;;  %v7473_v39 = vld [vmem:[%s7190_s16 + $0x68] sm:$0x1] }
  0x4d   : > { %6211 = vmatprep.subr.bf16.mxu1 %v7401_v32  ;;  %6140 = vmatmul.mubr.bf16.gmra.mrb[8].mxu1 %v5269_v15  ;;  %v2312_v60 = vrot.slane %v2310_v53, 4  ;;  %v2316_v61 = vshll.u32 %v7437_v30, 16  ;;  %v483_v63 = vshrl.u32 %v7445_v48, 16  ;;  %v471_v1 = vsel %vm7226_vm2, %v466_v42, %v470_v13 }
  0x4e   : > { %v2285_v31 = vsel %vm7226_vm2, %v2280_v16, %v2284_v59  ;;  %v2290_v33 = vrot.slane %v2289_v17, 4  ;;  %6370 = vmatpush3.bf16.msra.mxu0 %v6871_v51  ;;  %v2303_v59 = vor.u32 %v2302_v50, %v2299_v49  ;;  %v476_v2 = vrot.slane %v475_v55, 4 }
  0x4f   : > { %6403 = vmatprep.subr.bf16.mxu0 %v7434_v14  ;;  %v486_v6 = vshll.u32 %v7445_v48, 16  ;;  %v2313_v15 = vor.u32 %v2312_v60, %v2308_v56  ;;  %v2318_v16 = vrot.slane %v2316_v61, 5  ;;  %v485_v17 = vrot.slane %v483_v63, 4 }
  0x50   : > { %v2295_v43 = vsel %vm7226_vm2, %v2290_v33, %v2294_v3  ;;  %v492_v3 = vshll.u32 %v7452_v54, 16  ;;  %v2304_v10 = vrot.slane %v2303_v59, 4  ;;  %v481_v21 = vsel %vm7226_vm2, %v476_v2, %v480_v44  ;;  %v7485_v59 = vld [vmem:[%s7190_s16 + $0x64] sm:$0xf]  ;;  %v273_v2 = vld [vmem:[%s7190_s16 + $0x68] sm:$0x1] }
  0x51   : > { %v5477_v51 = vcombine.low %v2285_v31, %v2295_v43  ;;  %v488_v22 = vrot.slane %v486_v6, 5  ;;  %v496_v13 = vshrl.u32 %v7452_v54, 16  ;;  %v5270_v28 = vcombine.low %v471_v1, %v481_v21 }
  0x52   : > { %v494_v25 = vrot.slane %v492_v3, 5  ;;  %v2309_v31 = vsel %vm7226_vm2, %v2304_v10, %v2308_v56  ;;  %v2314_v33 = vrot.slane %v2313_v15, 4  ;;  %v502_v35 = vshll.u32 %v270_v58, 16 }
  0x53   : > { %6332 = vmatmul.mubr.bf16.gmra.mrb[8].mxu0 %v5477_v51  ;;  %v489_v36 = vor.u32 %v488_v22, %v485_v17  ;;  %v498_v4 = vrot.slane %v496_v13, 4  ;;  %v2321_v45 = vshrl.u32 %v7458_v0, 16  ;;  %v2324_v44 = vshll.u32 %v7458_v0, 16  ;;  %6143 = vmatprep.mubr.bf16.mxu1 %v5270_v28  ;;  %v7482_v51 = vld [vmem:[%s7190_s16 + $0x60] sm:$0xf] }
  0x54   : > { %v2319_v43 = vsel %vm7226_vm2, %v2314_v33, %v2318_v16  ;;  %v504_v49 = vrot.slane %v502_v35, 5  ;;  %v2330_v50 = vshll.u32 %v7465_v7, 16  ;;  %v2334_v53 = vshrl.u32 %v7465_v7, 16  ;;  %v7494_v16 = vld [vmem:[%s7190_s16 + $0x6c] sm:$0xf] }
  0x55   : > { %v5478_v42 = vcombine.low %v2309_v31, %v2319_v43  ;;  %v490_v55 = vrot.slane %v489_v36, 4  ;;  %v499_v56 = vor.u32 %v498_v4, %v494_v25  ;;  %v2323_v58 = vrot.slane %v2321_v45, 4 }
  0x56   : > { %v2326_v60 = vrot.slane %v2324_v44, 5  ;;  %v2332_v61 = vrot.slane %v2330_v50, 5  ;;  %v2336_v63 = vrot.slane %v2334_v53, 4  ;;  %v2340_v1 = vshll.u32 %v7473_v39, 16 }
  0x57   : > { %6335 = vmatprep.mubr.bf16.mxu0 %v5478_v42  ;;  %v495_v6 = vsel %vm7226_vm2, %v490_v55, %v494_v25  ;;  %v500_v3 = vrot.slane %v499_v56, 4  ;;  %v507_v10 = vshrl.u32 %v7482_v51, 16  ;;  %v510_v15 = vshll.u32 %v7482_v51, 16 }
  0x58   : > { %v2327_v17 = vor.u32 %v2326_v60, %v2323_v58  ;;  %v2337_v21 = vor.u32 %v2336_v63, %v2332_v61  ;;  %v2342_v22 = vrot.slane %v2340_v1, 5  ;;  %v516_v13 = vshll.u32 %v7485_v59, 16  ;;  %v7513_v58 = vld [vmem:[%s7190_s16 + $0x70] sm:$0xf] }
  0x59   : > { %v505_v28 = vsel %vm7226_vm2, %v500_v3, %v504_v49  ;;  %v509_v31 = vrot.slane %v507_v10, 4  ;;  %v512_v33 = vrot.slane %v510_v15, 5  ;;  %v520_v25 = vshrl.u32 %v7485_v59, 16 }
  0x5a   : > { %v5271_v35 = vcombine.low %v495_v6, %v505_v28  ;;  %v2328_v36 = vrot.slane %v2327_v17, 4  ;;  %v2338_v4 = vrot.slane %v2337_v21, 4  ;;  %v518_v45 = vrot.slane %v516_v13, 5  ;;  %v7521_v17 = vld [vmem:[%s7190_s16 + $0x78] sm:$0xf] }
  0x5b   : > { %v513_v44 = vor.u32 %v512_v33, %v509_v31  ;;  %v522_v43 = vrot.slane %v520_v25, 4  ;;  %v526_v50 = vshll.u32 %v273_v2, 16  ;;  %v5496_v49 = vrot.slane %v7202_v20, 9  ;;  %v276_v20 = vld [vmem:[%s7190_s16 + $0x74] sm:$0x1] }
  0x5c   : > { %6144 = vmatmul.mubr.bf16.gmra.mrb[12].mxu1 %v5271_v35  ;;  %v2333_v42 = vsel %vm7226_vm2, %v2328_v36, %v2332_v61  ;;  %v2343_v55 = vsel %vm7226_vm2, %v2338_v4, %v2342_v22  ;;  %v2876_v56 = vrot.slane %v7205_v23, 5  ;;  %v531_v60 = vshrl.u32 %v7494_v16, 16  ;;  %v7524_v21 = vld [vmem:[%s7190_s16 + $0x7c] sm:$0xf] }
  0x5d   : > { %v5479_v63 = vcombine.low %v2333_v42, %v2343_v55  ;;  %v514_v1 = vrot.slane %v513_v44, 4  ;;  %v523_v2 = vor.u32 %v522_v43, %v518_v45  ;;  %v528_v6 = vrot.slane %v526_v50, 5  ;;  %v279_v55 = vld [vmem:[%s7190_s16 + $0x80] sm:$0x1] }
  0x5e   : > { %v2877_v3 = vsel %vm7502_vm5, %v5496_v49, %v2876_v56  ;;  %v2878_v10 = vrot.slane %v2876_v56, 4  ;;  %v533_v15 = vrot.slane %v531_v60, 4  ;;  %v534_v61 = vshll.u32 %v7494_v16, 16 }
  0x5f   : > { %6336 = vmatmul.mubr.bf16.gmra.mrb[12].mxu0 %v5479_v63  ;;  %v519_v23 = vsel %vm7226_vm2, %v514_v1, %v518_v45  ;;  %v524_v22 = vrot.slane %v523_v2, 4  ;;  %v540_v13 = vshll.u32 %v7513_v58, 16  ;;  %v544_v28 = vshrl.u32 %v7513_v58, 16 }
  0x60   : > { %v2880_v31 = vsel %vm7502_vm5, %v2878_v10, %v2879_v41  ;;  %v536_v33 = vrot.slane %v534_v61, 5  ;;  %v550_v25 = vshll.u32 %v276_v20, 16  ;;  %v5497_v35 = vrot.slane %v7240_v57, 9  ;;  %v7546_v10 = vld [vmem:[%s7190_s16 + $0x84] sm:$0xf] }
  0x61   : > { %v529_v36 = vsel %vm7226_vm2, %v524_v22, %v528_v6  ;;  %v5528_v4 = vcombine.low %v2877_v3, %v2880_v31  ;;  %v542_v45 = vrot.slane %v540_v13, 5  ;;  %v546_v44 = vrot.slane %v544_v28, 4  ;;  %v7555_v13 = vld [vmem:[%s7190_s16 + $0x88] sm:$0xf] }
  0x62   : > { %v5272_v43 = vcombine.low %v519_v23, %v529_v36  ;;  %v537_v50 = vor.u32 %v536_v33, %v533_v15  ;;  %v552_v49 = vrot.slane %v550_v25, 5  ;;  %v2883_v42 = vrot.slane %v7245_v62, 5 }
  0x63   : > { %6371 = vmatprep.mubr.bf16.mxu0 %v5528_v4  ;;  %v547_v24 = vor.u32 %v546_v44, %v542_v45  ;;  %v555_v41 = vshrl.u32 %v7521_v17, 16  ;;  %v558_v56 = vshll.u32 %v7521_v17, 16  ;;  %v564_v57 = vshll.u32 %v7524_v21, 16 }
  0x64   : > { %6147 = vmatprep.mubr.bf16.mxu1 %v5272_v43  ;;  %v538_v60 = vrot.slane %v537_v50, 4  ;;  %v2884_v63 = vsel %vm7502_vm5, %v5497_v35, %v2883_v42  ;;  %v2885_v1 = vrot.slane %v2883_v42, 4  ;;  %v568_v2 = vshrl.u32 %v7524_v21, 16  ;;  %v6875_v35 = vld [vmem:[%s9192_s1 + $0x188] sm:$0xff]  }
  0x65   : > { %v548_v62 = vrot.slane %v547_v24, 4  ;;  %v557_v6 = vrot.slane %v555_v41, 4  ;;  %v560_v20 = vrot.slane %v558_v56, 5  ;;  %v566_v3 = vrot.slane %v564_v57, 5  ;;  %v282_v43 = vld [vmem:[%s7190_s16 + $0x8c] sm:$0x1] }
  0x66   : > { %v543_v15 = vsel %vm7226_vm2, %v538_v60, %v542_v45  ;;  %v2887_v61 = vsel %vm7502_vm5, %v2885_v1, %v2886_v29  ;;  %v570_v23 = vrot.slane %v568_v2, 4  ;;  %v574_v22 = vshll.u32 %v279_v55, 16  ;;  %v7583_v2 = vld [vmem:[%s7190_s16 + $0x90] sm:$0xf] }
  0x67   : > { %v553_v28 = vsel %vm7226_vm2, %v548_v62, %v552_v49  ;;  %v5529_v31 = vcombine.low %v2884_v63, %v2887_v61  ;;  %v561_v33 = vor.u32 %v560_v20, %v557_v6  ;;  %v5498_v25 = vrot.slane %v7277_v40, 9  ;;  %v285_v61 = vld [vmem:[%s7190_s16 + $0x98] sm:$0x1] }
  0x68   : > { %v5273_v8 = vcombine.low %v543_v15, %v553_v28  ;;  %v571_v36 = vor.u32 %v570_v23, %v566_v3  ;;  %v576_v4 = vrot.slane %v574_v22, 5  ;;  %v2890_v29 = vrot.slane %v7280_v46, 5  ;;  %v7586_v15 = vld [vmem:[%s7190_s16 + $0x94] sm:$0xf] }
  0x69   : > { %6372 = vmatmul.mubr.bf16.vlgmr.msra.gmra.mrb[0].mxu0 %v5529_v31  ;;  %v562_v45 = vrot.slane %v561_v33, 4  ;;  %v2893_v44 = vrot.slane %v7286_v52, 5  ;;  %v579_v50 = vshrl.u32 %v7546_v10, 16  ;;  %v582_v49 = vshll.u32 %v7546_v10, 16 }
  0x6a   : > { %6148 = vmatmul.mubr.bf16.gmra.mrb[16].mxu1 %v5273_v8  ;;  %6404 = vmatpush3.bf16.msra.mxu0 %v7434_v14  ;;  %v572_v40 = vrot.slane %v571_v36, 4  ;;  %v2891_v42 = vsel %vm7502_vm5, %v5498_v25, %v2890_v29  ;;  %v2892_v24 = vrot.slane %v2890_v29, 4  ;;  %v588_v46 = vshll.u32 %v7555_v13, 16  ;;  %v6877_v14 = vld [vmem:[%s9192_s1 + $0x190] sm:$0xff]  }
  0x6b   : > { %v567_v52 = vsel %vm7226_vm2, %v562_v45, %v566_v3  ;;  %v581_v55 = vrot.slane %v579_v50, 4  ;;  %v584_v41 = vrot.slane %v582_v49, 5  ;;  %v592_v56 = vshrl.u32 %v7555_v13, 16  ;;  %6405 = vmatprep.subr.bf16.mxu0 %v6875_v35  ;;  %v7604_v50 = vld [vmem:[%s7190_s16 + $0x9c] sm:$0xf] }
  0x6c   : > { %v577_v57 = vsel %vm7226_vm2, %v572_v40, %v576_v4  ;;  %v2894_v60 = vsel %vm7502_vm5, %v2892_v24, %v2893_v44  ;;  %v590_v63 = vrot.slane %v588_v46, 5  ;;  %v598_v1 = vshll.u32 %v282_v43, 16  ;;  %v6879_v4 = vld [vmem:[%s9192_s1 + $0x198] sm:$0xff]   ;;  %v7609_v46 = vld [vmem:[%s7190_s16 + $0xa0] sm:$0xf] }
  0x6d   : > { %v5274_v62 = vcombine.low %v567_v52, %v577_v57  ;;  %v5530_v6 = vcombine.low %v2891_v42, %v2894_v60  ;;  %v585_v20 = vor.u32 %v584_v41, %v581_v55  ;;  %v594_v3 = vrot.slane %v592_v56, 4  ;;  %v6883_v57 = vld [vmem:[%s9192_s1 + $0x1a0] sm:$0xff]  }
  0x6e   : > { %v600_v23 = vrot.slane %v598_v1, 5  ;;  %v5499_v22 = vrot.slane %v7307_v18, 9  ;;  %v2897_v28 = vrot.slane %v7312_v26, 5  ;;  %v2900_v31 = vrot.slane %v7326_v47, 5  ;;  %6406 = vmatpush3.bf16.msra.mxu0 %v6875_v35 }
  0x6f   : > { %6151 = vmatprep.mubr.bf16.mxu1 %v5274_v62  ;;  %6375 = vmatprep.mubr.bf16.mxu0 %v5530_v6  ;;  %v586_v33 = vrot.slane %v585_v20, 4  ;;  %v595_v25 = vor.u32 %v594_v3, %v590_v63  ;;  %v603_v8 = vshrl.u32 %v7583_v2, 16  ;;  %v606_v36 = vshll.u32 %v7583_v2, 16  ;;  %v288_v20 = vld [vmem:[%s7190_s16 + $0xa4] sm:$0x1] }
  0x70   : > { %v2898_v18 = vsel %vm7502_vm5, %v5499_v22, %v2897_v28  ;;  %v2899_v26 = vrot.slane %v2897_v28, 4  ;;  %v612_v47 = vshll.u32 %v7586_v15, 16  ;;  %v616_v35 = vshrl.u32 %v7586_v15, 16  ;;  %6407 = vmatprep.subr.bf16.mxu0 %v6877_v14 }
  0x71   : > { %v591_v29 = vsel %vm7226_vm2, %v586_v33, %v590_v63  ;;  %v596_v45 = vrot.slane %v595_v25, 4  ;;  %v605_v44 = vrot.slane %v603_v8, 4  ;;  %v608_v43 = vrot.slane %v606_v36, 5 }
  0x72   : > { %v2901_v49 = vsel %vm7502_vm5, %v2899_v26, %v2900_v31  ;;  %v614_v40 = vrot.slane %v612_v47, 5  ;;  %v618_v42 = vrot.slane %v616_v35, 4  ;;  %v622_v24 = vshll.u32 %v285_v61, 16  ;;  %6408 = vmatpush3.bf16.msra.mxu0 %v6877_v14  ;;  %v7633_v26 = vld [vmem:[%s7190_s16 + $0xa8] sm:$0xf] }
  0x73   : > { %v601_v52 = vsel %vm7226_vm2, %v596_v45, %v600_v23  ;;  %v5531_v55 = vcombine.low %v2898_v18, %v2901_v49  ;;  %v609_v41 = vor.u32 %v608_v43, %v605_v44  ;;  %v5500_v56 = vrot.slane %v7347_v12, 9  ;;  %6409 = vmatprep.subr.bf16.mxu0 %v6879_v4  ;;  %v7639_v44 = vld [vmem:[%s7190_s16 + $0xac] sm:$0xf] }
  0x74   : > { %v5275_v60 = vcombine.low %v591_v29, %v601_v52  ;;  %v619_v63 = vor.u32 %v618_v42, %v614_v40  ;;  %v624_v1 = vrot.slane %v622_v24, 5  ;;  %v2904_v62 = vrot.slane %v7353_v19, 5 }
  0x75   : > { %6376 = vmatmul.mubr.bf16.gmra.mrb[4].mxu0 %v5531_v55  ;;  %v610_v6 = vrot.slane %v609_v41, 4  ;;  %v2907_v14 = vrot.slane %v7361_v34, 5  ;;  %v627_v3 = vshrl.u32 %v7604_v50, 16  ;;  %v630_v61 = vshll.u32 %v7604_v50, 16  ;;  %v291_v55 = vld [vmem:[%s7190_s16 + $0xb0] sm:$0x1] }
  0x76   : > { %6152 = vmatmul.mubr.bf16.gmra.mrb[20].mxu1 %v5275_v60  ;;  %v620_v12 = vrot.slane %v619_v63, 4  ;;  %v2905_v23 = vsel %vm7502_vm5, %v5500_v56, %v2904_v62  ;;  %v2906_v22 = vrot.slane %v2904_v62, 4  ;;  %v636_v28 = vshll.u32 %v7609_v46, 16  ;;  %6410 = vmatpush3.bf16.msra.mxu0 %v6879_v4  ;;  %v6887_v4 = vld [vmem:[%s9192_s1 + $0x1a8] sm:$0xff]   ;;  %v6891_v60 = vld [vmem:[%s9192_s1 + $0x1b0] sm:$0xff]  }
  0x77   : > { %v615_v19 = vsel %vm7226_vm2, %v610_v6, %v614_v40  ;;  %v629_v34 = vrot.slane %v627_v3, 4  ;;  %v632_v31 = vrot.slane %v630_v61, 5  ;;  %v640_v33 = vshrl.u32 %v7609_v46, 16  ;;  %6411 = vmatprep.subr.bf16.mxu0 %v6883_v57 }
  0x78   : > { %v625_v25 = vsel %vm7226_vm2, %v620_v12, %v624_v1  ;;  %v2908_v8 = vsel %vm7502_vm5, %v2906_v22, %v2907_v14  ;;  %v638_v36 = vrot.slane %v636_v28, 5  ;;  %v646_v18 = vshll.u32 %v288_v20, 16  ;;  %v7657_v14 = vld [vmem:[%s7190_s16 + $0xb4] sm:$0xf] }
  0x79   : > { %v5276_v47 = vcombine.low %v615_v19, %v625_v25  ;;  %v5532_v35 = vcombine.low %v2905_v23, %v2908_v8  ;;  %v633_v29 = vor.u32 %v632_v31, %v629_v34  ;;  %v642_v45 = vrot.slane %v640_v33, 4  ;;  %v7665_v34 = vld [vmem:[%s7190_s16 + $0xb8] sm:$0xf] }
  0x7a   : > { %v648_v43 = vrot.slane %v646_v18, 5  ;;  %v5501_v49 = vrot.slane %v7384_v9, 9  ;;  %v2911_v40 = vrot.slane %v7395_v27, 5  ;;  %v2914_v42 = vrot.slane %v7406_v38, 5  ;;  %6412 = vmatpush3.bf16.msra.mxu0 %v6883_v57  ;;  %v6895_v31 = vld [vmem:[%s9192_s1 + $0x1b8] sm:$0xff]  }
  0x7b   : > { %6155 = vmatprep.mubr.bf16.mxu1 %v5276_v47  ;;  %6379 = vmatprep.mubr.bf16.mxu0 %v5532_v35  ;;  %v634_v24 = vrot.slane %v633_v29, 4  ;;  %v643_v52 = vor.u32 %v642_v45, %v638_v36  ;;  %v651_v41 = vshrl.u32 %v7633_v26, 16  ;;  %v654_v56 = vshll.u32 %v7633_v26, 16  ;;  %v294_v18 = vld [vmem:[%s7190_s16 + $0xbc] sm:$0x1] }
  0x7c   : > { %v2912_v9 = vsel %vm7502_vm5, %v5501_v49, %v2911_v40  ;;  %v2913_v27 = vrot.slane %v2911_v40, 4  ;;  %v660_v38 = vshll.u32 %v7639_v44, 16  ;;  %v664_v57 = vshrl.u32 %v7639_v44, 16  ;;  %6413 = vmatprep.subr.bf16.mxu0 %v6887_v4 }
  0x7d   : > { %v639_v63 = vsel %vm7226_vm2, %v634_v24, %v638_v36  ;;  %v644_v1 = vrot.slane %v643_v52, 4  ;;  %v653_v62 = vrot.slane %v651_v41, 4  ;;  %v656_v6 = vrot.slane %v654_v56, 5  ;;  %v5392_v24 = vld [vmem:[%s7190_s16 + $0x6c] sm:$0xf]  ;;  %v7685_v52 = vld [vmem:[%s9192_s1 + $0x1c0] sm:$0xff]  }
  0x7e   : > { %v2915_v20 = vsel %vm7502_vm5, %v2913_v27, %v2914_v42  ;;  %v662_v3 = vrot.slane %v660_v38, 5  ;;  %v666_v61 = vrot.slane %v664_v57, 4  ;;  %v670_v12 = vshll.u32 %v291_v55, 16  ;;  %6414 = vmatpush3.bf16.msra.mxu0 %v6887_v4  ;;  %v5394_v27 = vld [vmem:[%s7190_s16 + $0x74] sm:$0x1] }
  0x7f   : > { %v649_v23 = vsel %vm7226_vm2, %v644_v1, %v648_v43  ;;  %v5533_v22 = vcombine.low %v2912_v9, %v2915_v20  ;;  %v657_v28 = vor.u32 %v656_v6, %v653_v62  ;;  %v5502_v19 = vrot.slane %v7423_v5, 9  ;;  %6415 = vmatprep.subr.bf16.mxu0 %v6891_v60  ;;  %v5393_v9 = vld [vmem:[%s7190_s16 + $0x70] sm:$0xf] }
  0x80   : > { %v5277_v33 = vcombine.low %v639_v63, %v649_v23  ;;  %v667_v25 = vor.u32 %v666_v61, %v662_v3  ;;  %v672_v8 = vrot.slane %v670_v12, 5  ;;  %v2918_v36 = vrot.slane %v7429_v11, 5 }
  0x81   : > { %6380 = vmatmul.mubr.bf16.gmra.mrb[8].mxu0 %v5533_v22  ;;  %v658_v4 = vrot.slane %v657_v28, 4  ;;  %v2921_v47 = vrot.slane %v7437_v30, 5  ;;  %v675_v5 = vshrl.u32 %v7657_v14, 16  ;;  %v678_v35 = vshll.u32 %v7657_v14, 16 }
  0x82   : > { %6156 = vmatmul.mubr.bf16.gmra.mrb[24].mxu1 %v5277_v33  ;;  %v668_v29 = vrot.slane %v667_v25, 4  ;;  %v2919_v45 = vsel %vm7502_vm5, %v5502_v19, %v2918_v36  ;;  %v2920_v43 = vrot.slane %v2918_v36, 4  ;;  %v684_v11 = vshll.u32 %v7665_v34, 16  ;;  %6416 = vmatpush3.bf16.msra.mxu0 %v6891_v60  ;;  %v5395_v25 = vld [vmem:[%s7190_s16 + $0x78] sm:$0xf] }
  0x83   : > { %v663_v49 = vsel %vm7226_vm2, %v658_v4, %v662_v3  ;;  %v677_v40 = vrot.slane %v675_v5, 4  ;;  %v680_v30 = vrot.slane %v678_v35, 5  ;;  %v688_v42 = vshrl.u32 %v7665_v34, 16  ;;  %6417 = vmatprep.subr.bf16.mxu0 %v6895_v31  ;;  %v5398_v4 = vld [vmem:[%s7190_s16 + $0x84] sm:$0xf] }
  0x84   : > { %v673_v55 = vsel %vm7226_vm2, %v668_v29, %v672_v8  ;;  %v2922_v41 = vsel %vm7502_vm5, %v2920_v43, %v2921_v47  ;;  %v686_v56 = vrot.slane %v684_v11, 5  ;;  %v694_v60 = vshll.u32 %v294_v18, 16  ;;  %v5396_v8 = vld [vmem:[%s7190_s16 + $0x7c] sm:$0xf]  ;;  %v5397_v18 = vld [vmem:[%s7190_s16 + $0x80] sm:$0x1] }
  0x85   : > { %v5278_v38 = vcombine.low %v663_v49, %v673_v55  ;;  %v5534_v57 = vcombine.low %v2919_v45, %v2922_v41  ;;  %v681_v63 = vor.u32 %v680_v30, %v677_v40  ;;  %v690_v1 = vrot.slane %v688_v42, 4  ;;  %v7712_v35 = vld [vmem:[%s7190_s16] sm:$0xf]  ;;  %v7715_v29 = vld [vmem:[%s7190_s16 + $0x4] sm:$0xf] }
  0x86   : > { %v696_v62 = vrot.slane %v694_v60, 5  ;;  %v5503_v6 = vrot.slane %v7458_v0, 9  ;;  %v2925_v20 = vrot.slane %v7465_v7, 5  ;;  %v2928_v3 = vrot.slane %v7473_v39, 5  ;;  %6418 = vmatpush3.bf16.msra.mxu0 %v6895_v31  ;;  %v5399_v11 = vld [vmem:[%s7190_s16 + $0x88] sm:$0xf] }
  0x87   : > { %6159 = vmatprep.mubr.bf16.mxu1 %v5278_v38  ;;  %6383 = vmatprep.mubr.bf16.mxu0 %v5534_v57  ;;  %v682_v61 = vrot.slane %v681_v63, 4  ;;  %v691_v12 = vor.u32 %v690_v1, %v686_v56  ;;  %v5504_v23 = vrot.slane %v5392_v24, 9  ;;  %v2932_v22 = vrot.slane %v5393_v9, 5  ;;  %v5400_v49 = vld [vmem:[%s7190_s16 + $0x8c] sm:$0x1] }
  0x88   : > { %v2926_v28 = vsel %vm7502_vm5, %v5503_v6, %v2925_v20  ;;  %v2927_v0 = vrot.slane %v2925_v20, 4  ;;  %v2935_v7 = vrot.slane %v5394_v27, 5  ;;  %6451 = vmatprep.subr.bf16.mxu0 %v7685_v52  ;;  %v5288_v45 = vcombine.low %v7712_v35, %v7715_v29  ;;  %v5401_v42 = vld [vmem:[%s7190_s16 + $0x90] sm:$0xf]  ;;  %v5402_v24 = vld [vmem:[%s7190_s16 + $0x94] sm:$0xf] }
  0x89   : > { %v687_v39 = vsel %vm7226_vm2, %v682_v61, %v686_v56  ;;  %v692_v19 = vrot.slane %v691_v12, 4  ;;  %v2933_v31 = vsel %vm7502_vm5, %v5504_v23, %v2932_v22  ;;  %v2934_v33 = vrot.slane %v2932_v22, 4  ;;  %v5403_v56 = vld [vmem:[%s7190_s16 + $0x98] sm:$0x1]  ;;  %v5404_v38 = vld [vmem:[%s7190_s16 + $0x9c] sm:$0xf] }
  0x8a   : > { %v2929_v36 = vsel %vm7502_vm5, %v2927_v0, %v2928_v3  ;;  %v5505_v55 = vrot.slane %v5395_v25, 9  ;;  %v2939_v41 = vrot.slane %v5396_v8, 5  ;;  %v2942_v60 = vrot.slane %v5397_v18, 5  ;;  %v5406_v6 = vld [vmem:[%s7190_s16 + $0xa4] sm:$0x1] }
  0x8b   : > { %v697_v47 = vsel %vm7226_vm2, %v692_v19, %v696_v62  ;;  %v5535_v5 = vcombine.low %v2926_v28, %v2929_v36  ;;  %v2936_v43 = vsel %vm7502_vm5, %v2934_v33, %v2935_v7  ;;  %v5506_v9 = vrot.slane %v5398_v4, 9  ;;  %v5405_v62 = vld [vmem:[%s7190_s16 + $0xa0] sm:$0xf]  ;;  %v7732_v20 = vld [vmem:[%s7190_s16 + $0xc] sm:$0xf] }
  0x8c   : > { %v5279_v40 = vcombine.low %v687_v39, %v697_v47  ;;  %v5536_v30 = vcombine.low %v2933_v31, %v2936_v43  ;;  %v2946_v27 = vrot.slane %v5399_v11, 5  ;;  %v2940_v57 = vsel %vm7502_vm5, %v5505_v55, %v2939_v41  ;;  %v7735_v3 = vld [vmem:[%s7190_s16 + $0x10] sm:$0xf]  ;;  %v7744_v28 = vld [vmem:[%s7190_s16 + $0x18] sm:$0xf]  ;;  %v6886_v43 = vld [vmem:[%s9192_s1 + $0x88] sm:$0xff]  }
  0x8d   : > { %6384 = vmatmul.mubr.bf16.gmra.mrb[12].mxu0 %v5535_v5  ;;  %v2941_v63 = vrot.slane %v2939_v41, 4  ;;  %v2949_v1 = vrot.slane %v5400_v49, 5  ;;  %v5289_v61 = vcombine.low %v7732_v20, %v7735_v3  ;;  %v7747_v0 = vld [vmem:[%s7190_s16 + $0x1c] sm:$0xf]  ;;  %v5507_v39 = vrot.slane %v5401_v42, 9  ;;  %v6890_v41 = vld [vmem:[%s9192_s1 + $0x90] sm:$0xff]  }
  0x8e   : > { %6160 = vmatmul.mubr.bf16.gmra.mrb[28].mxu1 %v5279_v40  ;;  %6387 = vmatprep.mubr.bf16.mxu0 %v5536_v30  ;;  %v2947_v12 = vsel %vm7502_vm5, %v5506_v9, %v2946_v27  ;;  %v2948_v23 = vrot.slane %v2946_v27, 4  ;;  %v5290_v7 = vcombine.low %v7744_v28, %v7747_v0  ;;  %v2953_v19 = vrot.slane %v5402_v24, 5  ;;  %v5408_v31 = vld [vmem:[%s7190_s16 + $0xac] sm:$0xf]  ;;  %v5407_v49 = vld [vmem:[%s7190_s16 + $0xa8] sm:$0xf] }
  0x8f   : > { %6179 = vmatprep.mubr.bf16.mxu1 %v5288_v45  ;;  %v2943_v22 = vsel %vm7502_vm5, %v2941_v63, %v2942_v60  ;;  %v2956_v8 = vrot.slane %v5403_v56, 5  ;;  %v2960_v36 = vrot.slane %v5405_v62, 5  ;;  %v5508_v47 = vrot.slane %v5404_v38, 9  ;;  %v5411_v45 = vld [vmem:[%s7190_s16 + $0xb8] sm:$0xf] }
  0x90   : > { %v5537_v33 = vcombine.low %v2940_v57, %v2943_v22  ;;  %v2950_v25 = vsel %vm7502_vm5, %v2948_v23, %v2949_v1  ;;  %v2955_v4 = vrot.slane %v2953_v19, 4  ;;  %v2963_v5 = vrot.slane %v5406_v6, 5  ;;  %v5409_v56 = vld [vmem:[%s7190_s16 + $0xb0] sm:$0x1]  ;;  %v5410_v60 = vld [vmem:[%s7190_s16 + $0xb4] sm:$0xf] }
  0x91   : > { %v5538_v18 = vcombine.low %v2947_v12, %v2950_v25  ;;  %v2962_v11 = vrot.slane %v2960_v36, 4  ;;  %v2954_v40 = vsel %vm7502_vm5, %v5507_v39, %v2953_v19  ;;  %v2967_v42 = vrot.slane %v5408_v31, 5  ;;  %v5412_v27 = vld [vmem:[%s7190_s16 + $0xbc] sm:$0x1]  ;;  %v7775_v57 = vld [vmem:[%s7190_s16 + $0x24] sm:$0xf] }
  0x92   : > { %v2957_v30 = vsel %vm7502_vm5, %v2955_v4, %v2956_v8  ;;  %v2961_v24 = vsel %vm7502_vm5, %v5508_v47, %v2960_v36  ;;  %v2974_v9 = vrot.slane %v5411_v45, 5  ;;  %v5509_v38 = vrot.slane %v5407_v49, 9  ;;  %v7778_v63 = vld [vmem:[%s7190_s16 + $0x28] sm:$0xf]  ;;  %v7783_v12 = vld [vmem:[%s7190_s16 + $0x30] sm:$0xf] }
  0x93   : > { %v2964_v55 = vsel %vm7502_vm5, %v2962_v11, %v2963_v5  ;;  %v5291_v1 = vcombine.low %v7775_v57, %v7778_v63  ;;  %v2969_v6 = vrot.slane %v2967_v42, 4  ;;  %v7786_v23 = vld [vmem:[%s7190_s16 + $0x34] sm:$0xf]  ;;  %v2977_v19 = vrot.slane %v5412_v27, 5  ;;  %v5414_v31 = vld [vmem:[%s7190_s16 + $0xc4] sm:$0xf] }
  0x94   : > { %v5540_v62 = vcombine.low %v2961_v24, %v2964_v55  ;;  %v5292_v22 = vcombine.low %v7783_v12, %v7786_v23  ;;  %v2976_v39 = vrot.slane %v2974_v9, 4  ;;  %v2968_v25 = vsel %vm7502_vm5, %v5509_v38, %v2967_v42  ;;  %v5413_v47 = vld [vmem:[%s7190_s16 + $0xc0] sm:$0xf]  ;;  %v5415_v5 = vld [vmem:[%s7190_s16 + $0xc8] sm:$0x1] }
  0x95   : > { %6388 = vmatmul.mubr.bf16.gmra.mrb[16].mxu0 %v5537_v33  ;;  %v6894_v33 = vld [vmem:[%s9192_s1 + $0x98] sm:$0xff]   ;;  %v2981_v36 = vrot.slane %v5414_v31, 5  ;;  %v6899_v45 = vld [vmem:[%s9192_s1 + $0xa0] sm:$0xff]   ;;  %v5511_v42 = vrot.slane %v5413_v47, 9  ;;  %v2984_v55 = vrot.slane %v5415_v5, 5 }
  0x96   : > { %6180 = vmatmul.mubr.bf16.vlgmr.msra.gmra.mrb[0].mxu1 %v5289_v61  ;;  %6391 = vmatprep.mubr.bf16.mxu0 %v5538_v18  ;;  %v2970_v61 = vrot.slane %v5409_v56, 5  ;;  %v2978_v4 = vsel %vm7502_vm5, %v2976_v39, %v2977_v19  ;;  %v7811_v11 = vld [vmem:[%s7190_s16 + $0x40] sm:$0xf]  ;;  %v7819_v56 = vld [vmem:[%s7190_s16 + $0x4c] sm:$0xf]  ;;  %v6917_v39 = vld [vmem:[%s9192_s1 + $0xb8] sm:$0xff]  }
  0x97   : > { %6212 = vmatpush3.bf16.msra.mxu1 %v7401_v32  ;;  %6183 = vmatprep.mubr.bf16.mxu1 %v5290_v7  ;;  %v5539_v32 = vcombine.low %v2954_v40, %v2957_v30  ;;  %v5510_v7 = vrot.slane %v5410_v60, 9  ;;  %v2983_v24 = vrot.slane %v2981_v36, 4  ;;  %v2982_v27 = vsel %vm7502_vm5, %v5511_v42, %v2981_v36  ;;  %v7831_v38 = vld [vmem:[%s7190_s16 + $0x18] sm:$0xf]  ;;  %v7849_v19 = vld [vmem:[%s7190_s16 + $0x24] sm:$0xf] }
  0x98   : > { %6213 = vmatprep.subr.bf16.mxu1 %v6886_v43  ;;  %v2971_v8 = vsel %vm7502_vm5, %v2969_v6, %v2970_v61  ;;  %v5295_v61 = vcombine.low %v7445_v48, %v7452_v54  ;;  %v7852_v31 = vld [vmem:[%s7190_s16 + $0x28] sm:$0xf]  ;;  %v7857_v48 = vld [vmem:[%s9192_s1 + $0xc0] sm:$0xff]   ;;  %v7860_v54 = vld [vmem:[%s7190_s16 + $0x30] sm:$0xf] }
  0x99   : > { %v2975_v18 = vsel %vm7502_vm5, %v5510_v7, %v2974_v9  ;;  %v5541_v40 = vcombine.low %v2968_v25, %v2971_v8  ;;  %v6905_v9 = vld [vmem:[%s9192_s1 + $0xa8] sm:$0xff]   ;;  %v5296_v7 = vcombine.low %v7482_v51, %v7485_v59  ;;  %v7863_v51 = vld [vmem:[%s7190_s16 + $0x34] sm:$0xf]  ;;  %v5617_v59 = vcombine.low %v7849_v19, %v7852_v31 }
  0x9a   : > { %v5542_v30 = vcombine.low %v2975_v18, %v2978_v4  ;;  %v5298_v25 = vcombine.low %v7521_v17, %v7524_v21  ;;  %v5618_v8 = vcombine.low %v7860_v54, %v7863_v51  ;;  %v6907_v36 = vld [vmem:[%s9192_s1 + $0x1c8] sm:$0xff]   ;;  %v7885_v17 = vld [vmem:[%s7190_s16 + $0x40] sm:$0xf]  ;;  %v7898_v5 = vld [vmem:[%s7190_s16 + $0x14] sm:$0x1] }
  0x9b   : > { %6214 = vmatpush3.bf16.msra.mxu1 %v6886_v43  ;;  %v7808_v43 = vld [vmem:[%s7190_s16 + $0x3c] sm:$0xf]  ;;  %v7888_v21 = vld [vmem:[%s7190_s16 + $0x48] sm:$0xf]  ;;  %v7891_v18 = vld [vmem:[%s7190_s16 + $0x4c] sm:$0xf] }
  0x9c   : > { %6215 = vmatprep.subr.bf16.mxu1 %v6890_v41  ;;  %v5293_v49 = vcombine.low %v7808_v43, %v7811_v11  ;;  %v7894_v4 = vld [vmem:[%s7190_s16 + $0x8] sm:$0x1]  ;;  %v7907_v42 = vld [vmem:[%s7190_s16 + $0x54] sm:$0xf] }
  0x9d   : > { %6392 = vmatmul.mubr.bf16.gmra.mrb[20].mxu0 %v5539_v32  ;;  %v2985_v32 = vsel %vm7502_vm5, %v2983_v24, %v2984_v55  ;;  %v1317_v47 = vrot.slane %v7894_v4, 5  ;;  %v7910_v24 = vld [vmem:[%s7190_s16 + $0x58] sm:$0xf]  ;;  %v8011_v4 = vld [vmem:[%s7190_s16 + $0x94] sm:$0xf] }
  0x9e   : > { %6184 = vmatmul.mubr.bf16.gmra.mrb[4].mxu1 %v5291_v1  ;;  %6395 = vmatprep.mubr.bf16.mxu0 %v5540_v62  ;;  %v7834_v1 = vld [vmem:[%s7190_s16 + $0x1c] sm:$0xf]  ;;  %v6911_v62 = vld [vmem:[%s9192_s1 + $0xb0] sm:$0xff]   ;;  %v5543_v6 = vcombine.low %v2982_v27, %v2985_v32  ;;  %v5620_v27 = vcombine.low %v7888_v21, %v7891_v18  ;;  %9219 = vst [vmem:[#allocation7_spill] sm:$0xff] %v8011_v4 }
  0x9f   : > { %6187 = vmatprep.mubr.bf16.mxu1 %v5292_v22  ;;  %6216 = vmatpush3.bf16.msra.mxu1 %v6890_v41  ;;  %v7816_v41 = vld [vmem:[%s7190_s16 + $0x48] sm:$0xf]  ;;  %v5616_v22 = vcombine.low %v7831_v38, %v7834_v1 }
  0xa0   : > { %6217 = vmatprep.subr.bf16.mxu1 %v6894_v33  ;;  %v5294_v60 = vcombine.low %v7816_v41, %v7819_v56 }
  0xa3   : > { %6218 = vmatpush3.bf16.msra.mxu1 %v6894_v33  ;;  %v5297_v33 = vcombine.low %v7494_v16, %v7513_v58  ;;  %v6913_v16 = vld [vmem:[%s9192_s1 + $0x1d0] sm:$0xff]   ;;  %v7882_v58 = vld [vmem:[%s7190_s16 + $0x3c] sm:$0xf] }
  0xa4   : > { %6219 = vmatprep.subr.bf16.mxu1 %v6899_v45 }
  0xa5   : > { %6396 = vmatmul.mubr.bf16.gmra.mrb[24].mxu0 %v5541_v40  ;;  %v3728_v40 = vshrl.u32 %v7834_v1, 16 }
  0xa6   : > { %6188 = vmatmul.mubr.bf16.gmra.mrb[8].mxu1 %v5293_v49  ;;  %6399 = vmatprep.mubr.bf16.mxu0 %v5542_v30  ;;  %v3718_v49 = vshll.u32 %v7831_v38, 16  ;;  %v5619_v30 = vcombine.low %v7882_v58, %v7885_v17 }
  0xa7   : > { %6191 = vmatprep.mubr.bf16.mxu1 %v5294_v60  ;;  %6220 = vmatpush3.bf16.msra.mxu1 %v6899_v45  ;;  %v3715_v45 = vshrl.u32 %v7831_v38, 16  ;;  %v6927_v60 = vld [vmem:[%s9192_s1 + $0x1e8] sm:$0xff]   ;;  %v3730_v38 = vrot.slane %v3728_v40, 4  ;;  %v6989_v40 = vld [vmem:[%s7190_s16 + $0x60] sm:$0xf] }
  0xa8   : > { %6221 = vmatprep.subr.bf16.mxu1 %v6905_v9 }
  0xab   : > { %6222 = vmatpush3.bf16.msra.mxu1 %v6905_v9  ;;  %v5299_v9 = vcombine.low %v7546_v10, %v7555_v13  ;;  %v6919_v10 = vld [vmem:[%s9192_s1 + $0x1d8] sm:$0xff]   ;;  %v5302_v13 = vcombine.low %v7633_v26, %v7639_v44  ;;  %v8004_v26 = vld [vmem:[%s7190_s16 + $0x90] sm:$0xf] }
  0xac   : > { %6223 = vmatprep.subr.bf16.mxu1 %v6911_v62  ;;  %9218 = vst [vmem:[#allocation6_spill] sm:$0xff] %v8004_v26 }
  0xad   : > { %6400 = vmatmul.mubr.bf16.gmra.mrb[28].mxu0 %v5543_v6 }
  0xae   : > { %6192 = vmatmul.mubr.bf16.gmra.mrb[12].mxu1 %v5295_v61  ;;  %6419 = vmatprep.mubr.bf16.mxu0 %v5616_v22  ;;  %v5300_v61 = vcombine.low %v7583_v2, %v7586_v15  ;;  %v7924_v22 = vld [vmem:[%s7190_s16 + $0x60] sm:$0xf]  ;;  %v7951_v15 = vld [vmem:[%s7190_s16 + $0x78] sm:$0xf] }
  0xaf   : > { %6195 = vmatprep.mubr.bf16.mxu1 %v5296_v7  ;;  %6224 = vmatpush3.bf16.msra.mxu1 %v6911_v62  ;;  %v7927_v7 = vld [vmem:[%s7190_s16 + $0x64] sm:$0xf]  ;;  %9215 = vst [vmem:[#allocation3_spill] sm:$0xff] %v7951_v15  ;;  %v5313_v62 = vrot.slane %v7732_v20, 9 }
  0xb0   : > { %6225 = vmatprep.subr.bf16.mxu1 %v6917_v39 }
  0xb3   : > { %6226 = vmatpush3.bf16.msra.mxu1 %v6917_v39  ;;  %v1314_v39 = vrot.slane %v7715_v29, 5  ;;  %v5301_v29 = vcombine.low %v7604_v50, %v7609_v46  ;;  %v5622_v50 = vcombine.low %v7924_v22, %v7927_v7  ;;  %v5312_v46 = vrot.slane %v7712_v35, 9 }
  0xb4   : > { %6259 = vmatprep.subr.bf16.mxu1 %v7857_v48  ;;  %v5303_v35 = vcombine.low %v7657_v14, %v7665_v34  ;;  %v5318_v14 = vrot.slane %v7816_v41, 9 }
  0xb5   : > { %6420 = vmatmul.mubr.bf16.vlgmr.msra.gmra.mrb[0].mxu0 %v5617_v59  ;;  %v1316_v2 = vrot.slane %v1314_v39, 4  ;;  %v1321_v59 = vrot.slane %v7735_v3, 5  ;;  %v7994_v6 = vsel %vm7502_vm5, %v5312_v46, %v1314_v39 }
  0xb6   : > { %6196 = vmatmul.mubr.bf16.gmra.mrb[16].mxu1 %v5297_v33  ;;  %6452 = vmatpush3.bf16.msra.mxu0 %v7685_v52  ;;  %v1324_v52 = vrot.slane %v7898_v5, 5  ;;  %v7954_v33 = vld [vmem:[%s7190_s16 + $0x7c] sm:$0xf] }
  0xb7   : > { %6199 = vmatprep.mubr.bf16.mxu1 %v5298_v25  ;;  %6423 = vmatprep.mubr.bf16.mxu0 %v5618_v8  ;;  %v7939_v25 = vld [vmem:[%s7190_s16 + $0x6c] sm:$0xf]  ;;  %v7942_v8 = vld [vmem:[%s7190_s16 + $0x70] sm:$0xf]  ;;  %v5624_v44 = vcombine.low %v7951_v15, %v7954_v33  ;;  %v8000_v20 = vsel %vm7502_vm5, %v1316_v2, %v1317_v47  ;;  %v1323_v32 = vrot.slane %v1321_v59, 4  ;;  %v1335_v47 = vrot.slane %v7778_v63, 5 }
  0xb8   : > { %6453 = vmatprep.subr.bf16.mxu0 %v6907_v36  ;;  %9214 = vst [vmem:[#allocation2_spill] sm:$0xff] %v7939_v25  ;;  %v5623_v3 = vcombine.low %v7939_v25, %v7942_v8  ;;  %v8016_v2 = vsel %vm7502_vm5, %v5313_v62, %v1321_v59  ;;  %v5344_v46 = vcombine.low %v7994_v6, %v8000_v20  ;;  %v5314_v63 = vrot.slane %v7744_v28, 9  ;;  %v8036_v59 = vld [vmem:[%s7190_s16 + $0x9c] sm:$0xf]  ;;  %v6931_v28 = vld [vmem:[%s9192_s1 + $0x1f0] sm:$0xff]  }
  0xb9   : > { %v8029_v62 = vsel %vm7502_vm5, %v1323_v32, %v1324_v52  ;;  %v5315_v6 = vrot.slane %v7775_v57, 9  ;;  %v1337_v52 = vrot.slane %v1335_v47, 4  ;;  %v6981_v32 = vld [vmem:[%s7190_s16 + $0x2c] sm:$0x1]  ;;  %v8044_v20 = vld [vmem:[%s7190_s16 + $0xa0] sm:$0xf] }
  0xba   : > { %6454 = vmatpush3.bf16.msra.mxu0 %v6907_v36  ;;  %v1328_v36 = vrot.slane %v7747_v0, 5  ;;  %v5316_v57 = vrot.slane %v7783_v12, 9  ;;  %v1356_v12 = vrot.slane %v7819_v56, 5  ;;  %v6990_v15 = vld [vmem:[%s7190_s16 + $0x68] sm:$0x1] }
  0xbb   : > { %6455 = vmatprep.subr.bf16.mxu0 %v6913_v16  ;;  %v1373_v25 = vrot.slane %v6990_v15, 5 }
  0xbc   : > { %v8054_v5 = vsel %vm7502_vm5, %v5314_v63, %v1328_v36  ;;  %v8076_v63 = vld [vmem:[%s7190_s16 + $0xac] sm:$0xf]  ;;  %v1358_v34 = vrot.slane %v1356_v12, 4 }
  0xbd   : > { %6424 = vmatmul.mubr.bf16.gmra.mrb[4].mxu0 %v5619_v30  ;;  %v5621_v30 = vcombine.low %v7907_v42, %v7910_v24 }
  0xbe   : > { %6200 = vmatmul.mubr.bf16.gmra.mrb[20].mxu1 %v5299_v9  ;;  %6427 = vmatprep.mubr.bf16.mxu0 %v5620_v27  ;;  %v7969_v9 = vld [vmem:[%s7190_s16 + $0x88] sm:$0xf] }
  0xbf   : > { %6203 = vmatprep.mubr.bf16.mxu1 %v5300_v61  ;;  %6456 = vmatpush3.bf16.msra.mxu0 %v6913_v16  ;;  %v7966_v61 = vld [vmem:[%s7190_s16 + $0x84] sm:$0xf]  ;;  %9217 = vst [vmem:[#allocation5_spill] sm:$0xff] %v7969_v9 }
  0xc0   : > { %6457 = vmatprep.subr.bf16.mxu0 %v6919_v10  ;;  %9216 = vst [vmem:[#allocation4_spill] sm:$0xff] %v7966_v61  ;;  %v6923_v16 = vld [vmem:[%s9192_s1 + $0x1e0] sm:$0xff]   ;;  %v5625_v39 = vcombine.low %v7966_v61, %v7969_v9 }
  0xc3   : > { %6458 = vmatpush3.bf16.msra.mxu0 %v6919_v10  ;;  %v1342_v10 = vrot.slane %v7786_v23, 5  ;;  %v8146_v23 = vld [vmem:[%s7190_s16 + $0xcc] sm:$0xf] }
  0xc4   : > { %6459 = vmatprep.subr.bf16.mxu0 %v6923_v16 }
  0xc5   : > { %6428 = vmatmul.mubr.bf16.gmra.mrb[8].mxu0 %v5621_v30  ;;  %v1344_v0 = vrot.slane %v1342_v10, 4  ;;  %v6982_v30 = vld [vmem:[%s7190_s16 + $0x38] sm:$0x1] }
  0xc6   : > { %6204 = vmatmul.mubr.bf16.gmra.mrb[24].mxu1 %v5301_v29  ;;  %6431 = vmatprep.mubr.bf16.mxu0 %v5622_v50  ;;  %v1330_v29 = vrot.slane %v1328_v36, 4  ;;  %v6980_v50 = vld [vmem:[%s7190_s16 + $0x20] sm:$0x1]  ;;  %v1345_v55 = vrot.slane %v6982_v30, 5  ;;  %v6935_v30 = vld [vmem:[%s9192_s1 + $0x1f8] sm:$0xff]  }
  0xc7   : > { %6207 = vmatprep.mubr.bf16.mxu1 %v5302_v13  ;;  %6460 = vmatpush3.bf16.msra.mxu0 %v6923_v16  ;;  %v1331_v27 = vrot.slane %v6980_v50, 5  ;;  %v1338_v16 = vrot.slane %v6981_v32, 5  ;;  %v1349_v50 = vrot.slane %v7811_v11, 5  ;;  %v8061_v11 = vld [vmem:[%s7190_s16 + $0xa8] sm:$0xf]  ;;  %v8069_v13 = vsel %vm7502_vm5, %v5315_v6, %v1335_v47 }
  0xc8   : > { %6461 = vmatprep.subr.bf16.mxu0 %v6927_v60  ;;  %v5317_v47 = vrot.slane %v7808_v43, 9  ;;  %v8091_v36 = vld [vmem:[%s7190_s16 + $0xb8] sm:$0xf]  ;;  %v6986_v43 = vld [vmem:[%s7190_s16 + $0x64] sm:$0xf] }
  0xc9   : > { %v8058_v32 = vsel %vm7502_vm5, %v1330_v29, %v1331_v27  ;;  %v8079_v29 = vld [vmem:[%s7190_s16 + $0xb4] sm:$0xf]  ;;  %v8086_v56 = vsel %vm7502_vm5, %v1337_v52, %v1338_v16  ;;  %v1351_v6 = vrot.slane %v1349_v50, 4  ;;  %v6983_v27 = vld [vmem:[%s7190_s16 + $0x44] sm:$0x1]  ;;  %v8104_v52 = vsel %vm7502_vm5, %v5316_v57, %v1342_v10 }
  0xca   : > { %v8108_v16 = vsel %vm7502_vm5, %v1344_v0, %v1345_v55  ;;  %v3724_v10 = vshll.u32 %v7834_v1, 16  ;;  %v8133_v57 = vsel %vm7502_vm5, %v5317_v47, %v1349_v50  ;;  %v1370_v41 = vrot.slane %v6986_v43, 5  ;;  %v8161_v43 = vld [vmem:[%s7190_s16 + $0xd0] sm:$0xf] }
  0xcb   : > { %6462 = vmatpush3.bf16.msra.mxu0 %v6927_v60  ;;  %v1352_v60 = vrot.slane %v6983_v27, 5  ;;  %v8111_v27 = vld [vmem:[%s7190_s16 + $0xc0] sm:$0xf]  ;;  %v3717_v50 = vrot.slane %v3715_v45, 4  ;;  %v8154_v47 = vsel %vm7502_vm5, %v5318_v14, %v1356_v12  ;;  %v6925_v45 = vld [vmem:[%s9192_s1 + $0xc8] sm:$0xff]  }
  0xcc   : > { %6463 = vmatprep.subr.bf16.mxu0 %v6931_v28  ;;  %v8166_v55 = vrot.slane %v3724_v10, 5  ;;  %v6987_v12 = vld [vmem:[%s7190_s16 + $0x54] sm:$0xf]  ;;  %v5320_v10 = vrot.slane %v6989_v40, 9  ;;  %v1372_v0 = vrot.slane %v1370_v41, 4 }
  0xcd   : > { %6432 = vmatmul.mubr.bf16.gmra.mrb[12].mxu0 %v5623_v3  ;;  %v5346_v3 = vcombine.low %v8054_v5, %v8058_v32  ;;  %v8116_v5 = vld [vmem:[%s7190_s16 + $0xc4] sm:$0xf]  ;;  %v8137_v32 = vsel %vm7502_vm5, %v1351_v6, %v1352_v60  ;;  %v3720_v60 = vrot.slane %v3718_v49, 5  ;;  %v5319_v14 = vrot.slane %v6987_v12, 9 }
  0xce   : > { %6208 = vmatmul.mubr.bf16.gmra.mrb[28].mxu1 %v5303_v35  ;;  %6435 = vmatprep.mubr.bf16.mxu0 %v5624_v44  ;;  %v6984_v44 = vld [vmem:[%s7190_s16 + $0x50] sm:$0x1]  ;;  %v9222_v12 = vcombine.low %v8016_v2, %v8029_v62  ;;  %v3731_v15 = vor.u32 %v3730_v38, %v8166_v55  ;;  %v9225_v49 = vshll.u32 %v7849_v19, 16  ;;  %v9227_v38 = vshrl.u32 %v7852_v31, 16 }
  0xcf   : > { %6227 = vmatprep.mubr.bf16.mxu1 %v5344_v46  ;;  %6464 = vmatpush3.bf16.msra.mxu0 %v6931_v28  ;;  %v1359_v35 = vrot.slane %v6984_v44, 5  ;;  %v8129_v28 = vld [vmem:[%s9192_s1 + $0x200] sm:$0xff]   ;;  %v6985_v44 = vld [vmem:[%s7190_s16 + $0x58] sm:$0xf]  ;;  %v3721_v40 = vor.u32 %v3720_v60, %v3717_v50  ;;  %v6991_v2 = vld [vmem:[%s7190_s16 + $0x70] sm:$0xf] }
  0xd0   : > { %6465 = vmatprep.subr.bf16.mxu0 %v6935_v30  ;;  %9220 = vst [vmem:[#allocation8_spill] sm:$0xff] %v8129_v28  ;;  %v1363_v46 = vrot.slane %v6985_v44, 5  ;;  %v8164_v44 = vld [vmem:[%s7190_s16 + $0x20] sm:$0x1]  ;;  %v1377_v62 = vrot.slane %v6991_v2, 5  ;;  %v6929_v50 = vld [vmem:[%s9192_s1 + $0xd0] sm:$0xff]  }
  0xd1   : > { %v8158_v6 = vsel %vm7502_vm5, %v1358_v34, %v1359_v35  ;;  %9221 = vst [vmem:[#allocation9_spill] sm:$0xff] %v8164_v44  ;;  %v6988_v34 = vld [vmem:[%s7190_s16 + $0x5c] sm:$0x1]  ;;  %v3734_v61 = vshll.u32 %v8164_v44, 16  ;;  %v3754_v2 = vrot.slane %v9227_v38, 4  ;;  %v3722_v44 = vrot.slane %v3721_v40, 4 }
  0xd2   : > { %v1366_v35 = vrot.slane %v6988_v34, 5  ;;  %v1365_v1 = vrot.slane %v1363_v46, 4  ;;  %v9223_v34 = vcombine.low %v8004_v26, %v8011_v4  ;;  %v3744_v26 = vrot.slane %v9225_v49, 5  ;;  %v6994_v38 = vld [vmem:[%s7190_s16 + $0x74] sm:$0x1] }
  0xd3   : > { %6466 = vmatpush3.bf16.msra.mxu0 %v6935_v30  ;;  %v3748_v30 = vshll.u32 %v7852_v31, 16  ;;  %v3736_v31 = vrot.slane %v3734_v61, 5  ;;  %v3772_v4 = vshll.u32 %v7863_v51, 16 }
  0xd4   : > { %6499 = vmatprep.subr.bf16.mxu0 %v8129_v28  ;;  %v8219_v49 = vsel %vm7502_vm5, %v1365_v1, %v1366_v35  ;;  %v3732_v35 = vrot.slane %v3731_v15, 4  ;;  %v1379_v1 = vrot.slane %v1377_v62, 4 }
  0xd5   : > { %6436 = vmatmul.mubr.bf16.gmra.mrb[16].mxu0 %v5625_v39  ;;  %v8212_v60 = vrot.slane %v3748_v30, 5  ;;  %v8223_v39 = vsel %vm7502_vm5, %v5320_v10, %v1370_v41  ;;  %v6995_v10 = vld [vmem:[%s7190_s16 + $0x78] sm:$0xf]  ;;  %v8263_v15 = vrot.slane %v3772_v4, 5 }
  0xd6   : > { %6228 = vmatmul.mubr.bf16.vlgmr.msra.gmra.mrb[0].mxu1 %v9222_v12  ;;  %6439 = vmatprep.mubr.bf16.mxu0 %v9223_v34  ;;  %v9224_v12 = vshrl.u32 %v7849_v19, 16  ;;  %v5322_v61 = vrot.slane %v6995_v10, 9  ;;  %v9231_v10 = vcombine.low %v8069_v13, %v8086_v56  ;;  %v9234_v13 = vcombine.low %v8104_v52, %v8108_v16 }
  0xd7   : > { %6260 = vmatpush3.bf16.msra.mxu1 %v7857_v48  ;;  %6231 = vmatprep.mubr.bf16.mxu1 %v5346_v3  ;;  %v8207_v48 = vsel %vm7502_vm5, %v5319_v14, %v1363_v46  ;;  %v8210_v3 = vld [vmem:[%s7190_s16 + $0x2c] sm:$0x1]  ;;  %v8227_v46 = vsel %vm7502_vm5, %v1372_v0, %v1373_v25  ;;  %v6933_v25 = vld [vmem:[%s9192_s1 + $0xd8] sm:$0xff]   ;;  %v3755_v0 = vor.u32 %v3754_v2, %v8212_v60  ;;  %v9230_v2 = vshll.u32 %v7860_v54, 16 }
  0xd8   : > { %v3741_v34 = vrot.slane %v9224_v12, 4  ;;  %6261 = vmatprep.subr.bf16.mxu1 %v6925_v45  ;;  %9226 = vst [vmem:[#allocation10_spill] sm:$0xff] %v8210_v3  ;;  %v6992_v12 = vld [vmem:[%s7190_s16 + $0x7c] sm:$0xf]  ;;  %v6993_v14 = vld [vmem:[%s7190_s16 + $0x6c] sm:$0xf]  ;;  %v3727_v56 = vsel %vm7226_vm2, %v3722_v44, %v8166_v55 }
  0xd9   : > { %v1384_v19 = vrot.slane %v6992_v12, 5  ;;  %v5321_v30 = vrot.slane %v6993_v14, 9  ;;  %v1380_v12 = vrot.slane %v6994_v38, 5  ;;  %v3758_v41 = vshll.u32 %v8210_v3, 16  ;;  %v6996_v14 = vld [vmem:[%s7190_s16 + $0x80] sm:$0x1] }
  0xda   : > { %v3745_v9 = vor.u32 %v3744_v26, %v3741_v34  ;;  %v1387_v38 = vrot.slane %v6996_v14, 5  ;;  %v9229_v34 = vshrl.u32 %v7860_v54, 16  ;;  %v3768_v28 = vrot.slane %v9230_v2, 5  ;;  %v8261_v26 = vld [vmem:[%s7190_s16 + $0x38] sm:$0x1] }
  0xdb   : > { %6262 = vmatpush3.bf16.msra.mxu1 %v6925_v45  ;;  %v1386_v40 = vrot.slane %v1384_v19, 4  ;;  %v9228_v45 = vcombine.low %v8036_v59, %v8044_v20  ;;  %v9232_v14 = vcombine.low %v8061_v11, %v8076_v63  ;;  %v3796_v2 = vshll.u32 %v7885_v17, 16 }
  0xdc   : > { %6263 = vmatprep.subr.bf16.mxu1 %v6929_v50  ;;  %v3765_v3 = vrot.slane %v9229_v34, 4  ;;  %v9233_v34 = vshrl.u32 %v7863_v51, 16  ;;  %v8278_v4 = vsel %vm7502_vm5, %v1379_v1, %v1380_v12  ;;  %v3746_v51 = vrot.slane %v3745_v9, 4 }
  0xdd   : > { %6440 = vmatmul.mubr.bf16.gmra.mrb[20].mxu0 %v9228_v45  ;;  %v8258_v45 = vsel %vm7502_vm5, %v5321_v30, %v1377_v62  ;;  %v3737_v62 = vsel %vm7226_vm2, %v3732_v35, %v3736_v31  ;;  %v6936_v30 = vld [vmem:[%s9192_s1 + $0xe0] sm:$0xff]   ;;  %v3756_v52 = vrot.slane %v3755_v0, 4  ;;  %v3760_v16 = vrot.slane %v3758_v41, 5  ;;  %v6997_v31 = vld [vmem:[%s7190_s16 + $0x88] sm:$0xf] }
  0xde   : > { %6232 = vmatmul.mubr.bf16.gmra.mrb[4].mxu1 %v9231_v10  ;;  %6443 = vmatprep.mubr.bf16.mxu0 %v9232_v14  ;;  %v3778_v54 = vrot.slane %v9233_v34, 4  ;;  %v8289_v55 = vsel %vm7502_vm5, %v1386_v40, %v1387_v38  ;;  %v3769_v44 = vor.u32 %v3768_v28, %v3765_v3  ;;  %v3782_v9 = vshll.u32 %v8261_v26, 16  ;;  %v6998_v14 = vld [vmem:[%s7190_s16 + $0x84] sm:$0xf] }
  0xdf   : > { %6235 = vmatprep.mubr.bf16.mxu1 %v9234_v13  ;;  %6264 = vmatpush3.bf16.msra.mxu1 %v6929_v50  ;;  %v8285_v50 = vsel %vm7502_vm5, %v5322_v61, %v1384_v19  ;;  %v1391_v12 = vrot.slane %v6997_v31, 5  ;;  %v9235_v35 = vshrl.u32 %v7882_v58, 16  ;;  %v9236_v0 = vshll.u32 %v7882_v58, 16  ;;  %v8311_v58 = vld [vmem:[%s7190_s16 + $0x44] sm:$0x1] }
  0xe0   : > { %6265 = vmatprep.subr.bf16.mxu1 %v6933_v25  ;;  %v3779_v41 = vor.u32 %v3778_v54, %v8263_v15  ;;  %v8298_v61 = vrot.slane %v3796_v2, 5  ;;  %v9237_v40 = vshrl.u32 %v7885_v17, 16  ;;  %v8302_v28 = vcombine.low %v3727_v56, %v3737_v62  ;;  %v6938_v54 = vld [vmem:[%s9192_s1 + $0xe8] sm:$0xff]   ;;  %v6999_v2 = vld [vmem:[%s7190_s16 + $0x94] sm:$0xf] }
  0xe1   : > { %v3789_v1 = vrot.slane %v9235_v35, 4  ;;  %v3792_v19 = vrot.slane %v9236_v0, 5  ;;  %v5353_v3 = vcombine.low %v8258_v45, %v8278_v4  ;;  %v3751_v10 = vsel %vm7226_vm2, %v3746_v51, %v8212_v60  ;;  %v8476_v45 = vld [vmem:[%s7190_s16 + $0x74] sm:$0x1] }
  0xe2   : > { %v3802_v38 = vrot.slane %v9237_v40, 4  ;;  %v5323_v34 = vrot.slane %v6998_v14, 9  ;;  %v3761_v17 = vsel %vm7226_vm2, %v3756_v52, %v3760_v16  ;;  %v1398_v13 = vrot.slane %v6999_v2, 5  ;;  %v7000_v52 = vld [vmem:[%s7190_s16 + $0x8c] sm:$0x1] }
  0xe3   : > { %6266 = vmatpush3.bf16.msra.mxu1 %v6933_v25  ;;  %v5354_v25 = vcombine.low %v8285_v50, %v8289_v55  ;;  %v3820_v56 = vshll.u32 %v7891_v18, 16  ;;  %v9238_v60 = vcombine.low %v8079_v29, %v8091_v36  ;;  %v3770_v62 = vrot.slane %v3769_v44, 4 }
  0xe4   : > { %6267 = vmatprep.subr.bf16.mxu1 %v6936_v30  ;;  %v3784_v51 = vrot.slane %v3782_v9, 5  ;;  %v1393_v31 = vrot.slane %v1391_v12, 4  ;;  %v1394_v16 = vrot.slane %v7000_v52, 5  ;;  %v9239_v35 = vcombine.low %v8133_v57, %v8137_v32  ;;  %v7001_v57 = vld [vmem:[%s7190_s16 + $0x90] sm:$0xf] }
  0xe5   : > { %6444 = vmatmul.mubr.bf16.gmra.mrb[24].mxu0 %v9238_v60  ;;  %v9240_v0 = vcombine.low %v8111_v27, %v8116_v5  ;;  %v3780_v40 = vrot.slane %v3779_v41, 4  ;;  %v3793_v14 = vor.u32 %v3792_v19, %v3789_v1  ;;  %v3803_v2 = vor.u32 %v3802_v38, %v8298_v61  ;;  %v6940_v1 = vld [vmem:[%s9192_s1 + $0xf0] sm:$0xff]   ;;  %v7002_v38 = vld [vmem:[%s7190_s16 + $0x98] sm:$0x1] }
  0xe6   : > { %6236 = vmatmul.mubr.bf16.gmra.mrb[8].mxu1 %v9239_v35  ;;  %v3806_v44 = vshll.u32 %v8311_v58, 16  ;;  %v9241_v9 = vcombine.low %v8154_v47, %v8158_v6  ;;  %v8337_v60 = vcombine.low %v3751_v10, %v3761_v17  ;;  %v5324_v32 = vrot.slane %v7001_v57, 9  ;;  %v8349_v6 = vld [vmem:[%s7190_s16 + $0x50] sm:$0x1] }
  0xe7   : > { %6447 = vmatprep.mubr.bf16.mxu0 %v9240_v0  ;;  %6268 = vmatpush3.bf16.msra.mxu1 %v6936_v30  ;;  %v9242_v52 = vshrl.u32 %v7888_v21, 16  ;;  %v9243_v41 = vshll.u32 %v7888_v21, 16  ;;  %v1400_v19 = vrot.slane %v1398_v13, 4  ;;  %v1401_v47 = vrot.slane %v7002_v38, 5 }
  0xe8   : > { %6239 = vmatprep.mubr.bf16.mxu1 %v9241_v9  ;;  %6269 = vmatprep.subr.bf16.mxu1 %v6938_v54  ;;  %v8351_v30 = vrot.slane %v3820_v56, 5  ;;  %v9244_v10 = vshrl.u32 %v7891_v18, 16  ;;  %v3775_v21 = vsel %vm7226_vm2, %v3770_v62, %v8263_v15  ;;  %v8360_v9 = vsel %vm7502_vm5, %v5323_v34, %v1391_v12  ;;  %v7003_v62 = vld [vmem:[%s7190_s16 + $0xa0] sm:$0xf] }
  0xe9   : > { %v3813_v35 = vrot.slane %v9242_v52, 4  ;;  %v3816_v0 = vrot.slane %v9243_v41, 5  ;;  %v8364_v57 = vsel %vm7502_vm5, %v1393_v31, %v1394_v16  ;;  %v3844_v52 = vshll.u32 %v7910_v24, 16 }
  0xea   : > { %v3826_v17 = vrot.slane %v9244_v10, 4  ;;  %v3785_v56 = vsel %vm7226_vm2, %v3780_v40, %v3784_v51  ;;  %v3794_v41 = vrot.slane %v3793_v14, 4  ;;  %v3804_v18 = vrot.slane %v3803_v2, 4 }
  0xeb   : > { %v3808_v38 = vrot.slane %v3806_v44, 5  ;;  %6270 = vmatpush3.bf16.msra.mxu1 %v6938_v54  ;;  %v8371_v15 = vsel %vm7502_vm5, %v5324_v32, %v1398_v13  ;;  %v3817_v12 = vor.u32 %v3816_v0, %v3813_v35  ;;  %v3830_v34 = vshll.u32 %v8349_v6, 16  ;;  %v6942_v13 = vld [vmem:[%s9192_s1 + $0xf8] sm:$0xff]  }
  0xec   : > { %v1405_v31 = vrot.slane %v7003_v62, 5  ;;  %v8377_v16 = vsel %vm7502_vm5, %v1400_v19, %v1401_v47  ;;  %v3827_v51 = vor.u32 %v3826_v17, %v8351_v30  ;;  %6271 = vmatprep.subr.bf16.mxu1 %v6940_v1  ;;  %v9245_v40 = vshrl.u32 %v7907_v42, 16  ;;  %v7004_v35 = vld [vmem:[%s7190_s16 + $0x9c] sm:$0xf] }
  0xed   : > { %v9246_v14 = vshll.u32 %v7907_v42, 16  ;;  %v9247_v44 = vcombine.low %v8146_v23, %v8161_v43  ;;  %v5355_v32 = vcombine.low %v8360_v9, %v8364_v57  ;;  %v5325_v0 = vrot.slane %v7004_v35, 9  ;;  %v8394_v19 = vld [vmem:[%s7190_s16 + $0x5c] sm:$0x1]  ;;  %v9265_v57 = vld [vmem:[#allocation4_spill] sm:$0xff] }
  0xee   : > { %v3837_v54 = vrot.slane %v9245_v40, 4  ;;  %v8396_v47 = vrot.slane %v3844_v52, 5  ;;  %v9248_v42 = vshrl.u32 %v7910_v24, 16  ;;  %v9249_v17 = vcombine.low %v8207_v48, %v8219_v49 }
  0xef   : > { %v3840_v2 = vrot.slane %v9246_v14, 5  ;;  %6448 = vmatmul.mubr.bf16.gmra.mrb[28].mxu0 %v9247_v44  ;;  %v5658_v62 = vcombine.low %v3775_v21, %v3785_v56  ;;  %v3799_v40 = vsel %vm7226_vm2, %v3794_v41, %v8298_v61  ;;  %v3809_v14 = vsel %vm7226_vm2, %v3804_v18, %v3808_v38  ;;  %v7005_v21 = vld [vmem:[%s7190_s16 + $0xa4] sm:$0x1]  ;;  %6272 = vmatpush3.bf16.msra.mxu1 %v6940_v1 }
  0xf0   : > { %v3850_v10 = vrot.slane %v9248_v42, 4  ;;  %6240 = vmatmul.mubr.bf16.gmra.mrb[12].mxu1 %v9249_v17  ;;  %6467 = vmatprep.mubr.bf16.mxu0 %v8302_v28  ;;  %v3868_v52 = vshll.u32 %v7927_v7, 16  ;;  %v9250_v24 = vcombine.low %v8223_v39, %v8227_v46  ;;  %v5356_v48 = vcombine.low %v8371_v15, %v8377_v16  ;;  %v8426_v42 = vld [vmem:[%s7190_s16 + $0x68] sm:$0x1] }
  0xf1   : > { %v3818_v49 = vrot.slane %v3817_v12, 4  ;;  %v1407_v28 = vrot.slane %v1405_v31, 4  ;;  %v1408_v56 = vrot.slane %v7005_v21, 5  ;;  %v3828_v61 = vrot.slane %v3827_v51, 4  ;;  %6273 = vmatprep.subr.bf16.mxu1 %v6942_v13  ;;  %v7006_v12 = vld [vmem:[%s7190_s16 + $0xac] sm:$0xf] }
  0xf2   : > { %6243 = vmatprep.mubr.bf16.mxu1 %v9250_v24  ;;  %v3832_v41 = vrot.slane %v3830_v34, 5  ;;  %v3841_v18 = vor.u32 %v3840_v2, %v3837_v54  ;;  %v3854_v38 = vshll.u32 %v8394_v19, 16  ;;  %v8417_v44 = vcombine.low %v3799_v40, %v3809_v14 }
  0xf3   : > { %v8421_v39 = vsel %vm7502_vm5, %v5325_v0, %v1405_v31  ;;  %v3851_v46 = vor.u32 %v3850_v10, %v8396_v47  ;;  %v1412_v35 = vrot.slane %v7006_v12, 5  ;;  %v9251_v1 = vshrl.u32 %v7924_v22, 16  ;;  %v7007_v10 = vld [vmem:[%s7190_s16 + $0xa8] sm:$0xf]  ;;  %6274 = vmatpush3.bf16.msra.mxu1 %v6942_v13 }
  0xf4   : > { %v9252_v51 = vshll.u32 %v7924_v22, 16  ;;  %v8432_v2 = vrot.slane %v3868_v52, 5  ;;  %v9253_v17 = vshrl.u32 %v7927_v7, 16  ;;  %v3823_v31 = vsel %vm7226_vm2, %v3818_v49, %v8351_v30  ;;  %v6939_v22 = vld [vmem:[%s9192_s1 + $0x208] sm:$0xff]   ;;  %v8454_v49 = vld [vmem:[%s9192_s1 + $0x100] sm:$0xff]  }
  0xf5   : > { %v3861_v34 = vrot.slane %v9251_v1, 4  ;;  %v8441_v0 = vsel %vm7502_vm5, %v1407_v28, %v1408_v56  ;;  %v5326_v14 = vrot.slane %v7007_v10, 9  ;;  %v3892_v24 = vshll.u32 %v7942_v8, 16  ;;  %6547 = vmatprep.subr.bf16.mxu1 %v8454_v49  ;;  %v7009_v56 = vld [vmem:[%s7190_s16 + $0xb0] sm:$0x1] }
  0xf6   : > { %v3864_v54 = vrot.slane %v9252_v51, 5  ;;  %v3874_v40 = vrot.slane %v9253_v17, 4  ;;  %v3833_v7 = vsel %vm7226_vm2, %v3828_v61, %v3832_v41  ;;  %v3842_v52 = vrot.slane %v3841_v18, 4  ;;  %v9254_v41 = vld [vmem:[#allocation8_spill] sm:$0xff] }
  0xf7   : > { %v3856_v21 = vrot.slane %v3854_v38, 5  ;;  %v3916_v30 = vshll.u32 %v7954_v33, 16  ;;  %6468 = vmatmul.mubr.bf16.vlgmr.msra.gmra.mrb[0].mxu0 %v8337_v60  ;;  %v3852_v13 = vrot.slane %v3851_v46, 4  ;;  %v1414_v28 = vrot.slane %v1412_v35, 4  ;;  %v6941_v18 = vld [vmem:[%s9192_s1 + $0x210] sm:$0xff]   ;;  %v9255_v60 = vld [vmem:[#allocation2_spill] sm:$0xff] }
  0xf8   : > { %v1415_v12 = vrot.slane %v7009_v56, 5  ;;  %v3878_v61 = vshll.u32 %v8426_v42, 16  ;;  %6244 = vmatmul.mubr.bf16.gmra.mrb[16].mxu1 %v5353_v3  ;;  %6500 = vmatpush3.bf16.msra.mxu0 %v9254_v41  ;;  %v3865_v38 = vor.u32 %v3864_v54, %v3861_v34  ;;  %v3875_v1 = vor.u32 %v3874_v40, %v8432_v2  ;;  %v9259_v54 = vld [vmem:[#allocation3_spill] sm:$0xff] }
  0xf9   : > { %v9256_v46 = vshrl.u32 %v9255_v60, 16  ;;  %v9257_v17 = vshll.u32 %v9255_v60, 16  ;;  %6247 = vmatprep.mubr.bf16.mxu1 %v5354_v25  ;;  %6471 = vmatprep.mubr.bf16.mxu0 %v5658_v62  ;;  %v8478_v4 = vrot.slane %v3892_v24, 5  ;;  %v9258_v3 = vshrl.u32 %v7942_v8, 16 }
  0xfa   : > { %v9260_v40 = vshrl.u32 %v9259_v54, 16  ;;  %v9261_v41 = vshll.u32 %v9259_v54, 16  ;;  %6501 = vmatprep.subr.bf16.mxu0 %v6939_v22  ;;  %v5357_v50 = vcombine.low %v8421_v39, %v8441_v0  ;;  %v8488_v55 = vrot.slane %v3916_v30, 5 }
  0xfb   : > { %v3885_v51 = vrot.slane %v9256_v46, 4  ;;  %v3888_v10 = vrot.slane %v9257_v17, 5  ;;  %v3898_v34 = vrot.slane %v9258_v3, 4  ;;  %v5660_v46 = vcombine.low %v3823_v31, %v3833_v7  ;;  %v7010_v3 = vld [vmem:[%s7190_s16 + $0xb8] sm:$0xf] }
  0xfc   : > { %v3909_v56 = vrot.slane %v9260_v40, 4  ;;  %v3912_v60 = vrot.slane %v9261_v41, 5  ;;  %v9262_v25 = vshrl.u32 %v7954_v33, 16  ;;  %v3847_v8 = vsel %vm7226_vm2, %v3842_v52, %v8396_v47  ;;  %v8499_v31 = vld [vmem:[%s7190_s16 + $0x80] sm:$0x1]  ;;  %6502 = vmatpush3.bf16.msra.mxu0 %v6939_v22 }
  0xfd   : > { %v3857_v24 = vsel %vm7226_vm2, %v3852_v13, %v3856_v21  ;;  %v3880_v17 = vrot.slane %v3878_v61, 5  ;;  %v1419_v54 = vrot.slane %v7010_v3, 5  ;;  %v3866_v7 = vrot.slane %v3865_v38, 4  ;;  %6503 = vmatprep.subr.bf16.mxu0 %v6941_v18  ;;  %v7011_v61 = vld [vmem:[%s7190_s16 + $0xb4] sm:$0xf]  ;;  %v6943_v38 = vld [vmem:[%s9192_s1 + $0x218] sm:$0xff]  }
  0xfe   : > { %v3922_v62 = vrot.slane %v9262_v25, 4  ;;  %v3876_v30 = vrot.slane %v3875_v1, 4  ;;  %v3889_v40 = vor.u32 %v3888_v10, %v3885_v51  ;;  %v3902_v33 = vshll.u32 %v8476_v45, 16  ;;  %v9263_v10 = vld [vmem:[#allocation5_spill] sm:$0xff] }
  0xff   : > { %v8504_v47 = vsel %vm7502_vm5, %v5326_v14, %v1412_v35  ;;  %v8508_v52 = vsel %vm7502_vm5, %v1414_v28, %v1415_v12  ;;  %v3899_v21 = vor.u32 %v3898_v34, %v8478_v4  ;;  %v3913_v13 = vor.u32 %v3912_v60, %v3909_v56  ;;  %6472 = vmatmul.mubr.bf16.gmra.mrb[4].mxu0 %v8417_v44  ;;  %v7012_v12 = vld [vmem:[%s7190_s16 + $0xbc] sm:$0x1]  ;;  %v9264_v34 = vld [vmem:[#allocation7_spill] sm:$0xff] }
 0x100   : > { %v5327_v22 = vrot.slane %v7011_v61, 9  ;;  %v3923_v1 = vor.u32 %v3922_v62, %v8488_v55  ;;  %v3926_v51 = vshll.u32 %v8499_v31, 16  ;;  %v3940_v35 = vshll.u32 %v9263_v10, 16  ;;  %6248 = vmatmul.mubr.bf16.gmra.mrb[20].mxu1 %v5355_v32  ;;  %6475 = vmatprep.mubr.bf16.mxu0 %v5660_v46 }
 0x101   : > { %v5661_v14 = vcombine.low %v3847_v8, %v3857_v24  ;;  %v1421_v28 = vrot.slane %v1419_v54, 4  ;;  %v1422_v41 = vrot.slane %v7012_v12, 5  ;;  %v3964_v56 = vshll.u32 %v9264_v34, 16  ;;  %6251 = vmatprep.mubr.bf16.mxu1 %v5356_v48  ;;  %6504 = vmatpush3.bf16.msra.mxu0 %v6941_v18  ;;  %v8547_v18 = vld [vmem:[%s7190_s16 + $0x98] sm:$0x1] }
 0x102   : > { %v3871_v60 = vsel %vm7226_vm2, %v3866_v7, %v8432_v2  ;;  %v3881_v25 = vsel %vm7226_vm2, %v3876_v30, %v3880_v17  ;;  %v3890_v44 = vrot.slane %v3889_v40, 4  ;;  %v3904_v62 = vrot.slane %v3902_v33, 5  ;;  %v6946_v2 = vld [vmem:[%s9192_s1 + $0x220] sm:$0xff]   ;;  %6505 = vmatprep.subr.bf16.mxu0 %v6943_v38  ;;  %v8540_v30 = vld [vmem:[%s7190_s16 + $0x8c] sm:$0x1] }
 0x103   : > { %v3900_v8 = vrot.slane %v3899_v21, 4  ;;  %v3914_v9 = vrot.slane %v3913_v13, 4  ;;  %v9266_v32 = vshrl.u32 %v9265_v57, 16  ;;  %v9267_v24 = vshll.u32 %v9265_v57, 16  ;;  %v9269_v40 = vld [vmem:[#allocation6_spill] sm:$0xff] }
 0x104   : > { %v3924_v17 = vrot.slane %v3923_v1, 4  ;;  %v3928_v7 = vrot.slane %v3926_v51, 5  ;;  %v8542_v15 = vrot.slane %v3940_v35, 5  ;;  %v9268_v16 = vshrl.u32 %v9263_v10, 16 }
 0x105   : > { %v3933_v46 = vrot.slane %v9266_v32, 4  ;;  %v3936_v3 = vrot.slane %v9267_v24, 5  ;;  %v9270_v33 = vshrl.u32 %v9269_v40, 16  ;;  %v9271_v13 = vshll.u32 %v9269_v40, 16  ;;  %6506 = vmatpush3.bf16.msra.mxu0 %v6943_v38 }
 0x106   : > { %v3946_v48 = vrot.slane %v9268_v16, 4  ;;  %v8553_v12 = vrot.slane %v3964_v56, 5  ;;  %v9272_v1 = vshrl.u32 %v9264_v34, 16  ;;  %v5358_v35 = vcombine.low %v8504_v47, %v8508_v52  ;;  %6507 = vmatprep.subr.bf16.mxu0 %v6946_v2 }
 0x107   : > { %v3957_v21 = vrot.slane %v9270_v33, 4  ;;  %v3960_v61 = vrot.slane %v9271_v13, 5  ;;  %v5662_v57 = vcombine.low %v3871_v60, %v3881_v25  ;;  %v8561_v10 = vsel %vm7502_vm5, %v5327_v22, %v1419_v54  ;;  %6476 = vmatmul.mubr.bf16.gmra.mrb[8].mxu0 %v5661_v14  ;;  %v8602_v33 = vld [vmem:[%s7190_s16 + $0xa4] sm:$0x1] }
 0x108   : > { %v3970_v51 = vrot.slane %v9272_v1, 4  ;;  %v8565_v32 = vsel %vm7502_vm5, %v1421_v28, %v1422_v41  ;;  %v3895_v56 = vsel %vm7226_vm2, %v3890_v44, %v8478_v4  ;;  %v3905_v34 = vsel %vm7226_vm2, %v3900_v8, %v3904_v62  ;;  %v6949_v4 = vld [vmem:[%s9192_s1 + $0x228] sm:$0xff]   ;;  %6252 = vmatmul.mubr.bf16.gmra.mrb[24].mxu1 %v5357_v50 }
 0x109   : > { %v3937_v24 = vor.u32 %v3936_v3, %v3933_v46  ;;  %v3950_v47 = vshll.u32 %v8540_v30, 16  ;;  %v3919_v54 = vsel %vm7226_vm2, %v3914_v9, %v8488_v55  ;;  %v3929_v52 = vsel %vm7226_vm2, %v3924_v17, %v3928_v7  ;;  %6479 = vmatprep.mubr.bf16.mxu0 %v5662_v57  ;;  %6255 = vmatprep.mubr.bf16.mxu1 %v5358_v35 }
 0x10a   : > { %v3947_v22 = vor.u32 %v3946_v48, %v8542_v15  ;;  %v3974_v28 = vshll.u32 %v8547_v18, 16  ;;  %v4006_v38 = vshll.u32 %v8061_v11, 16  ;;  %v3961_v41 = vor.u32 %v3960_v61, %v3957_v21  ;;  %6508 = vmatpush3.bf16.msra.mxu0 %v6946_v2 }
 0x10b   : > { %v3971_v60 = vor.u32 %v3970_v51, %v8553_v12  ;;  %v3988_v55 = vshll.u32 %v8044_v20, 16  ;;  %v4016_v25 = vshrl.u32 %v8076_v63, 16  ;;  %v4027_v44 = vshrl.u32 %v8079_v29, 16  ;;  %6509 = vmatprep.subr.bf16.mxu0 %v6949_v4 }
 0x10c   : > { %v5359_v62 = vcombine.low %v8561_v10, %v8565_v32  ;;  %v4012_v14 = vshll.u32 %v8076_v63, 16  ;;  %v5663_v8 = vcombine.low %v3895_v56, %v3905_v34  ;;  %v5664_v9 = vcombine.low %v3919_v54, %v3929_v52  ;;  %v6952_v63 = vld [vmem:[%s9192_s1 + $0x230] sm:$0xff]   ;;  %v7013_v56 = vld [vmem:[%s7190_s16 + $0xc] sm:$0xf] }
 0x10d   : > { %v3938_v46 = vrot.slane %v3937_v24, 4  ;;  %v3952_v3 = vrot.slane %v3950_v47, 5  ;;  %v3948_v17 = vrot.slane %v3947_v22, 4  ;;  %v3976_v7 = vrot.slane %v3974_v28, 5  ;;  %v7014_v34 = vld [vmem:[%s7190_s16 + $0x10] sm:$0xf] }
 0x10e   : > { %v9273_v16 = vshrl.u32 %v8036_v59, 16  ;;  %v9274_v39 = vshll.u32 %v8036_v59, 16  ;;  %v3962_v50 = vrot.slane %v3961_v41, 4  ;;  %v3972_v40 = vrot.slane %v3971_v60, 4  ;;  %6510 = vmatpush3.bf16.msra.mxu0 %v6949_v4  ;;  %v8618_v47 = vld [vmem:[%s7190_s16 + $0xb0] sm:$0x1] }
 0x10f   : > { %v8604_v2 = vrot.slane %v3988_v55, 5  ;;  %v9275_v21 = vshrl.u32 %v8044_v20, 16  ;;  %v9276_v59 = vshrl.u32 %v8061_v11, 16  ;;  %v4008_v1 = vrot.slane %v4006_v38, 5  ;;  %6511 = vmatprep.subr.bf16.mxu0 %v6952_v63  ;;  %v6955_v22 = vld [vmem:[%s9192_s1 + $0x238] sm:$0xff]   ;;  %6480 = vmatmul.mubr.bf16.gmra.mrb[12].mxu0 %v5663_v8 }
 0x110   : > { %v3981_v48 = vrot.slane %v9273_v16, 4  ;;  %v3984_v0 = vrot.slane %v9274_v39, 5  ;;  %v8610_v51 = vrot.slane %v4012_v14, 5  ;;  %v4018_v35 = vrot.slane %v4016_v25, 4  ;;  %6256 = vmatmul.mubr.bf16.gmra.mrb[28].mxu1 %v5359_v62  ;;  %6483 = vmatprep.mubr.bf16.mxu0 %v5664_v9  ;;  %v7015_v14 = vld [vmem:[%s7190_s16 + $0x18] sm:$0xf] }
 0x111   : > { %v3994_v13 = vrot.slane %v9275_v21, 4  ;;  %v4005_v61 = vrot.slane %v9276_v59, 4  ;;  %v4030_v57 = vshll.u32 %v8079_v29, 16  ;;  %v4040_v10 = vshrl.u32 %v8091_v36, 16  ;;  %v7016_v8 = vld [vmem:[%s7190_s16 + $0x1c] sm:$0xf] }
 0x112   : > { %v4051_v32 = vshrl.u32 %v8111_v27, 16  ;;  %v5432_v24 = vcombine.low %v7013_v56, %v7014_v34  ;;  %v4054_v20 = vshll.u32 %v8111_v27, 16  ;;  %v3943_v11 = vsel %vm7226_vm2, %v3938_v46, %v8542_v15  ;;  %v7017_v46 = vld [vmem:[%s7190_s16 + $0x24] sm:$0xf]  ;;  %6512 = vmatpush3.bf16.msra.mxu0 %v6952_v63  ;;  %v8650_v63 = vld [vmem:[%s7190_s16 + $0xbc] sm:$0x1] }
 0x113   : > { %v3985_v54 = vor.u32 %v3984_v0, %v3981_v48  ;;  %v3998_v52 = vshll.u32 %v8602_v33, 16  ;;  %v3953_v28 = vsel %vm7226_vm2, %v3948_v17, %v3952_v3  ;;  %v3967_v27 = vsel %vm7226_vm2, %v3962_v50, %v8553_v12  ;;  %v7018_v3 = vld [vmem:[%s7190_s16 + $0x28] sm:$0xf]  ;;  %6513 = vmatprep.subr.bf16.mxu0 %v6955_v22 }
 0x114   : > { %v3977_v15 = vsel %vm7226_vm2, %v3972_v40, %v3976_v7  ;;  %v4036_v4 = vshll.u32 %v8091_v36, 16  ;;  %v3995_v38 = vor.u32 %v3994_v13, %v8604_v2  ;;  %v4009_v41 = vor.u32 %v4008_v1, %v4005_v61  ;;  %6275 = vmatprep.mubr.bf16.mxu1 %v5432_v24 }
 0x115   : > { %v4019_v60 = vor.u32 %v4018_v35, %v8610_v51  ;;  %v4022_v55 = vshll.u32 %v8618_v47, 16  ;;  %v4064_v25 = vshrl.u32 %v8116_v5, 16  ;;  %v5433_v12 = vcombine.low %v7015_v14, %v7016_v8  ;;  %v7022_v8 = vld [vmem:[%s7190_s16 + $0x3c] sm:$0xf] }
 0x116   : > { %v5434_v17 = vcombine.low %v7017_v46, %v7018_v3  ;;  %v4060_v36 = vshll.u32 %v8116_v5, 16  ;;  %v5665_v62 = vcombine.low %v3943_v11, %v3953_v28  ;;  %v5666_v9 = vcombine.low %v3967_v27, %v3977_v15  ;;  %6514 = vmatpush3.bf16.msra.mxu0 %v6955_v22 }
 0x117   : > { %v3986_v7 = vrot.slane %v3985_v54, 4  ;;  %v4000_v16 = vrot.slane %v3998_v52, 5  ;;  %v4029_v48 = vrot.slane %v4027_v44, 4  ;;  %v4032_v39 = vrot.slane %v4030_v57, 5  ;;  %v8657_v57 = vld [vmem:[%s7190_s16 + $0xc8] sm:$0x1] }
 0x118   : > { %v8647_v0 = vrot.slane %v4036_v4, 5  ;;  %v4042_v50 = vrot.slane %v4040_v10, 4  ;;  %v3996_v40 = vrot.slane %v3995_v38, 4  ;;  %v4010_v21 = vrot.slane %v4009_v41, 4  ;;  %6484 = vmatmul.mubr.bf16.gmra.mrb[16].mxu0 %v5665_v62  ;;  %6276 = vmatmul.mubr.bf16.vlgmr.msra.gmra.mrb[0].mxu1 %v5433_v12  ;;  %v7020_v38 = vld [vmem:[%s7190_s16 + $0x30] sm:$0xf] }
 0x119   : > { %v4020_v13 = vrot.slane %v4019_v60, 4  ;;  %v4024_v59 = vrot.slane %v4022_v55, 5  ;;  %v4053_v5 = vrot.slane %v4051_v32, 4  ;;  %v4056_v61 = vrot.slane %v4054_v20, 5  ;;  %6487 = vmatprep.mubr.bf16.mxu0 %v5666_v9  ;;  %6555 = vmatpush3.bf16.msra.mxu1 %v8454_v49  ;;  %v7021_v41 = vld [vmem:[%s7190_s16 + $0x34] sm:$0xf] }
 0x11a   : > { %v8652_v1 = vrot.slane %v4060_v36, 5  ;;  %v4066_v35 = vrot.slane %v4064_v25, 4  ;;  %v4075_v29 = vshrl.u32 %v8146_v23, 16  ;;  %v4078_v44 = vshll.u32 %v8146_v23, 16  ;;  %6279 = vmatprep.mubr.bf16.mxu1 %v5434_v17  ;;  %v7023_v12 = vld [vmem:[%s7190_s16 + $0x40] sm:$0xf] }
 0x11b   : > { %v4088_v10 = vshrl.u32 %v8161_v43, 16  ;;  %v4033_v56 = vor.u32 %v4032_v39, %v4029_v48  ;;  %v4043_v34 = vor.u32 %v4042_v50, %v8647_v0  ;;  %v4046_v24 = vshll.u32 %v8650_v63, 16  ;;  %v8686_v62 = vld [vmem:[%s7190_s16 + $0xd4] sm:$0x1]  ;;  %v7025_v39 = vld [vmem:[%s7190_s16 + $0x1c] sm:$0xf] }
 0x11c   : > { %v3991_v32 = vsel %vm7226_vm2, %v3986_v7, %v8604_v2  ;;  %v4001_v20 = vsel %vm7226_vm2, %v3996_v40, %v4000_v16  ;;  %v4015_v23 = vsel %vm7226_vm2, %v4010_v21, %v8610_v51  ;;  %v4084_v11 = vshll.u32 %v8161_v43, 16  ;;  %v7019_v51 = vld [vmem:[%s9192_s1 + $0x108] sm:$0xff]   ;;  %v7024_v9 = vld [vmem:[%s9192_s1 + $0x110] sm:$0xff]  }
 0x11d   : > { %v4025_v54 = vsel %vm7226_vm2, %v4020_v13, %v4024_v59  ;;  %v4057_v52 = vor.u32 %v4056_v61, %v4053_v5  ;;  %v4067_v2 = vor.u32 %v4066_v35, %v8652_v1  ;;  %v4070_v22 = vshll.u32 %v8657_v57, 16  ;;  %6548 = vmatprep.subr.bf16.mxu1 %v7019_v51  ;;  %v7026_v59 = vld [vmem:[%s7190_s16 + $0x48] sm:$0xf]  ;;  %v7027_v5 = vld [vmem:[%s7190_s16 + $0x4c] sm:$0xf] }
 0x11e   : > { %v4077_v43 = vrot.slane %v4075_v29, 4  ;;  %v4080_v28 = vrot.slane %v4078_v44, 5  ;;  %v5667_v27 = vcombine.low %v3991_v32, %v4001_v20  ;;  %v4034_v49 = vrot.slane %v4033_v56, 4  ;;  %6556 = vmatpush3.bf16.msra.mxu1 %v7019_v51  ;;  %v7028_v29 = vld [vmem:[%s9192_s1 + $0x118] sm:$0xff]   ;;  %v7030_v32 = vld [vmem:[%s7190_s16 + $0x28] sm:$0xf] }
 0x11f   : > { %v4044_v15 = vrot.slane %v4043_v34, 4  ;;  %v4048_v4 = vrot.slane %v4046_v24, 5  ;;  %v5435_v60 = vcombine.low %v7020_v38, %v7021_v41  ;;  %v5668_v55 = vcombine.low %v4015_v23, %v4025_v54  ;;  %6549 = vmatprep.subr.bf16.mxu1 %v7024_v9  ;;  %v9277_v34 = vld [vmem:[#allocation9_spill] sm:$0xff]  ;;  %v7036_v38 = vld [vmem:[%s7190_s16 + $0x24] sm:$0xf] }
 0x120   : > { %v8681_v25 = vrot.slane %v4084_v11, 5  ;;  %v4090_v14 = vrot.slane %v4088_v10, 4  ;;  %v5436_v46 = vcombine.low %v7022_v8, %v7023_v12  ;;  %v4058_v3 = vrot.slane %v4057_v52, 4  ;;  %6488 = vmatmul.mubr.bf16.gmra.mrb[20].mxu0 %v5667_v27  ;;  %v7029_v10 = vld [vmem:[%s7190_s16 + $0x18] sm:$0xf]  ;;  %v9278_v8 = vld [vmem:[#allocation10_spill] sm:$0xff] }
 0x121   : > { %v4068_v17 = vrot.slane %v4067_v2, 4  ;;  %v4072_v36 = vrot.slane %v4070_v22, 5  ;;  %v4081_v7 = vor.u32 %v4080_v28, %v4077_v43  ;;  %v4039_v16 = vsel %vm7226_vm2, %v4034_v49, %v8647_v0  ;;  %6280 = vmatmul.mubr.bf16.gmra.mrb[4].mxu1 %v5435_v60  ;;  %6491 = vmatprep.mubr.bf16.mxu0 %v5668_v55  ;;  %v7031_v52 = vld [vmem:[%s7190_s16 + $0x34] sm:$0xf]  ;;  %v7033_v51 = vld [vmem:[%s7190_s16 + $0x58] sm:$0xf] }
 0x122   : > { %v4049_v48 = vsel %vm7226_vm2, %v4044_v15, %v4048_v4  ;;  %v4438_v50 = vrot.slane %v7025_v39, 5  ;;  %v4091_v40 = vor.u32 %v4090_v14, %v8681_v25  ;;  %v4094_v21 = vshll.u32 %v8686_v62, 16  ;;  %6283 = vmatprep.mubr.bf16.mxu1 %v5436_v46  ;;  %6557 = vmatpush3.bf16.msra.mxu1 %v7024_v9  ;;  %v7032_v22 = vld [vmem:[%s7190_s16 + $0x54] sm:$0xf]  ;;  %v8716_v28 = vld [vmem:[%s7190_s16 + $0x78] sm:$0xf] }
 0x123   : > { %v4063_v13 = vsel %vm7226_vm2, %v4058_v3, %v8652_v1  ;;  %v4073_v0 = vsel %vm7226_vm2, %v4068_v17, %v4072_v36  ;;  %v5437_v61 = vcombine.low %v7026_v59, %v7027_v5  ;;  %v5669_v35 = vcombine.low %v4039_v16, %v4049_v48  ;;  %6550 = vmatprep.subr.bf16.mxu1 %v7028_v29  ;;  %v7035_v4 = vld [vmem:[%s9192_s1 + $0x120] sm:$0xff]   ;;  %v7037_v46 = vld [vmem:[%s7190_s16 + $0x30] sm:$0xf]  ;;  %v8739_v9 = vld [vmem:[%s7190_s16 + $0x7c] sm:$0xf] }
 0x124   : > { %v4082_v44 = vrot.slane %v4081_v7, 4  ;;  %v5680_v56 = vrot.slane %v7029_v10, 9  ;;  %v4440_v1 = vrot.slane %v4438_v50, 4  ;;  %v4441_v24 = vrot.slane %v9277_v34, 5  ;;  %v7039_v48 = vld [vmem:[%s7190_s16 + $0x80] sm:$0x1] }
 0x125   : > { %v4445_v20 = vrot.slane %v7030_v32, 5  ;;  %v5670_v23 = vcombine.low %v4063_v13, %v4073_v0  ;;  %v4092_v11 = vrot.slane %v4091_v40, 4  ;;  %v4096_v54 = vrot.slane %v4094_v21, 5  ;;  %v7040_v21 = vld [vmem:[%s7190_s16 + $0x60] sm:$0xf]  ;;  %v7042_v59 = vld [vmem:[%s9192_s1 + $0x128] sm:$0xff]  }
 0x126   : > { %v4452_v2 = vrot.slane %v7031_v52, 5  ;;  %v5438_v43 = vcombine.low %v7032_v22, %v7033_v51  ;;  %6558 = vmatpush3.bf16.msra.mxu1 %v7028_v29  ;;  %v2369_v27 = vshrl.u32 %v8716_v28, 16  ;;  %v2372_v49 = vshll.u32 %v8716_v28, 16  ;;  %v7041_v13 = vld [vmem:[%s7190_s16 + $0x64] sm:$0xf] }
 0x127   : > { %v4087_v15 = vsel %vm7226_vm2, %v4082_v44, %v8681_v25  ;;  %6551 = vmatprep.subr.bf16.mxu1 %v7035_v4  ;;  %v5681_v41 = vrot.slane %v7036_v38, 9  ;;  %v8729_v60 = vsel %vm7502_vm5, %v5680_v56, %v4438_v50  ;;  %v4442_v55 = vsel %vm7502_vm5, %v4440_v1, %v4441_v24  ;;  %v7043_v29 = vld [vmem:[%s7190_s16 + $0x40] sm:$0xf]  ;;  %v7044_v1 = vld [vmem:[%s7190_s16 + $0x3c] sm:$0xf] }
 0x128   : > { %6492 = vmatmul.mubr.bf16.gmra.mrb[24].mxu0 %v5669_v35  ;;  %v4447_v14 = vrot.slane %v4445_v20, 4  ;;  %v4448_v25 = vrot.slane %v9278_v8, 5  ;;  %v4097_v12 = vsel %vm7226_vm2, %v4092_v11, %v4096_v54  ;;  %v5682_v3 = vrot.slane %v7037_v46, 9  ;;  %v7045_v24 = vld [vmem:[%s7190_s16 + $0x4c] sm:$0xf] }
 0x129   : > { %6284 = vmatmul.mubr.bf16.gmra.mrb[8].mxu1 %v5437_v61  ;;  %6495 = vmatprep.mubr.bf16.mxu0 %v5670_v23  ;;  %v4454_v17 = vrot.slane %v4452_v2, 4  ;;  %v4455_v36 = vrot.slane %v8261_v26, 5  ;;  %v2378_v7 = vshll.u32 %v8739_v9, 16  ;;  %v2382_v16 = vshrl.u32 %v8739_v9, 16  ;;  %v7046_v11 = vld [vmem:[%s7190_s16 + $0x6c] sm:$0xf] }
 0x12a   : > { %v2388_v39 = vshll.u32 %v7039_v48, 16  ;;  %6287 = vmatprep.mubr.bf16.mxu1 %v5438_v43  ;;  %6559 = vmatpush3.bf16.msra.mxu1 %v7035_v4  ;;  %v8744_v50 = vrot.slane %v2369_v27, 4  ;;  %v8746_v40 = vrot.slane %v2372_v49, 5  ;;  %v5439_v26 = vcombine.low %v7040_v21, %v7041_v13  ;;  %v7047_v54 = vld [vmem:[%s7190_s16 + $0x70] sm:$0xf] }
 0x12b   : > { %v5712_v0 = vcombine.low %v8729_v60, %v4442_v55  ;;  %6552 = vmatprep.subr.bf16.mxu1 %v7042_v59  ;;  %v5671_v5 = vcombine.low %v4087_v15, %v4097_v12  ;;  %v8756_v61 = vsel %vm7502_vm5, %v5681_v41, %v4445_v20  ;;  %v8760_v35 = vsel %vm7502_vm5, %v4447_v14, %v4448_v25  ;;  %v8784_v51 = vld [vmem:[%s7190_s16 + $0x84] sm:$0xf]  ;;  %v8787_v43 = vld [vmem:[%s7190_s16 + $0x88] sm:$0xf]  ;;  %v8792_v49 = vld [vmem:[%s7190_s16 + $0x90] sm:$0xf] }
 0x12c   : > { %v4459_v44 = vrot.slane %v7043_v29, 5  ;;  %v8765_v10 = vsel %vm7502_vm5, %v5682_v3, %v4452_v2  ;;  %v8769_v56 = vsel %vm7502_vm5, %v4454_v17, %v4455_v36  ;;  %v5683_v34 = vrot.slane %v7044_v1, 9  ;;  %v8795_v15 = vld [vmem:[%s7190_s16 + $0x94] sm:$0xf]  ;;  %v8806_v14 = vld [vmem:[%s7190_s16 + $0x9c] sm:$0xf] }
 0x12d   : > { %v4466_v32 = vrot.slane %v7045_v24, 5  ;;  %v8773_v20 = vrot.slane %v2382_v16, 4  ;;  %v8775_v23 = vrot.slane %v2388_v39, 5  ;;  %v5440_v52 = vcombine.low %v7046_v11, %v7047_v54  ;;  %v7052_v41 = vld [vmem:[%s9192_s1 + $0x130] sm:$0xff]   ;;  %v8809_v8 = vld [vmem:[%s7190_s16 + $0xa0] sm:$0xf] }
 0x12e   : > { %v5441_v2 = vcombine.low %v8716_v28, %v8739_v9  ;;  %6560 = vmatpush3.bf16.msra.mxu1 %v7042_v59  ;;  %v5713_v22 = vcombine.low %v8756_v61, %v8760_v35  ;;  %v5442_v27 = vcombine.low %v8784_v51, %v8787_v43  ;;  %v5443_v4 = vcombine.low %v8792_v49, %v8795_v15  ;;  %v7056_v36 = vld [vmem:[%s7190_s16 + $0x58] sm:$0xf]  ;;  %v7060_v61 = vld [vmem:[%s7190_s16 + $0x64] sm:$0xf] }
 0x12f   : > { %v4462_v38 = vrot.slane %v8311_v58, 5  ;;  %6553 = vmatprep.subr.bf16.mxu1 %v7052_v41  ;;  %v5714_v60 = vcombine.low %v8765_v10, %v8769_v56  ;;  %v4461_v55 = vrot.slane %v4459_v44, 4  ;;  %v5444_v25 = vcombine.low %v8806_v14, %v8809_v8  ;;  %v7055_v58 = vld [vmem:[%s7190_s16 + $0x48] sm:$0xf]  ;;  %v7061_v29 = vld [vmem:[%s9192_s1 + $0x138] sm:$0xff]  }
 0x130   : > { %6496 = vmatmul.mubr.bf16.gmra.mrb[28].mxu0 %v5671_v5  ;;  %v5684_v12 = vrot.slane %v7055_v58, 9  ;;  %v8816_v46 = vsel %vm7502_vm5, %v5683_v34, %v4459_v44  ;;  %v4468_v3 = vrot.slane %v4466_v32, 4  ;;  %v4469_v17 = vrot.slane %v8349_v6, 5  ;;  %v7059_v5 = vld [vmem:[%s7190_s16 + $0x54] sm:$0xf] }
 0x131   : > { %6288 = vmatmul.mubr.bf16.gmra.mrb[12].mxu1 %v5439_v26  ;;  %6515 = vmatprep.mubr.bf16.mxu0 %v5712_v0  ;;  %v4473_v16 = vrot.slane %v7056_v36, 5  ;;  %v2345_v48 = vshrl.u32 %v7046_v11, 16  ;;  %v2348_v39 = vshll.u32 %v7046_v11, 16  ;;  %v2354_v21 = vshll.u32 %v7047_v54, 16  ;;  %v8821_v26 = vld [vmem:[%s7190_s16 + $0xac] sm:$0xf] }
 0x132   : > { %6291 = vmatprep.mubr.bf16.mxu1 %v5440_v52  ;;  %6561 = vmatpush3.bf16.msra.mxu1 %v7052_v41  ;;  %v2358_v13 = vshrl.u32 %v7047_v54, 16  ;;  %v8824_v0 = vld [vmem:[%s7190_s16 + $0xa8] sm:$0xf]  ;;  %v5685_v6 = vrot.slane %v7059_v5, 9  ;;  %v4480_v35 = vrot.slane %v7060_v61, 5  ;;  %v8836_v56 = vsel %vm7502_vm5, %v4461_v55, %v4462_v38 }
 0x133   : > { %v5445_v59 = vcombine.low %v8824_v0, %v8821_v26  ;;  %6554 = vmatprep.subr.bf16.mxu1 %v7061_v29  ;;  %v7062_v44 = vld [vmem:[%s7190_s16 + $0x70] sm:$0xf]  ;;  %v8840_v1 = vsel %vm7502_vm5, %v5684_v12, %v4466_v32  ;;  %v4476_v34 = vrot.slane %v8394_v19, 5  ;;  %v8844_v24 = vld [vmem:[%s7190_s16 + $0xb8] sm:$0xf]  ;;  %v8853_v52 = vsel %vm7502_vm5, %v4468_v3, %v4469_v17 }
 0x134   : > { %v4487_v10 = vrot.slane %v7062_v44, 5  ;;  %v8847_v11 = vld [vmem:[%s7190_s16 + $0xb4] sm:$0xf]  ;;  %v4475_v38 = vrot.slane %v4473_v16, 4  ;;  %v7065_v41 = vld [vmem:[%s7190_s16 + $0x60] sm:$0xf] }
 0x135   : > { %v5446_v54 = vcombine.low %v8847_v11, %v8844_v24  ;;  %v5686_v55 = vrot.slane %v7065_v41, 9  ;;  %v4483_v32 = vrot.slane %v8426_v42, 5  ;;  %v2347_v19 = vrot.slane %v2345_v48, 4  ;;  %v7066_v61 = vld [vmem:[%s7190_s16 + $0x6c] sm:$0xf] }
 0x136   : > { %6562 = vmatpush3.bf16.msra.mxu1 %v7061_v29  ;;  %v2350_v58 = vrot.slane %v2348_v39, 5  ;;  %v8857_v12 = vrot.slane %v2354_v21, 5  ;;  %v2360_v36 = vrot.slane %v2358_v13, 4  ;;  %v4482_v5 = vrot.slane %v4480_v35, 4  ;;  %v8870_v39 = vld [vmem:[%s7190_s16 + $0xc4] sm:$0xf] }
 0x137   : > { %v5687_v44 = vrot.slane %v7066_v61, 9  ;;  %v4489_v3 = vrot.slane %v4487_v10, 4  ;;  %v4490_v17 = vrot.slane %v8476_v45, 5  ;;  %v5715_v41 = vcombine.low %v8816_v46, %v8836_v56  ;;  %v8873_v21 = vld [vmem:[%s7190_s16 + $0xc0] sm:$0xf] }
 0x138   : > { %6516 = vmatmul.mubr.bf16.vlgmr.msra.gmra.mrb[0].mxu0 %v5713_v22  ;;  %v5716_v42 = vcombine.low %v8840_v1, %v8853_v52  ;;  %v8867_v48 = vsel %vm7502_vm5, %v5685_v6, %v4473_v16  ;;  %v5447_v13 = vcombine.low %v8873_v21, %v8870_v39  ;;  %v8882_v45 = vsel %vm7502_vm5, %v4475_v38, %v4476_v34  ;;  %v7069_v46 = vld [vmem:[%s7190_s16 + $0x74] sm:$0x1]  ;;  %v7070_v6 = vld [vmem:[%s7190_s16 + $0x7c] sm:$0xf]  ;;  %v7071_v34 = vld [vmem:[%s7190_s16 + $0x78] sm:$0xf] }
 0x139   : > { %6292 = vmatmul.mubr.bf16.gmra.mrb[16].mxu1 %v5441_v2  ;;  %6519 = vmatprep.mubr.bf16.mxu0 %v5714_v60  ;;  %v8886_v22 = vsel %vm7502_vm5, %v5686_v55, %v4480_v35  ;;  %v2364_v16 = vshll.u32 %v7069_v46, 16  ;;  %v4494_v29 = vrot.slane %v7070_v6, 5  ;;  %v2351_v28 = vor.u32 %v2350_v58, %v2347_v19  ;;  %v7072_v61 = vld [vmem:[%s7190_s16 + $0x84] sm:$0xf] }
 0x13a   : > { %6295 = vmatprep.mubr.bf16.mxu1 %v5442_v27  ;;  %v2361_v2 = vor.u32 %v2360_v36, %v8857_v12  ;;  %v2375_v60 = vor.u32 %v8746_v40, %v8744_v50  ;;  %v8898_v56 = vrot.slane %v2378_v7, 5  ;;  %v8902_v35 = vsel %vm7502_vm5, %v4482_v5, %v4483_v32 }
 0x13b   : > { %v8906_v1 = vsel %vm7502_vm5, %v5687_v44, %v4487_v10  ;;  %v8910_v27 = vsel %vm7502_vm5, %v4489_v3, %v4490_v17  ;;  %v5688_v52 = vrot.slane %v7071_v34, 9  ;;  %v2393_v50 = vshrl.u32 %v8784_v51, 16 }
 0x13c   : > { %v2396_v9 = vshll.u32 %v8784_v51, 16  ;;  %v2402_v7 = vshll.u32 %v8787_v43, 16  ;;  %v2406_v40 = vshrl.u32 %v8787_v43, 16  ;;  %v5717_v38 = vcombine.low %v8867_v48, %v8882_v45 }
 0x13d   : > { %v8919_v10 = vrot.slane %v2364_v16, 5  ;;  %v4496_v55 = vrot.slane %v4494_v29, 4  ;;  %v4497_v32 = vrot.slane %v8499_v31, 5  ;;  %v8922_v19 = vrot.slane %v2351_v28, 4 }
 0x13e   : > { %v8924_v58 = vrot.slane %v2361_v2, 4  ;;  %v8926_v36 = vrot.slane %v2375_v60, 4  ;;  %v2385_v51 = vor.u32 %v8773_v20, %v8898_v56  ;;  %v5718_v43 = vcombine.low %v8886_v22, %v8902_v35  ;;  %v7073_v22 = vld [vmem:[%s7190_s16 + $0x88] sm:$0xf] }
 0x13f   : > { %v5719_v5 = vcombine.low %v8906_v1, %v8910_v27  ;;  %v8936_v31 = vsel %vm7502_vm5, %v5688_v52, %v4494_v29  ;;  %v5689_v44 = vrot.slane %v7072_v61, 9  ;;  %v2395_v3 = vrot.slane %v2393_v50, 4  ;;  %v7075_v52 = vld [vmem:[%s7190_s16 + $0x8c] sm:$0x1] }
 0x140   : > { %6520 = vmatmul.mubr.bf16.gmra.mrb[4].mxu0 %v5715_v41  ;;  %v2398_v17 = vrot.slane %v2396_v9, 5  ;;  %v8939_v48 = vrot.slane %v2402_v7, 5  ;;  %v2408_v45 = vrot.slane %v2406_v40, 4  ;;  %v8946_v20 = vsel %vm7502_vm5, %v4496_v55, %v4497_v32  ;;  %v7074_v41 = vld [vmem:[%s7190_s16 + $0x94] sm:$0xf] }
 0x141   : > { %6296 = vmatmul.mubr.bf16.gmra.mrb[20].mxu1 %v5443_v4  ;;  %6523 = vmatprep.mubr.bf16.mxu0 %v5716_v42  ;;  %v4501_v46 = vrot.slane %v7073_v22, 5  ;;  %v4504_v16 = vrot.slane %v8540_v30, 5  ;;  %v4508_v6 = vrot.slane %v7074_v41, 5  ;;  %v2357_v4 = vsel %vm7226_vm2, %v8922_v19, %v8857_v12 }
 0x142   : > { %6299 = vmatprep.mubr.bf16.mxu1 %v5444_v25  ;;  %v2367_v42 = vsel %vm7226_vm2, %v8924_v58, %v8919_v10  ;;  %v2381_v30 = vsel %vm7226_vm2, %v8926_v36, %v8898_v56  ;;  %v2386_v29 = vrot.slane %v2385_v51, 4  ;;  %v2417_v28 = vshrl.u32 %v8792_v49, 16  ;;  %v7076_v56 = vld [vmem:[%s7190_s16 + $0x90] sm:$0xf] }
 0x143   : > { %v2420_v25 = vshll.u32 %v8792_v49, 16  ;;  %v2426_v2 = vshll.u32 %v8795_v15, 16  ;;  %v2430_v60 = vshrl.u32 %v8795_v15, 16  ;;  %v8972_v12 = vsel %vm7502_vm5, %v5689_v44, %v4501_v46 }
 0x144   : > { %v2399_v35 = vor.u32 %v2398_v17, %v2395_v3  ;;  %v2409_v34 = vor.u32 %v2408_v45, %v8939_v48  ;;  %v2412_v50 = vshll.u32 %v7075_v52, 16  ;;  %v4503_v9 = vrot.slane %v4501_v46, 4 }
 0x145   : > { %v5690_v7 = vrot.slane %v7076_v56, 9  ;;  %v4510_v40 = vrot.slane %v4508_v6, 4  ;;  %v4511_v10 = vrot.slane %v8547_v18, 5  ;;  %v2441_v49 = vshrl.u32 %v8806_v14, 16 }
 0x146   : > { %v2444_v55 = vshll.u32 %v8806_v14, 16  ;;  %v2450_v15 = vshll.u32 %v8809_v8, 16  ;;  %v2454_v32 = vshrl.u32 %v8809_v8, 16  ;;  %v2419_v19 = vrot.slane %v2417_v28, 4  ;;  %v7078_v28 = vld [vmem:[%s7190_s16 + $0x9c] sm:$0xf] }
 0x147   : > { %v2422_v58 = vrot.slane %v2420_v25, 5  ;;  %v8982_v36 = vrot.slane %v2426_v2, 5  ;;  %v2432_v51 = vrot.slane %v2430_v60, 4  ;;  %v2391_v61 = vsel %vm7226_vm2, %v2386_v29, %v8775_v23  ;;  %v7079_v2 = vld [vmem:[%s7190_s16 + $0xa0] sm:$0xf] }
 0x148   : > { %6524 = vmatmul.mubr.bf16.gmra.mrb[8].mxu0 %v5717_v38  ;;  %v2400_v18 = vrot.slane %v2399_v35, 4  ;;  %v2410_v44 = vrot.slane %v2409_v34, 4  ;;  %v2414_v3 = vrot.slane %v2412_v50, 5  ;;  %v8992_v14 = vsel %vm7502_vm5, %v4503_v9, %v4504_v16  ;;  %v7077_v38 = vld [vmem:[%s7190_s16 + $0x98] sm:$0x1] }
 0x149   : > { %6300 = vmatmul.mubr.bf16.gmra.mrb[24].mxu1 %v5445_v59  ;;  %6527 = vmatprep.mubr.bf16.mxu0 %v5718_v43  ;;  %v8996_v8 = vsel %vm7502_vm5, %v5690_v7, %v4508_v6  ;;  %v9000_v23 = vsel %vm7502_vm5, %v4510_v40, %v4511_v10  ;;  %v2436_v17 = vshll.u32 %v7077_v38, 16  ;;  %v2443_v59 = vrot.slane %v2441_v49, 4  ;;  %v7081_v50 = vld [vmem:[%s7190_s16 + $0xac] sm:$0xf] }
 0x14a   : > { %6303 = vmatprep.mubr.bf16.mxu1 %v5446_v54  ;;  %v2446_v43 = vrot.slane %v2444_v55, 5  ;;  %v9006_v45 = vrot.slane %v2450_v15, 5  ;;  %v2456_v22 = vrot.slane %v2454_v32, 4  ;;  %v5480_v46 = vcombine.low %v2357_v4, %v2367_v42 }
 0x14b   : > { %v5720_v16 = vcombine.low %v8936_v31, %v8946_v20  ;;  %v2423_v41 = vor.u32 %v2422_v58, %v2419_v19  ;;  %v2433_v6 = vor.u32 %v2432_v51, %v8982_v36  ;;  %v2405_v29 = vsel %vm7226_vm2, %v2400_v18, %v8939_v48  ;;  %v7080_v20 = vld [vmem:[%s7190_s16 + $0xa4] sm:$0x1] }
 0x14c   : > { %v2415_v54 = vsel %vm7226_vm2, %v2410_v44, %v2414_v3  ;;  %v5691_v25 = vrot.slane %v7078_v28, 9  ;;  %v4515_v60 = vrot.slane %v7079_v2, 5  ;;  %v5481_v35 = vcombine.low %v2381_v30, %v2391_v61 }
 0x14d   : > { %v5721_v4 = vcombine.low %v8972_v12, %v8992_v14  ;;  %v5722_v31 = vcombine.low %v8996_v8, %v9000_v23  ;;  %v2460_v42 = vshll.u32 %v7080_v20, 16  ;;  %v2438_v34 = vrot.slane %v2436_v17, 5  ;;  %v7083_v17 = vld [vmem:[%s7190_s16 + $0xb0] sm:$0x1] }
 0x14e   : > { %v2447_v52 = vor.u32 %v2446_v43, %v2443_v59  ;;  %v2457_v48 = vor.u32 %v2456_v22, %v9006_v45  ;;  %v4522_v9 = vrot.slane %v7081_v50, 5  ;;  %v5482_v56 = vcombine.low %v2405_v29, %v2415_v54  ;;  %v7086_v50 = vld [vmem:[%s7190_s16 + $0xbc] sm:$0x1] }
 0x14f   : > { %v2424_v7 = vrot.slane %v2423_v41, 4  ;;  %v2434_v40 = vrot.slane %v2433_v6, 4  ;;  %v4518_v30 = vrot.slane %v8602_v33, 5  ;;  %v9031_v12 = vsel %vm7502_vm5, %v5691_v25, %v4515_v60  ;;  %v7082_v33 = vld [vmem:[%s7190_s16 + $0xa8] sm:$0xf] }
 0x150   : > { %6528 = vmatmul.mubr.bf16.gmra.mrb[12].mxu0 %v5719_v5  ;;  %v4517_v10 = vrot.slane %v4515_v60, 4  ;;  %v2465_v49 = vshrl.u32 %v8824_v0, 16  ;;  %v2468_v55 = vshll.u32 %v8824_v0, 16  ;;  %v2462_v15 = vrot.slane %v2460_v42, 5  ;;  %v7085_v60 = vld [vmem:[%s7190_s16 + $0xc4] sm:$0xf] }
 0x151   : > { %6304 = vmatmul.mubr.bf16.gmra.mrb[28].mxu1 %v5447_v13  ;;  %6531 = vmatprep.mubr.bf16.mxu0 %v5720_v16  ;;  %v5692_v32 = vrot.slane %v7082_v33, 9  ;;  %v2474_v1 = vshll.u32 %v8821_v26, 16  ;;  %v2478_v27 = vshrl.u32 %v8821_v26, 16  ;;  %v2448_v5 = vrot.slane %v2447_v52, 4 }
 0x152   : > { %6339 = vmatprep.mubr.bf16.mxu1 %v5480_v46  ;;  %v2458_v19 = vrot.slane %v2457_v48, 4  ;;  %v4524_v58 = vrot.slane %v4522_v9, 4  ;;  %v4525_v51 = vrot.slane %v8618_v47, 5  ;;  %v2489_v0 = vshrl.u32 %v8847_v11, 16 }
 0x153   : > { %v2492_v61 = vshll.u32 %v8847_v11, 16  ;;  %v2498_v13 = vshll.u32 %v8844_v24, 16  ;;  %v2502_v18 = vshrl.u32 %v8844_v24, 16  ;;  %v2429_v44 = vsel %vm7226_vm2, %v2424_v7, %v8982_v36 }
 0x154   : > { %v2439_v26 = vsel %vm7226_vm2, %v2434_v40, %v2438_v34  ;;  %v2467_v3 = vrot.slane %v2465_v49, 4  ;;  %v2470_v14 = vrot.slane %v2468_v55, 5  ;;  %v4519_v47 = vsel %vm7502_vm5, %v4517_v10, %v4518_v30  ;;  %v7087_v40 = vld [vmem:[%s7190_s16 + $0xb4] sm:$0xf]  ;;  %v7088_v49 = vld [vmem:[%s7190_s16 + $0xc0] sm:$0xf] }
 0x155   : > { %v4523_v8 = vsel %vm7502_vm5, %v5692_v32, %v4522_v9  ;;  %v9055_v11 = vrot.slane %v2474_v1, 5  ;;  %v2480_v23 = vrot.slane %v2478_v27, 4  ;;  %v2453_v24 = vsel %vm7226_vm2, %v2448_v5, %v9006_v45  ;;  %v7084_v45 = vld [vmem:[%s7190_s16 + $0xb8] sm:$0xf] }
 0x156   : > { %v2463_v36 = vsel %vm7226_vm2, %v2458_v19, %v2462_v15  ;;  %v4526_v38 = vsel %vm7502_vm5, %v4524_v58, %v4525_v51  ;;  %v2484_v59 = vshll.u32 %v7083_v17, 16  ;;  %v2491_v43 = vrot.slane %v2489_v0, 4 }
 0x157   : > { %v2494_v22 = vrot.slane %v2492_v61, 5  ;;  %v9065_v46 = vrot.slane %v2498_v13, 5  ;;  %v2504_v16 = vrot.slane %v2502_v18, 4  ;;  %v5483_v41 = vcombine.low %v2429_v44, %v2439_v26  ;;  %v7089_v61 = vld [vmem:[%s7190_s16 + $0xd0] sm:$0xf] }
 0x158   : > { %6532 = vmatmul.mubr.bf16.gmra.mrb[16].mxu0 %v5721_v4  ;;  %v5723_v6 = vcombine.low %v9031_v12, %v4519_v47  ;;  %v2471_v29 = vor.u32 %v2470_v14, %v2467_v3  ;;  %v4529_v54 = vrot.slane %v7084_v45, 5  ;;  %v5484_v28 = vcombine.low %v2453_v24, %v2463_v36  ;;  %v7090_v3 = vld [vmem:[%s7190_s16 + $0xc8] sm:$0x1]  ;;  %v7091_v36 = vld [vmem:[%s7190_s16 + $0xcc] sm:$0xf] }
 0x159   : > { %6340 = vmatmul.mubr.bf16.vlgmr.msra.gmra.mrb[16].mxu1 %v5481_v35  ;;  %6535 = vmatprep.mubr.bf16.mxu0 %v5722_v31  ;;  %v5724_v25 = vcombine.low %v4523_v8, %v4526_v38  ;;  %v2481_v2 = vor.u32 %v2480_v23, %v9055_v11  ;;  %v4536_v20 = vrot.slane %v7085_v60, 5  ;;  %v2513_v4 = vshrl.u32 %v8873_v21, 16 }
 0x15a   : > { %6343 = vmatprep.mubr.bf16.mxu1 %v5482_v56  ;;  %v2516_v42 = vshll.u32 %v8873_v21, 16  ;;  %v2522_v34 = vshll.u32 %v8870_v39, 16  ;;  %v2526_v52 = vshrl.u32 %v8870_v39, 16  ;;  %v2486_v48 = vrot.slane %v2484_v59, 5 }
 0x15b   : > { %v2495_v35 = vor.u32 %v2494_v22, %v2491_v43  ;;  %v2505_v31 = vor.u32 %v2504_v16, %v9065_v46  ;;  %v2508_v9 = vshll.u32 %v7086_v50, 16  ;;  %v2472_v7 = vrot.slane %v2471_v29, 4 }
 0x15c   : > { %v5693_v30 = vrot.slane %v7087_v40, 9  ;;  %v4531_v12 = vrot.slane %v4529_v54, 4  ;;  %v4532_v56 = vrot.slane %v8650_v63, 5  ;;  %v2482_v10 = vrot.slane %v2481_v2, 4  ;;  %v9122_v40 = vld [vmem:[%s9193_s2] ss:$0 sm:$0xff] }
 0x15d   : > { %v5694_v55 = vrot.slane %v7088_v49, 9  ;;  %v4538_v21 = vrot.slane %v4536_v20, 4  ;;  %v4539_v15 = vrot.slane %v8657_v57, 5  ;;  %v2515_v39 = vrot.slane %v2513_v4, 4 }
 0x15e   : > { %v2518_v33 = vrot.slane %v2516_v42, 5  ;;  %v2524_v32 = vrot.slane %v2522_v34, 5  ;;  %v2528_v1 = vrot.slane %v2526_v52, 4  ;;  %v2496_v27 = vrot.slane %v2495_v35, 4 }
 0x15f   : > { %v2506_v5 = vrot.slane %v2505_v31, 4  ;;  %v2510_v19 = vrot.slane %v2508_v9, 5  ;;  %v2477_v63 = vsel %vm7226_vm2, %v2472_v7, %v9055_v11  ;;  %v4530_v58 = vsel %vm7502_vm5, %v5693_v30, %v4529_v54 }
 0x160   : > { %6536 = vmatmul.mubr.bf16.gmra.mrb[20].mxu0 %v5723_v6  ;;  %v2487_v57 = vsel %vm7226_vm2, %v2482_v10, %v2486_v48  ;;  %v4533_v51 = vsel %vm7502_vm5, %v4531_v12, %v4532_v56  ;;  %v4537_v0 = vsel %vm7502_vm5, %v5694_v55, %v4536_v20  ;;  %v4543_v13 = vrot.slane %v7089_v61, 5 }
 0x161   : > { %6344 = vmatmul.mubr.bf16.gmra.mrb[20].mxu1 %v5483_v41  ;;  %6539 = vmatprep.mubr.bf16.mxu0 %v5724_v25  ;;  %v4540_v18 = vsel %vm7502_vm5, %v4538_v21, %v4539_v15  ;;  %v2519_v44 = vor.u32 %v2518_v33, %v2515_v39  ;;  %v2529_v26 = vor.u32 %v2528_v1, %v2524_v32  ;;  %v2532_v14 = vshll.u32 %v7090_v3, 16 }
 0x162   : > { %6347 = vmatprep.mubr.bf16.mxu1 %v5484_v28  ;;  %v2501_v47 = vsel %vm7226_vm2, %v2496_v27, %v9065_v46  ;;  %v2511_v8 = vsel %vm7226_vm2, %v2506_v5, %v2510_v19  ;;  %v5485_v11 = vcombine.low %v2477_v63, %v2487_v57  ;;  %v5725_v23 = vcombine.low %v4530_v58, %v4533_v51 }
 0x163   : > { %v5726_v24 = vcombine.low %v4537_v0, %v4540_v18  ;;  %v5695_v38 = vrot.slane %v7091_v36, 9  ;;  %v4545_v17 = vrot.slane %v4543_v13, 4  ;;  %v4546_v59 = vrot.slane %v8686_v62, 5 }
 0x164   : > { %v5486_v43 = vcombine.low %v2501_v47, %v2511_v8  ;;  %v2520_v22 = vrot.slane %v2519_v44, 4  ;;  %v2530_v16 = vrot.slane %v2529_v26, 4  ;;  %v2534_v41 = vrot.slane %v2532_v14, 5 }
 0x165   : > { %v4544_v46 = vsel %vm7502_vm5, %v5695_v38, %v4543_v13  ;;  %v4547_v6 = vsel %vm7502_vm5, %v4545_v17, %v4546_v59 }
 0x166   : > { %v2525_v29 = vsel %vm7226_vm2, %v2520_v22, %v2524_v32  ;;  %v2535_v62 = vsel %vm7226_vm2, %v2530_v16, %v2534_v41  ;;  %v5727_v45 = vcombine.low %v4544_v46, %v4547_v6 }
 0x167   : > { %v5487_v54 = vcombine.low %v2525_v29, %v2535_v62 }
 0x168   : > { %6540 = vmatmul.mubr.bf16.gmra.mrb[24].mxu0 %v5725_v23 }
 0x169   : > { %6348 = vmatmul.mubr.bf16.gmra.mrb[24].mxu1 %v5485_v11  ;;  %6543 = vmatprep.mubr.bf16.mxu0 %v5726_v24 }
 0x16a   : > { %6351 = vmatprep.mubr.bf16.mxu1 %v5486_v43 }
 0x170   : > { %6544 = vmatmul.mubr.bf16.gmra.mrb[28].mxu0 %v5727_v45 }
 0x171   : > { %6352 = vmatmul.mubr.bf16.gmra.mrb[28].mxu1 %v5487_v54 }
 0x1eb   : > { %v6277_v28 = vpop.f32.mrb[0].mxu1 }
 0x1ec   : > { %v1993_v25 = vpop.f32.mrb[1].mxu1 }
 0x1ed   : > { %v6278_v2 = vpop.f32.mrb[2].mxu1 }
 0x1ee   : > { %v1996_v60 = vpop.f32.mrb[3].mxu1 }
 0x1f4   : > { %v6281_v20 = vpop.f32.mrb[4].mxu1 }
 0x1f5   : > { %v2009_v4 = vpop.f32.mrb[5].mxu1 }
 0x1f6   : > { %v6282_v42 = vpop.f32.mrb[6].mxu1 }
 0x1f7   : > { %v2012_v53 = vpop.f32.mrb[7].mxu1 }
 0x1fc   : > { %v6285_v34 = vpop.f32.mrb[8].mxu1 }
 0x1fd   : > { %v2025_v52 = vpop.f32.mrb[9].mxu1 }
 0x1fe   : > { %v6286_v48 = vpop.f32.mrb[10].mxu1 }
 0x1ff   : > { %v2028_v35 = vpop.f32.mrb[11].mxu1 }
 0x204   : > { %v9111_v31 = vpop.f32.mrb[12].mxu1 }
 0x205   : > { %v9113_v37 = vpop.f32.mrb[13].mxu1 }
 0x206   : > { %v9115_v50 = vpop.f32.mrb[14].mxu1 }
 0x207   : > { %v9117_v9 = vpop.f32.mrb[15].mxu1 }
 0x20b   : > { %v6517_v7 = vpop.f32.mrb[0].mxu0 }
 0x20c   : > { %v6563_v30 = vadd.f32 %v6517_v7, %v6277_v28  ;;  %v4711_v12 = vpop.f32.mrb[1].mxu0 }
 0x20d   : > { %v6564_v56 = vadd.f32 %v4711_v12, %v1993_v25  ;;  %v6518_v10 = vpop.f32.mrb[2].mxu0 }
 0x20e   : > { %v4879_v49 = vadd.f32 %v6563_v30, %v9122_v40  ;;  %v6565_v55 = vadd.f32 %v6518_v10, %v6278_v2  ;;  %v4714_v21 = vpop.f32.mrb[3].mxu0 }
 0x20f   : > { %v4877_v15 = vadd.f32 %v6564_v56, %v9122_v40  ;;  %v6566_v39 = vadd.f32 %v4714_v21, %v1996_v60 }
 0x210   : > { %v4880_v33 = vadd.f32 %v6565_v55, %v9122_v40  ;;  %v4911_v1 = vmax.f32 %v4879_v49, 0.0 }
 0x211   : > { %v4878_v32 = vadd.f32 %v6566_v39, %v9122_v40  ;;  %v4909_v5 = vmax.f32 %v4877_v15, 0.0 }
 0x212   : > { %v4912_v27 = vmax.f32 %v4880_v33, 0.0 }
 0x213   : > { %v4910_v19 = vmax.f32 %v4878_v32, 0.0  ;;  %v6521_v63 = vpop.f32.mrb[4].mxu0 }
 0x214   : > { %v5812_v58 = vpack.c.bf16 %v4912_v27, %v4911_v1  ;;  %v6567_v57 = vadd.f32 %v6521_v63, %v6281_v20  ;;  %v4727_v51 = vpop.f32.mrb[5].mxu0 }
 0x215   : > { %v5807_v0 = vpack.c.bf16 %v4910_v19, %v4909_v5  ;;  %v6568_v61 = vadd.f32 %v4727_v51, %v2009_v4  ;;  %v6522_v13 = vpop.f32.mrb[6].mxu0 }
 0x216   : > { %5884 = vst [vmem:[%s9132_s29 + $0x8] sm:$0xff] %v5812_v58   ;;  %v4883_v18 = vadd.f32 %v6567_v57, %v9122_v40  ;;  %v6569_v44 = vadd.f32 %v6522_v13, %v6282_v42  ;;  %v4730_v26 = vpop.f32.mrb[7].mxu0 }
 0x217   : > { %5808 = vst [vmem:[%s9132_s29] sm:$0xff] %v5807_v0   ;;  %v4881_v3 = vadd.f32 %v6568_v61, %v9122_v40  ;;  %v6570_v14 = vadd.f32 %v4730_v26, %v2012_v53 }
 0x218   : > { %v4884_v47 = vadd.f32 %v6569_v44, %v9122_v40  ;;  %v4915_v11 = vmax.f32 %v4883_v18, 0.0 }
 0x219   : > { %v4882_v8 = vadd.f32 %v6570_v14, %v9122_v40  ;;  %v4913_v24 = vmax.f32 %v4881_v3, 0.0 }
 0x21a   : > { %v4916_v23 = vmax.f32 %v4884_v47, 0.0 }
 0x21b   : > { %v4914_v36 = vmax.f32 %v4882_v8, 0.0  ;;  %v6525_v38 = vpop.f32.mrb[8].mxu0 }
 0x21c   : > { %v5822_v17 = vpack.c.bf16 %v4916_v23, %v4915_v11  ;;  %v6571_v59 = vadd.f32 %v6525_v38, %v6285_v34  ;;  %v4743_v43 = vpop.f32.mrb[9].mxu0 }
 0x21d   : > { %v5817_v22 = vpack.c.bf16 %v4914_v36, %v4913_v24  ;;  %v6572_v16 = vadd.f32 %v4743_v43, %v2025_v52  ;;  %v6526_v41 = vpop.f32.mrb[10].mxu0 }
 0x21e   : > { %5886 = vst [vmem:[%s9132_s29 + $0x18] sm:$0xff] %v5822_v17   ;;  %v4887_v46 = vadd.f32 %v6571_v59, %v9122_v40  ;;  %v6573_v6 = vadd.f32 %v6526_v41, %v6286_v48  ;;  %v4746_v29 = vpop.f32.mrb[11].mxu0 }
 0x21f   : > { %5885 = vst [vmem:[%s9132_s29 + $0x10] sm:$0xff] %v5817_v22   ;;  %v4885_v62 = vadd.f32 %v6572_v16, %v9122_v40  ;;  %v6574_v45 = vadd.f32 %v4746_v29, %v2028_v35 }
 0x220   : > { %v4888_v54 = vadd.f32 %v6573_v6, %v9122_v40  ;;  %v4919_v25 = vmax.f32 %v4887_v46, 0.0 }
 0x221   : > { %v4886_v28 = vadd.f32 %v6574_v45, %v9122_v40  ;;  %v4917_v60 = vmax.f32 %v4885_v62, 0.0 }
 0x222   : > { %v4920_v2 = vmax.f32 %v4888_v54, 0.0 }
 0x223   : > { %v4918_v20 = vmax.f32 %v4886_v28, 0.0  ;;  %v6529_v4 = vpop.f32.mrb[12].mxu0 }
 0x224   : > { %v5832_v42 = vpack.c.bf16 %v4920_v2, %v4919_v25  ;;  %v6575_v53 = vadd.f32 %v6529_v4, %v9111_v31  ;;  %v4759_v34 = vpop.f32.mrb[13].mxu0 }
 0x225   : > { %v5827_v52 = vpack.c.bf16 %v4918_v20, %v4917_v60  ;;  %v6576_v48 = vadd.f32 %v4759_v34, %v9113_v37  ;;  %v6530_v7 = vpop.f32.mrb[14].mxu0 }
 0x226   : > { %5888 = vst [vmem:[%s9132_s29 + $0x28] sm:$0xff] %v5832_v42   ;;  %v4891_v35 = vadd.f32 %v6575_v53, %v9122_v40  ;;  %v6577_v30 = vadd.f32 %v6530_v7, %v9115_v50  ;;  %v4762_v12 = vpop.f32.mrb[15].mxu0 }
 0x227   : > { %5887 = vst [vmem:[%s9132_s29 + $0x20] sm:$0xff] %v5827_v52   ;;  %v4889_v56 = vadd.f32 %v6576_v48, %v9122_v40  ;;  %v6578_v10 = vadd.f32 %v4762_v12, %v9117_v9 }
 0x228   : > { %v4892_v49 = vadd.f32 %v6577_v30, %v9122_v40  ;;  %v4923_v55 = vmax.f32 %v4891_v35, 0.0 }
 0x229   : > { %v4890_v31 = vadd.f32 %v6578_v10, %v9122_v40  ;;  %v4921_v21 = vmax.f32 %v4889_v56, 0.0 }
 0x22a   : > { %v4924_v37 = vmax.f32 %v4892_v49, 0.0 }
 0x22b   : > { %v4922_v15 = vmax.f32 %v4890_v31, 0.0  ;;  %v6533_v39 = vpop.f32.mrb[16].mxu0 }
 0x22c   : > { %v5842_v33 = vpack.c.bf16 %v4924_v37, %v4923_v55  ;;  %v6341_v32 = vpop.f32.mrb[16].mxu1  ;;  %v4775_v50 = vpop.f32.mrb[17].mxu0 }
 0x22d   : > { %v5837_v1 = vpack.c.bf16 %v4922_v15, %v4921_v21  ;;  %v6579_v27 = vadd.f32 %v6533_v39, %v6341_v32  ;;  %v2763_v5 = vpop.f32.mrb[17].mxu1  ;;  %v6534_v19 = vpop.f32.mrb[18].mxu0 }
 0x22e   : > { %5890 = vst [vmem:[%s9132_s29 + $0x38] sm:$0xff] %v5842_v33   ;;  %v6580_v63 = vadd.f32 %v4775_v50, %v2763_v5  ;;  %v6342_v9 = vpop.f32.mrb[18].mxu1  ;;  %v4778_v58 = vpop.f32.mrb[19].mxu0 }
 0x22f   : > { %5889 = vst [vmem:[%s9132_s29 + $0x30] sm:$0xff] %v5837_v1   ;;  %v4895_v57 = vadd.f32 %v6579_v27, %v9122_v40  ;;  %v6581_v51 = vadd.f32 %v6534_v19, %v6342_v9  ;;  %v2766_v0 = vpop.f32.mrb[19].mxu1 }
 0x230   : > { %v4893_v61 = vadd.f32 %v6580_v63, %v9122_v40  ;;  %v6582_v13 = vadd.f32 %v4778_v58, %v2766_v0 }
 0x231   : > { %v4896_v18 = vadd.f32 %v6581_v51, %v9122_v40  ;;  %v4927_v26 = vmax.f32 %v4895_v57, 0.0 }
 0x232   : > { %v4894_v44 = vadd.f32 %v6582_v13, %v9122_v40  ;;  %v4925_v47 = vmax.f32 %v4893_v61, 0.0 }
 0x233   : > { %v4928_v3 = vmax.f32 %v4896_v18, 0.0  ;;  %v6537_v14 = vpop.f32.mrb[20].mxu0 }
 0x234   : > { %v4926_v8 = vmax.f32 %v4894_v44, 0.0  ;;  %v6345_v11 = vpop.f32.mrb[20].mxu1  ;;  %v4791_v23 = vpop.f32.mrb[21].mxu0 }
 0x235   : > { %v5852_v24 = vpack.c.bf16 %v4928_v3, %v4927_v26  ;;  %v6583_v36 = vadd.f32 %v6537_v14, %v6345_v11  ;;  %v2779_v38 = vpop.f32.mrb[21].mxu1  ;;  %v6538_v17 = vpop.f32.mrb[22].mxu0 }
 0x236   : > { %v5847_v59 = vpack.c.bf16 %v4926_v8, %v4925_v47  ;;  %v6584_v43 = vadd.f32 %v4791_v23, %v2779_v38  ;;  %v6346_v22 = vpop.f32.mrb[22].mxu1  ;;  %v4794_v16 = vpop.f32.mrb[23].mxu0 }
 0x237   : > { %5892 = vst [vmem:[%s9132_s29 + $0x48] sm:$0xff] %v5852_v24   ;;  %v4899_v41 = vadd.f32 %v6583_v36, %v9122_v40  ;;  %v6585_v46 = vadd.f32 %v6538_v17, %v6346_v22  ;;  %v2782_v6 = vpop.f32.mrb[23].mxu1 }
 0x238   : > { %5891 = vst [vmem:[%s9132_s29 + $0x40] sm:$0xff] %v5847_v59   ;;  %v4897_v29 = vadd.f32 %v6584_v43, %v9122_v40  ;;  %v6586_v62 = vadd.f32 %v4794_v16, %v2782_v6 }
 0x239   : > { %v4900_v45 = vadd.f32 %v6585_v46, %v9122_v40  ;;  %v4931_v28 = vmax.f32 %v4899_v41, 0.0 }
 0x23a   : > { %v4898_v54 = vadd.f32 %v6586_v62, %v9122_v40  ;;  %v4929_v60 = vmax.f32 %v4897_v29, 0.0 }
 0x23b   : > { %v4932_v25 = vmax.f32 %v4900_v45, 0.0  ;;  %v6541_v2 = vpop.f32.mrb[24].mxu0 }
 0x23c   : > { %v4930_v20 = vmax.f32 %v4898_v54, 0.0  ;;  %v6349_v4 = vpop.f32.mrb[24].mxu1  ;;  %v4807_v42 = vpop.f32.mrb[25].mxu0 }
 0x23d   : > { %v5862_v53 = vpack.c.bf16 %v4932_v25, %v4931_v28  ;;  %v6587_v34 = vadd.f32 %v6541_v2, %v6349_v4  ;;  %v2795_v52 = vpop.f32.mrb[25].mxu1  ;;  %v6542_v48 = vpop.f32.mrb[26].mxu0 }
 0x23e   : > { %v5857_v7 = vpack.c.bf16 %v4930_v20, %v4929_v60  ;;  %v6588_v35 = vadd.f32 %v4807_v42, %v2795_v52  ;;  %v6350_v30 = vpop.f32.mrb[26].mxu1  ;;  %v4810_v12 = vpop.f32.mrb[27].mxu0 }
 0x23f   : > { %5894 = vst [vmem:[%s9132_s29 + $0x58] sm:$0xff] %v5862_v53   ;;  %v4903_v56 = vadd.f32 %v6587_v34, %v9122_v40  ;;  %v6589_v10 = vadd.f32 %v6542_v48, %v6350_v30  ;;  %v2798_v49 = vpop.f32.mrb[27].mxu1 }
 0x240   : > { %5893 = vst [vmem:[%s9132_s29 + $0x50] sm:$0xff] %v5857_v7   ;;  %v4901_v31 = vadd.f32 %v6588_v35, %v9122_v40  ;;  %v6590_v55 = vadd.f32 %v4810_v12, %v2798_v49 }
 0x241   : > { %v4904_v37 = vadd.f32 %v6589_v10, %v9122_v40  ;;  %v4935_v15 = vmax.f32 %v4903_v56, 0.0 }
 0x242   : > { %v4902_v21 = vadd.f32 %v6590_v55, %v9122_v40  ;;  %v4933_v32 = vmax.f32 %v4901_v31, 0.0 }
 0x243   : > { %v4936_v39 = vmax.f32 %v4904_v37, 0.0  ;;  %v6545_v33 = vpop.f32.mrb[28].mxu0 }
 0x244   : > { %v4934_v50 = vmax.f32 %v4902_v21, 0.0  ;;  %v6353_v1 = vpop.f32.mrb[28].mxu1  ;;  %v4823_v27 = vpop.f32.mrb[29].mxu0 }
 0x245   : > { %v5872_v5 = vpack.c.bf16 %v4936_v39, %v4935_v15  ;;  %v6591_v19 = vadd.f32 %v6545_v33, %v6353_v1  ;;  %v2811_v63 = vpop.f32.mrb[29].mxu1  ;;  %v6546_v9 = vpop.f32.mrb[30].mxu0 }
 0x246   : > { %v5867_v58 = vpack.c.bf16 %v4934_v50, %v4933_v32  ;;  %v6592_v57 = vadd.f32 %v4823_v27, %v2811_v63  ;;  %v6354_v51 = vpop.f32.mrb[30].mxu1  ;;  %v4826_v0 = vpop.f32.mrb[31].mxu0 }
 0x247   : > { %5896 = vst [vmem:[%s9132_s29 + $0x68] sm:$0xff] %v5872_v5   ;;  %v4907_v61 = vadd.f32 %v6591_v19, %v9122_v40  ;;  %v6593_v13 = vadd.f32 %v6546_v9, %v6354_v51  ;;  %v2814_v18 = vpop.f32.mrb[31].mxu1 }
 0x248   : > { %5895 = vst [vmem:[%s9132_s29 + $0x60] sm:$0xff] %v5867_v58   ;;  %v4905_v44 = vadd.f32 %v6592_v57, %v9122_v40  ;;  %v6594_v26 = vadd.f32 %v4826_v0, %v2814_v18 }
 0x249   : > { %v4908_v3 = vadd.f32 %v6593_v13, %v9122_v40  ;;  %v4939_v47 = vmax.f32 %v4907_v61, 0.0 }
 0x24a   : > { %v4906_v14 = vadd.f32 %v6594_v26, %v9122_v40  ;;  %v4937_v11 = vmax.f32 %v4905_v44, 0.0 }
 0x24b   : > { %v4940_v8 = vmax.f32 %v4908_v3, 0.0 }
 0x24c   : > { %v4938_v23 = vmax.f32 %v4906_v14, 0.0 }
 0x24d   : > { %v5882_v24 = vpack.c.bf16 %v4940_v8, %v4939_v47 }
 0x24e   : > { %v5877_v36 = vpack.c.bf16 %v4938_v23, %v4937_v11 }
 0x24f   : > { %5898 = vst [vmem:[%s9132_s29 + $0x78] sm:$0xff] %v5882_v24  }
 0x250   : > { %5897 = vst [vmem:[%s9132_s29 + $0x70] sm:$0xff] %v5877_v36  }
 0x251 PF: > { %s13_s14 = sadd.s32 1, %s7114_s14   ;;  %s9279_s12 = smov %s7110_s13 }
 0x252   : > { %p10_p5 = scmp.ge.s32.totalorder %s13_s14, 4   ;;  %s9280_s13 = smov %s9282_s15 }
 0x254   :  { %12 = sbr.rel (!%p10_p5) target bundleno = 2 (0x2), region = 79 }

// kernel: vae_forward.31
= control target key start
LH: loop header
LB: loop body
LE: loop exit
PB: predicated region body
PF: predicated region fallthrough
CT: control target
= control target key end

     0   :  { %s357_s6 = smov 0   ;;  %s359_s7 = smov 0   ;;  %s390_s0 = inlined_call_operand.vmem [shape: bf16[2,4,2,4,256], index: 0, kind: input, shape index: {}]   ;;  %s391_s1 = inlined_call_operand.vmem [shape: bf16[2,4,4,128], index: 1, kind: output, shape index: {}]  }
   0x1   :  { %s361_s8 = smov 0  }
   0x2 LB: > { %s23_s9 = sadd.s32 1, %s341_s7  ;;  %p286_p0 = scmp.ge.s32.totalorder %s345_s8, 1  ;;  %s345_s8 = sphi %s361_s8, %s11_s8   ;;  %s341_s7 = sphi %s359_s7, %s393_s7   ;;  %s337_s6 = sphi %s357_s6, %s392_s6  }
   0x3   : > { %p25_p1 = scmp.ge.s32.totalorder %s23_s9, 2  ;;  %p109_p2 = scmp.lt.s32.totalorder %s345_s8, 3 }
   0x5   : > { %s395_s9 = smov (%p25_p1, %s23_s9), 0  ;;  %p110_p3 = pnand %p286_p0, %p109_p2 }
   0x6   : > { %p139_p4 = scmp.lt.s32.totalorder (!%p110_p3), %s337_s6, 1 }
   0x7   : > { %113 = sbr.rel (%p110_p3) target bundleno = 27 (0x1b), region = 24 }
   0xe   : > { %s397_s6 = smov (!%p139_p4, %s337_s6), 1 }
   0xf   : > { %s297_s10 = sshll.u32 %s397_s6, 5  ;;  %s298_s14 = sshll.u32 %s397_s6, 3 }
  0x10   : > { %s147_s13 = scalar_lea.vmem %s390_s0, %s297_s10  ;;  %s157_s17 = scalar_lea.vmem %s391_s1, %s298_s14 }
  0x11   : > { %v159_v0 = vld [vmem:[%s147_s13] sm:$0xf]  ;;  %v291_v1 = vld [vmem:[%s147_s13 + $0x4] sm:$0xf]  ;;  %v160_v2 = vld [vmem:[%s147_s13 + $0x8] sm:$0xf] }
  0x12   : > { %v168_v3 = vmax.bf16 %v291_v1, %v159_v0  ;;  %v292_v4 = vld [vmem:[%s147_s13 + $0xc] sm:$0xf]  ;;  %v161_v5 = vld [vmem:[%s147_s13 + $0x10] sm:$0xf]  ;;  %v293_v6 = vld [vmem:[%s147_s13 + $0x14] sm:$0xf] }
  0x13   : > { %v169_v7 = vmax.bf16 %v292_v4, %v160_v2  ;;  %v170_v8 = vmax.bf16 %v293_v6, %v161_v5  ;;  %v162_v9 = vld [vmem:[%s147_s13 + $0x18] sm:$0xf]  ;;  %v294_v10 = vld [vmem:[%s147_s13 + $0x1c] sm:$0xf] }
  0x14   : > { %v176_v11 = vrot.slane %v168_v3, 2  ;;  %v171_v12 = vmax.bf16 %v294_v10, %v162_v9 }
  0x15   : > { %v177_v13 = vrot.slane %v169_v7, 2  ;;  %v178_v14 = vrot.slane %v170_v8, 2 }
  0x16   : > { %v184_v15 = vmax.bf16 %v176_v11, %v168_v3  ;;  %v179_v16 = vrot.slane %v171_v12, 2 }
  0x17   : > { %v185_v17 = vmax.bf16 %v177_v13, %v169_v7  ;;  %v186_v18 = vmax.bf16 %v178_v14, %v170_v8 }
  0x18   : > { %188 = vst [vmem:[%s157_s17] sm:$0x3] %v184_v15  ;;  %v187_v19 = vmax.bf16 %v179_v16, %v171_v12 }
  0x19   : > { %189 = vst [vmem:[%s157_s17 + $0x2] sm:$0x3] %v185_v17  ;;  %190 = vst [vmem:[%s157_s17 + $0x4] sm:$0x3] %v186_v18 }
  0x1a   : > { %191 = vst [vmem:[%s157_s17 + $0x6] sm:$0x3] %v187_v19 }
  0x1b PF: > { %s11_s8 = sadd.s32 1, %s345_s8   ;;  %s392_s6 = smov %s341_s7 }
  0x1c   : > { %p8_p5 = scmp.ge.s32.totalorder %s11_s8, 4   ;;  %s393_s7 = smov %s395_s9 }
  0x1e   :  { %10 = sbr.rel (!%p8_p5) target bundleno = 2 (0x2), region = 55 }

// kernel: vae_forward.32
= control target key start
LH: loop header
LB: loop body
LE: loop exit
PB: predicated region body
PF: predicated region fallthrough
CT: control target
= control target key end

     0   :  { %s1071_s12 = smov 0   ;;  %s1073_s13 = smov 0   ;;  %s1181_s0 = inlined_call_operand.vmem [shape: bf16[32,1152], index: 0, kind: input, shape index: {}]   ;;  %s1182_s1 = inlined_call_operand.vmem [shape: bf16[1152,128], index: 1, kind: input, shape index: {}]   ;;  %s1183_s2 = inlined_call_operand.vmem [shape: f32[1,128], index: 2, kind: input, shape index: {}]   ;;  %s1184_s3 = inlined_call_operand.vmem [shape: bf16[32,128], index: 3, kind: output, shape index: {}]  }
   0x1   :  { %s1075_s14 = smov 0   ;;  %s1077_s15 = smov 0  }
   0x2   :  { %s1079_s16 = smov 0  }
   0x3 LB: > { %s25_s17 = sadd.s32 1, %s1044_s15  ;;  %p48_p1 = scmp.ne.s32.totalorder %s1036_s13, %s1032_s12  ;;  %s1048_s16 = sphi %s1079_s16, %s13_s16   ;;  %s1044_s15 = sphi %s1077_s15, %s1188_s15   ;;  %s1040_s14 = sphi %s1075_s14, %s1187_s14   ;;  %s1036_s13 = sphi %s1073_s13, %s1186_s13   ;;  %s1032_s12 = sphi %s1071_s12, %s1185_s12  }
   0x4   : > { %p26_p0 = scmp.ge.s32.totalorder %s25_s17, 3  ;;  %p49_p2 = scmp.eq.s32.totalorder %s1048_s16, 0 }
   0x5   : > { %s41_s19 = sadd.s32 1, %s1036_s13  ;;  %p808_p5 = scmp.ge.s32.totalorder %s1048_s16, 3 }
   0x6   : > { %s1190_s17 = smov (%p26_p0, %s25_s17), 0  ;;  %p50_p3 = por %p49_p2, %p48_p1 }
   0x7   : > { %s37_s18 = ssub.s32 %s1044_s15, %s1190_s17  ;;  %162 = sbr.rel (%p808_p5) target bundleno = 23 (0x17), region = 20 }
   0x8   : > { %p39_p4 = scmp.eq.s32.totalorder %s37_s18, 0 }
   0xa   : > { %s1106_s20 = scalar_select %p39_p4, %s1036_s13, %s41_s19  }
   0xe   : > { %165 = sbr.rel (!%p50_p3) target bundleno = 23 (0x17), region = 24  ;;  %s167_s21 = sand.u32 (%p50_p3), 1, %s1036_s13  }
   0xf   : > { %s861_s22 = smul.u32 (%p50_p3), 12, %s1044_s15 }
  0x10   : > { %s935_s23 = smul.u32 (%p50_p3), 48, %s167_s21 }
  0x11   : > { %s175_s26 = scalar_lea.vmem (%p50_p3), %s1181_s0, %s861_s22 }
  0x12   : > { %v190_v0 = vld [vmem:[%s175_s26] sm:$0xff] (%p50_p3)  ;;  %v194_v2 = vld [vmem:[%s175_s26 + $0x48] sm:$0xff] (%p50_p3)  ;;  %s169_s27 = scalar_lea.vmem (%p50_p3), [#allocation3], %s935_s23  ;;  %v814_v6 = vld [vmem:[%s175_s26 + $0x50] sm:$0xf] (%p50_p3) }
  0x13   : > { %v192_v1 = vld [vmem:[%s175_s26 + $0x24] sm:$0xff] (%p50_p3)  ;;  %191 = vst [vmem:[%s169_s27] sm:$0xff] (%p50_p3), %v190_v0  ;;  %195 = vst [vmem:[%s169_s27 + $0x18] sm:$0xff] (%p50_p3), %v194_v2  ;;  %v196_v3 = vld [vmem:[%s175_s26 + $0x6c] sm:$0xff] (%p50_p3) }
  0x14   : > { %193 = vst [vmem:[%s169_s27 + $0xc] sm:$0xff] (%p50_p3), %v192_v1  ;;  %v810_v4 = vld [vmem:[%s175_s26 + $0x8] sm:$0xf] (%p50_p3)  ;;  %v812_v5 = vld [vmem:[%s175_s26 + $0x2c] sm:$0xf] (%p50_p3)  ;;  %197 = vst [vmem:[%s169_s27 + $0x24] sm:$0xff] (%p50_p3), %v196_v3 }
  0x15   : > { %811 = vst [vmem:[%s169_s27 + $0x8] sm:$0xf] %v810_v4  ;;  %813 = vst [vmem:[%s169_s27 + $0x14] sm:$0xf] %v812_v5  ;;  %v816_v7 = vld [vmem:[%s175_s26 + $0x74] sm:$0xf] }
  0x16   : > { %815 = vst [vmem:[%s169_s27 + $0x20] sm:$0xf] %v814_v6  ;;  %817 = vst [vmem:[%s169_s27 + $0x2c] sm:$0xf] %v816_v7 }
  0x17 PF: > { %p818_p6 = scmp.ge.s32.totalorder %s1048_s16, 1  ;;  %p229_p7 = scmp.lt.s32.totalorder %s1048_s16, 4 }
  0x19   : > { %p230_p8 = pnand %p818_p6, %p229_p7 }
  0x1a   : > { %s236_s28 = sand.u32 (!%p230_p8), 1, %s1032_s12   ;;  %s275_s29 = smul.u32 (!%p230_p8), 48, %s1040_s14 }
  0x1b   : > { %233 = sbr.rel (%p230_p8) target bundleno = 318 (0x13e), region = 54  ;;  %p820_p10 = scmp.ne.s32.totalorder (!%p230_p8), %s1040_s14, 0 }
  0x1c   : > { %s936_s30 = smul.u32 (!%p230_p8), 48, %s236_s28  ;;  %p276_p9 = scmp.lt.s32.totalorder (!%p230_p8), %s275_s29, 143 }
  0x1e   : > { %s1123_s8 = scalar_lea.vmem (!%p230_p8), [#allocation3], %s936_s30 }
  0x22   : > { %s1192_s29 = smov (!%p276_p9, %s275_s29), 143  ;;  %300 = sbr.rel (%p820_p10) target bundleno = 41 (0x29), region = 62 }
  0x23   : > { %s819_s4 = sshll.u32 %s1192_s29, 2  ;;  %v1050_v8 = vmov (!%p820_p10), 0.0  }
  0x24   : > { %s1121_s7 = scalar_lea.vmem %s1182_s1, %s819_s4  ;;  %301 = vst [vmem:[#allocation2] sm:$0xff] (!%p820_p10), %v1050_v8  ;;  %302 = vst [vmem:[#allocation2 + $0x8] sm:$0xff] (!%p820_p10), %v1050_v8 }
  0x25   : > { %303 = vst [vmem:[#allocation2 + $0x10] sm:$0xff] (!%p820_p10), %v1050_v8  ;;  %304 = vst [vmem:[#allocation2 + $0x18] sm:$0xff] (!%p820_p10), %v1050_v8 }
  0x29 PF: > { %v978_v9 = vld [vmem:[%s1121_s7 + $0x40] sm:$0xff]   ;;  %v981_v12 = vld [vmem:[%s1121_s7 + $0x48] sm:$0xff]   ;;  %v984_v15 = vld [vmem:[%s1121_s7 + $0x50] sm:$0xff]   ;;  %p851_p11 = scmp.ne.s32.totalorder %s1040_s14, 2 }
  0x2a   : > { %v979_v10 = vld [vmem:[%s1121_s7] sm:$0xff]   ;;  %877 = vmatprep.subr.bf16.mxu0 %v978_v9  ;;  %v982_v13 = vld [vmem:[%s1121_s7 + $0x8] sm:$0xff]   ;;  %v985_v16 = vld [vmem:[%s1121_s7 + $0x10] sm:$0xff]  }
  0x2b   : > { %v980_v11 = vld [vmem:[%s1121_s7 + $0x80] sm:$0xff]   ;;  %878 = vmatpush3.bf16.msra.mxu0 %v979_v10  ;;  %v983_v14 = vld [vmem:[%s1121_s7 + $0x88] sm:$0xff]   ;;  %v986_v17 = vld [vmem:[%s1121_s7 + $0x90] sm:$0xff]  }
  0x2c   : > { %915 = vmatprep.subr.bf16.mxu1 %v980_v11  ;;  %879 = vmatprep.subr.bf16.mxu0 %v981_v12  ;;  %v987_v18 = vld [vmem:[%s1121_s7 + $0x58] sm:$0xff]   ;;  %v990_v21 = vld [vmem:[%s1121_s7 + $0x60] sm:$0xff]   ;;  %v993_v24 = vld [vmem:[%s1121_s7 + $0x68] sm:$0xff]  }
  0x2d   : > { %916 = vmatpush3.bf16.msra.mxu1 %v980_v11  ;;  %v988_v19 = vld [vmem:[%s1121_s7 + $0x18] sm:$0xff]   ;;  %v992_v22 = vld [vmem:[%s1121_s7 + $0xa0] sm:$0xff]   ;;  %v995_v25 = vld [vmem:[%s1121_s7 + $0xa8] sm:$0xff]  }
  0x2e   : > { %917 = vmatprep.subr.bf16.mxu1 %v983_v14  ;;  %v989_v20 = vld [vmem:[%s1121_s7 + $0x98] sm:$0xff]   ;;  %v991_v23 = vld [vmem:[%s1121_s7 + $0x20] sm:$0xff]   ;;  %v994_v26 = vld [vmem:[%s1121_s7 + $0x28] sm:$0xff]  }
  0x2f   : > { %880 = vmatpush3.bf16.msra.mxu0 %v982_v13  ;;  %v996_v27 = vld [vmem:[%s1121_s7 + $0x70] sm:$0xff]   ;;  %v999_v30 = vld [vmem:[%s1121_s7 + $0x78] sm:$0xff]   ;;  %v305_v45 = vld [vmem:[#allocation2] sm:$0xff] }
  0x30   : > { %881 = vmatprep.subr.bf16.mxu0 %v984_v15  ;;  %v997_v28 = vld [vmem:[%s1121_s7 + $0x30] sm:$0xff]   ;;  %v1001_v31 = vld [vmem:[%s1121_s7 + $0xb8] sm:$0xff]   ;;  %v306_v50 = vld [vmem:[#allocation2 + $0x8] sm:$0xff] }
  0x31   : > { %918 = vmatpush3.bf16.msra.mxu1 %v983_v14  ;;  %v998_v29 = vld [vmem:[%s1121_s7 + $0xb0] sm:$0xff]   ;;  %v1000_v34 = vld [vmem:[%s1121_s7 + $0x38] sm:$0xff]   ;;  %v852_v5 = vld [vmem:[%s1183_s2] ss:$0 sm:$0xff] (!%p851_p11) }
  0x32   : > { %919 = vmatprep.subr.bf16.mxu1 %v986_v17  ;;  %v1004_v32 = vld [vmem:[%s1123_s8 + $0x4] ss:$12 sps:$4 sm:$0xff]   ;;  %v1005_v33 = vld [vmem:[%s1123_s8 + $0x8] ss:$12 sps:$4 sm:$0xff]   ;;  %v1002_v35 = vld [vmem:[%s1123_s8] ss:$12 sps:$4 sm:$0xff]  }
  0x33   : > { %882 = vmatpush3.bf16.msra.mxu0 %v985_v16  ;;  %573 = vmatprep.mubr.bf16.mxu0 %v1004_v32  ;;  %v1007_v36 = vld [vmem:[%s1123_s8 + $0x1c] ss:$12 sps:$4 sm:$0xff]   ;;  %v1006_v37 = vld [vmem:[%s1123_s8 + $0x20] ss:$12 sps:$4 sm:$0xff]   ;;  %v1009_v38 = vld [vmem:[%s1123_s8 + $0x18] ss:$12 sps:$4 sm:$0xff]  }
  0x34   : > { %883 = vmatprep.subr.bf16.mxu0 %v987_v18  ;;  %931 = vmatprep.mubr.bf16.mxu1 %v1005_v33  ;;  %v307_v59 = vld [vmem:[#allocation2 + $0x10] sm:$0xff]  ;;  %v308_v63 = vld [vmem:[#allocation2 + $0x18] sm:$0xff] }
  0x35   : > { %920 = vmatpush3.bf16.msra.mxu1 %v986_v17 }
  0x36   : > { %921 = vmatprep.subr.bf16.mxu1 %v989_v20 }
  0x37   : > { %884 = vmatpush3.bf16.msra.mxu0 %v988_v19 }
  0x38   : > { %885 = vmatprep.subr.bf16.mxu0 %v990_v21 }
  0x39   : > { %922 = vmatpush3.bf16.msra.mxu1 %v989_v20 }
  0x3a   : > { %923 = vmatprep.subr.bf16.mxu1 %v992_v22 }
  0x3b   : > { %886 = vmatpush3.bf16.msra.mxu0 %v991_v23 }
  0x3c   : > { %887 = vmatprep.subr.bf16.mxu0 %v993_v24 }
  0x3d   : > { %924 = vmatpush3.bf16.msra.mxu1 %v992_v22 }
  0x3e   : > { %925 = vmatprep.subr.bf16.mxu1 %v995_v25 }
  0x3f   : > { %888 = vmatpush3.bf16.msra.mxu0 %v994_v26 }
  0x40   : > { %889 = vmatprep.subr.bf16.mxu0 %v996_v27 }
  0x41   : > { %926 = vmatpush3.bf16.msra.mxu1 %v995_v25 }
  0x42   : > { %927 = vmatprep.subr.bf16.mxu1 %v998_v29 }
  0x43   : > { %890 = vmatpush3.bf16.msra.mxu0 %v997_v28 }
  0x44   : > { %891 = vmatprep.subr.bf16.mxu0 %v999_v30 }
  0x45   : > { %928 = vmatpush3.bf16.msra.mxu1 %v998_v29 }
  0x46   : > { %929 = vmatprep.subr.bf16.mxu1 %v1001_v31 }
  0x47   : > { %892 = vmatpush3.bf16.msra.mxu0 %v1000_v34 }
  0x49   : > { %930 = vmatpush3.bf16.msra.mxu1 %v1001_v31 }
  0x4a   : > { %574 = vmatmul.mubr.bf16.vlgmr.msra.gmra.mrb[0].mxu0 %v1002_v35 }
  0x4b   : > { %581 = vmatprep.mubr.bf16.mxu0 %v1007_v36 }
  0x4c   : > { %932 = vmatmul.mubr.bf16.vlgmr.msra.gmra.mrb[0].mxu1 %v1006_v37 }
  0x52   : > { %582 = vmatmul.mubr.bf16.gmra.mrb[4].mxu0 %v1009_v38 }
 0x11d   : > { %v893_v39 = vpop.f32.mrb[0].mxu0 }
 0x11e   : > { %v894_v40 = vpop.f32.mrb[1].mxu0 }
 0x11f   : > { %v895_v41 = vadd.f32 %v894_v40, %v893_v39  ;;  %v896_v42 = vpop.f32.mrb[2].mxu0  ;;  %v933_v43 = vpop.f32.mrb[0].mxu1 }
 0x120   : > { %v897_v44 = vpop.f32.mrb[3].mxu0  ;;  %v624_v46 = vpop.f32.mrb[1].mxu1 }
 0x121   : > { %v898_v47 = vadd.f32 %v897_v44, %v896_v42  ;;  %v625_v48 = vadd.f32 %v895_v41, %v624_v46  ;;  %v934_v49 = vpop.f32.mrb[2].mxu1 }
 0x122   : > { %v627_v51 = vpop.f32.mrb[3].mxu1 }
 0x123   : > { %v639_v52 = vadd.f32 %v625_v48, %v305_v45  ;;  %v628_v53 = vadd.f32 %v898_v47, %v627_v51 }
 0x125   : > { %643 = vst [vmem:[#allocation2] sm:$0xff] %v639_v52  ;;  %v640_v54 = vadd.f32 %v628_v53, %v306_v50  ;;  %v899_v55 = vpop.f32.mrb[4].mxu0 }
 0x126   : > { %v900_v56 = vpop.f32.mrb[5].mxu0 }
 0x127   : > { %644 = vst [vmem:[#allocation2 + $0x8] sm:$0xff] %v640_v54  ;;  %v901_v57 = vadd.f32 %v900_v56, %v899_v55  ;;  %v902_v58 = vpop.f32.mrb[6].mxu0 }
 0x128   : > { %v903_v60 = vpop.f32.mrb[7].mxu0 }
 0x129   : > { %v633_v61 = vadd.f32 %v933_v43, %v901_v57  ;;  %v904_v62 = vadd.f32 %v903_v60, %v902_v58  ;;  %650 = sbr.rel (%p851_p11) target bundleno = 318 (0x13e), region = 66 }
 0x12b   : > { %v641_v0 = vadd.f32 %v633_v61, %v307_v59  ;;  %v636_v1 = vadd.f32 %v934_v49, %v904_v62 }
 0x12c   : > { %v651_v3 = vld [vmem:[#allocation2] sm:$0xff] (!%p851_p11) }
 0x12d   : > { %645 = vst [vmem:[#allocation2 + $0x10] sm:$0xff] %v641_v0  ;;  %v642_v2 = vadd.f32 %v636_v1, %v308_v63  ;;  %v662_v6 = vadd.f32 (!%p851_p11), %v852_v5, %v651_v3 }
 0x12e   : > { %v652_v4 = vld [vmem:[#allocation2 + $0x8] sm:$0xff] (!%p851_p11) }
 0x12f   : > { %646 = vst [vmem:[#allocation2 + $0x18] sm:$0xff] %v642_v2  ;;  %v663_v7 = vadd.f32 (!%p851_p11), %v852_v5, %v652_v4  ;;  %v666_v12 = vmax.f32 (!%p851_p11), %v662_v6, 0.0 }
 0x131   : > { %v667_v13 = vmax.f32 %v663_v7, 0.0 }
 0x133   : > { %v869_v16 = vpack.c.bf16 %v667_v13, %v666_v12 }
 0x134   : > { %v653_v8 = vld [vmem:[#allocation2 + $0x10] sm:$0xff] }
 0x135   : > { %v664_v10 = vadd.f32 %v852_v5, %v653_v8  ;;  %870 = vst [vmem:[%s1184_s3] sm:$0xff] %v869_v16  }
 0x136   : > { %v654_v9 = vld [vmem:[#allocation2 + $0x18] sm:$0xff] }
 0x137   : > { %v665_v11 = vadd.f32 %v852_v5, %v654_v9  ;;  %v668_v14 = vmax.f32 %v664_v10, 0.0 }
 0x139   : > { %v669_v15 = vmax.f32 %v665_v11, 0.0 }
 0x13b   : > { %v874_v17 = vpack.c.bf16 %v669_v15, %v668_v14 }
 0x13d   : > { %876 = vst [vmem:[%s1184_s3 + $0x8] sm:$0xff] %v874_v17  }
 0x13e PF: > { %s13_s16 = sadd.s32 1, %s1048_s16   ;;  %s1185_s12 = smov %s1036_s13 }
 0x13f   : > { %p10_p12 = scmp.ge.s32.totalorder %s13_s16, 5   ;;  %s1186_s13 = smov %s1106_s20 }
 0x140   : > { %s1187_s14 = smov %s1044_s15  ;;  %s1188_s15 = smov %s1190_s17 }
 0x141   :  { %12 = sbr.rel (!%p10_p12) target bundleno = 3 (0x3), region = 113 }

// kernel: vae_forward.34
= control target key start
LH: loop header
LB: loop body
LE: loop exit
PB: predicated region body
PF: predicated region fallthrough
CT: control target
= control target key end

     0   :  { %s321_s6 = smov 0   ;;  %s323_s7 = smov 0   ;;  %s351_s0 = inlined_call_operand.vmem [shape: bf16[2,2,2,2,256], index: 0, kind: input, shape index: {}]   ;;  %s352_s1 = inlined_call_operand.vmem [shape: bf16[2,2,2,128], index: 1, kind: output, shape index: {}]  }
   0x1   :  { %s325_s8 = smov 0  }
   0x2 LB: > { %s23_s9 = sadd.s32 1, %s305_s7  ;;  %p256_p0 = scmp.ge.s32.totalorder %s309_s8, 1  ;;  %s309_s8 = sphi %s325_s8, %s11_s8   ;;  %s305_s7 = sphi %s323_s7, %s354_s7   ;;  %s301_s6 = sphi %s321_s6, %s353_s6  }
   0x3   : > { %p25_p1 = scmp.ge.s32.totalorder %s23_s9, 2  ;;  %p108_p2 = scmp.lt.s32.totalorder %s309_s8, 3 }
   0x5   : > { %s356_s9 = smov (%p25_p1, %s23_s9), 0  ;;  %p109_p3 = pnand %p256_p0, %p108_p2 }
   0x6   : > { %p136_p4 = scmp.lt.s32.totalorder (!%p109_p3), %s301_s6, 1 }
   0x7   : > { %112 = sbr.rel (%p109_p3) target bundleno = 26 (0x1a), region = 24 }
   0xe   : > { %s358_s6 = smov (!%p136_p4, %s301_s6), 1 }
   0xf   : > { %s257_s10 = sshll.u32 %s358_s6, 3  ;;  %s258_s14 = sshll.u32 %s358_s6, 1 }
  0x10   : > { %s143_s13 = scalar_lea.vmem %s351_s0, %s257_s10  ;;  %s152_s17 = scalar_lea.vmem %s352_s1, %s258_s14 }
  0x11   : > { %v154_v0 = vld [vmem:[%s143_s13] sm:$0x3]  ;;  %v259_v1 = vld [vmem:[%s143_s13 + $0x2] sm:$0x3]  ;;  %v155_v2 = vld [vmem:[%s143_s13 + $0x4] sm:$0x3] }
  0x12   : > { %v159_v3 = vmax.bf16 %v259_v1, %v154_v0  ;;  %v260_v4 = vld [vmem:[%s143_s13 + $0x6] sm:$0x3] }
  0x13   : > { %v160_v5 = vmax.bf16 %v260_v4, %v155_v2 }
  0x14   : > { %v163_v6 = vrot.slane %v159_v3, 1 }
  0x15   : > { %v164_v7 = vrot.slane %v160_v5, 1 }
  0x16   : > { %v167_v8 = vmax.bf16 %v163_v6, %v159_v3 }
  0x17   : > { %v168_v9 = vmax.bf16 %v164_v7, %v160_v5 }
  0x18   : > { %169 = vst [vmem:[%s152_s17] sm:$0x1] %v167_v8 }
  0x19   : > { %170 = vst [vmem:[%s152_s17 + $0x1] sm:$0x1] %v168_v9 }
  0x1a PF: > { %s11_s8 = sadd.s32 1, %s309_s8   ;;  %s353_s6 = smov %s305_s7 }
  0x1b   : > { %p8_p5 = scmp.ge.s32.totalorder %s11_s8, 4   ;;  %s354_s7 = smov %s356_s9 }
  0x1d   :  { %10 = sbr.rel (!%p8_p5) target bundleno = 2 (0x2), region = 55 }

// kernel: vae_forward.35
= control target key start
LH: loop header
LB: loop body
LE: loop exit
PB: predicated region body
PF: predicated region fallthrough
CT: control target
= control target key end

     0   :  { %s866_s12 = smov 0   ;;  %s868_s13 = smov 0   ;;  %s941_s0 = inlined_call_operand.vmem [shape: bf16[8,1152], index: 0, kind: input, shape index: {}]   ;;  %s942_s1 = inlined_call_operand.vmem [shape: bf16[1152,128], index: 1, kind: input, shape index: {}]   ;;  %s943_s2 = inlined_call_operand.vmem [shape: f32[1,128], index: 2, kind: input, shape index: {}]   ;;  %s944_s3 = inlined_call_operand.vmem [shape: bf16[8,128], index: 3, kind: output, shape index: {}]  }
   0x1   :  { %s870_s14 = smov 0  }
   0x2 LB: > { %s25_s15 = sadd.s32 1, %s837_s13  ;;  %p678_p0 = scmp.ge.s32.totalorder %s841_s14, 1  ;;  %s841_s14 = sphi %s870_s14, %s13_s14   ;;  %s837_s13 = sphi %s868_s13, %s946_s13   ;;  %s833_s12 = sphi %s866_s12, %s945_s12  }
   0x3   : > { %p26_p1 = scmp.ge.s32.totalorder %s25_s15, 3  ;;  %p189_p2 = scmp.lt.s32.totalorder %s841_s14, 4 }
   0x5   : > { %s948_s15 = smov (%p26_p1, %s25_s15), 0  ;;  %p190_p3 = pnand %p678_p0, %p189_p2 }
   0x6   : > { %s230_s16 = smul.u32 (!%p190_p3), 3, %s833_s12  ;;  %p681_p6 = scmp.ne.s32.totalorder (!%p190_p3), %s833_s12, 0 }
   0x7   : > { %193 = sbr.rel (%p190_p3) target bundleno = 291 (0x123), region = 32 }
   0x8   : > { %s240_s17 = smul.u32 (!%p190_p3), 48, %s833_s12  ;;  %p233_p4 = scmp.lt.s32.totalorder (!%p190_p3), %s230_s16, 8 }
   0xa   : > { %p241_p5 = scmp.lt.s32.totalorder (!%p190_p3), %s240_s17, 143 }
   0xe   : > { %s950_s16 = smov (!%p233_p4, %s230_s16), 8  ;;  %s952_s17 = smov (!%p241_p5, %s240_s17), 143 }
   0xf   : > { %s679_s18 = sshll.u32 %s950_s16, 2  ;;  %s680_s22 = sshll.u32 %s952_s17, 2  ;;  %v843_v0 = vmov (!%p681_p6), 0.0  }
  0x10   : > { %s891_s21 = scalar_lea.vmem %s941_s0, %s679_s18  ;;  %s896_s25 = scalar_lea.vmem %s942_s1, %s680_s22  ;;  %264 = vst [vmem:[#allocation2] sm:$0xff] (!%p681_p6), %v843_v0 }
  0x11   : > { %263 = sbr.rel (%p681_p6) target bundleno = 24 (0x18), region = 36 }
  0x18 PF: > { %v792_v1 = vld [vmem:[%s896_s25 + $0x40] sm:$0xff]   ;;  %v844_v2 = vmov 0.0   ;;  %vm845_vm0 = vmmov 0   ;;  %v795_v5 = vld [vmem:[%s896_s25 + $0x48] sm:$0xff]   ;;  %v798_v8 = vld [vmem:[%s896_s25 + $0x50] sm:$0xff]   ;;  %p709_p7 = scmp.ne.s32.totalorder %s833_s12, 2 }
  0x19   : > { %745 = vmatprep.subr.bf16.mxu1 %v844_v2  ;;  %v793_v3 = vld [vmem:[%s896_s25] sm:$0xff]   ;;  %714 = vmatprep.subr.bf16.mxu0 %v792_v1  ;;  %v796_v6 = vld [vmem:[%s896_s25 + $0x8] sm:$0xff]   ;;  %v799_v9 = vld [vmem:[%s896_s25 + $0x10] sm:$0xff]  }
  0x1a   : > { %v794_v4 = vld [vmem:[%s896_s25 + $0x80] sm:$0xff]   ;;  %761 = vmatprep.mubr.msk.bf16.mxu1 %vm845_vm0, %v844_v2  ;;  %715 = vmatpush3.bf16.msra.mxu0 %v793_v3  ;;  %v797_v7 = vld [vmem:[%s896_s25 + $0x88] sm:$0xff]   ;;  %v800_v10 = vld [vmem:[%s896_s25 + $0x90] sm:$0xff]  }
  0x1b   : > { %746 = vmatpush3.bf16.msra.mxu1 %v794_v4  ;;  %716 = vmatprep.subr.bf16.mxu0 %v795_v5  ;;  %v801_v11 = vld [vmem:[%s896_s25 + $0x58] sm:$0xff]   ;;  %v804_v14 = vld [vmem:[%s896_s25 + $0x60] sm:$0xff]   ;;  %v807_v17 = vld [vmem:[%s896_s25 + $0x68] sm:$0xff]  }
  0x1c   : > { %747 = vmatprep.subr.bf16.mxu1 %v844_v2  ;;  %v802_v12 = vld [vmem:[%s896_s25 + $0x18] sm:$0xff]   ;;  %v805_v15 = vld [vmem:[%s896_s25 + $0x20] sm:$0xff]   ;;  %v808_v18 = vld [vmem:[%s896_s25 + $0x28] sm:$0xff]  }
  0x1d   : > { %v803_v13 = vld [vmem:[%s896_s25 + $0x98] sm:$0xff]   ;;  %v806_v16 = vld [vmem:[%s896_s25 + $0xa0] sm:$0xff]   ;;  %v809_v19 = vld [vmem:[%s896_s25 + $0xa8] sm:$0xff]  }
  0x1e   : > { %717 = vmatpush3.bf16.msra.mxu0 %v796_v6  ;;  %v810_v20 = vld [vmem:[%s896_s25 + $0x70] sm:$0xff]   ;;  %v813_v23 = vld [vmem:[%s896_s25 + $0x78] sm:$0xff]   ;;  %v266_v24 = vld [vmem:[%s891_s21] sm:$0xff] }
  0x1f   : > { %748 = vmatpush3.bf16.msra.mxu1 %v797_v7  ;;  %718 = vmatprep.subr.bf16.mxu0 %v798_v8  ;;  %v811_v21 = vld [vmem:[%s896_s25 + $0x30] sm:$0xff]   ;;  %v683_v25 = vcombine.high %v266_v24, %v266_v24  ;;  %v814_v26 = vld [vmem:[%s896_s25 + $0x38] sm:$0xff]   ;;  %v682_v28 = vcombine.low %v266_v24, %v266_v24  ;;  %v818_v29 = vld [vmem:[%s891_s21 + $0x8] ss:$0 sps:$4 sm:$0xff]  }
  0x20   : > { %749 = vmatprep.subr.bf16.mxu1 %v844_v2  ;;  %v812_v22 = vld [vmem:[%s896_s25 + $0xb0] sm:$0xff]   ;;  %v815_v27 = vld [vmem:[%s896_s25 + $0xb8] sm:$0xff]   ;;  %v265_v36 = vld [vmem:[#allocation2] sm:$0xff] }
  0x21   : > { %503 = vmatprep.mubr.bf16.mxu0 %v683_v25  ;;  %v710_v43 = vld [vmem:[%s943_s2] ss:$0 sm:$0xff] (!%p709_p7) }
  0x22   : > { %719 = vmatpush3.bf16.msra.mxu0 %v799_v9 }
  0x23   : > { %750 = vmatpush3.bf16.msra.mxu1 %v800_v10  ;;  %720 = vmatprep.subr.bf16.mxu0 %v801_v11 }
  0x24   : > { %751 = vmatprep.subr.bf16.mxu1 %v844_v2 }
  0x26   : > { %721 = vmatpush3.bf16.msra.mxu0 %v802_v12 }
  0x27   : > { %752 = vmatpush3.bf16.msra.mxu1 %v803_v13  ;;  %722 = vmatprep.subr.bf16.mxu0 %v804_v14 }
  0x28   : > { %753 = vmatprep.subr.bf16.mxu1 %v844_v2 }
  0x2a   : > { %723 = vmatpush3.bf16.msra.mxu0 %v805_v15 }
  0x2b   : > { %754 = vmatpush3.bf16.msra.mxu1 %v806_v16  ;;  %724 = vmatprep.subr.bf16.mxu0 %v807_v17 }
  0x2c   : > { %755 = vmatprep.subr.bf16.mxu1 %v844_v2 }
  0x2e   : > { %725 = vmatpush3.bf16.msra.mxu0 %v808_v18 }
  0x2f   : > { %756 = vmatpush3.bf16.msra.mxu1 %v809_v19  ;;  %726 = vmatprep.subr.bf16.mxu0 %v810_v20 }
  0x30   : > { %757 = vmatprep.subr.bf16.mxu1 %v844_v2 }
  0x32   : > { %727 = vmatpush3.bf16.msra.mxu0 %v811_v21 }
  0x33   : > { %758 = vmatpush3.bf16.msra.mxu1 %v812_v22  ;;  %728 = vmatprep.subr.bf16.mxu0 %v813_v23 }
  0x34   : > { %759 = vmatprep.subr.bf16.mxu1 %v844_v2 }
  0x36   : > { %729 = vmatpush3.bf16.msra.mxu0 %v814_v26 }
  0x37   : > { %760 = vmatpush3.bf16.msra.mxu1 %v815_v27 }
  0x39   : > { %504 = vmatmul.mubr.bf16.vlgmr.msra.gmra.mrb[0].mxu0 %v682_v28 }
  0x3a   : > { %762 = vmatmul.mubr.bf16.vlgmr.msra.gmra.mrb[0].mxu1 %v818_v29 }
 0x10c   : > { %v730_v30 = vpop.f32.mrb[0].mxu0 }
 0x10d   : > { %v545_v31 = vpop.f32.mrb[0].mxu1  ;;  %v731_v32 = vpop.f32.mrb[1].mxu0 }
 0x10e   : > { %v732_v33 = vadd.f32 %v731_v32, %v730_v30  ;;  %v763_v34 = vpop.f32.mrb[1].mxu1  ;;  %v733_v35 = vpop.f32.mrb[2].mxu0  ;;  %556 = sbr.rel (%p709_p7) target bundleno = 291 (0x123), region = 40 }
 0x10f   : > { %v548_v37 = vpop.f32.mrb[2].mxu1  ;;  %v734_v38 = vpop.f32.mrb[3].mxu0 }
 0x110   : > { %v546_v39 = vadd.f32 %v732_v33, %v545_v31  ;;  %v764_v40 = vpop.f32.mrb[3].mxu1 }
 0x112   : > { %v551_v41 = vadd.f32 %v546_v39, %v265_v36 }
 0x114   : > { %552 = vst [vmem:[#allocation2] sm:$0xff] %v551_v41 }
 0x11b   : > { %v557_v42 = vld [vmem:[#allocation2] sm:$0xff] }
 0x11c   : > { %v565_v44 = vadd.f32 %v710_v43, %v557_v42 }
 0x11e   : > { %v566_v45 = vmax.f32 %v565_v44, 0.0 }
 0x120   : > { %v567_v46 = vpack.c.bf16 %v566_v45, %v566_v45 }
 0x122   : > { %568 = vst [vmem:[%s944_s3] sm:$0xf] %v567_v46 }
 0x123 PF: > { %s13_s14 = sadd.s32 1, %s841_s14   ;;  %s945_s12 = smov %s837_s13 }
 0x124   : > { %p10_p8 = scmp.ge.s32.totalorder %s13_s14, 5   ;;  %s946_s13 = smov %s948_s15 }
 0x126   :  { %12 = sbr.rel (!%p10_p8) target bundleno = 2 (0x2), region = 76 }

// kernel: vae_forward.37
= control target key start
LH: loop header
LB: loop body
LE: loop exit
PB: predicated region body
PF: predicated region fallthrough
CT: control target
= control target key end

     0   :  { %v194_v0 = vmov 0.0   ;;  %vm195_vm0 = vmmov 0   ;;  %s249_s1 = inlined_call_operand.vmem [shape: bf16[128,128], index: 1, kind: input, shape index: {}]   ;;  %s250_s0 = inlined_call_operand.vmem [shape: bf16[8,128], index: 0, kind: input, shape index: {}]   ;;  %s251_s2 = inlined_call_operand.vmem [shape: f32[1,128], index: 2, kind: input, shape index: {}]   ;;  %s252_s3 = inlined_call_operand.vmem [shape: f32[8,128], index: 3, kind: output, shape index: {}]  }
   0x1   :  { %164 = vmatprep.subr.bf16.mxu0 %v194_v0  ;;  %v186_v1 = vld [vmem:[%s249_s1] sm:$0xff]   ;;  %180 = vmatprep.mubr.msk.bf16.mxu0 %vm195_vm0, %v194_v0  ;;  %v187_v2 = vld [vmem:[%s249_s1 + $0x8] sm:$0xff]   ;;  %v188_v3 = vld [vmem:[%s249_s1 + $0x10] sm:$0xff]  }
   0x2   :  { %165 = vmatpush3.bf16.msra.mxu0 %v186_v1  ;;  %v189_v4 = vld [vmem:[%s249_s1 + $0x18] sm:$0xff]   ;;  %v190_v5 = vld [vmem:[%s249_s1 + $0x20] sm:$0xff]   ;;  %v191_v6 = vld [vmem:[%s249_s1 + $0x28] sm:$0xff]  }
   0x3   :  { %166 = vmatprep.subr.bf16.mxu0 %v194_v0  ;;  %v192_v7 = vld [vmem:[%s249_s1 + $0x30] sm:$0xff]   ;;  %v193_v8 = vld [vmem:[%s249_s1 + $0x38] sm:$0xff]   ;;  %v21_v9 = vld [vmem:[%s250_s0] sm:$0xf] }
   0x4   :  { %v154_v10 = vld [vmem:[%s251_s2] ss:$0 sm:$0xff] }
   0x6   :  { %167 = vmatpush3.bf16.msra.mxu0 %v187_v2 }
   0x7   :  { %168 = vmatprep.subr.bf16.mxu0 %v194_v0 }
   0xa   :  { %169 = vmatpush3.bf16.msra.mxu0 %v188_v3 }
   0xb   :  { %170 = vmatprep.subr.bf16.mxu0 %v194_v0 }
   0xe   :  { %171 = vmatpush3.bf16.msra.mxu0 %v189_v4 }
   0xf   :  { %172 = vmatprep.subr.bf16.mxu0 %v194_v0 }
  0x12   :  { %173 = vmatpush3.bf16.msra.mxu0 %v190_v5 }
  0x13   :  { %174 = vmatprep.subr.bf16.mxu0 %v194_v0 }
  0x16   :  { %175 = vmatpush3.bf16.msra.mxu0 %v191_v6 }
  0x17   :  { %176 = vmatprep.subr.bf16.mxu0 %v194_v0 }
  0x1a   :  { %177 = vmatpush3.bf16.msra.mxu0 %v192_v7 }
  0x1b   :  { %178 = vmatprep.subr.bf16.mxu0 %v194_v0 }
  0x1e   :  { %179 = vmatpush3.bf16.msra.mxu0 %v193_v8 }
  0x21   :  { %181 = vmatmul.mubr.bf16.vlgmr.msra.gmra.mrb[0].mxu0 %v21_v9 }
  0xf4   :  { %v120_v11 = vpop.f32.mrb[0].mxu0 }
  0xf5   :  { %v139_v12 = vadd.f32 %v154_v10, %v120_v11  ;;  %v182_v13 = vpop.f32.mrb[1].mxu0 }
  0xf6   :  { %v123_v14 = vpop.f32.mrb[2].mxu0 }
  0xf7   :  { %v140_v15 = vmax.f32 %v139_v12, 0.0  ;;  %v183_v16 = vpop.f32.mrb[3].mxu0 }
  0xf9   :  { %141 = vst [vmem:[%s252_s3] sm:$0xff] %v140_v15 }

// kernel: vae_forward.39
= control target key start
LH: loop header
LB: loop body
LE: loop exit
PB: predicated region body
PF: predicated region fallthrough
CT: control target
= control target key end

     0   :  { %v450_v1 = vmov 0   ;;  %v319_v34 = vlaneseq  ;;  %s579_s1 = inlined_call_operand.vmem [shape: bf16[128,512], index: 1, kind: input, shape index: {}]   ;;  %s580_s0 = inlined_call_operand.vmem [shape: bf16[8,128], index: 0, kind: input, shape index: {}]   ;;  %s581_s2 = inlined_call_operand.vmem [shape: f32[1,512], index: 2, kind: input, shape index: {}]   ;;  %s582_s3 = inlined_call_operand.vmem [shape: bf16[8,512], index: 3, kind: output, shape index: {}]  }
   0x1   :  { %v402_v0 = vld [vmem:[%s579_s1 + $0x4] ss:$16 sps:$4 sm:$0xff]   ;;  %252 = vmatprep.mubr.bf16.mxu0 %v450_v1  ;;  %293 = vmatprep.mubr.bf16.mxu1 %v450_v1  ;;  %v404_v2 = vld [vmem:[%s579_s1 + $0xc] ss:$16 sps:$4 sm:$0xff]   ;;  %v406_v3 = vld [vmem:[%s579_s1] ss:$16 sps:$4 sm:$0xff]  }
   0x2   :  { %220 = vmatprep.subr.bf16.mxu0 %v402_v0  ;;  %v407_v4 = vld [vmem:[%s579_s1 + $0x8] ss:$16 sps:$4 sm:$0xff]   ;;  %261 = vmatprep.subr.bf16.mxu1 %v404_v2  ;;  %v408_v5 = vld [vmem:[%s579_s1 + $0x24] ss:$16 sps:$4 sm:$0xff]   ;;  %v410_v6 = vld [vmem:[%s579_s1 + $0x2c] ss:$16 sps:$4 sm:$0xff]  }
   0x3   :  { %221 = vmatpush1.bf16.msra.mxu0 %v406_v3  ;;  %262 = vmatpush1.bf16.msra.mxu1 %v407_v4  ;;  %v412_v7 = vld [vmem:[%s579_s1 + $0x20] ss:$16 sps:$4 sm:$0xff]   ;;  %v413_v8 = vld [vmem:[%s579_s1 + $0x28] ss:$16 sps:$4 sm:$0xff]   ;;  %v414_v9 = vld [vmem:[%s579_s1 + $0x44] ss:$16 sps:$4 sm:$0xff]  }
   0x4   :  { %222 = vmatprep.subr.bf16.mxu0 %v408_v5  ;;  %263 = vmatprep.subr.bf16.mxu1 %v410_v6  ;;  %v416_v10 = vld [vmem:[%s579_s1 + $0x4c] ss:$16 sps:$4 sm:$0xff]   ;;  %v418_v11 = vld [vmem:[%s579_s1 + $0x40] ss:$16 sps:$4 sm:$0xff]   ;;  %v419_v12 = vld [vmem:[%s579_s1 + $0x48] ss:$16 sps:$4 sm:$0xff]  }
   0x5   :  { %v420_v13 = vld [vmem:[%s579_s1 + $0x64] ss:$16 sps:$4 sm:$0xff]   ;;  %v422_v14 = vld [vmem:[%s579_s1 + $0x6c] ss:$16 sps:$4 sm:$0xff]   ;;  %v424_v15 = vld [vmem:[%s579_s1 + $0x60] ss:$16 sps:$4 sm:$0xff]  }
   0x6   :  { %v425_v16 = vld [vmem:[%s579_s1 + $0x68] ss:$16 sps:$4 sm:$0xff]   ;;  %v426_v17 = vld [vmem:[%s579_s1 + $0x84] ss:$16 sps:$4 sm:$0xff]   ;;  %v428_v18 = vld [vmem:[%s579_s1 + $0x8c] ss:$16 sps:$4 sm:$0xff]  }
   0x7   :  { %223 = vmatpush1.bf16.msra.mxu0 %v412_v7  ;;  %264 = vmatpush1.bf16.msra.mxu1 %v413_v8  ;;  %v430_v19 = vld [vmem:[%s579_s1 + $0x80] ss:$16 sps:$4 sm:$0xff]   ;;  %v431_v20 = vld [vmem:[%s579_s1 + $0x88] ss:$16 sps:$4 sm:$0xff]   ;;  %v432_v21 = vld [vmem:[%s579_s1 + $0xa4] ss:$16 sps:$4 sm:$0xff]  }
   0x8   :  { %224 = vmatprep.subr.bf16.mxu0 %v414_v9  ;;  %265 = vmatprep.subr.bf16.mxu1 %v416_v10  ;;  %v434_v22 = vld [vmem:[%s579_s1 + $0xac] ss:$16 sps:$4 sm:$0xff]   ;;  %v436_v23 = vld [vmem:[%s579_s1 + $0xa0] ss:$16 sps:$4 sm:$0xff]   ;;  %v437_v24 = vld [vmem:[%s579_s1 + $0xa8] ss:$16 sps:$4 sm:$0xff]  }
   0x9   :  { %v438_v25 = vld [vmem:[%s579_s1 + $0xc4] ss:$16 sps:$4 sm:$0xff]   ;;  %v440_v26 = vld [vmem:[%s579_s1 + $0xcc] ss:$16 sps:$4 sm:$0xff]   ;;  %v442_v27 = vld [vmem:[%s579_s1 + $0xc0] ss:$16 sps:$4 sm:$0xff]  }
   0xa   :  { %v443_v28 = vld [vmem:[%s579_s1 + $0xc8] ss:$16 sps:$4 sm:$0xff]   ;;  %v444_v29 = vld [vmem:[%s579_s1 + $0xe4] ss:$16 sps:$4 sm:$0xff]   ;;  %v446_v30 = vld [vmem:[%s579_s1 + $0xec] ss:$16 sps:$4 sm:$0xff]  }
   0xb   :  { %225 = vmatpush1.bf16.msra.mxu0 %v418_v11  ;;  %266 = vmatpush1.bf16.msra.mxu1 %v419_v12  ;;  %v448_v31 = vld [vmem:[%s579_s1 + $0xe0] ss:$16 sps:$4 sm:$0xff]   ;;  %v449_v32 = vld [vmem:[%s579_s1 + $0xe8] ss:$16 sps:$4 sm:$0xff]   ;;  %v320_v35 = vshrl.u32 %v319_v34, 7 }
   0xc   :  { %226 = vmatprep.subr.bf16.mxu0 %v420_v13  ;;  %267 = vmatprep.subr.bf16.mxu1 %v422_v14  ;;  %v27_v33 = vld [vmem:[%s580_s0] sm:$0xf] }
   0xd   :  { %v321_v36 = vsub.s32 0, %v320_v35  ;;  %v329_v37 = vsub.s32 2, %v320_v35  ;;  %v317_v38 = vld [vmem:[%s581_s2] sm:$0xf]  ;;  %v325_v39 = vsub.s32 1, %v320_v35  ;;  %v333_v40 = vsub.s32 3, %v320_v35 }
   0xf   :  { %227 = vmatpush1.bf16.msra.mxu0 %v424_v15  ;;  %268 = vmatpush1.bf16.msra.mxu1 %v425_v16  ;;  %v322_v41 = vrot.slane %v317_v38, %v321_v36  ;;  %v330_v42 = vrot.slane %v317_v38, %v329_v37  ;;  %v326_v43 = vrot.slane %v317_v38, %v325_v39 }
  0x10   :  { %228 = vmatprep.subr.bf16.mxu0 %v426_v17  ;;  %269 = vmatprep.subr.bf16.mxu1 %v428_v18  ;;  %v334_v44 = vrot.slane %v317_v38, %v333_v40 }
  0x13   :  { %229 = vmatpush1.bf16.msra.mxu0 %v430_v19  ;;  %270 = vmatpush1.bf16.msra.mxu1 %v431_v20 }
  0x14   :  { %230 = vmatprep.subr.bf16.mxu0 %v432_v21  ;;  %271 = vmatprep.subr.bf16.mxu1 %v434_v22 }
  0x17   :  { %231 = vmatpush1.bf16.msra.mxu0 %v436_v23  ;;  %272 = vmatpush1.bf16.msra.mxu1 %v437_v24 }
  0x18   :  { %232 = vmatprep.subr.bf16.mxu0 %v438_v25  ;;  %273 = vmatprep.subr.bf16.mxu1 %v440_v26 }
  0x1b   :  { %233 = vmatpush1.bf16.msra.mxu0 %v442_v27  ;;  %274 = vmatpush1.bf16.msra.mxu1 %v443_v28 }
  0x1c   :  { %234 = vmatprep.subr.bf16.mxu0 %v444_v29  ;;  %275 = vmatprep.subr.bf16.mxu1 %v446_v30 }
  0x1f   :  { %235 = vmatpush1.bf16.msra.mxu0 %v448_v31  ;;  %276 = vmatpush1.bf16.msra.mxu1 %v449_v32 }
  0x22   :  { %253 = vmatmul.mubr.bf16.vlgmr.msra.gmra.mrb[0].mxu0 %v27_v33  ;;  %294 = vmatmul.mubr.bf16.vlgmr.msra.gmra.mrb[0].mxu1 %v27_v33 }
  0xf5   :  { %v254_v45 = vpop.f32.mrb[0].mxu0  ;;  %v295_v46 = vpop.f32.mrb[0].mxu1 }
  0xf6   :  { %v339_v47 = vadd.f32 %v322_v41, %v254_v45  ;;  %v341_v48 = vadd.f32 %v330_v42, %v295_v46  ;;  %v256_v49 = vpop.f32.mrb[1].mxu0  ;;  %v297_v50 = vpop.f32.mrb[1].mxu1 }
  0xf7   :  { %v340_v51 = vadd.f32 %v326_v43, %v256_v49  ;;  %v342_v52 = vadd.f32 %v334_v44, %v297_v50  ;;  %v258_v53 = vpop.f32.mrb[2].mxu0  ;;  %v299_v54 = vpop.f32.mrb[2].mxu1 }
  0xf8   :  { %v259_v55 = vpop.f32.mrb[3].mxu0  ;;  %v300_v56 = vpop.f32.mrb[3].mxu1 }
  0xf9   :  { %v399_v57 = vpack.c.bf16 %v340_v51, %v339_v47  ;;  %v400_v58 = vpack.c.bf16 %v342_v52, %v341_v48 }
  0xfb   :  { %359 = vst [vmem:[%s582_s3] sm:$0xff] %v399_v57  ;;  %360 = vst [vmem:[%s582_s3 + $0x8] sm:$0xff] %v400_v58 }

// kernel: vae_forward.45
= control target key start
LH: loop header
LB: loop body
LE: loop exit
PB: predicated region body
PF: predicated region fallthrough
CT: control target
= control target key end

     0   :  { %v615_v1 = vmov 0   ;;  %v418_v35 = vlaneseq  ;;  %s769_s1 = inlined_call_operand.vmem [shape: bf16[128,512], index: 1, kind: input, shape index: {}]   ;;  %s770_s0 = inlined_call_operand.vmem [shape: bf16[32,128], index: 0, kind: input, shape index: {}]   ;;  %s771_s2 = inlined_call_operand.vmem [shape: f32[1,512], index: 2, kind: input, shape index: {}]   ;;  %s772_s3 = inlined_call_operand.vmem [shape: bf16[32,512], index: 3, kind: output, shape index: {}]  }
   0x1   :  { %v565_v0 = vld [vmem:[%s769_s1 + $0x4] ss:$16 sps:$4 sm:$0xff]   ;;  %291 = vmatprep.mubr.bf16.mxu0 %v615_v1  ;;  %344 = vmatprep.mubr.bf16.mxu1 %v615_v1  ;;  %v567_v2 = vld [vmem:[%s769_s1 + $0xc] ss:$16 sps:$4 sm:$0xff]   ;;  %v569_v3 = vld [vmem:[%s769_s1] ss:$16 sps:$4 sm:$0xff]  }
   0x2   :  { %259 = vmatprep.subr.bf16.mxu0 %v565_v0  ;;  %v570_v4 = vld [vmem:[%s769_s1 + $0x8] ss:$16 sps:$4 sm:$0xff]   ;;  %312 = vmatprep.subr.bf16.mxu1 %v567_v2  ;;  %v571_v5 = vld [vmem:[%s769_s1 + $0x24] ss:$16 sps:$4 sm:$0xff]   ;;  %v573_v6 = vld [vmem:[%s769_s1 + $0x2c] ss:$16 sps:$4 sm:$0xff]  }
   0x3   :  { %260 = vmatpush1.bf16.msra.mxu0 %v569_v3  ;;  %313 = vmatpush1.bf16.msra.mxu1 %v570_v4  ;;  %v575_v7 = vld [vmem:[%s769_s1 + $0x20] ss:$16 sps:$4 sm:$0xff]   ;;  %v576_v8 = vld [vmem:[%s769_s1 + $0x28] ss:$16 sps:$4 sm:$0xff]   ;;  %v577_v9 = vld [vmem:[%s769_s1 + $0x44] ss:$16 sps:$4 sm:$0xff]  }
   0x4   :  { %261 = vmatprep.subr.bf16.mxu0 %v571_v5  ;;  %314 = vmatprep.subr.bf16.mxu1 %v573_v6  ;;  %v579_v10 = vld [vmem:[%s769_s1 + $0x4c] ss:$16 sps:$4 sm:$0xff]   ;;  %v581_v11 = vld [vmem:[%s769_s1 + $0x40] ss:$16 sps:$4 sm:$0xff]   ;;  %v582_v12 = vld [vmem:[%s769_s1 + $0x48] ss:$16 sps:$4 sm:$0xff]  }
   0x5   :  { %v583_v13 = vld [vmem:[%s769_s1 + $0x64] ss:$16 sps:$4 sm:$0xff]   ;;  %v585_v14 = vld [vmem:[%s769_s1 + $0x6c] ss:$16 sps:$4 sm:$0xff]   ;;  %v587_v15 = vld [vmem:[%s769_s1 + $0x60] ss:$16 sps:$4 sm:$0xff]  }
   0x6   :  { %v588_v16 = vld [vmem:[%s769_s1 + $0x68] ss:$16 sps:$4 sm:$0xff]   ;;  %v589_v17 = vld [vmem:[%s769_s1 + $0x84] ss:$16 sps:$4 sm:$0xff]   ;;  %v591_v18 = vld [vmem:[%s769_s1 + $0x8c] ss:$16 sps:$4 sm:$0xff]  }
   0x7   :  { %262 = vmatpush1.bf16.msra.mxu0 %v575_v7  ;;  %315 = vmatpush1.bf16.msra.mxu1 %v576_v8  ;;  %v593_v19 = vld [vmem:[%s769_s1 + $0x80] ss:$16 sps:$4 sm:$0xff]   ;;  %v594_v20 = vld [vmem:[%s769_s1 + $0x88] ss:$16 sps:$4 sm:$0xff]   ;;  %v595_v21 = vld [vmem:[%s769_s1 + $0xa4] ss:$16 sps:$4 sm:$0xff]  }
   0x8   :  { %263 = vmatprep.subr.bf16.mxu0 %v577_v9  ;;  %316 = vmatprep.subr.bf16.mxu1 %v579_v10  ;;  %v597_v22 = vld [vmem:[%s769_s1 + $0xac] ss:$16 sps:$4 sm:$0xff]   ;;  %v599_v23 = vld [vmem:[%s769_s1 + $0xa0] ss:$16 sps:$4 sm:$0xff]   ;;  %v600_v24 = vld [vmem:[%s769_s1 + $0xa8] ss:$16 sps:$4 sm:$0xff]  }
   0x9   :  { %v601_v25 = vld [vmem:[%s769_s1 + $0xc4] ss:$16 sps:$4 sm:$0xff]   ;;  %v603_v26 = vld [vmem:[%s769_s1 + $0xcc] ss:$16 sps:$4 sm:$0xff]   ;;  %v605_v27 = vld [vmem:[%s769_s1 + $0xc0] ss:$16 sps:$4 sm:$0xff]  }
   0xa   :  { %v606_v28 = vld [vmem:[%s769_s1 + $0xc8] ss:$16 sps:$4 sm:$0xff]   ;;  %v607_v29 = vld [vmem:[%s769_s1 + $0xe4] ss:$16 sps:$4 sm:$0xff]   ;;  %v609_v30 = vld [vmem:[%s769_s1 + $0xec] ss:$16 sps:$4 sm:$0xff]  }
   0xb   :  { %264 = vmatpush1.bf16.msra.mxu0 %v581_v11  ;;  %317 = vmatpush1.bf16.msra.mxu1 %v582_v12  ;;  %v611_v31 = vld [vmem:[%s769_s1 + $0xe0] ss:$16 sps:$4 sm:$0xff]   ;;  %v612_v32 = vld [vmem:[%s769_s1 + $0xe8] ss:$16 sps:$4 sm:$0xff]   ;;  %v419_v36 = vshrl.u32 %v418_v35, 7 }
   0xc   :  { %265 = vmatprep.subr.bf16.mxu0 %v583_v13  ;;  %318 = vmatprep.subr.bf16.mxu1 %v585_v14  ;;  %v613_v33 = vld [vmem:[%s770_s0] sm:$0xff]   ;;  %v614_v34 = vld [vmem:[%s770_s0 + $0x8] sm:$0xff]  }
   0xd   :  { %v420_v37 = vsub.s32 0, %v419_v36  ;;  %v428_v38 = vsub.s32 2, %v419_v36  ;;  %v416_v39 = vld [vmem:[%s771_s2] sm:$0xf]  ;;  %v424_v40 = vsub.s32 1, %v419_v36  ;;  %v432_v41 = vsub.s32 3, %v419_v36 }
   0xf   :  { %266 = vmatpush1.bf16.msra.mxu0 %v587_v15  ;;  %319 = vmatpush1.bf16.msra.mxu1 %v588_v16  ;;  %v421_v42 = vrot.slane %v416_v39, %v420_v37  ;;  %v429_v43 = vrot.slane %v416_v39, %v428_v38  ;;  %v425_v44 = vrot.slane %v416_v39, %v424_v40 }
  0x10   :  { %267 = vmatprep.subr.bf16.mxu0 %v589_v17  ;;  %320 = vmatprep.subr.bf16.mxu1 %v591_v18  ;;  %v433_v45 = vrot.slane %v416_v39, %v432_v41 }
  0x13   :  { %268 = vmatpush1.bf16.msra.mxu0 %v593_v19  ;;  %321 = vmatpush1.bf16.msra.mxu1 %v594_v20 }
  0x14   :  { %269 = vmatprep.subr.bf16.mxu0 %v595_v21  ;;  %322 = vmatprep.subr.bf16.mxu1 %v597_v22 }
  0x17   :  { %270 = vmatpush1.bf16.msra.mxu0 %v599_v23  ;;  %323 = vmatpush1.bf16.msra.mxu1 %v600_v24 }
  0x18   :  { %271 = vmatprep.subr.bf16.mxu0 %v601_v25  ;;  %324 = vmatprep.subr.bf16.mxu1 %v603_v26 }
  0x1b   :  { %272 = vmatpush1.bf16.msra.mxu0 %v605_v27  ;;  %325 = vmatpush1.bf16.msra.mxu1 %v606_v28 }
  0x1c   :  { %273 = vmatprep.subr.bf16.mxu0 %v607_v29  ;;  %326 = vmatprep.subr.bf16.mxu1 %v609_v30 }
  0x1f   :  { %274 = vmatpush1.bf16.msra.mxu0 %v611_v31  ;;  %327 = vmatpush1.bf16.msra.mxu1 %v612_v32 }
  0x22   :  { %292 = vmatmul.mubr.bf16.vlgmr.msra.gmra.mrb[0].mxu0 %v613_v33  ;;  %345 = vmatmul.mubr.bf16.vlgmr.msra.gmra.mrb[0].mxu1 %v613_v33 }
  0x23   :  { %301 = vmatprep.mubr.bf16.mxu0 %v615_v1  ;;  %354 = vmatprep.mubr.bf16.mxu1 %v615_v1 }
  0x2a   :  { %302 = vmatmul.mubr.bf16.gmra.mrb[4].mxu0 %v614_v34  ;;  %355 = vmatmul.mubr.bf16.gmra.mrb[4].mxu1 %v614_v34 }
  0xf5   :  { %v293_v46 = vpop.f32.mrb[0].mxu0  ;;  %v346_v47 = vpop.f32.mrb[0].mxu1 }
  0xf6   :  { %v438_v48 = vadd.f32 %v421_v42, %v293_v46  ;;  %v440_v49 = vadd.f32 %v429_v43, %v346_v47  ;;  %v295_v50 = vpop.f32.mrb[1].mxu0  ;;  %v348_v51 = vpop.f32.mrb[1].mxu1 }
  0xf7   :  { %v439_v52 = vadd.f32 %v425_v44, %v295_v50  ;;  %v441_v53 = vadd.f32 %v433_v45, %v348_v51  ;;  %v297_v54 = vpop.f32.mrb[2].mxu0  ;;  %v350_v55 = vpop.f32.mrb[2].mxu1 }
  0xf8   :  { %v442_v56 = vadd.f32 %v421_v42, %v297_v54  ;;  %v444_v57 = vadd.f32 %v429_v43, %v350_v55  ;;  %v299_v58 = vpop.f32.mrb[3].mxu0  ;;  %v352_v59 = vpop.f32.mrb[3].mxu1 }
  0xf9   :  { %v556_v60 = vpack.c.bf16 %v439_v52, %v438_v48  ;;  %v557_v61 = vpack.c.bf16 %v441_v53, %v440_v49  ;;  %v443_v62 = vadd.f32 %v425_v44, %v299_v58  ;;  %v445_v63 = vadd.f32 %v433_v45, %v352_v59 }
  0xfb   :  { %502 = vst [vmem:[%s772_s3] sm:$0xff] %v556_v60  ;;  %503 = vst [vmem:[%s772_s3 + $0x8] sm:$0xff] %v557_v61  ;;  %v558_v0 = vpack.c.bf16 %v443_v62, %v442_v56  ;;  %v559_v1 = vpack.c.bf16 %v445_v63, %v444_v57 }
  0xfd   :  { %504 = vst [vmem:[%s772_s3 + $0x10] sm:$0xff] %v558_v0  ;;  %505 = vst [vmem:[%s772_s3 + $0x18] sm:$0xff] %v559_v1  ;;  %v303_v2 = vpop.f32.mrb[4].mxu0  ;;  %v356_v3 = vpop.f32.mrb[4].mxu1 }
  0xfe   :  { %v446_v4 = vadd.f32 %v421_v42, %v303_v2  ;;  %v448_v5 = vadd.f32 %v429_v43, %v356_v3  ;;  %v305_v6 = vpop.f32.mrb[5].mxu0  ;;  %v358_v7 = vpop.f32.mrb[5].mxu1 }
  0xff   :  { %v447_v8 = vadd.f32 %v425_v44, %v305_v6  ;;  %v449_v9 = vadd.f32 %v433_v45, %v358_v7  ;;  %v307_v10 = vpop.f32.mrb[6].mxu0  ;;  %v360_v11 = vpop.f32.mrb[6].mxu1 }
 0x100   :  { %v450_v12 = vadd.f32 %v421_v42, %v307_v10  ;;  %v452_v13 = vadd.f32 %v429_v43, %v360_v11  ;;  %v309_v14 = vpop.f32.mrb[7].mxu0  ;;  %v362_v15 = vpop.f32.mrb[7].mxu1 }
 0x101   :  { %v560_v16 = vpack.c.bf16 %v447_v8, %v446_v4  ;;  %v561_v17 = vpack.c.bf16 %v449_v9, %v448_v5  ;;  %v451_v18 = vadd.f32 %v425_v44, %v309_v14  ;;  %v453_v19 = vadd.f32 %v433_v45, %v362_v15 }
 0x103   :  { %506 = vst [vmem:[%s772_s3 + $0x20] sm:$0xff] %v560_v16  ;;  %507 = vst [vmem:[%s772_s3 + $0x28] sm:$0xff] %v561_v17  ;;  %v562_v20 = vpack.c.bf16 %v451_v18, %v450_v12  ;;  %v563_v21 = vpack.c.bf16 %v453_v19, %v452_v13 }
 0x105   :  { %508 = vst [vmem:[%s772_s3 + $0x30] sm:$0xff] %v562_v20  ;;  %509 = vst [vmem:[%s772_s3 + $0x38] sm:$0xff] %v563_v21 }

// kernel: vae_forward.48
= control target key start
LH: loop header
LB: loop body
LE: loop exit
PB: predicated region body
PF: predicated region fallthrough
CT: control target
= control target key end

     0   :  { %v1299_v1 = vmov 0   ;;  %v826_v41 = vlaneseq  ;;  %s1627_s1 = inlined_call_operand.vmem [shape: bf16[128,512], index: 1, kind: input, shape index: {}]   ;;  %s1628_s0 = inlined_call_operand.vmem [shape: bf16[128,128], index: 0, kind: input, shape index: {}]   ;;  %s1629_s2 = inlined_call_operand.vmem [shape: f32[1,512], index: 2, kind: input, shape index: {}]   ;;  %s1630_s3 = inlined_call_operand.vmem [shape: bf16[128,512], index: 3, kind: output, shape index: {}]  }
   0x1   :  { %v1243_v0 = vld [vmem:[%s1627_s1 + $0x4] ss:$16 sps:$4 sm:$0xff]   ;;  %435 = vmatprep.mubr.bf16.mxu0 %v1299_v1  ;;  %548 = vmatprep.mubr.bf16.mxu1 %v1299_v1  ;;  %v1245_v2 = vld [vmem:[%s1627_s1 + $0xc] ss:$16 sps:$4 sm:$0xff]   ;;  %v1247_v3 = vld [vmem:[%s1627_s1] ss:$16 sps:$4 sm:$0xff]  }
   0x2   :  { %403 = vmatprep.subr.bf16.mxu0 %v1243_v0  ;;  %v1248_v4 = vld [vmem:[%s1627_s1 + $0x8] ss:$16 sps:$4 sm:$0xff]   ;;  %516 = vmatprep.subr.bf16.mxu1 %v1245_v2  ;;  %v1249_v5 = vld [vmem:[%s1627_s1 + $0x24] ss:$16 sps:$4 sm:$0xff]   ;;  %v1251_v6 = vld [vmem:[%s1627_s1 + $0x2c] ss:$16 sps:$4 sm:$0xff]  }
   0x3   :  { %404 = vmatpush1.bf16.msra.mxu0 %v1247_v3  ;;  %517 = vmatpush1.bf16.msra.mxu1 %v1248_v4  ;;  %v1253_v7 = vld [vmem:[%s1627_s1 + $0x20] ss:$16 sps:$4 sm:$0xff]   ;;  %v1254_v8 = vld [vmem:[%s1627_s1 + $0x28] ss:$16 sps:$4 sm:$0xff]   ;;  %v1255_v9 = vld [vmem:[%s1627_s1 + $0x44] ss:$16 sps:$4 sm:$0xff]  }
   0x4   :  { %405 = vmatprep.subr.bf16.mxu0 %v1249_v5  ;;  %518 = vmatprep.subr.bf16.mxu1 %v1251_v6  ;;  %v1257_v10 = vld [vmem:[%s1627_s1 + $0x4c] ss:$16 sps:$4 sm:$0xff]   ;;  %v1259_v11 = vld [vmem:[%s1627_s1 + $0x40] ss:$16 sps:$4 sm:$0xff]   ;;  %v1260_v12 = vld [vmem:[%s1627_s1 + $0x48] ss:$16 sps:$4 sm:$0xff]  }
   0x5   :  { %v1261_v13 = vld [vmem:[%s1627_s1 + $0x64] ss:$16 sps:$4 sm:$0xff]   ;;  %v1263_v14 = vld [vmem:[%s1627_s1 + $0x6c] ss:$16 sps:$4 sm:$0xff]   ;;  %v1265_v15 = vld [vmem:[%s1627_s1 + $0x60] ss:$16 sps:$4 sm:$0xff]  }
   0x6   :  { %v1266_v16 = vld [vmem:[%s1627_s1 + $0x68] ss:$16 sps:$4 sm:$0xff]   ;;  %v1267_v17 = vld [vmem:[%s1627_s1 + $0x84] ss:$16 sps:$4 sm:$0xff]   ;;  %v1269_v18 = vld [vmem:[%s1627_s1 + $0x8c] ss:$16 sps:$4 sm:$0xff]  }
   0x7   :  { %406 = vmatpush1.bf16.msra.mxu0 %v1253_v7  ;;  %519 = vmatpush1.bf16.msra.mxu1 %v1254_v8  ;;  %v1271_v19 = vld [vmem:[%s1627_s1 + $0x80] ss:$16 sps:$4 sm:$0xff]   ;;  %v1272_v20 = vld [vmem:[%s1627_s1 + $0x88] ss:$16 sps:$4 sm:$0xff]   ;;  %v1273_v21 = vld [vmem:[%s1627_s1 + $0xa4] ss:$16 sps:$4 sm:$0xff]  }
   0x8   :  { %407 = vmatprep.subr.bf16.mxu0 %v1255_v9  ;;  %520 = vmatprep.subr.bf16.mxu1 %v1257_v10  ;;  %v1275_v22 = vld [vmem:[%s1627_s1 + $0xac] ss:$16 sps:$4 sm:$0xff]   ;;  %v1277_v23 = vld [vmem:[%s1627_s1 + $0xa0] ss:$16 sps:$4 sm:$0xff]   ;;  %v1278_v24 = vld [vmem:[%s1627_s1 + $0xa8] ss:$16 sps:$4 sm:$0xff]  }
   0x9   :  { %v1279_v25 = vld [vmem:[%s1627_s1 + $0xc4] ss:$16 sps:$4 sm:$0xff]   ;;  %v1281_v26 = vld [vmem:[%s1627_s1 + $0xcc] ss:$16 sps:$4 sm:$0xff]   ;;  %v1283_v27 = vld [vmem:[%s1627_s1 + $0xc0] ss:$16 sps:$4 sm:$0xff]  }
   0xa   :  { %v1284_v28 = vld [vmem:[%s1627_s1 + $0xc8] ss:$16 sps:$4 sm:$0xff]   ;;  %v1285_v29 = vld [vmem:[%s1627_s1 + $0xe4] ss:$16 sps:$4 sm:$0xff]   ;;  %v1287_v30 = vld [vmem:[%s1627_s1 + $0xec] ss:$16 sps:$4 sm:$0xff]  }
   0xb   :  { %408 = vmatpush1.bf16.msra.mxu0 %v1259_v11  ;;  %521 = vmatpush1.bf16.msra.mxu1 %v1260_v12  ;;  %v1289_v31 = vld [vmem:[%s1627_s1 + $0xe0] ss:$16 sps:$4 sm:$0xff]   ;;  %v1290_v32 = vld [vmem:[%s1627_s1 + $0xe8] ss:$16 sps:$4 sm:$0xff]   ;;  %v827_v42 = vshrl.u32 %v826_v41, 7 }
   0xc   :  { %409 = vmatprep.subr.bf16.mxu0 %v1261_v13  ;;  %522 = vmatprep.subr.bf16.mxu1 %v1263_v14  ;;  %v1291_v33 = vld [vmem:[%s1628_s0] sm:$0xff]   ;;  %v1292_v34 = vld [vmem:[%s1628_s0 + $0x8] sm:$0xff]   ;;  %v1293_v35 = vld [vmem:[%s1628_s0 + $0x10] sm:$0xff]  }
   0xd   :  { %v1294_v36 = vld [vmem:[%s1628_s0 + $0x18] sm:$0xff]   ;;  %v1295_v37 = vld [vmem:[%s1628_s0 + $0x20] sm:$0xff]   ;;  %v1296_v38 = vld [vmem:[%s1628_s0 + $0x28] sm:$0xff]   ;;  %v828_v43 = vsub.s32 0, %v827_v42  ;;  %v836_v44 = vsub.s32 2, %v827_v42  ;;  %v832_v46 = vsub.s32 1, %v827_v42 }
   0xe   :  { %v1297_v39 = vld [vmem:[%s1628_s0 + $0x30] sm:$0xff]   ;;  %v1298_v40 = vld [vmem:[%s1628_s0 + $0x38] sm:$0xff]   ;;  %v824_v45 = vld [vmem:[%s1629_s2] sm:$0xf]  ;;  %v840_v47 = vsub.s32 3, %v827_v42 }
   0xf   :  { %410 = vmatpush1.bf16.msra.mxu0 %v1265_v15  ;;  %523 = vmatpush1.bf16.msra.mxu1 %v1266_v16  ;;  %v1459_v48 = vrot.slane %v824_v45, %v828_v43  ;;  %v1461_v49 = vrot.slane %v824_v45, %v836_v44  ;;  %v1463_v50 = vrot.slane %v824_v45, %v832_v46 }
  0x10   :  { %411 = vmatprep.subr.bf16.mxu0 %v1267_v17  ;;  %524 = vmatprep.subr.bf16.mxu1 %v1269_v18  ;;  %v1465_v51 = vrot.slane %v824_v45, %v840_v47 }
  0x13   :  { %412 = vmatpush1.bf16.msra.mxu0 %v1271_v19  ;;  %525 = vmatpush1.bf16.msra.mxu1 %v1272_v20 }
  0x14   :  { %413 = vmatprep.subr.bf16.mxu0 %v1273_v21  ;;  %526 = vmatprep.subr.bf16.mxu1 %v1275_v22 }
  0x17   :  { %414 = vmatpush1.bf16.msra.mxu0 %v1277_v23  ;;  %527 = vmatpush1.bf16.msra.mxu1 %v1278_v24 }
  0x18   :  { %415 = vmatprep.subr.bf16.mxu0 %v1279_v25  ;;  %528 = vmatprep.subr.bf16.mxu1 %v1281_v26 }
  0x1b   :  { %416 = vmatpush1.bf16.msra.mxu0 %v1283_v27  ;;  %529 = vmatpush1.bf16.msra.mxu1 %v1284_v28 }
  0x1c   :  { %417 = vmatprep.subr.bf16.mxu0 %v1285_v29  ;;  %530 = vmatprep.subr.bf16.mxu1 %v1287_v30 }
  0x1f   :  { %418 = vmatpush1.bf16.msra.mxu0 %v1289_v31  ;;  %531 = vmatpush1.bf16.msra.mxu1 %v1290_v32 }
  0x22   :  { %436 = vmatmul.mubr.bf16.vlgmr.msra.gmra.mrb[0].mxu0 %v1291_v33  ;;  %549 = vmatmul.mubr.bf16.vlgmr.msra.gmra.mrb[0].mxu1 %v1291_v33 }
  0x23   :  { %445 = vmatprep.mubr.bf16.mxu0 %v1299_v1  ;;  %558 = vmatprep.mubr.bf16.mxu1 %v1299_v1 }
  0x2a   :  { %446 = vmatmul.mubr.bf16.gmra.mrb[4].mxu0 %v1292_v34  ;;  %559 = vmatmul.mubr.bf16.gmra.mrb[4].mxu1 %v1292_v34 }
  0x2b   :  { %455 = vmatprep.mubr.bf16.mxu0 %v1299_v1  ;;  %568 = vmatprep.mubr.bf16.mxu1 %v1299_v1 }
  0x32   :  { %456 = vmatmul.mubr.bf16.gmra.mrb[8].mxu0 %v1293_v35  ;;  %569 = vmatmul.mubr.bf16.gmra.mrb[8].mxu1 %v1293_v35 }
  0x33   :  { %465 = vmatprep.mubr.bf16.mxu0 %v1299_v1  ;;  %578 = vmatprep.mubr.bf16.mxu1 %v1299_v1 }
  0x3a   :  { %466 = vmatmul.mubr.bf16.gmra.mrb[12].mxu0 %v1294_v36  ;;  %579 = vmatmul.mubr.bf16.gmra.mrb[12].mxu1 %v1294_v36 }
  0x3b   :  { %475 = vmatprep.mubr.bf16.mxu0 %v1299_v1  ;;  %588 = vmatprep.mubr.bf16.mxu1 %v1299_v1 }
  0x42   :  { %476 = vmatmul.mubr.bf16.gmra.mrb[16].mxu0 %v1295_v37  ;;  %589 = vmatmul.mubr.bf16.gmra.mrb[16].mxu1 %v1295_v37 }
  0x43   :  { %485 = vmatprep.mubr.bf16.mxu0 %v1299_v1  ;;  %598 = vmatprep.mubr.bf16.mxu1 %v1299_v1 }
  0x4a   :  { %486 = vmatmul.mubr.bf16.gmra.mrb[20].mxu0 %v1296_v38  ;;  %599 = vmatmul.mubr.bf16.gmra.mrb[20].mxu1 %v1296_v38 }
  0x4b   :  { %495 = vmatprep.mubr.bf16.mxu0 %v1299_v1  ;;  %608 = vmatprep.mubr.bf16.mxu1 %v1299_v1 }
  0x52   :  { %496 = vmatmul.mubr.bf16.gmra.mrb[24].mxu0 %v1297_v39  ;;  %609 = vmatmul.mubr.bf16.gmra.mrb[24].mxu1 %v1297_v39 }
  0x53   :  { %505 = vmatprep.mubr.bf16.mxu0 %v1299_v1  ;;  %618 = vmatprep.mubr.bf16.mxu1 %v1299_v1 }
  0x5a   :  { %506 = vmatmul.mubr.bf16.gmra.mrb[28].mxu0 %v1298_v40  ;;  %619 = vmatmul.mubr.bf16.gmra.mrb[28].mxu1 %v1298_v40 }
  0xf5   :  { %v437_v52 = vpop.f32.mrb[0].mxu0  ;;  %v550_v53 = vpop.f32.mrb[0].mxu1 }
  0xf6   :  { %v846_v54 = vadd.f32 %v1459_v48, %v437_v52  ;;  %v848_v55 = vadd.f32 %v1461_v49, %v550_v53  ;;  %v439_v56 = vpop.f32.mrb[1].mxu0  ;;  %v552_v57 = vpop.f32.mrb[1].mxu1 }
  0xf7   :  { %v847_v58 = vadd.f32 %v1463_v50, %v439_v56  ;;  %v849_v59 = vadd.f32 %v1465_v51, %v552_v57  ;;  %v441_v60 = vpop.f32.mrb[2].mxu0  ;;  %v554_v61 = vpop.f32.mrb[2].mxu1 }
  0xf8   :  { %v850_v62 = vadd.f32 %v1459_v48, %v441_v60  ;;  %v852_v63 = vadd.f32 %v1461_v49, %v554_v61  ;;  %v443_v0 = vpop.f32.mrb[3].mxu0  ;;  %v556_v1 = vpop.f32.mrb[3].mxu1 }
  0xf9   :  { %v1210_v2 = vpack.c.bf16 %v847_v58, %v846_v54  ;;  %v1211_v3 = vpack.c.bf16 %v849_v59, %v848_v55  ;;  %v851_v4 = vadd.f32 %v1463_v50, %v443_v0  ;;  %v853_v5 = vadd.f32 %v1465_v51, %v556_v1 }
  0xfb   :  { %1102 = vst [vmem:[%s1630_s3] sm:$0xff] %v1210_v2  ;;  %1103 = vst [vmem:[%s1630_s3 + $0x8] sm:$0xff] %v1211_v3  ;;  %v1212_v6 = vpack.c.bf16 %v851_v4, %v850_v62  ;;  %v1213_v7 = vpack.c.bf16 %v853_v5, %v852_v63 }
  0xfd   :  { %1104 = vst [vmem:[%s1630_s3 + $0x10] sm:$0xff] %v1212_v6  ;;  %1105 = vst [vmem:[%s1630_s3 + $0x18] sm:$0xff] %v1213_v7  ;;  %v447_v8 = vpop.f32.mrb[4].mxu0  ;;  %v560_v9 = vpop.f32.mrb[4].mxu1 }
  0xfe   :  { %v854_v10 = vadd.f32 %v1459_v48, %v447_v8  ;;  %v856_v11 = vadd.f32 %v1461_v49, %v560_v9  ;;  %v449_v12 = vpop.f32.mrb[5].mxu0  ;;  %v562_v13 = vpop.f32.mrb[5].mxu1 }
  0xff   :  { %v855_v14 = vadd.f32 %v1463_v50, %v449_v12  ;;  %v857_v15 = vadd.f32 %v1465_v51, %v562_v13  ;;  %v451_v16 = vpop.f32.mrb[6].mxu0  ;;  %v564_v17 = vpop.f32.mrb[6].mxu1 }
 0x100   :  { %v858_v18 = vadd.f32 %v1459_v48, %v451_v16  ;;  %v860_v19 = vadd.f32 %v1461_v49, %v564_v17  ;;  %v453_v20 = vpop.f32.mrb[7].mxu0  ;;  %v566_v21 = vpop.f32.mrb[7].mxu1 }
 0x101   :  { %v1214_v22 = vpack.c.bf16 %v855_v14, %v854_v10  ;;  %v1215_v23 = vpack.c.bf16 %v857_v15, %v856_v11  ;;  %v859_v24 = vadd.f32 %v1463_v50, %v453_v20  ;;  %v861_v25 = vadd.f32 %v1465_v51, %v566_v21 }
 0x103   :  { %1106 = vst [vmem:[%s1630_s3 + $0x20] sm:$0xff] %v1214_v22  ;;  %1107 = vst [vmem:[%s1630_s3 + $0x28] sm:$0xff] %v1215_v23  ;;  %v1216_v26 = vpack.c.bf16 %v859_v24, %v858_v18  ;;  %v1217_v27 = vpack.c.bf16 %v861_v25, %v860_v19 }
 0x105   :  { %1108 = vst [vmem:[%s1630_s3 + $0x30] sm:$0xff] %v1216_v26  ;;  %1109 = vst [vmem:[%s1630_s3 + $0x38] sm:$0xff] %v1217_v27  ;;  %v457_v28 = vpop.f32.mrb[8].mxu0  ;;  %v570_v29 = vpop.f32.mrb[8].mxu1 }
 0x106   :  { %v862_v30 = vadd.f32 %v1459_v48, %v457_v28  ;;  %v864_v31 = vadd.f32 %v1461_v49, %v570_v29  ;;  %v459_v32 = vpop.f32.mrb[9].mxu0  ;;  %v572_v33 = vpop.f32.mrb[9].mxu1 }
 0x107   :  { %v863_v34 = vadd.f32 %v1463_v50, %v459_v32  ;;  %v865_v35 = vadd.f32 %v1465_v51, %v572_v33  ;;  %v461_v36 = vpop.f32.mrb[10].mxu0  ;;  %v574_v37 = vpop.f32.mrb[10].mxu1 }
 0x108   :  { %v866_v38 = vadd.f32 %v1459_v48, %v461_v36  ;;  %v868_v39 = vadd.f32 %v1461_v49, %v574_v37  ;;  %v463_v40 = vpop.f32.mrb[11].mxu0  ;;  %v576_v41 = vpop.f32.mrb[11].mxu1 }
 0x109   :  { %v1218_v42 = vpack.c.bf16 %v863_v34, %v862_v30  ;;  %v1219_v43 = vpack.c.bf16 %v865_v35, %v864_v31  ;;  %v867_v44 = vadd.f32 %v1463_v50, %v463_v40  ;;  %v869_v45 = vadd.f32 %v1465_v51, %v576_v41 }
 0x10b   :  { %1110 = vst [vmem:[%s1630_s3 + $0x40] sm:$0xff] %v1218_v42  ;;  %1111 = vst [vmem:[%s1630_s3 + $0x48] sm:$0xff] %v1219_v43  ;;  %v1220_v46 = vpack.c.bf16 %v867_v44, %v866_v38  ;;  %v1221_v47 = vpack.c.bf16 %v869_v45, %v868_v39 }
 0x10d   :  { %1112 = vst [vmem:[%s1630_s3 + $0x50] sm:$0xff] %v1220_v46  ;;  %1113 = vst [vmem:[%s1630_s3 + $0x58] sm:$0xff] %v1221_v47  ;;  %v467_v52 = vpop.f32.mrb[12].mxu0  ;;  %v580_v53 = vpop.f32.mrb[12].mxu1 }
 0x10e   :  { %v870_v54 = vadd.f32 %v1459_v48, %v467_v52  ;;  %v872_v55 = vadd.f32 %v1461_v49, %v580_v53  ;;  %v469_v56 = vpop.f32.mrb[13].mxu0  ;;  %v582_v57 = vpop.f32.mrb[13].mxu1 }
 0x10f   :  { %v871_v58 = vadd.f32 %v1463_v50, %v469_v56  ;;  %v873_v59 = vadd.f32 %v1465_v51, %v582_v57  ;;  %v471_v60 = vpop.f32.mrb[14].mxu0  ;;  %v584_v61 = vpop.f32.mrb[14].mxu1 }
 0x110   :  { %v874_v62 = vadd.f32 %v1459_v48, %v471_v60  ;;  %v876_v63 = vadd.f32 %v1461_v49, %v584_v61  ;;  %v473_v0 = vpop.f32.mrb[15].mxu0  ;;  %v586_v1 = vpop.f32.mrb[15].mxu1 }
 0x111   :  { %v1222_v2 = vpack.c.bf16 %v871_v58, %v870_v54  ;;  %v1223_v3 = vpack.c.bf16 %v873_v59, %v872_v55  ;;  %v875_v4 = vadd.f32 %v1463_v50, %v473_v0  ;;  %v877_v5 = vadd.f32 %v1465_v51, %v586_v1 }
 0x113   :  { %1114 = vst [vmem:[%s1630_s3 + $0x60] sm:$0xff] %v1222_v2  ;;  %1115 = vst [vmem:[%s1630_s3 + $0x68] sm:$0xff] %v1223_v3  ;;  %v1224_v6 = vpack.c.bf16 %v875_v4, %v874_v62  ;;  %v1225_v7 = vpack.c.bf16 %v877_v5, %v876_v63 }
 0x115   :  { %1116 = vst [vmem:[%s1630_s3 + $0x70] sm:$0xff] %v1224_v6  ;;  %1117 = vst [vmem:[%s1630_s3 + $0x78] sm:$0xff] %v1225_v7  ;;  %v477_v8 = vpop.f32.mrb[16].mxu0  ;;  %v590_v9 = vpop.f32.mrb[16].mxu1 }
 0x116   :  { %v878_v10 = vadd.f32 %v1459_v48, %v477_v8  ;;  %v880_v11 = vadd.f32 %v1461_v49, %v590_v9  ;;  %v479_v12 = vpop.f32.mrb[17].mxu0  ;;  %v592_v13 = vpop.f32.mrb[17].mxu1 }
 0x117   :  { %v879_v14 = vadd.f32 %v1463_v50, %v479_v12  ;;  %v881_v15 = vadd.f32 %v1465_v51, %v592_v13  ;;  %v481_v16 = vpop.f32.mrb[18].mxu0  ;;  %v594_v17 = vpop.f32.mrb[18].mxu1 }
 0x118   :  { %v882_v18 = vadd.f32 %v1459_v48, %v481_v16  ;;  %v884_v19 = vadd.f32 %v1461_v49, %v594_v17  ;;  %v483_v20 = vpop.f32.mrb[19].mxu0  ;;  %v596_v21 = vpop.f32.mrb[19].mxu1 }
 0x119   :  { %v1226_v22 = vpack.c.bf16 %v879_v14, %v878_v10  ;;  %v1227_v23 = vpack.c.bf16 %v881_v15, %v880_v11  ;;  %v883_v24 = vadd.f32 %v1463_v50, %v483_v20  ;;  %v885_v25 = vadd.f32 %v1465_v51, %v596_v21 }
 0x11b   :  { %1118 = vst [vmem:[%s1630_s3 + $0x80] sm:$0xff] %v1226_v22  ;;  %1119 = vst [vmem:[%s1630_s3 + $0x88] sm:$0xff] %v1227_v23  ;;  %v1228_v26 = vpack.c.bf16 %v883_v24, %v882_v18  ;;  %v1229_v27 = vpack.c.bf16 %v885_v25, %v884_v19 }
 0x11d   :  { %1120 = vst [vmem:[%s1630_s3 + $0x90] sm:$0xff] %v1228_v26  ;;  %1121 = vst [vmem:[%s1630_s3 + $0x98] sm:$0xff] %v1229_v27  ;;  %v487_v28 = vpop.f32.mrb[20].mxu0  ;;  %v600_v29 = vpop.f32.mrb[20].mxu1 }
 0x11e   :  { %v886_v30 = vadd.f32 %v1459_v48, %v487_v28  ;;  %v888_v31 = vadd.f32 %v1461_v49, %v600_v29  ;;  %v489_v32 = vpop.f32.mrb[21].mxu0  ;;  %v602_v33 = vpop.f32.mrb[21].mxu1 }
 0x11f   :  { %v887_v34 = vadd.f32 %v1463_v50, %v489_v32  ;;  %v889_v35 = vadd.f32 %v1465_v51, %v602_v33  ;;  %v491_v36 = vpop.f32.mrb[22].mxu0  ;;  %v604_v37 = vpop.f32.mrb[22].mxu1 }
 0x120   :  { %v890_v38 = vadd.f32 %v1459_v48, %v491_v36  ;;  %v892_v39 = vadd.f32 %v1461_v49, %v604_v37  ;;  %v493_v40 = vpop.f32.mrb[23].mxu0  ;;  %v606_v41 = vpop.f32.mrb[23].mxu1 }
 0x121   :  { %v1230_v42 = vpack.c.bf16 %v887_v34, %v886_v30  ;;  %v1231_v43 = vpack.c.bf16 %v889_v35, %v888_v31  ;;  %v891_v44 = vadd.f32 %v1463_v50, %v493_v40  ;;  %v893_v45 = vadd.f32 %v1465_v51, %v606_v41 }
 0x123   :  { %1122 = vst [vmem:[%s1630_s3 + $0xa0] sm:$0xff] %v1230_v42  ;;  %1123 = vst [vmem:[%s1630_s3 + $0xa8] sm:$0xff] %v1231_v43  ;;  %v1232_v46 = vpack.c.bf16 %v891_v44, %v890_v38  ;;  %v1233_v47 = vpack.c.bf16 %v893_v45, %v892_v39 }
 0x125   :  { %1124 = vst [vmem:[%s1630_s3 + $0xb0] sm:$0xff] %v1232_v46  ;;  %1125 = vst [vmem:[%s1630_s3 + $0xb8] sm:$0xff] %v1233_v47  ;;  %v497_v52 = vpop.f32.mrb[24].mxu0  ;;  %v610_v53 = vpop.f32.mrb[24].mxu1 }
 0x126   :  { %v894_v54 = vadd.f32 %v1459_v48, %v497_v52  ;;  %v896_v55 = vadd.f32 %v1461_v49, %v610_v53  ;;  %v499_v56 = vpop.f32.mrb[25].mxu0  ;;  %v612_v57 = vpop.f32.mrb[25].mxu1 }
 0x127   :  { %v895_v58 = vadd.f32 %v1463_v50, %v499_v56  ;;  %v897_v59 = vadd.f32 %v1465_v51, %v612_v57  ;;  %v501_v60 = vpop.f32.mrb[26].mxu0  ;;  %v614_v61 = vpop.f32.mrb[26].mxu1 }
 0x128   :  { %v898_v62 = vadd.f32 %v1459_v48, %v501_v60  ;;  %v900_v63 = vadd.f32 %v1461_v49, %v614_v61  ;;  %v503_v0 = vpop.f32.mrb[27].mxu0  ;;  %v616_v1 = vpop.f32.mrb[27].mxu1 }
 0x129   :  { %v1234_v2 = vpack.c.bf16 %v895_v58, %v894_v54  ;;  %v1235_v3 = vpack.c.bf16 %v897_v59, %v896_v55  ;;  %v899_v4 = vadd.f32 %v1463_v50, %v503_v0  ;;  %v901_v5 = vadd.f32 %v1465_v51, %v616_v1 }
 0x12b   :  { %1126 = vst [vmem:[%s1630_s3 + $0xc0] sm:$0xff] %v1234_v2  ;;  %1127 = vst [vmem:[%s1630_s3 + $0xc8] sm:$0xff] %v1235_v3  ;;  %v1236_v6 = vpack.c.bf16 %v899_v4, %v898_v62  ;;  %v1237_v7 = vpack.c.bf16 %v901_v5, %v900_v63 }
 0x12d   :  { %1128 = vst [vmem:[%s1630_s3 + $0xd0] sm:$0xff] %v1236_v6  ;;  %1129 = vst [vmem:[%s1630_s3 + $0xd8] sm:$0xff] %v1237_v7  ;;  %v507_v8 = vpop.f32.mrb[28].mxu0  ;;  %v620_v9 = vpop.f32.mrb[28].mxu1 }
 0x12e   :  { %v902_v10 = vadd.f32 %v1459_v48, %v507_v8  ;;  %v904_v11 = vadd.f32 %v1461_v49, %v620_v9  ;;  %v509_v12 = vpop.f32.mrb[29].mxu0  ;;  %v622_v13 = vpop.f32.mrb[29].mxu1 }
 0x12f   :  { %v903_v14 = vadd.f32 %v1463_v50, %v509_v12  ;;  %v905_v15 = vadd.f32 %v1465_v51, %v622_v13  ;;  %v511_v16 = vpop.f32.mrb[30].mxu0  ;;  %v624_v17 = vpop.f32.mrb[30].mxu1 }
 0x130   :  { %v906_v18 = vadd.f32 %v1459_v48, %v511_v16  ;;  %v908_v19 = vadd.f32 %v1461_v49, %v624_v17  ;;  %v513_v20 = vpop.f32.mrb[31].mxu0  ;;  %v626_v21 = vpop.f32.mrb[31].mxu1 }
 0x131   :  { %v1238_v22 = vpack.c.bf16 %v903_v14, %v902_v10  ;;  %v1239_v23 = vpack.c.bf16 %v905_v15, %v904_v11  ;;  %v907_v24 = vadd.f32 %v1463_v50, %v513_v20  ;;  %v909_v25 = vadd.f32 %v1465_v51, %v626_v21 }
 0x133   :  { %1130 = vst [vmem:[%s1630_s3 + $0xe0] sm:$0xff] %v1238_v22  ;;  %1131 = vst [vmem:[%s1630_s3 + $0xe8] sm:$0xff] %v1239_v23  ;;  %v1240_v26 = vpack.c.bf16 %v907_v24, %v906_v18  ;;  %v1241_v48 = vpack.c.bf16 %v909_v25, %v908_v19 }
 0x135   :  { %1132 = vst [vmem:[%s1630_s3 + $0xf0] sm:$0xff] %v1240_v26  ;;  %1133 = vst [vmem:[%s1630_s3 + $0xf8] sm:$0xff] %v1241_v48 }

// kernel: vae_forward.38
= control target key start
LH: loop header
LB: loop body
LE: loop exit
PB: predicated region body
PF: predicated region fallthrough
CT: control target
= control target key end

     0   :  { %v193_v0 = vmov 0.0   ;;  %vm194_vm0 = vmmov 0   ;;  %s248_s1 = inlined_call_operand.vmem [shape: bf16[128,128], index: 1, kind: input, shape index: {}]   ;;  %s249_s0 = inlined_call_operand.vmem [shape: bf16[8,128], index: 0, kind: input, shape index: {}]   ;;  %s250_s2 = inlined_call_operand.vmem [shape: f32[1,128], index: 2, kind: input, shape index: {}]   ;;  %s251_s3 = inlined_call_operand.vmem [shape: f32[8,128], index: 3, kind: output, shape index: {}]  }
   0x1   :  { %163 = vmatprep.subr.bf16.mxu0 %v193_v0  ;;  %v185_v1 = vld [vmem:[%s248_s1] sm:$0xff]   ;;  %179 = vmatprep.mubr.msk.bf16.mxu0 %vm194_vm0, %v193_v0  ;;  %v186_v2 = vld [vmem:[%s248_s1 + $0x8] sm:$0xff]   ;;  %v187_v3 = vld [vmem:[%s248_s1 + $0x10] sm:$0xff]  }
   0x2   :  { %164 = vmatpush3.bf16.msra.mxu0 %v185_v1  ;;  %v188_v4 = vld [vmem:[%s248_s1 + $0x18] sm:$0xff]   ;;  %v189_v5 = vld [vmem:[%s248_s1 + $0x20] sm:$0xff]   ;;  %v190_v6 = vld [vmem:[%s248_s1 + $0x28] sm:$0xff]  }
   0x3   :  { %165 = vmatprep.subr.bf16.mxu0 %v193_v0  ;;  %v191_v7 = vld [vmem:[%s248_s1 + $0x30] sm:$0xff]   ;;  %v192_v8 = vld [vmem:[%s248_s1 + $0x38] sm:$0xff]   ;;  %v21_v9 = vld [vmem:[%s249_s0] sm:$0xf] }
   0x4   :  { %v153_v10 = vld [vmem:[%s250_s2] ss:$0 sm:$0xff] }
   0x6   :  { %166 = vmatpush3.bf16.msra.mxu0 %v186_v2 }
   0x7   :  { %167 = vmatprep.subr.bf16.mxu0 %v193_v0 }
   0xa   :  { %168 = vmatpush3.bf16.msra.mxu0 %v187_v3 }
   0xb   :  { %169 = vmatprep.subr.bf16.mxu0 %v193_v0 }
   0xe   :  { %170 = vmatpush3.bf16.msra.mxu0 %v188_v4 }
   0xf   :  { %171 = vmatprep.subr.bf16.mxu0 %v193_v0 }
  0x12   :  { %172 = vmatpush3.bf16.msra.mxu0 %v189_v5 }
  0x13   :  { %173 = vmatprep.subr.bf16.mxu0 %v193_v0 }
  0x16   :  { %174 = vmatpush3.bf16.msra.mxu0 %v190_v6 }
  0x17   :  { %175 = vmatprep.subr.bf16.mxu0 %v193_v0 }
  0x1a   :  { %176 = vmatpush3.bf16.msra.mxu0 %v191_v7 }
  0x1b   :  { %177 = vmatprep.subr.bf16.mxu0 %v193_v0 }
  0x1e   :  { %178 = vmatpush3.bf16.msra.mxu0 %v192_v8 }
  0x21   :  { %180 = vmatmul.mubr.bf16.vlgmr.msra.gmra.mrb[0].mxu0 %v21_v9 }
  0xf4   :  { %v120_v11 = vpop.f32.mrb[0].mxu0 }
  0xf5   :  { %v139_v12 = vadd.f32 %v153_v10, %v120_v11  ;;  %v181_v13 = vpop.f32.mrb[1].mxu0 }
  0xf6   :  { %v123_v14 = vpop.f32.mrb[2].mxu0 }
  0xf7   :  { %140 = vst [vmem:[%s251_s3] sm:$0xff] %v139_v12  ;;  %v182_v15 = vpop.f32.mrb[3].mxu0 }

// kernel: vae_forward.51
= control target key start
LH: loop header
LB: loop body
LE: loop exit
PB: predicated region body
PF: predicated region fallthrough
CT: control target
= control target key end

     0   :  { %s2187_s1 = inlined_call_operand.vmem [shape: bf16[128,128], index: 1, kind: input, shape index: {}]   ;;  %s2188_s0 = inlined_call_operand.vmem [shape: bf16[512,128], index: 0, kind: input, shape index: {}]   ;;  %s2189_s2 = inlined_call_operand.vmem [shape: f32[1,128], index: 2, kind: input, shape index: {}]   ;;  %s2190_s3 = inlined_call_operand.vmem [shape: bf16[512,128], index: 3, kind: output, shape index: {}]  }
   0x1   :  { %v1842_v0 = vld [vmem:[%s2187_s1] sm:$0xff]   ;;  %v1843_v1 = vld [vmem:[%s2187_s1 + $0x8] sm:$0xff]   ;;  %v1844_v2 = vld [vmem:[%s2187_s1 + $0x10] sm:$0xff]  }
   0x2   :  { %1746 = vmatprep.subr.bf16.mxu0 %v1842_v0  ;;  %1826 = vmatprep.subr.bf16.mxu1 %v1842_v0  ;;  %v1845_v3 = vld [vmem:[%s2187_s1 + $0x18] sm:$0xff]   ;;  %v1850_v4 = vld [vmem:[%s2188_s0] sm:$0xff]   ;;  %v1847_v7 = vld [vmem:[%s2187_s1 + $0x28] sm:$0xff]  }
   0x3   :  { %1747 = vmatpush3.bf16.msra.mxu0 %v1842_v0  ;;  %1834 = vmatpush3.bf16.msra.mxu1 %v1842_v0  ;;  %v1851_v5 = vld [vmem:[%s2188_s0 + $0x80] sm:$0xff]   ;;  %v1848_v8 = vld [vmem:[%s2187_s1 + $0x30] sm:$0xff]   ;;  %v1849_v9 = vld [vmem:[%s2187_s1 + $0x38] sm:$0xff]  }
   0x4   :  { %1748 = vmatprep.subr.bf16.mxu0 %v1843_v1  ;;  %1827 = vmatprep.subr.bf16.mxu1 %v1843_v1  ;;  %v1846_v6 = vld [vmem:[%s2187_s1 + $0x20] sm:$0xff]   ;;  %v1852_v10 = vld [vmem:[%s2188_s0 + $0x8] sm:$0xff]   ;;  %v1854_v12 = vld [vmem:[%s2188_s0 + $0x10] sm:$0xff]  }
   0x5   :  { %1762 = vmatprep.mubr.bf16.mxu0 %v1850_v4  ;;  %1794 = vmatprep.mubr.bf16.mxu1 %v1851_v5  ;;  %v1853_v11 = vld [vmem:[%s2188_s0 + $0x88] sm:$0xff]   ;;  %v1855_v13 = vld [vmem:[%s2188_s0 + $0x90] sm:$0xff]   ;;  %v1856_v14 = vld [vmem:[%s2188_s0 + $0x18] sm:$0xff]  }
   0x6   :  { %v1857_v15 = vld [vmem:[%s2188_s0 + $0x98] sm:$0xff]   ;;  %v1858_v16 = vld [vmem:[%s2188_s0 + $0x20] sm:$0xff]   ;;  %v1860_v18 = vld [vmem:[%s2188_s0 + $0x28] sm:$0xff]  }
   0x7   :  { %1749 = vmatpush3.bf16.msra.mxu0 %v1843_v1  ;;  %1835 = vmatpush3.bf16.msra.mxu1 %v1843_v1  ;;  %v1859_v17 = vld [vmem:[%s2188_s0 + $0xa0] sm:$0xff]   ;;  %v1861_v19 = vld [vmem:[%s2188_s0 + $0xa8] sm:$0xff]   ;;  %v1862_v20 = vld [vmem:[%s2188_s0 + $0x30] sm:$0xff]  }
   0x8   :  { %1750 = vmatprep.subr.bf16.mxu0 %v1844_v2  ;;  %1828 = vmatprep.subr.bf16.mxu1 %v1844_v2  ;;  %v1863_v21 = vld [vmem:[%s2188_s0 + $0xb0] sm:$0xff]   ;;  %v1864_v22 = vld [vmem:[%s2188_s0 + $0x38] sm:$0xff]   ;;  %v1866_v24 = vld [vmem:[%s2188_s0 + $0x40] sm:$0xff]  }
   0x9   :  { %v1865_v23 = vld [vmem:[%s2188_s0 + $0xb8] sm:$0xff]   ;;  %v1867_v25 = vld [vmem:[%s2188_s0 + $0xc0] sm:$0xff]   ;;  %v1868_v26 = vld [vmem:[%s2188_s0 + $0x48] sm:$0xff]  }
   0xa   :  { %v1869_v27 = vld [vmem:[%s2188_s0 + $0xc8] sm:$0xff]   ;;  %v1870_v28 = vld [vmem:[%s2188_s0 + $0x50] sm:$0xff]   ;;  %v1872_v30 = vld [vmem:[%s2188_s0 + $0x58] sm:$0xff]  }
   0xb   :  { %1751 = vmatpush3.bf16.msra.mxu0 %v1844_v2  ;;  %1836 = vmatpush3.bf16.msra.mxu1 %v1844_v2  ;;  %v1871_v29 = vld [vmem:[%s2188_s0 + $0xd0] sm:$0xff]   ;;  %v1873_v31 = vld [vmem:[%s2188_s0 + $0xd8] sm:$0xff]   ;;  %v1874_v32 = vld [vmem:[%s2188_s0 + $0x60] sm:$0xff]  }
   0xc   :  { %1752 = vmatprep.subr.bf16.mxu0 %v1845_v3  ;;  %1829 = vmatprep.subr.bf16.mxu1 %v1845_v3  ;;  %v1875_v33 = vld [vmem:[%s2188_s0 + $0xe0] sm:$0xff]   ;;  %v1876_v34 = vld [vmem:[%s2188_s0 + $0x68] sm:$0xff]   ;;  %v1878_v36 = vld [vmem:[%s2188_s0 + $0x70] sm:$0xff]  }
   0xd   :  { %v1877_v35 = vld [vmem:[%s2188_s0 + $0xe8] sm:$0xff]   ;;  %v1879_v37 = vld [vmem:[%s2188_s0 + $0xf0] sm:$0xff]   ;;  %v1880_v38 = vld [vmem:[%s2188_s0 + $0x78] sm:$0xff]  }
   0xe   :  { %v1881_v39 = vld [vmem:[%s2188_s0 + $0xf8] sm:$0xff]   ;;  %v2025_v41 = vld [vmem:[%s2189_s2] ss:$0 sm:$0xff] }
   0xf   :  { %1753 = vmatpush3.bf16.msra.mxu0 %v1845_v3  ;;  %1837 = vmatpush3.bf16.msra.mxu1 %v1845_v3 }
  0x10   :  { %1754 = vmatprep.subr.bf16.mxu0 %v1846_v6  ;;  %1830 = vmatprep.subr.bf16.mxu1 %v1846_v6 }
  0x13   :  { %1755 = vmatpush3.bf16.msra.mxu0 %v1846_v6  ;;  %1838 = vmatpush3.bf16.msra.mxu1 %v1846_v6 }
  0x14   :  { %1756 = vmatprep.subr.bf16.mxu0 %v1847_v7  ;;  %1831 = vmatprep.subr.bf16.mxu1 %v1847_v7 }
  0x17   :  { %1757 = vmatpush3.bf16.msra.mxu0 %v1847_v7  ;;  %1839 = vmatpush3.bf16.msra.mxu1 %v1847_v7 }
  0x18   :  { %1758 = vmatprep.subr.bf16.mxu0 %v1848_v8  ;;  %1832 = vmatprep.subr.bf16.mxu1 %v1848_v8 }
  0x1b   :  { %1759 = vmatpush3.bf16.msra.mxu0 %v1848_v8  ;;  %1840 = vmatpush3.bf16.msra.mxu1 %v1848_v8 }
  0x1c   :  { %1760 = vmatprep.subr.bf16.mxu0 %v1849_v9  ;;  %1833 = vmatprep.subr.bf16.mxu1 %v1849_v9 }
  0x1f   :  { %1761 = vmatpush3.bf16.msra.mxu0 %v1849_v9  ;;  %1841 = vmatpush3.bf16.msra.mxu1 %v1849_v9 }
  0x22   :  { %1763 = vmatmul.mubr.bf16.vlgmr.msra.gmra.mrb[0].mxu0 %v1852_v10  ;;  %1795 = vmatmul.mubr.bf16.vlgmr.msra.gmra.mrb[0].mxu1 %v1853_v11 }
  0x23   :  { %1766 = vmatprep.mubr.bf16.mxu0 %v1854_v12  ;;  %1798 = vmatprep.mubr.bf16.mxu1 %v1855_v13 }
  0x2a   :  { %1767 = vmatmul.mubr.bf16.gmra.mrb[4].mxu0 %v1856_v14  ;;  %1799 = vmatmul.mubr.bf16.gmra.mrb[4].mxu1 %v1857_v15 }
  0x2b   :  { %1770 = vmatprep.mubr.bf16.mxu0 %v1858_v16  ;;  %1802 = vmatprep.mubr.bf16.mxu1 %v1859_v17 }
  0x32   :  { %1771 = vmatmul.mubr.bf16.gmra.mrb[8].mxu0 %v1860_v18  ;;  %1803 = vmatmul.mubr.bf16.gmra.mrb[8].mxu1 %v1861_v19 }
  0x33   :  { %1774 = vmatprep.mubr.bf16.mxu0 %v1862_v20  ;;  %1806 = vmatprep.mubr.bf16.mxu1 %v1863_v21 }
  0x3a   :  { %1775 = vmatmul.mubr.bf16.gmra.mrb[12].mxu0 %v1864_v22  ;;  %1807 = vmatmul.mubr.bf16.gmra.mrb[12].mxu1 %v1865_v23 }
  0x3b   :  { %1778 = vmatprep.mubr.bf16.mxu0 %v1866_v24  ;;  %1810 = vmatprep.mubr.bf16.mxu1 %v1867_v25 }
  0x42   :  { %1779 = vmatmul.mubr.bf16.gmra.mrb[16].mxu0 %v1868_v26  ;;  %1811 = vmatmul.mubr.bf16.gmra.mrb[16].mxu1 %v1869_v27 }
  0x43   :  { %1782 = vmatprep.mubr.bf16.mxu0 %v1870_v28  ;;  %1814 = vmatprep.mubr.bf16.mxu1 %v1871_v29 }
  0x4a   :  { %1783 = vmatmul.mubr.bf16.gmra.mrb[20].mxu0 %v1872_v30  ;;  %1815 = vmatmul.mubr.bf16.gmra.mrb[20].mxu1 %v1873_v31 }
  0x4b   :  { %1786 = vmatprep.mubr.bf16.mxu0 %v1874_v32  ;;  %1818 = vmatprep.mubr.bf16.mxu1 %v1875_v33 }
  0x52   :  { %1787 = vmatmul.mubr.bf16.gmra.mrb[24].mxu0 %v1876_v34  ;;  %1819 = vmatmul.mubr.bf16.gmra.mrb[24].mxu1 %v1877_v35 }
  0x53   :  { %1790 = vmatprep.mubr.bf16.mxu0 %v1878_v36  ;;  %1822 = vmatprep.mubr.bf16.mxu1 %v1879_v37 }
  0x5a   :  { %1791 = vmatmul.mubr.bf16.gmra.mrb[28].mxu0 %v1880_v38  ;;  %1823 = vmatmul.mubr.bf16.gmra.mrb[28].mxu1 %v1881_v39 }
  0xf5   :  { %v1764_v40 = vpop.f32.mrb[0].mxu0  ;;  %v1796_v42 = vpop.f32.mrb[0].mxu1 }
  0xf6   :  { %v501_v43 = vpop.f32.mrb[1].mxu0  ;;  %v629_v44 = vpop.f32.mrb[1].mxu1  ;;  %v960_v47 = vadd.f32 %v1764_v40, %v2025_v41  ;;  %v992_v48 = vadd.f32 %v1796_v42, %v2025_v41 }
  0xf7   :  { %v1765_v45 = vpop.f32.mrb[2].mxu0  ;;  %v1797_v46 = vpop.f32.mrb[2].mxu1  ;;  %v958_v53 = vadd.f32 %v2025_v41, %v501_v43  ;;  %v990_v54 = vadd.f32 %v2025_v41, %v629_v44 }
  0xf8   :  { %v961_v49 = vadd.f32 %v1765_v45, %v2025_v41  ;;  %v993_v50 = vadd.f32 %v1797_v46, %v2025_v41  ;;  %v504_v51 = vpop.f32.mrb[3].mxu0  ;;  %v632_v52 = vpop.f32.mrb[3].mxu1 }
  0xf9   :  { %v959_v55 = vadd.f32 %v2025_v41, %v504_v51  ;;  %v991_v56 = vadd.f32 %v2025_v41, %v632_v52 }
  0xfa   :  { %v1523_v57 = vpack.c.bf16 %v961_v49, %v960_v47  ;;  %v1603_v58 = vpack.c.bf16 %v993_v50, %v992_v48 }
  0xfb   :  { %v1518_v59 = vpack.c.bf16 %v959_v55, %v958_v53  ;;  %v1598_v60 = vpack.c.bf16 %v991_v56, %v990_v54 }
  0xfc   :  { %1675 = vst [vmem:[%s2190_s3 + $0x8] sm:$0xff] %v1523_v57   ;;  %1691 = vst [vmem:[%s2190_s3 + $0x88] sm:$0xff] %v1603_v58  }
  0xfd   :  { %1519 = vst [vmem:[%s2190_s3] sm:$0xff] %v1518_v59   ;;  %1690 = vst [vmem:[%s2190_s3 + $0x80] sm:$0xff] %v1598_v60   ;;  %v1768_v61 = vpop.f32.mrb[4].mxu0  ;;  %v1800_v62 = vpop.f32.mrb[4].mxu1 }
  0xfe   :  { %v517_v63 = vpop.f32.mrb[5].mxu0  ;;  %v645_v0 = vpop.f32.mrb[5].mxu1  ;;  %v964_v3 = vadd.f32 %v1768_v61, %v2025_v41  ;;  %v996_v4 = vadd.f32 %v1800_v62, %v2025_v41 }
  0xff   :  { %v1769_v1 = vpop.f32.mrb[6].mxu0  ;;  %v1801_v2 = vpop.f32.mrb[6].mxu1  ;;  %v962_v9 = vadd.f32 %v2025_v41, %v517_v63  ;;  %v994_v10 = vadd.f32 %v2025_v41, %v645_v0 }
 0x100   :  { %v965_v5 = vadd.f32 %v1769_v1, %v2025_v41  ;;  %v997_v6 = vadd.f32 %v1801_v2, %v2025_v41  ;;  %v520_v7 = vpop.f32.mrb[7].mxu0  ;;  %v648_v8 = vpop.f32.mrb[7].mxu1 }
 0x101   :  { %v963_v11 = vadd.f32 %v2025_v41, %v520_v7  ;;  %v995_v12 = vadd.f32 %v2025_v41, %v648_v8 }
 0x102   :  { %v1533_v13 = vpack.c.bf16 %v965_v5, %v964_v3  ;;  %v1613_v14 = vpack.c.bf16 %v997_v6, %v996_v4 }
 0x103   :  { %v1528_v15 = vpack.c.bf16 %v963_v11, %v962_v9  ;;  %v1608_v16 = vpack.c.bf16 %v995_v12, %v994_v10 }
 0x104   :  { %1677 = vst [vmem:[%s2190_s3 + $0x18] sm:$0xff] %v1533_v13   ;;  %1693 = vst [vmem:[%s2190_s3 + $0x98] sm:$0xff] %v1613_v14  }
 0x105   :  { %1676 = vst [vmem:[%s2190_s3 + $0x10] sm:$0xff] %v1528_v15   ;;  %1692 = vst [vmem:[%s2190_s3 + $0x90] sm:$0xff] %v1608_v16   ;;  %v1772_v17 = vpop.f32.mrb[8].mxu0  ;;  %v1804_v18 = vpop.f32.mrb[8].mxu1 }
 0x106   :  { %v533_v19 = vpop.f32.mrb[9].mxu0  ;;  %v661_v20 = vpop.f32.mrb[9].mxu1  ;;  %v968_v23 = vadd.f32 %v1772_v17, %v2025_v41  ;;  %v1000_v24 = vadd.f32 %v1804_v18, %v2025_v41 }
 0x107   :  { %v1773_v21 = vpop.f32.mrb[10].mxu0  ;;  %v1805_v22 = vpop.f32.mrb[10].mxu1  ;;  %v966_v29 = vadd.f32 %v2025_v41, %v533_v19  ;;  %v998_v30 = vadd.f32 %v2025_v41, %v661_v20 }
 0x108   :  { %v969_v25 = vadd.f32 %v1773_v21, %v2025_v41  ;;  %v1001_v26 = vadd.f32 %v1805_v22, %v2025_v41  ;;  %v536_v27 = vpop.f32.mrb[11].mxu0  ;;  %v664_v28 = vpop.f32.mrb[11].mxu1 }
 0x109   :  { %v967_v31 = vadd.f32 %v2025_v41, %v536_v27  ;;  %v999_v32 = vadd.f32 %v2025_v41, %v664_v28 }
 0x10a   :  { %v1543_v33 = vpack.c.bf16 %v969_v25, %v968_v23  ;;  %v1623_v34 = vpack.c.bf16 %v1001_v26, %v1000_v24 }
 0x10b   :  { %v1538_v35 = vpack.c.bf16 %v967_v31, %v966_v29  ;;  %v1618_v36 = vpack.c.bf16 %v999_v32, %v998_v30 }
 0x10c   :  { %1679 = vst [vmem:[%s2190_s3 + $0x28] sm:$0xff] %v1543_v33   ;;  %1695 = vst [vmem:[%s2190_s3 + $0xa8] sm:$0xff] %v1623_v34  }
 0x10d   :  { %1678 = vst [vmem:[%s2190_s3 + $0x20] sm:$0xff] %v1538_v35   ;;  %1694 = vst [vmem:[%s2190_s3 + $0xa0] sm:$0xff] %v1618_v36   ;;  %v1776_v37 = vpop.f32.mrb[12].mxu0  ;;  %v1808_v38 = vpop.f32.mrb[12].mxu1 }
 0x10e   :  { %v549_v39 = vpop.f32.mrb[13].mxu0  ;;  %v677_v40 = vpop.f32.mrb[13].mxu1  ;;  %v972_v44 = vadd.f32 %v1776_v37, %v2025_v41  ;;  %v1004_v45 = vadd.f32 %v1808_v38, %v2025_v41 }
 0x10f   :  { %v1777_v42 = vpop.f32.mrb[14].mxu0  ;;  %v1809_v43 = vpop.f32.mrb[14].mxu1  ;;  %v970_v50 = vadd.f32 %v2025_v41, %v549_v39  ;;  %v1002_v51 = vadd.f32 %v2025_v41, %v677_v40 }
 0x110   :  { %v973_v46 = vadd.f32 %v1777_v42, %v2025_v41  ;;  %v1005_v47 = vadd.f32 %v1809_v43, %v2025_v41  ;;  %v552_v48 = vpop.f32.mrb[15].mxu0  ;;  %v680_v49 = vpop.f32.mrb[15].mxu1 }
 0x111   :  { %v971_v52 = vadd.f32 %v2025_v41, %v552_v48  ;;  %v1003_v53 = vadd.f32 %v2025_v41, %v680_v49 }
 0x112   :  { %v1553_v54 = vpack.c.bf16 %v973_v46, %v972_v44  ;;  %v1633_v55 = vpack.c.bf16 %v1005_v47, %v1004_v45 }
 0x113   :  { %v1548_v56 = vpack.c.bf16 %v971_v52, %v970_v50  ;;  %v1628_v57 = vpack.c.bf16 %v1003_v53, %v1002_v51 }
 0x114   :  { %1681 = vst [vmem:[%s2190_s3 + $0x38] sm:$0xff] %v1553_v54   ;;  %1697 = vst [vmem:[%s2190_s3 + $0xb8] sm:$0xff] %v1633_v55  }
 0x115   :  { %1680 = vst [vmem:[%s2190_s3 + $0x30] sm:$0xff] %v1548_v56   ;;  %1696 = vst [vmem:[%s2190_s3 + $0xb0] sm:$0xff] %v1628_v57   ;;  %v1780_v58 = vpop.f32.mrb[16].mxu0  ;;  %v1812_v59 = vpop.f32.mrb[16].mxu1 }
 0x116   :  { %v565_v60 = vpop.f32.mrb[17].mxu0  ;;  %v693_v61 = vpop.f32.mrb[17].mxu1  ;;  %v976_v0 = vadd.f32 %v1780_v58, %v2025_v41  ;;  %v1008_v1 = vadd.f32 %v1812_v59, %v2025_v41 }
 0x117   :  { %v1781_v62 = vpop.f32.mrb[18].mxu0  ;;  %v1813_v63 = vpop.f32.mrb[18].mxu1  ;;  %v974_v6 = vadd.f32 %v2025_v41, %v565_v60  ;;  %v1006_v7 = vadd.f32 %v2025_v41, %v693_v61 }
 0x118   :  { %v977_v2 = vadd.f32 %v1781_v62, %v2025_v41  ;;  %v1009_v3 = vadd.f32 %v1813_v63, %v2025_v41  ;;  %v568_v4 = vpop.f32.mrb[19].mxu0  ;;  %v696_v5 = vpop.f32.mrb[19].mxu1 }
 0x119   :  { %v975_v8 = vadd.f32 %v2025_v41, %v568_v4  ;;  %v1007_v9 = vadd.f32 %v2025_v41, %v696_v5 }
 0x11a   :  { %v1563_v10 = vpack.c.bf16 %v977_v2, %v976_v0  ;;  %v1643_v11 = vpack.c.bf16 %v1009_v3, %v1008_v1 }
 0x11b   :  { %v1558_v12 = vpack.c.bf16 %v975_v8, %v974_v6  ;;  %v1638_v13 = vpack.c.bf16 %v1007_v9, %v1006_v7 }
 0x11c   :  { %1683 = vst [vmem:[%s2190_s3 + $0x48] sm:$0xff] %v1563_v10   ;;  %1699 = vst [vmem:[%s2190_s3 + $0xc8] sm:$0xff] %v1643_v11  }
 0x11d   :  { %1682 = vst [vmem:[%s2190_s3 + $0x40] sm:$0xff] %v1558_v12   ;;  %1698 = vst [vmem:[%s2190_s3 + $0xc0] sm:$0xff] %v1638_v13   ;;  %v1784_v14 = vpop.f32.mrb[20].mxu0  ;;  %v1816_v15 = vpop.f32.mrb[20].mxu1 }
 0x11e   :  { %v581_v16 = vpop.f32.mrb[21].mxu0  ;;  %v709_v17 = vpop.f32.mrb[21].mxu1  ;;  %v980_v20 = vadd.f32 %v1784_v14, %v2025_v41  ;;  %v1012_v21 = vadd.f32 %v1816_v15, %v2025_v41 }
 0x11f   :  { %v1785_v18 = vpop.f32.mrb[22].mxu0  ;;  %v1817_v19 = vpop.f32.mrb[22].mxu1  ;;  %v978_v26 = vadd.f32 %v2025_v41, %v581_v16  ;;  %v1010_v27 = vadd.f32 %v2025_v41, %v709_v17 }
 0x120   :  { %v981_v22 = vadd.f32 %v1785_v18, %v2025_v41  ;;  %v1013_v23 = vadd.f32 %v1817_v19, %v2025_v41  ;;  %v584_v24 = vpop.f32.mrb[23].mxu0  ;;  %v712_v25 = vpop.f32.mrb[23].mxu1 }
 0x121   :  { %v979_v28 = vadd.f32 %v2025_v41, %v584_v24  ;;  %v1011_v29 = vadd.f32 %v2025_v41, %v712_v25 }
 0x122   :  { %v1573_v30 = vpack.c.bf16 %v981_v22, %v980_v20  ;;  %v1653_v31 = vpack.c.bf16 %v1013_v23, %v1012_v21 }
 0x123   :  { %v1568_v32 = vpack.c.bf16 %v979_v28, %v978_v26  ;;  %v1648_v33 = vpack.c.bf16 %v1011_v29, %v1010_v27 }
 0x124   :  { %1685 = vst [vmem:[%s2190_s3 + $0x58] sm:$0xff] %v1573_v30   ;;  %1701 = vst [vmem:[%s2190_s3 + $0xd8] sm:$0xff] %v1653_v31  }
 0x125   :  { %1684 = vst [vmem:[%s2190_s3 + $0x50] sm:$0xff] %v1568_v32   ;;  %1700 = vst [vmem:[%s2190_s3 + $0xd0] sm:$0xff] %v1648_v33   ;;  %v1788_v34 = vpop.f32.mrb[24].mxu0  ;;  %v1820_v35 = vpop.f32.mrb[24].mxu1 }
 0x126   :  { %v597_v36 = vpop.f32.mrb[25].mxu0  ;;  %v725_v37 = vpop.f32.mrb[25].mxu1  ;;  %v984_v40 = vadd.f32 %v1788_v34, %v2025_v41  ;;  %v1016_v42 = vadd.f32 %v1820_v35, %v2025_v41 }
 0x127   :  { %v1789_v38 = vpop.f32.mrb[26].mxu0  ;;  %v1821_v39 = vpop.f32.mrb[26].mxu1  ;;  %v982_v47 = vadd.f32 %v2025_v41, %v597_v36  ;;  %v1014_v48 = vadd.f32 %v2025_v41, %v725_v37 }
 0x128   :  { %v985_v43 = vadd.f32 %v1789_v38, %v2025_v41  ;;  %v1017_v44 = vadd.f32 %v1821_v39, %v2025_v41  ;;  %v600_v45 = vpop.f32.mrb[27].mxu0  ;;  %v728_v46 = vpop.f32.mrb[27].mxu1 }
 0x129   :  { %v983_v49 = vadd.f32 %v2025_v41, %v600_v45  ;;  %v1015_v50 = vadd.f32 %v2025_v41, %v728_v46 }
 0x12a   :  { %v1583_v51 = vpack.c.bf16 %v985_v43, %v984_v40  ;;  %v1663_v52 = vpack.c.bf16 %v1017_v44, %v1016_v42 }
 0x12b   :  { %v1578_v53 = vpack.c.bf16 %v983_v49, %v982_v47  ;;  %v1658_v54 = vpack.c.bf16 %v1015_v50, %v1014_v48 }
 0x12c   :  { %1687 = vst [vmem:[%s2190_s3 + $0x68] sm:$0xff] %v1583_v51   ;;  %1703 = vst [vmem:[%s2190_s3 + $0xe8] sm:$0xff] %v1663_v52  }
 0x12d   :  { %1686 = vst [vmem:[%s2190_s3 + $0x60] sm:$0xff] %v1578_v53   ;;  %1702 = vst [vmem:[%s2190_s3 + $0xe0] sm:$0xff] %v1658_v54   ;;  %v1792_v55 = vpop.f32.mrb[28].mxu0  ;;  %v1824_v56 = vpop.f32.mrb[28].mxu1 }
 0x12e   :  { %v613_v57 = vpop.f32.mrb[29].mxu0  ;;  %v741_v58 = vpop.f32.mrb[29].mxu1  ;;  %v988_v61 = vadd.f32 %v1792_v55, %v2025_v41  ;;  %v1020_v62 = vadd.f32 %v1824_v56, %v2025_v41 }
 0x12f   :  { %v1793_v59 = vpop.f32.mrb[30].mxu0  ;;  %v1825_v60 = vpop.f32.mrb[30].mxu1  ;;  %v986_v3 = vadd.f32 %v2025_v41, %v613_v57  ;;  %v1018_v4 = vadd.f32 %v2025_v41, %v741_v58 }
 0x130   :  { %v989_v63 = vadd.f32 %v1793_v59, %v2025_v41  ;;  %v1021_v0 = vadd.f32 %v1825_v60, %v2025_v41  ;;  %v616_v1 = vpop.f32.mrb[31].mxu0  ;;  %v744_v2 = vpop.f32.mrb[31].mxu1 }
 0x131   :  { %v987_v5 = vadd.f32 %v2025_v41, %v616_v1  ;;  %v1019_v6 = vadd.f32 %v2025_v41, %v744_v2 }
 0x132   :  { %v1593_v7 = vpack.c.bf16 %v989_v63, %v988_v61  ;;  %v1673_v8 = vpack.c.bf16 %v1021_v0, %v1020_v62 }
 0x133   :  { %v1588_v9 = vpack.c.bf16 %v987_v5, %v986_v3  ;;  %v1668_v10 = vpack.c.bf16 %v1019_v6, %v1018_v4 }
 0x134   :  { %1689 = vst [vmem:[%s2190_s3 + $0x78] sm:$0xff] %v1593_v7   ;;  %1705 = vst [vmem:[%s2190_s3 + $0xf8] sm:$0xff] %v1673_v8  }
 0x135   :  { %1688 = vst [vmem:[%s2190_s3 + $0x70] sm:$0xff] %v1588_v9   ;;  %1704 = vst [vmem:[%s2190_s3 + $0xf0] sm:$0xff] %v1668_v10  }

</bundles_post_ra>
